<compile_context>
chip_gen: v5e
topology: v5e:2x2
jax: 0.10.0
libtpu: 0.0.40
codegen_flags: <defaults>
</compile_context>

<pallas_src>
import functools

import numpy as np
import jax
import jax.numpy as jnp
from jax import lax
from jax.experimental import pallas as pl
from jax.experimental.pallas import tpu as pltpu

SQRT2_INV = 0.7071067811865476


def _erf(x):
    # Abramowitz & Stegun 7.1.26 rational approximation (|err| <= 1.5e-7);
    # lax.erf has no guaranteed Mosaic lowering.  Exact (non-approx) EUP
    # reciprocal: the EUP slot has plenty of slack here, so it is free.
    a1, a2, a3, a4, a5 = (0.254829592, -0.284496736, 1.421413741,
                          -1.453152027, 1.061405429)
    p = 0.3275911
    ax = jnp.abs(x)
    t = pl.reciprocal(1.0 + p * ax, approx=False)
    poly = ((((a5 * t + a4) * t + a3) * t + a2) * t + a1) * t
    y = 1.0 - poly * jnp.exp(-ax * ax)
    return jnp.where(x >= 0, y, -y)


def _gelu_exact(x):
    # matches torch.nn.GELU() (approximate='none')
    return 0.5 * x * (1.0 + _erf(x * SQRT2_INV))


# ---------------------------------------------------------------------------
# Fused kernel: ConvNeXt block + ConvTranspose2d(4,2,1), NB images per step.
# Per-pixel tensors are (channels, G) with G = H * RST, RST = NB * RSP and
# RSP the per-image padded row stride (images are lane-packed side by side).
# ---------------------------------------------------------------------------
def up_kernel(x1_ref, x2_ref, proj_ref, rc_ref, mask_ref, sel_ref,
              w7_ref, b7_ref, g_ref, bb_ref, w1_ref, b1_ref, wf_ref,
              wta_ref, bta_ref,
              o_ref,
              hp_ref, p_ref, rhs_ref, ypb_ref, p2_ref,
              *, H, W, C1, C2, Cout, NB, RSP, RST, G, eps):
    f32 = jnp.float32
    bf16 = jnp.bfloat16
    Cin = C1 + C2
    mid = w1_ref.shape[0]

    # Guard regions of the flat padded buffers must be zero.  Zeroed EVERY
    # step because scratch is per-core when the "parallel" batch grid is
    # split across TensorCores -- do not move this to a program_id==0 init.
    hp_ref[...] = jnp.zeros_like(hp_ref)
    ypb_ref[...] = jnp.zeros_like(ypb_ref)

    # Scatter h = x + t_proj(t_emb) into the flat zero-padded slab.  The
    # +proj broadcast is hoisted to one add per (image, input half); only
    # narrow row copies stay in the loop.  Image m pixel (r, c) lives at
    # flat index (3 + r) * RST + m * RSP + 3 + c.
    for m in range(NB):
        x1p = x1_ref[m] + proj_ref[m, 0:C1]            # (C1, H*W) f32
        x2p = x2_ref[m] + proj_ref[m, C1:Cin]          # (C2, H*W) f32
        base = 3 * RST + m * RSP + 3
        for r in range(H):
            sl = pl.ds(base + r * RST, W)
            hp_ref[0:C1, sl] = x1p[:, r * W:(r + 1) * W]
            hp_ref[C1:Cin, sl] = x2p[:, r * W:(r + 1) * W]

    # im2col for the 7x7 conv: each tap is a contiguous lane slice of the
    # flat slab; cast to bf16 on the copy (no separate full-buffer cast pass).
    for kh in range(7):
        for kw in range(7):
            t = kh * 7 + kw
            p_ref[t * Cin:(t + 1) * Cin, :] = (
                hp_ref[:, pl.ds(kh * RST + kw, G)].astype(bf16))

    # 7x7 conv as ONE bf16 MXU matmul (K = 49*Cin), f32 accumulation.
    c7 = jnp.dot(w7_ref[...], p_ref[...],
                 preferred_element_type=f32) + b7_ref[...]

    # Channel LayerNorm (channels on the sublane axis -> cheap reduce).
    mean = jnp.mean(c7, axis=0, keepdims=True)
    var = jnp.mean((c7 - mean) ** 2, axis=0, keepdims=True)
    normed = (c7 - mean) * lax.rsqrt(var + eps) * g_ref[...] + bb_ref[...]

    # 1x1 conv -> GELU; then conv2 (1x1) and the residual 1x1 conv are FUSED
    # into a single bf16 matmul: LHS = [W2 | Wr], RHS = [gelu(h1) ; x+proj].
    h1 = jnp.dot(w1_ref[...], normed.astype(bf16),
                 preferred_element_type=f32) + b1_ref[...]
    rhs_ref[0:mid, :] = _gelu_exact(h1).astype(bf16)
    rhs_ref[mid:mid + Cin, :] = hp_ref[:, pl.ds(3 * RST + 3, G)].astype(bf16)

    # Per-image constant (conv2_b + res_b - Wr @ proj) expanded onto the lane
    # layout via the per-image selector rows (also makes the residual see the
    # ORIGINAL x even though the slab holds x + proj).
    rc = rc_ref[0]                                     # (Cout, NB) f32
    rcf = rc[:, 0:1] * sel_ref[0:1, :]
    for m in range(1, NB):
        rcf = rcf + rc[:, m:m + 1] * sel_ref[m:m + 1, :]

    y = jnp.dot(wf_ref[...], rhs_ref[...], preferred_element_type=f32)
    y = (y + rcf) * mask_ref[...]          # zero the RSP-W garbage columns

    # ConvTranspose2d(4,2,1) as a 4-phase 2x2 conv over y: embed y with a
    # 1-pixel border, gather the 9 distinct taps (bf16, cast on copy), then
    # ONE bf16 matmul (no zero-insertion FLOPs).
    ypb_ref[:, pl.ds(RST + 1, G)] = y
    for dr in range(3):
        for dc in range(3):
            t = dr * 3 + dc
            p2_ref[t * Cout:(t + 1) * Cout, :] = (
                ypb_ref[:, pl.ds(dr * RST + dc, G)].astype(bf16))
    out_all = jnp.dot(wta_ref[...], p2_ref[...],
                      preferred_element_type=f32) + bta_ref[...]

    # Lane-dense bf16 output store (halves HBM writeback).
    o_ref[0] = out_all.astype(o_ref.dtype)


# ---------------------------------------------------------------------------
# One-time weight re-layout (hoisted out of the forward pass).
# ---------------------------------------------------------------------------
def prepare_params(params, H, W):
    Cin = params["conv7_w"].shape[0]
    Cout = params["conv2_w"].shape[0]
    mid = params["conv1_w"].shape[0]

    # Per-image padded row stride: >= W+6, rounded so H*rs is 128-aligned.
    rs = W + 6
    while (H * rs) % 128 != 0 and rs < W + 6 + 128:
        rs += 1

    # 7x7 conv weight -> (Cin, 49*Cin): column index = (kh*7+kw)*Cin + ci.
    w7m = jnp.transpose(params["conv7_w"], (0, 2, 3, 1)).reshape(Cin, 49 * Cin)

    # Fused [conv2 | residual] 1x1 weight; RHS rows are [gelu(h1) ; x+proj].
    wf = jnp.concatenate([params["conv2_w"][:, :, 0, 0],
                          params["res_w"][:, :, 0, 0]], axis=1)

    # 4-phase transposed-conv weight -> (4*Cout, 9*Cout).
    wt = np.asarray(params["up_w"])                    # (ci, co, kh, kw)
    wta = np.zeros((4 * Cout, 9 * Cout), np.float32)
    for p in range(2):
        for q in range(2):
            pi = 2 * p + q
            for dr in range(3):
                if dr - p not in (0, 1):
                    continue
                for dc in range(3):
                    if dc - q not in (0, 1):
                        continue
                    kh, kw = 3 + p - 2 * dr, 3 + q - 2 * dc
                    blk = dr * 3 + dc
                    wta[pi * Cout:(pi + 1) * Cout,
                        blk * Cout:(blk + 1) * Cout] = wt[:, :, kh, kw].T

    return dict(
        rowstride=rs,
        w7m=w7m.astype(jnp.bfloat16),
        b7_col=params["conv7_b"].reshape(Cin, 1),
        g_col=params["ln_g"].reshape(Cin, 1),
        beta_col=params["ln_b"].reshape(Cin, 1),
        w1t=params["conv1_w"][:, :, 0, 0].astype(jnp.bfloat16),
        b1_col=params["conv1_b"].reshape(mid, 1),
        wf=wf.astype(jnp.bfloat16),
        wta=jnp.asarray(wta).astype(jnp.bfloat16),
        bta_col=jnp.tile(params["up_b"].reshape(1, Cout), (4, 1)).reshape(4 * Cout, 1),
        # raw pieces for the tiny per-call scalar precompute
        t_w=params["t_w"], t_b=params["t_b"],
        res_w2d=params["res_w"][:, :, 0, 0], res_b=params["res_b"],
        conv2_b=params["conv2_b"],
    )


def _pick_nb(B, max_nb=8):
    # Largest NB dividing B that still leaves >= 2 grid steps (so both v7x
    # TensorCores get work); NB > 1 lane-packs images inside one grid step.
    nb = 1
    for cand in range(2, max_nb + 1):
        if B % cand == 0 and B // cand >= 2:
            nb = cand
    return nb


# ---------------------------------------------------------------------------
# Wrapper (NCHW in / NCHW out, like the PyTorch module).
# ---------------------------------------------------------------------------
def up_forward(prep, x1, x2, t_emb):
    B, C1, H, W = x1.shape
    C2 = x2.shape[1]
    Cin = C1 + C2
    Cout = prep["wta"].shape[0] // 4
    mid = prep["w1t"].shape[0]
    RSP = prep["rowstride"]

    NB = _pick_nb(B)
    S = B // NB
    RST = NB * RSP
    G = H * RST
    HP_LEN = (H + 7) * RST
    YPB_LEN = (H + 3) * RST

    # Lane-dense inputs; x1/x2 stay separate (no HBM concat pass).
    x1f = x1.reshape(B, C1, H * W)
    x2f = x2.reshape(B, C2, H * W)

    # Tiny per-call scalar precompute (XLA): t_emb projection and the
    # per-image constant conv2_b + res_b - Wr @ proj.
    proj = t_emb.astype(jnp.float32) @ prep["t_w"].T + prep["t_b"]       # (B, Cin)
    rc = (prep["conv2_b"] + prep["res_b"])[None, :] - proj @ prep["res_w2d"].T
    rc = rc.reshape(S, NB, Cout).transpose(0, 2, 1)                       # (S, Cout, NB)

    # Compile-time lane masks: valid-column mask and per-image block selector.
    lane = np.arange(G)
    mask = ((lane % RSP) < W).astype(np.float32).reshape(1, G)
    img = (lane % RST) // RSP
    sel = np.stack([(img == m) for m in range(NB)]).astype(np.float32)    # (NB, G)

    def _full(a):
        z = (0,) * a.ndim
        return pl.BlockSpec(a.shape, lambda s, _z=z: _z)

    kernel = functools.partial(up_kernel, H=H, W=W, C1=C1, C2=C2, Cout=Cout,
                               NB=NB, RSP=RSP, RST=RST, G=G, eps=1e-5)

    out = pl.pallas_call(
        kernel,
        out_shape=jax.ShapeDtypeStruct((S, 4 * Cout, G), jnp.bfloat16),
        grid=(S,),
        in_specs=[
            pl.BlockSpec((NB, C1, H * W), lambda s: (s, 0, 0)),
            pl.BlockSpec((NB, C2, H * W), lambda s: (s, 0, 0)),
            pl.BlockSpec((NB, Cin, 1), lambda s: (s, 0, 0)),
            pl.BlockSpec((1, Cout, NB), lambda s: (s, 0, 0)),
            _full(mask), _full(sel),
            _full(prep["w7m"]), _full(prep["b7_col"]),
            _full(prep["g_col"]), _full(prep["beta_col"]),
            _full(prep["w1t"]), _full(prep["b1_col"]),
            _full(prep["wf"]), _full(prep["wta"]), _full(prep["bta_col"]),
        ],
        out_specs=pl.BlockSpec((1, 4 * Cout, G), lambda s: (s, 0, 0)),
        scratch_shapes=[
            pltpu.VMEM((Cin, HP_LEN), jnp.float32),       # flat padded x+proj
            pltpu.VMEM((49 * Cin, G), jnp.bfloat16),      # im2col (7x7), bf16
            pltpu.VMEM((mid + Cin, G), jnp.bfloat16),     # fused-matmul RHS
            pltpu.VMEM((Cout, YPB_LEN), jnp.float32),     # flat padded y
            pltpu.VMEM((9 * Cout, G), jnp.bfloat16),      # im2col (upconv), bf16
        ],
        compiler_params=pltpu.CompilerParams(
            dimension_semantics=("parallel",),
            vmem_limit_bytes=32 * 1024 * 1024),
    )(x1f, x2f, proj[..., None], rc, mask, sel,
      prep["w7m"], prep["b7_col"], prep["g_col"], prep["beta_col"],
      prep["w1t"], prep["b1_col"], prep["wf"], prep["wta"], prep["bta_col"])

    # Decode: (S, 4*Cout, H*RST) bf16 -> NCHW (B, Cout, 2H, 2W).  Drops the
    # RSP-W garbage columns and interleaves the 4 output phases / NB lane-
    # packed images (small XLA op, runs in bf16).
    out = out.reshape(S, 2, 2, Cout, H, NB, RSP)[..., :W]
    out = jnp.transpose(out, (0, 5, 3, 4, 1, 6, 2)).reshape(B, Cout, 2 * H, 2 * W)
    # Cast back to f32 to match the PyTorch module's output dtype (drop this
    # cast if the downstream consumer is happy with bf16).
    return out.astype(jnp.float32)


# ---------------------------------------------------------------------------
# Pure-JAX fp32 reference (same math as the PyTorch module) for a sanity check.
# ---------------------------------------------------------------------------
def up_forward_ref(params, x1, x2, t_emb):
    x = jnp.concatenate([x1, x2], axis=1).astype(jnp.float32)
    xh = jnp.transpose(x, (0, 2, 3, 1))                                 # NHWC
    proj = t_emb.astype(jnp.float32) @ params["t_w"].T + params["t_b"]
    h = xh + proj[:, None, None, :]
    w7 = jnp.transpose(params["conv7_w"], (2, 3, 1, 0))                 # HWIO
    h = lax.conv_general_dilated(h, w7, (1, 1), [(3, 3), (3, 3)],
                                 dimension_numbers=("NHWC", "HWIO", "NHWC"))
    h = h + params["conv7_b"]
    mean = jnp.mean(h, axis=-1, keepdims=True)
    var = jnp.mean((h - mean) ** 2, axis=-1, keepdims=True)
    h = (h - mean) / jnp.sqrt(var + 1e-5) * params["ln_g"] + params["ln_b"]
    h = h @ params["conv1_w"][:, :, 0, 0].T + params["conv1_b"]
    h = jax.nn.gelu(h, approximate=False)
    h = h @ params["conv2_w"][:, :, 0, 0].T + params["conv2_b"]
    y = h + (xh @ params["res_w"][:, :, 0, 0].T + params["res_b"])
    wf = jnp.transpose(params["up_w"][:, :, ::-1, ::-1], (2, 3, 0, 1))  # flipped
    out = lax.conv_general_dilated(y, wf, (1, 1), [(2, 2), (2, 2)],
                                   lhs_dilation=(2, 2),
                                   dimension_numbers=("NHWC", "HWIO", "NHWC"))
    out = out + params["up_b"]
    return jnp.transpose(out, (0, 3, 1, 2))


def init_params(key, in_ch, out_ch, t_dim, expansion=2):
    mid = expansion * out_ch
    ks = jax.random.split(key, 12)
    n = lambda k, shape, s=0.1: (s * jax.random.normal(k, shape)).astype(jnp.float32)
    return dict(
        t_w=n(ks[0], (in_ch, t_dim)),            # nn.Linear weight (out, in)
        t_b=n(ks[1], (in_ch,)),
        conv7_w=n(ks[2], (in_ch, in_ch, 7, 7)),  # Conv2d weight (out, in, kh, kw)
        conv7_b=n(ks[3], (in_ch,)),
        ln_g=jnp.ones((in_ch,), jnp.float32),
        ln_b=jnp.zeros((in_ch,), jnp.float32),
        conv1_w=n(ks[4], (mid, in_ch, 1, 1)),
        conv1_b=n(ks[5], (mid,)),
        conv2_w=n(ks[6], (out_ch, mid, 1, 1)),
        conv2_b=n(ks[7], (out_ch,)),
        res_w=n(ks[8], (out_ch, in_ch, 1, 1)),
        res_b=n(ks[9], (out_ch,)),
        up_w=n(ks[10], (out_ch, out_ch, 4, 4)),  # ConvTranspose2d weight (in, out, kh, kw)
        up_b=n(ks[11], (out_ch,)),
    )


if __name__ == "__main__":
    C1, C2, Hs, Ws, t_dim, Cout = 4, 4, 16, 16, 32, 8
    Cin = C1 + C2

    key = jax.random.PRNGKey(0)
    kp, kd = jax.random.split(key)
    params = init_params(kp, Cin, Cout, t_dim)
    prep = prepare_params(params, Hs, Ws)        # one-time weight re-layout

    fwd = jax.jit(functools.partial(up_forward, prep))

    # B=4 exercises NB=2 lane-packing (grid=2), B=2 the NB=1 path (grid=2).
    for B in (4, 2):
        k1, k2, k3 = jax.random.split(jax.random.fold_in(kd, B), 3)
        x1 = jax.random.normal(k1, (B, C1, Hs, Ws), jnp.float32)
        x2 = jax.random.normal(k2, (B, C2, Hs, Ws), jnp.float32)
        t_emb = jax.random.normal(k3, (B, t_dim), jnp.float32)

        out = jax.block_until_ready(fwd(x1, x2, t_emb))
        assert out.shape == (B, Cout, 2 * Hs, 2 * Ws), out.shape

        ref = jax.block_until_ready(up_forward_ref(params, x1, x2, t_emb))
        err = float(jnp.max(jnp.abs(out - ref)))
        # bf16 MXU inputs + bf16 kernel output vs an fp32 reference: allow 3e-2.
        assert err < 3e-2, f"B={B}: max abs error vs fp32 reference too large: {err}"

    print("KERNEL_OK")
</pallas_src>

<mosaic_0001>
module attributes {stable_mosaic.version = 11 : i64} {
  func.func @up_kernel(%arg0: i32, %arg1: memref<2x4x256xf32, #tpu.memory_space<vmem>>, %arg2: memref<2x4x256xf32, #tpu.memory_space<vmem>>, %arg3: memref<2x8x1xf32, #tpu.memory_space<vmem>>, %arg4: memref<1x8x2xf32, #tpu.memory_space<vmem>>, %arg5: memref<1x768xf32, #tpu.memory_space<vmem>>, %arg6: memref<2x768xf32, #tpu.memory_space<vmem>>, %arg7: memref<8x392xbf16, #tpu.memory_space<vmem>>, %arg8: memref<8x1xf32, #tpu.memory_space<vmem>>, %arg9: memref<8x1xf32, #tpu.memory_space<vmem>>, %arg10: memref<8x1xf32, #tpu.memory_space<vmem>>, %arg11: memref<16x8xbf16, #tpu.memory_space<vmem>>, %arg12: memref<16x1xf32, #tpu.memory_space<vmem>>, %arg13: memref<8x24xbf16, #tpu.memory_space<vmem>>, %arg14: memref<32x72xbf16, #tpu.memory_space<vmem>>, %arg15: memref<32x1xf32, #tpu.memory_space<vmem>>, %arg16: memref<1x32x768xbf16, #tpu.memory_space<vmem>>, %arg17: memref<8x1104xf32, #tpu.memory_space<vmem>>, %arg18: memref<392x768xbf16, #tpu.memory_space<vmem>>, %arg19: memref<24x768xbf16, #tpu.memory_space<vmem>>, %arg20: memref<8x912xf32, #tpu.memory_space<vmem>>, %arg21: memref<72x768xbf16, #tpu.memory_space<vmem>>) attributes {dimension_semantics = [#tpu.dimension_semantics<parallel>], iteration_bounds = array<i64: 2>, scalar_prefetch = 0 : i64, scratch_operands = 5 : i64, tpu.core_type = #tpu.core_type<tc>, window_params = [{transform_indices = @transform_0, window_bounds = array<i64: 2, 4, 256>}, {transform_indices = @transform_1, window_bounds = array<i64: 2, 4, 256>}, {transform_indices = @transform_2, window_bounds = array<i64: 2, 8, 1>}, {transform_indices = @transform_3, window_bounds = array<i64: 1, 8, 2>}, {pipeline_mode = #tpu.pipeline_mode<synchronous>, transform_indices = @transform_4, window_bounds = array<i64: 1, 768>}, {pipeline_mode = #tpu.pipeline_mode<synchronous>, transform_indices = @transform_5, window_bounds = array<i64: 2, 768>}, {pipeline_mode = #tpu.pipeline_mode<synchronous>, transform_indices = @transform_6, window_bounds = array<i64: 8, 392>}, {pipeline_mode = #tpu.pipeline_mode<synchronous>, transform_indices = @transform_7, window_bounds = array<i64: 8, 1>}, {pipeline_mode = #tpu.pipeline_mode<synchronous>, transform_indices = @transform_8, window_bounds = array<i64: 8, 1>}, {pipeline_mode = #tpu.pipeline_mode<synchronous>, transform_indices = @transform_9, window_bounds = array<i64: 8, 1>}, {pipeline_mode = #tpu.pipeline_mode<synchronous>, transform_indices = @transform_10, window_bounds = array<i64: 16, 8>}, {pipeline_mode = #tpu.pipeline_mode<synchronous>, transform_indices = @transform_11, window_bounds = array<i64: 16, 1>}, {pipeline_mode = #tpu.pipeline_mode<synchronous>, transform_indices = @transform_12, window_bounds = array<i64: 8, 24>}, {pipeline_mode = #tpu.pipeline_mode<synchronous>, transform_indices = @transform_13, window_bounds = array<i64: 32, 72>}, {pipeline_mode = #tpu.pipeline_mode<synchronous>, transform_indices = @transform_14, window_bounds = array<i64: 32, 1>}, {transform_indices = @transform_15, window_bounds = array<i64: 1, 32, 768>}]} {
    %cst = arith.constant 0.000000e+00 : f32
    %0 = vector.broadcast %cst : f32 to vector<8x1104xf32>
    %c0 = arith.constant 0 : index
    %c0_0 = arith.constant 0 : index
    %1 = vector.load %arg17[%c0, %c0_0] : memref<8x1104xf32, #tpu.memory_space<vmem>>, vector<8x1104xf32>
    tpu.vector_store %arg17[%c0, %c0_0], %0 {strides = array<i32>} : memref<8x1104xf32, #tpu.memory_space<vmem>>, vector<8x1104xf32>,
    %cst_1 = arith.constant 0.000000e+00 : f32
    %2 = vector.broadcast %cst_1 : f32 to vector<8x912xf32>
    %c0_2 = arith.constant 0 : index
    %c0_3 = arith.constant 0 : index
    %3 = vector.load %arg20[%c0_2, %c0_3] : memref<8x912xf32, #tpu.memory_space<vmem>>, vector<8x912xf32>
    tpu.vector_store %arg20[%c0_2, %c0_3], %2 {strides = array<i32>} : memref<8x912xf32, #tpu.memory_space<vmem>>, vector<8x912xf32>,
    %c0_4 = arith.constant 0 : index
    %c0_5 = arith.constant 0 : index
    %c0_6 = arith.constant 0 : index
    %4 = vector.load %arg1[%c0_4, %c0_5, %c0_6] : memref<2x4x256xf32, #tpu.memory_space<vmem>>, vector<1x4x256xf32>
    %5 = vector.shape_cast %4 : vector<1x4x256xf32> to vector<4x256xf32>
    %c0_7 = arith.constant 0 : index
    %c0_8 = arith.constant 0 : index
    %c0_9 = arith.constant 0 : index
    %6 = vector.load %arg3[%c0_7, %c0_8, %c0_9] : memref<2x8x1xf32, #tpu.memory_space<vmem>>, vector<1x4x1xf32>
    %7 = vector.shape_cast %6 : vector<1x4x1xf32> to vector<4x1xf32>
    %8 = vector.broadcast %7 : vector<4x1xf32> to vector<4x256xf32>
    %9 = arith.addf %5, %8 : vector<4x256xf32>
    %c0_10 = arith.constant 0 : index
    %c0_11 = arith.constant 0 : index
    %c0_12 = arith.constant 0 : index
    %10 = vector.load %arg2[%c0_10, %c0_11, %c0_12] : memref<2x4x256xf32, #tpu.memory_space<vmem>>, vector<1x4x256xf32>
    %11 = vector.shape_cast %10 : vector<1x4x256xf32> to vector<4x256xf32>
    %c0_13 = arith.constant 0 : index
    %c4 = arith.constant 4 : index
    %c0_14 = arith.constant 0 : index
    %12 = vector.load %arg3[%c0_13, %c4, %c0_14] : memref<2x8x1xf32, #tpu.memory_space<vmem>>, vector<1x4x1xf32>
    %13 = vector.shape_cast %12 : vector<1x4x1xf32> to vector<4x1xf32>
    %14 = vector.broadcast %13 : vector<4x1xf32> to vector<4x256xf32>
    %15 = arith.addf %11, %14 : vector<4x256xf32>
    %16 = vector.extract_strided_slice %9 {offsets = [0, 0], sizes = [4, 16], strides = [1, 1]} : vector<4x256xf32> to vector<4x16xf32>
    %c0_15 = arith.constant 0 : index
    %c147 = arith.constant 147 : index
    %17 = vector.load %arg17[%c0_15, %c147] : memref<8x1104xf32, #tpu.memory_space<vmem>>, vector<4x16xf32>
    tpu.vector_store %arg17[%c0_15, %c147], %16 {strides = array<i32>} : memref<8x1104xf32, #tpu.memory_space<vmem>>, vector<4x16xf32>,
    %18 = vector.extract_strided_slice %15 {offsets = [0, 0], sizes = [4, 16], strides = [1, 1]} : vector<4x256xf32> to vector<4x16xf32>
    %c4_16 = arith.constant 4 : index
    %c147_17 = arith.constant 147 : index
    %19 = vector.load %arg17[%c4_16, %c147_17] : memref<8x1104xf32, #tpu.memory_space<vmem>>, vector<4x16xf32>
    tpu.vector_store %arg17[%c4_16, %c147_17], %18 {strides = array<i32>} : memref<8x1104xf32, #tpu.memory_space<vmem>>, vector<4x16xf32>,
    %20 = vector.extract_strided_slice %9 {offsets = [0, 16], sizes = [4, 16], strides = [1, 1]} : vector<4x256xf32> to vector<4x16xf32>
    %c0_18 = arith.constant 0 : index
    %c195 = arith.constant 195 : index
    %21 = vector.load %arg17[%c0_18, %c195] : memref<8x1104xf32, #tpu.memory_space<vmem>>, vector<4x16xf32>
    tpu.vector_store %arg17[%c0_18, %c195], %20 {strides = array<i32>} : memref<8x1104xf32, #tpu.memory_space<vmem>>, vector<4x16xf32>,
    %22 = vector.extract_strided_slice %15 {offsets = [0, 16], sizes = [4, 16], strides = [1, 1]} : vector<4x256xf32> to vector<4x16xf32>
    %c4_19 = arith.constant 4 : index
    %c195_20 = arith.constant 195 : index
    %23 = vector.load %arg17[%c4_19, %c195_20] : memref<8x1104xf32, #tpu.memory_space<vmem>>, vector<4x16xf32>
    tpu.vector_store %arg17[%c4_19, %c195_20], %22 {strides = array<i32>} : memref<8x1104xf32, #tpu.memory_space<vmem>>, vector<4x16xf32>,
    %24 = vector.extract_strided_slice %9 {offsets = [0, 32], sizes = [4, 16], strides = [1, 1]} : vector<4x256xf32> to vector<4x16xf32>
    %c0_21 = arith.constant 0 : index
    %c243 = arith.constant 243 : index
    %25 = vector.load %arg17[%c0_21, %c243] : memref<8x1104xf32, #tpu.memory_space<vmem>>, vector<4x16xf32>
    tpu.vector_store %arg17[%c0_21, %c243], %24 {strides = array<i32>} : memref<8x1104xf32, #tpu.memory_space<vmem>>, vector<4x16xf32>,
    %26 = vector.extract_strided_slice %15 {offsets = [0, 32], sizes = [4, 16], strides = [1, 1]} : vector<4x256xf32> to vector<4x16xf32>
    %c4_22 = arith.constant 4 : index
    %c243_23 = arith.constant 243 : index
    %27 = vector.load %arg17[%c4_22, %c243_23] : memref<8x1104xf32, #tpu.memory_space<vmem>>, vector<4x16xf32>
    tpu.vector_store %arg17[%c4_22, %c243_23], %26 {strides = array<i32>} : memref<8x1104xf32, #tpu.memory_space<vmem>>, vector<4x16xf32>,
    %28 = vector.extract_strided_slice %9 {offsets = [0, 48], sizes = [4, 16], strides = [1, 1]} : vector<4x256xf32> to vector<4x16xf32>
    %c0_24 = arith.constant 0 : index
    %c291 = arith.constant 291 : index
    %29 = vector.load %arg17[%c0_24, %c291] : memref<8x1104xf32, #tpu.memory_space<vmem>>, vector<4x16xf32>
    tpu.vector_store %arg17[%c0_24, %c291], %28 {strides = array<i32>} : memref<8x1104xf32, #tpu.memory_space<vmem>>, vector<4x16xf32>,
    %30 = vector.extract_strided_slice %15 {offsets = [0, 48], sizes = [4, 16], strides = [1, 1]} : vector<4x256xf32> to vector<4x16xf32>
    %c4_25 = arith.constant 4 : index
    %c291_26 = arith.constant 291 : index
    %31 = vector.load %arg17[%c4_25, %c291_26] : memref<8x1104xf32, #tpu.memory_space<vmem>>, vector<4x16xf32>
    tpu.vector_store %arg17[%c4_25, %c291_26], %30 {strides = array<i32>} : memref<8x1104xf32, #tpu.memory_space<vmem>>, vector<4x16xf32>,
    %32 = vector.extract_strided_slice %9 {offsets = [0, 64], sizes = [4, 16], strides = [1, 1]} : vector<4x256xf32> to vector<4x16xf32>
    %c0_27 = arith.constant 0 : index
    %c339 = arith.constant 339 : index
    %33 = vector.load %arg17[%c0_27, %c339] : memref<8x1104xf32, #tpu.memory_space<vmem>>, vector<4x16xf32>
    tpu.vector_store %arg17[%c0_27, %c339], %32 {strides = array<i32>} : memref<8x1104xf32, #tpu.memory_space<vmem>>, vector<4x16xf32>,
    %34 = vector.extract_strided_slice %15 {offsets = [0, 64], sizes = [4, 16], strides = [1, 1]} : vector<4x256xf32> to vector<4x16xf32>
    %c4_28 = arith.constant 4 : index
    %c339_29 = arith.constant 339 : index
    %35 = vector.load %arg17[%c4_28, %c339_29] : memref<8x1104xf32, #tpu.memory_space<vmem>>, vector<4x16xf32>
    tpu.vector_store %arg17[%c4_28, %c339_29], %34 {strides = array<i32>} : memref<8x1104xf32, #tpu.memory_space<vmem>>, vector<4x16xf32>,
    %36 = vector.extract_strided_slice %9 {offsets = [0, 80], sizes = [4, 16], strides = [1, 1]} : vector<4x256xf32> to vector<4x16xf32>
    %c0_30 = arith.constant 0 : index
    %c387 = arith.constant 387 : index
    %37 = vector.load %arg17[%c0_30, %c387] : memref<8x1104xf32, #tpu.memory_space<vmem>>, vector<4x16xf32>
    tpu.vector_store %arg17[%c0_30, %c387], %36 {strides = array<i32>} : memref<8x1104xf32, #tpu.memory_space<vmem>>, vector<4x16xf32>,
    %38 = vector.extract_strided_slice %15 {offsets = [0, 80], sizes = [4, 16], strides = [1, 1]} : vector<4x256xf32> to vector<4x16xf32>
    %c4_31 = arith.constant 4 : index
    %c387_32 = arith.constant 387 : index
    %39 = vector.load %arg17[%c4_31, %c387_32] : memref<8x1104xf32, #tpu.memory_space<vmem>>, vector<4x16xf32>
    tpu.vector_store %arg17[%c4_31, %c387_32], %38 {strides = array<i32>} : memref<8x1104xf32, #tpu.memory_space<vmem>>, vector<4x16xf32>,
    %40 = vector.extract_strided_slice %9 {offsets = [0, 96], sizes = [4, 16], strides = [1, 1]} : vector<4x256xf32> to vector<4x16xf32>
    %c0_33 = arith.constant 0 : index
    %c435 = arith.constant 435 : index
    %41 = vector.load %arg17[%c0_33, %c435] : memref<8x1104xf32, #tpu.memory_space<vmem>>, vector<4x16xf32>
    tpu.vector_store %arg17[%c0_33, %c435], %40 {strides = array<i32>} : memref<8x1104xf32, #tpu.memory_space<vmem>>, vector<4x16xf32>,
    %42 = vector.extract_strided_slice %15 {offsets = [0, 96], sizes = [4, 16], strides = [1, 1]} : vector<4x256xf32> to vector<4x16xf32>
    %c4_34 = arith.constant 4 : index
    %c435_35 = arith.constant 435 : index
    %43 = vector.load %arg17[%c4_34, %c435_35] : memref<8x1104xf32, #tpu.memory_space<vmem>>, vector<4x16xf32>
    tpu.vector_store %arg17[%c4_34, %c435_35], %42 {strides = array<i32>} : memref<8x1104xf32, #tpu.memory_space<vmem>>, vector<4x16xf32>,
    %44 = vector.extract_strided_slice %9 {offsets = [0, 112], sizes = [4, 16], strides = [1, 1]} : vector<4x256xf32> to vector<4x16xf32>
    %c0_36 = arith.constant 0 : index
    %c483 = arith.constant 483 : index
    %45 = vector.load %arg17[%c0_36, %c483] : memref<8x1104xf32, #tpu.memory_space<vmem>>, vector<4x16xf32>
    tpu.vector_store %arg17[%c0_36, %c483], %44 {strides = array<i32>} : memref<8x1104xf32, #tpu.memory_space<vmem>>, vector<4x16xf32>,
    %46 = vector.extract_strided_slice %15 {offsets = [0, 112], sizes = [4, 16], strides = [1, 1]} : vector<4x256xf32> to vector<4x16xf32>
    %c4_37 = arith.constant 4 : index
    %c483_38 = arith.constant 483 : index
    %47 = vector.load %arg17[%c4_37, %c483_38] : memref<8x1104xf32, #tpu.memory_space<vmem>>, vector<4x16xf32>
    tpu.vector_store %arg17[%c4_37, %c483_38], %46 {strides = array<i32>} : memref<8x1104xf32, #tpu.memory_space<vmem>>, vector<4x16xf32>,
    %48 = vector.extract_strided_slice %9 {offsets = [0, 128], sizes = [4, 16], strides = [1, 1]} : vector<4x256xf32> to vector<4x16xf32>
    %c0_39 = arith.constant 0 : index
    %c531 = arith.constant 531 : index
    %49 = vector.load %arg17[%c0_39, %c531] : memref<8x1104xf32, #tpu.memory_space<vmem>>, vector<4x16xf32>
    tpu.vector_store %arg17[%c0_39, %c531], %48 {strides = array<i32>} : memref<8x1104xf32, #tpu.memory_space<vmem>>, vector<4x16xf32>,
    %50 = vector.extract_strided_slice %15 {offsets = [0, 128], sizes = [4, 16], strides = [1, 1]} : vector<4x256xf32> to vector<4x16xf32>
    %c4_40 = arith.constant 4 : index
    %c531_41 = arith.constant 531 : index
    %51 = vector.load %arg17[%c4_40, %c531_41] : memref<8x1104xf32, #tpu.memory_space<vmem>>, vector<4x16xf32>
    tpu.vector_store %arg17[%c4_40, %c531_41], %50 {strides = array<i32>} : memref<8x1104xf32, #tpu.memory_space<vmem>>, vector<4x16xf32>,
    %52 = vector.extract_strided_slice %9 {offsets = [0, 144], sizes = [4, 16], strides = [1, 1]} : vector<4x256xf32> to vector<4x16xf32>
    %c0_42 = arith.constant 0 : index
    %c579 = arith.constant 579 : index
    %53 = vector.load %arg17[%c0_42, %c579] : memref<8x1104xf32, #tpu.memory_space<vmem>>, vector<4x16xf32>
    tpu.vector_store %arg17[%c0_42, %c579], %52 {strides = array<i32>} : memref<8x1104xf32, #tpu.memory_space<vmem>>, vector<4x16xf32>,
    %54 = vector.extract_strided_slice %15 {offsets = [0, 144], sizes = [4, 16], strides = [1, 1]} : vector<4x256xf32> to vector<4x16xf32>
    %c4_43 = arith.constant 4 : index
    %c579_44 = arith.constant 579 : index
    %55 = vector.load %arg17[%c4_43, %c579_44] : memref<8x1104xf32, #tpu.memory_space<vmem>>, vector<4x16xf32>
    tpu.vector_store %arg17[%c4_43, %c579_44], %54 {strides = array<i32>} : memref<8x1104xf32, #tpu.memory_space<vmem>>, vector<4x16xf32>,
    %56 = vector.extract_strided_slice %9 {offsets = [0, 160], sizes = [4, 16], strides = [1, 1]} : vector<4x256xf32> to vector<4x16xf32>
    %c0_45 = arith.constant 0 : index
    %c627 = arith.constant 627 : index
    %57 = vector.load %arg17[%c0_45, %c627] : memref<8x1104xf32, #tpu.memory_space<vmem>>, vector<4x16xf32>
    tpu.vector_store %arg17[%c0_45, %c627], %56 {strides = array<i32>} : memref<8x1104xf32, #tpu.memory_space<vmem>>, vector<4x16xf32>,
    %58 = vector.extract_strided_slice %15 {offsets = [0, 160], sizes = [4, 16], strides = [1, 1]} : vector<4x256xf32> to vector<4x16xf32>
    %c4_46 = arith.constant 4 : index
    %c627_47 = arith.constant 627 : index
    %59 = vector.load %arg17[%c4_46, %c627_47] : memref<8x1104xf32, #tpu.memory_space<vmem>>, vector<4x16xf32>
    tpu.vector_store %arg17[%c4_46, %c627_47], %58 {strides = array<i32>} : memref<8x1104xf32, #tpu.memory_space<vmem>>, vector<4x16xf32>,
    %60 = vector.extract_strided_slice %9 {offsets = [0, 176], sizes = [4, 16], strides = [1, 1]} : vector<4x256xf32> to vector<4x16xf32>
    %c0_48 = arith.constant 0 : index
    %c675 = arith.constant 675 : index
    %61 = vector.load %arg17[%c0_48, %c675] : memref<8x1104xf32, #tpu.memory_space<vmem>>, vector<4x16xf32>
    tpu.vector_store %arg17[%c0_48, %c675], %60 {strides = array<i32>} : memref<8x1104xf32, #tpu.memory_space<vmem>>, vector<4x16xf32>,
    %62 = vector.extract_strided_slice %15 {offsets = [0, 176], sizes = [4, 16], strides = [1, 1]} : vector<4x256xf32> to vector<4x16xf32>
    %c4_49 = arith.constant 4 : index
    %c675_50 = arith.constant 675 : index
    %63 = vector.load %arg17[%c4_49, %c675_50] : memref<8x1104xf32, #tpu.memory_space<vmem>>, vector<4x16xf32>
    tpu.vector_store %arg17[%c4_49, %c675_50], %62 {strides = array<i32>} : memref<8x1104xf32, #tpu.memory_space<vmem>>, vector<4x16xf32>,
    %64 = vector.extract_strided_slice %9 {offsets = [0, 192], sizes = [4, 16], strides = [1, 1]} : vector<4x256xf32> to vector<4x16xf32>
    %c0_51 = arith.constant 0 : index
    %c723 = arith.constant 723 : index
    %65 = vector.load %arg17[%c0_51, %c723] : memref<8x1104xf32, #tpu.memory_space<vmem>>, vector<4x16xf32>
    tpu.vector_store %arg17[%c0_51, %c723], %64 {strides = array<i32>} : memref<8x1104xf32, #tpu.memory_space<vmem>>, vector<4x16xf32>,
    %66 = vector.extract_strided_slice %15 {offsets = [0, 192], sizes = [4, 16], strides = [1, 1]} : vector<4x256xf32> to vector<4x16xf32>
    %c4_52 = arith.constant 4 : index
    %c723_53 = arith.constant 723 : index
    %67 = vector.load %arg17[%c4_52, %c723_53] : memref<8x1104xf32, #tpu.memory_space<vmem>>, vector<4x16xf32>
    tpu.vector_store %arg17[%c4_52, %c723_53], %66 {strides = array<i32>} : memref<8x1104xf32, #tpu.memory_space<vmem>>, vector<4x16xf32>,
    %68 = vector.extract_strided_slice %9 {offsets = [0, 208], sizes = [4, 16], strides = [1, 1]} : vector<4x256xf32> to vector<4x16xf32>
    %c0_54 = arith.constant 0 : index
    %c771 = arith.constant 771 : index
    %69 = vector.load %arg17[%c0_54, %c771] : memref<8x1104xf32, #tpu.memory_space<vmem>>, vector<4x16xf32>
    tpu.vector_store %arg17[%c0_54, %c771], %68 {strides = array<i32>} : memref<8x1104xf32, #tpu.memory_space<vmem>>, vector<4x16xf32>,
    %70 = vector.extract_strided_slice %15 {offsets = [0, 208], sizes = [4, 16], strides = [1, 1]} : vector<4x256xf32> to vector<4x16xf32>
    %c4_55 = arith.constant 4 : index
    %c771_56 = arith.constant 771 : index
    %71 = vector.load %arg17[%c4_55, %c771_56] : memref<8x1104xf32, #tpu.memory_space<vmem>>, vector<4x16xf32>
    tpu.vector_store %arg17[%c4_55, %c771_56], %70 {strides = array<i32>} : memref<8x1104xf32, #tpu.memory_space<vmem>>, vector<4x16xf32>,
    %72 = vector.extract_strided_slice %9 {offsets = [0, 224], sizes = [4, 16], strides = [1, 1]} : vector<4x256xf32> to vector<4x16xf32>
    %c0_57 = arith.constant 0 : index
    %c819 = arith.constant 819 : index
    %73 = vector.load %arg17[%c0_57, %c819] : memref<8x1104xf32, #tpu.memory_space<vmem>>, vector<4x16xf32>
    tpu.vector_store %arg17[%c0_57, %c819], %72 {strides = array<i32>} : memref<8x1104xf32, #tpu.memory_space<vmem>>, vector<4x16xf32>,
    %74 = vector.extract_strided_slice %15 {offsets = [0, 224], sizes = [4, 16], strides = [1, 1]} : vector<4x256xf32> to vector<4x16xf32>
    %c4_58 = arith.constant 4 : index
    %c819_59 = arith.constant 819 : index
    %75 = vector.load %arg17[%c4_58, %c819_59] : memref<8x1104xf32, #tpu.memory_space<vmem>>, vector<4x16xf32>
    tpu.vector_store %arg17[%c4_58, %c819_59], %74 {strides = array<i32>} : memref<8x1104xf32, #tpu.memory_space<vmem>>, vector<4x16xf32>,
    %76 = vector.extract_strided_slice %9 {offsets = [0, 240], sizes = [4, 16], strides = [1, 1]} : vector<4x256xf32> to vector<4x16xf32>
    %c0_60 = arith.constant 0 : index
    %c867 = arith.constant 867 : index
    %77 = vector.load %arg17[%c0_60, %c867] : memref<8x1104xf32, #tpu.memory_space<vmem>>, vector<4x16xf32>
    tpu.vector_store %arg17[%c0_60, %c867], %76 {strides = array<i32>} : memref<8x1104xf32, #tpu.memory_space<vmem>>, vector<4x16xf32>,
    %78 = vector.extract_strided_slice %15 {offsets = [0, 240], sizes = [4, 16], strides = [1, 1]} : vector<4x256xf32> to vector<4x16xf32>
    %c4_61 = arith.constant 4 : index
    %c867_62 = arith.constant 867 : index
    %79 = vector.load %arg17[%c4_61, %c867_62] : memref<8x1104xf32, #tpu.memory_space<vmem>>, vector<4x16xf32>
    tpu.vector_store %arg17[%c4_61, %c867_62], %78 {strides = array<i32>} : memref<8x1104xf32, #tpu.memory_space<vmem>>, vector<4x16xf32>,
    %c1 = arith.constant 1 : index
    %c0_63 = arith.constant 0 : index
    %c0_64 = arith.constant 0 : index
    %80 = vector.load %arg1[%c1, %c0_63, %c0_64] : memref<2x4x256xf32, #tpu.memory_space<vmem>>, vector<1x4x256xf32>
    %81 = vector.shape_cast %80 : vector<1x4x256xf32> to vector<4x256xf32>
    %c1_65 = arith.constant 1 : index
    %c0_66 = arith.constant 0 : index
    %c0_67 = arith.constant 0 : index
    %82 = vector.load %arg3[%c1_65, %c0_66, %c0_67] : memref<2x8x1xf32, #tpu.memory_space<vmem>>, vector<1x4x1xf32>
    %83 = vector.shape_cast %82 : vector<1x4x1xf32> to vector<4x1xf32>
    %84 = vector.broadcast %83 : vector<4x1xf32> to vector<4x256xf32>
    %85 = arith.addf %81, %84 : vector<4x256xf32>
    %c1_68 = arith.constant 1 : index
    %c0_69 = arith.constant 0 : index
    %c0_70 = arith.constant 0 : index
    %86 = vector.load %arg2[%c1_68, %c0_69, %c0_70] : memref<2x4x256xf32, #tpu.memory_space<vmem>>, vector<1x4x256xf32>
    %87 = vector.shape_cast %86 : vector<1x4x256xf32> to vector<4x256xf32>
    %c1_71 = arith.constant 1 : index
    %c4_72 = arith.constant 4 : index
    %c0_73 = arith.constant 0 : index
    %88 = vector.load %arg3[%c1_71, %c4_72, %c0_73] : memref<2x8x1xf32, #tpu.memory_space<vmem>>, vector<1x4x1xf32>
    %89 = vector.shape_cast %88 : vector<1x4x1xf32> to vector<4x1xf32>
    %90 = vector.broadcast %89 : vector<4x1xf32> to vector<4x256xf32>
    %91 = arith.addf %87, %90 : vector<4x256xf32>
    %92 = vector.extract_strided_slice %85 {offsets = [0, 0], sizes = [4, 16], strides = [1, 1]} : vector<4x256xf32> to vector<4x16xf32>
    %c0_74 = arith.constant 0 : index
    %c171 = arith.constant 171 : index
    %93 = vector.load %arg17[%c0_74, %c171] : memref<8x1104xf32, #tpu.memory_space<vmem>>, vector<4x16xf32>
    tpu.vector_store %arg17[%c0_74, %c171], %92 {strides = array<i32>} : memref<8x1104xf32, #tpu.memory_space<vmem>>, vector<4x16xf32>,
    %94 = vector.extract_strided_slice %91 {offsets = [0, 0], sizes = [4, 16], strides = [1, 1]} : vector<4x256xf32> to vector<4x16xf32>
    %c4_75 = arith.constant 4 : index
    %c171_76 = arith.constant 171 : index
    %95 = vector.load %arg17[%c4_75, %c171_76] : memref<8x1104xf32, #tpu.memory_space<vmem>>, vector<4x16xf32>
    tpu.vector_store %arg17[%c4_75, %c171_76], %94 {strides = array<i32>} : memref<8x1104xf32, #tpu.memory_space<vmem>>, vector<4x16xf32>,
    %96 = vector.extract_strided_slice %85 {offsets = [0, 16], sizes = [4, 16], strides = [1, 1]} : vector<4x256xf32> to vector<4x16xf32>
    %c0_77 = arith.constant 0 : index
    %c219 = arith.constant 219 : index
    %97 = vector.load %arg17[%c0_77, %c219] : memref<8x1104xf32, #tpu.memory_space<vmem>>, vector<4x16xf32>
    tpu.vector_store %arg17[%c0_77, %c219], %96 {strides = array<i32>} : memref<8x1104xf32, #tpu.memory_space<vmem>>, vector<4x16xf32>,
    %98 = vector.extract_strided_slice %91 {offsets = [0, 16], sizes = [4, 16], strides = [1, 1]} : vector<4x256xf32> to vector<4x16xf32>
    %c4_78 = arith.constant 4 : index
    %c219_79 = arith.constant 219 : index
    %99 = vector.load %arg17[%c4_78, %c219_79] : memref<8x1104xf32, #tpu.memory_space<vmem>>, vector<4x16xf32>
    tpu.vector_store %arg17[%c4_78, %c219_79], %98 {strides = array<i32>} : memref<8x1104xf32, #tpu.memory_space<vmem>>, vector<4x16xf32>,
    %100 = vector.extract_strided_slice %85 {offsets = [0, 32], sizes = [4, 16], strides = [1, 1]} : vector<4x256xf32> to vector<4x16xf32>
    %c0_80 = arith.constant 0 : index
    %c267 = arith.constant 267 : index
    %101 = vector.load %arg17[%c0_80, %c267] : memref<8x1104xf32, #tpu.memory_space<vmem>>, vector<4x16xf32>
    tpu.vector_store %arg17[%c0_80, %c267], %100 {strides = array<i32>} : memref<8x1104xf32, #tpu.memory_space<vmem>>, vector<4x16xf32>,
    %102 = vector.extract_strided_slice %91 {offsets = [0, 32], sizes = [4, 16], strides = [1, 1]} : vector<4x256xf32> to vector<4x16xf32>
    %c4_81 = arith.constant 4 : index
    %c267_82 = arith.constant 267 : index
    %103 = vector.load %arg17[%c4_81, %c267_82] : memref<8x1104xf32, #tpu.memory_space<vmem>>, vector<4x16xf32>
    tpu.vector_store %arg17[%c4_81, %c267_82], %102 {strides = array<i32>} : memref<8x1104xf32, #tpu.memory_space<vmem>>, vector<4x16xf32>,
    %104 = vector.extract_strided_slice %85 {offsets = [0, 48], sizes = [4, 16], strides = [1, 1]} : vector<4x256xf32> to vector<4x16xf32>
    %c0_83 = arith.constant 0 : index
    %c315 = arith.constant 315 : index
    %105 = vector.load %arg17[%c0_83, %c315] : memref<8x1104xf32, #tpu.memory_space<vmem>>, vector<4x16xf32>
    tpu.vector_store %arg17[%c0_83, %c315], %104 {strides = array<i32>} : memref<8x1104xf32, #tpu.memory_space<vmem>>, vector<4x16xf32>,
    %106 = vector.extract_strided_slice %91 {offsets = [0, 48], sizes = [4, 16], strides = [1, 1]} : vector<4x256xf32> to vector<4x16xf32>
    %c4_84 = arith.constant 4 : index
    %c315_85 = arith.constant 315 : index
    %107 = vector.load %arg17[%c4_84, %c315_85] : memref<8x1104xf32, #tpu.memory_space<vmem>>, vector<4x16xf32>
    tpu.vector_store %arg17[%c4_84, %c315_85], %106 {strides = array<i32>} : memref<8x1104xf32, #tpu.memory_space<vmem>>, vector<4x16xf32>,
    %108 = vector.extract_strided_slice %85 {offsets = [0, 64], sizes = [4, 16], strides = [1, 1]} : vector<4x256xf32> to vector<4x16xf32>
    %c0_86 = arith.constant 0 : index
    %c363 = arith.constant 363 : index
    %109 = vector.load %arg17[%c0_86, %c363] : memref<8x1104xf32, #tpu.memory_space<vmem>>, vector<4x16xf32>
    tpu.vector_store %arg17[%c0_86, %c363], %108 {strides = array<i32>} : memref<8x1104xf32, #tpu.memory_space<vmem>>, vector<4x16xf32>,
    %110 = vector.extract_strided_slice %91 {offsets = [0, 64], sizes = [4, 16], strides = [1, 1]} : vector<4x256xf32> to vector<4x16xf32>
    %c4_87 = arith.constant 4 : index
    %c363_88 = arith.constant 363 : index
    %111 = vector.load %arg17[%c4_87, %c363_88] : memref<8x1104xf32, #tpu.memory_space<vmem>>, vector<4x16xf32>
    tpu.vector_store %arg17[%c4_87, %c363_88], %110 {strides = array<i32>} : memref<8x1104xf32, #tpu.memory_space<vmem>>, vector<4x16xf32>,
    %112 = vector.extract_strided_slice %85 {offsets = [0, 80], sizes = [4, 16], strides = [1, 1]} : vector<4x256xf32> to vector<4x16xf32>
    %c0_89 = arith.constant 0 : index
    %c411 = arith.constant 411 : index
    %113 = vector.load %arg17[%c0_89, %c411] : memref<8x1104xf32, #tpu.memory_space<vmem>>, vector<4x16xf32>
    tpu.vector_store %arg17[%c0_89, %c411], %112 {strides = array<i32>} : memref<8x1104xf32, #tpu.memory_space<vmem>>, vector<4x16xf32>,
    %114 = vector.extract_strided_slice %91 {offsets = [0, 80], sizes = [4, 16], strides = [1, 1]} : vector<4x256xf32> to vector<4x16xf32>
    %c4_90 = arith.constant 4 : index
    %c411_91 = arith.constant 411 : index
    %115 = vector.load %arg17[%c4_90, %c411_91] : memref<8x1104xf32, #tpu.memory_space<vmem>>, vector<4x16xf32>
    tpu.vector_store %arg17[%c4_90, %c411_91], %114 {strides = array<i32>} : memref<8x1104xf32, #tpu.memory_space<vmem>>, vector<4x16xf32>,
    %116 = vector.extract_strided_slice %85 {offsets = [0, 96], sizes = [4, 16], strides = [1, 1]} : vector<4x256xf32> to vector<4x16xf32>
    %c0_92 = arith.constant 0 : index
    %c459 = arith.constant 459 : index
    %117 = vector.load %arg17[%c0_92, %c459] : memref<8x1104xf32, #tpu.memory_space<vmem>>, vector<4x16xf32>
    tpu.vector_store %arg17[%c0_92, %c459], %116 {strides = array<i32>} : memref<8x1104xf32, #tpu.memory_space<vmem>>, vector<4x16xf32>,
    %118 = vector.extract_strided_slice %91 {offsets = [0, 96], sizes = [4, 16], strides = [1, 1]} : vector<4x256xf32> to vector<4x16xf32>
    %c4_93 = arith.constant 4 : index
    %c459_94 = arith.constant 459 : index
    %119 = vector.load %arg17[%c4_93, %c459_94] : memref<8x1104xf32, #tpu.memory_space<vmem>>, vector<4x16xf32>
    tpu.vector_store %arg17[%c4_93, %c459_94], %118 {strides = array<i32>} : memref<8x1104xf32, #tpu.memory_space<vmem>>, vector<4x16xf32>,
    %120 = vector.extract_strided_slice %85 {offsets = [0, 112], sizes = [4, 16], strides = [1, 1]} : vector<4x256xf32> to vector<4x16xf32>
    %c0_95 = arith.constant 0 : index
    %c507 = arith.constant 507 : index
    %121 = vector.load %arg17[%c0_95, %c507] : memref<8x1104xf32, #tpu.memory_space<vmem>>, vector<4x16xf32>
    tpu.vector_store %arg17[%c0_95, %c507], %120 {strides = array<i32>} : memref<8x1104xf32, #tpu.memory_space<vmem>>, vector<4x16xf32>,
    %122 = vector.extract_strided_slice %91 {offsets = [0, 112], sizes = [4, 16], strides = [1, 1]} : vector<4x256xf32> to vector<4x16xf32>
    %c4_96 = arith.constant 4 : index
    %c507_97 = arith.constant 507 : index
    %123 = vector.load %arg17[%c4_96, %c507_97] : memref<8x1104xf32, #tpu.memory_space<vmem>>, vector<4x16xf32>
    tpu.vector_store %arg17[%c4_96, %c507_97], %122 {strides = array<i32>} : memref<8x1104xf32, #tpu.memory_space<vmem>>, vector<4x16xf32>,
    %124 = vector.extract_strided_slice %85 {offsets = [0, 128], sizes = [4, 16], strides = [1, 1]} : vector<4x256xf32> to vector<4x16xf32>
    %c0_98 = arith.constant 0 : index
    %c555 = arith.constant 555 : index
    %125 = vector.load %arg17[%c0_98, %c555] : memref<8x1104xf32, #tpu.memory_space<vmem>>, vector<4x16xf32>
    tpu.vector_store %arg17[%c0_98, %c555], %124 {strides = array<i32>} : memref<8x1104xf32, #tpu.memory_space<vmem>>, vector<4x16xf32>,
    %126 = vector.extract_strided_slice %91 {offsets = [0, 128], sizes = [4, 16], strides = [1, 1]} : vector<4x256xf32> to vector<4x16xf32>
    %c4_99 = arith.constant 4 : index
    %c555_100 = arith.constant 555 : index
    %127 = vector.load %arg17[%c4_99, %c555_100] : memref<8x1104xf32, #tpu.memory_space<vmem>>, vector<4x16xf32>
    tpu.vector_store %arg17[%c4_99, %c555_100], %126 {strides = array<i32>} : memref<8x1104xf32, #tpu.memory_space<vmem>>, vector<4x16xf32>,
    %128 = vector.extract_strided_slice %85 {offsets = [0, 144], sizes = [4, 16], strides = [1, 1]} : vector<4x256xf32> to vector<4x16xf32>
    %c0_101 = arith.constant 0 : index
    %c603 = arith.constant 603 : index
    %129 = vector.load %arg17[%c0_101, %c603] : memref<8x1104xf32, #tpu.memory_space<vmem>>, vector<4x16xf32>
    tpu.vector_store %arg17[%c0_101, %c603], %128 {strides = array<i32>} : memref<8x1104xf32, #tpu.memory_space<vmem>>, vector<4x16xf32>,
    %130 = vector.extract_strided_slice %91 {offsets = [0, 144], sizes = [4, 16], strides = [1, 1]} : vector<4x256xf32> to vector<4x16xf32>
    %c4_102 = arith.constant 4 : index
    %c603_103 = arith.constant 603 : index
    %131 = vector.load %arg17[%c4_102, %c603_103] : memref<8x1104xf32, #tpu.memory_space<vmem>>, vector<4x16xf32>
    tpu.vector_store %arg17[%c4_102, %c603_103], %130 {strides = array<i32>} : memref<8x1104xf32, #tpu.memory_space<vmem>>, vector<4x16xf32>,
    %132 = vector.extract_strided_slice %85 {offsets = [0, 160], sizes = [4, 16], strides = [1, 1]} : vector<4x256xf32> to vector<4x16xf32>
    %c0_104 = arith.constant 0 : index
    %c651 = arith.constant 651 : index
    %133 = vector.load %arg17[%c0_104, %c651] : memref<8x1104xf32, #tpu.memory_space<vmem>>, vector<4x16xf32>
    tpu.vector_store %arg17[%c0_104, %c651], %132 {strides = array<i32>} : memref<8x1104xf32, #tpu.memory_space<vmem>>, vector<4x16xf32>,
    %134 = vector.extract_strided_slice %91 {offsets = [0, 160], sizes = [4, 16], strides = [1, 1]} : vector<4x256xf32> to vector<4x16xf32>
    %c4_105 = arith.constant 4 : index
    %c651_106 = arith.constant 651 : index
    %135 = vector.load %arg17[%c4_105, %c651_106] : memref<8x1104xf32, #tpu.memory_space<vmem>>, vector<4x16xf32>
    tpu.vector_store %arg17[%c4_105, %c651_106], %134 {strides = array<i32>} : memref<8x1104xf32, #tpu.memory_space<vmem>>, vector<4x16xf32>,
    %136 = vector.extract_strided_slice %85 {offsets = [0, 176], sizes = [4, 16], strides = [1, 1]} : vector<4x256xf32> to vector<4x16xf32>
    %c0_107 = arith.constant 0 : index
    %c699 = arith.constant 699 : index
    %137 = vector.load %arg17[%c0_107, %c699] : memref<8x1104xf32, #tpu.memory_space<vmem>>, vector<4x16xf32>
    tpu.vector_store %arg17[%c0_107, %c699], %136 {strides = array<i32>} : memref<8x1104xf32, #tpu.memory_space<vmem>>, vector<4x16xf32>,
    %138 = vector.extract_strided_slice %91 {offsets = [0, 176], sizes = [4, 16], strides = [1, 1]} : vector<4x256xf32> to vector<4x16xf32>
    %c4_108 = arith.constant 4 : index
    %c699_109 = arith.constant 699 : index
    %139 = vector.load %arg17[%c4_108, %c699_109] : memref<8x1104xf32, #tpu.memory_space<vmem>>, vector<4x16xf32>
    tpu.vector_store %arg17[%c4_108, %c699_109], %138 {strides = array<i32>} : memref<8x1104xf32, #tpu.memory_space<vmem>>, vector<4x16xf32>,
    %140 = vector.extract_strided_slice %85 {offsets = [0, 192], sizes = [4, 16], strides = [1, 1]} : vector<4x256xf32> to vector<4x16xf32>
    %c0_110 = arith.constant 0 : index
    %c747 = arith.constant 747 : index
    %141 = vector.load %arg17[%c0_110, %c747] : memref<8x1104xf32, #tpu.memory_space<vmem>>, vector<4x16xf32>
    tpu.vector_store %arg17[%c0_110, %c747], %140 {strides = array<i32>} : memref<8x1104xf32, #tpu.memory_space<vmem>>, vector<4x16xf32>,
    %142 = vector.extract_strided_slice %91 {offsets = [0, 192], sizes = [4, 16], strides = [1, 1]} : vector<4x256xf32> to vector<4x16xf32>
    %c4_111 = arith.constant 4 : index
    %c747_112 = arith.constant 747 : index
    %143 = vector.load %arg17[%c4_111, %c747_112] : memref<8x1104xf32, #tpu.memory_space<vmem>>, vector<4x16xf32>
    tpu.vector_store %arg17[%c4_111, %c747_112], %142 {strides = array<i32>} : memref<8x1104xf32, #tpu.memory_space<vmem>>, vector<4x16xf32>,
    %144 = vector.extract_strided_slice %85 {offsets = [0, 208], sizes = [4, 16], strides = [1, 1]} : vector<4x256xf32> to vector<4x16xf32>
    %c0_113 = arith.constant 0 : index
    %c795 = arith.constant 795 : index
    %145 = vector.load %arg17[%c0_113, %c795] : memref<8x1104xf32, #tpu.memory_space<vmem>>, vector<4x16xf32>
    tpu.vector_store %arg17[%c0_113, %c795], %144 {strides = array<i32>} : memref<8x1104xf32, #tpu.memory_space<vmem>>, vector<4x16xf32>,
    %146 = vector.extract_strided_slice %91 {offsets = [0, 208], sizes = [4, 16], strides = [1, 1]} : vector<4x256xf32> to vector<4x16xf32>
    %c4_114 = arith.constant 4 : index
    %c795_115 = arith.constant 795 : index
    %147 = vector.load %arg17[%c4_114, %c795_115] : memref<8x1104xf32, #tpu.memory_space<vmem>>, vector<4x16xf32>
    tpu.vector_store %arg17[%c4_114, %c795_115], %146 {strides = array<i32>} : memref<8x1104xf32, #tpu.memory_space<vmem>>, vector<4x16xf32>,
    %148 = vector.extract_strided_slice %85 {offsets = [0, 224], sizes = [4, 16], strides = [1, 1]} : vector<4x256xf32> to vector<4x16xf32>
    %c0_116 = arith.constant 0 : index
    %c843 = arith.constant 843 : index
    %149 = vector.load %arg17[%c0_116, %c843] : memref<8x1104xf32, #tpu.memory_space<vmem>>, vector<4x16xf32>
    tpu.vector_store %arg17[%c0_116, %c843], %148 {strides = array<i32>} : memref<8x1104xf32, #tpu.memory_space<vmem>>, vector<4x16xf32>,
    %150 = vector.extract_strided_slice %91 {offsets = [0, 224], sizes = [4, 16], strides = [1, 1]} : vector<4x256xf32> to vector<4x16xf32>
    %c4_117 = arith.constant 4 : index
    %c843_118 = arith.constant 843 : index
    %151 = vector.load %arg17[%c4_117, %c843_118] : memref<8x1104xf32, #tpu.memory_space<vmem>>, vector<4x16xf32>
    tpu.vector_store %arg17[%c4_117, %c843_118], %150 {strides = array<i32>} : memref<8x1104xf32, #tpu.memory_space<vmem>>, vector<4x16xf32>,
    %152 = vector.extract_strided_slice %85 {offsets = [0, 240], sizes = [4, 16], strides = [1, 1]} : vector<4x256xf32> to vector<4x16xf32>
    %c0_119 = arith.constant 0 : index
    %c891 = arith.constant 891 : index
    %153 = vector.load %arg17[%c0_119, %c891] : memref<8x1104xf32, #tpu.memory_space<vmem>>, vector<4x16xf32>
    tpu.vector_store %arg17[%c0_119, %c891], %152 {strides = array<i32>} : memref<8x1104xf32, #tpu.memory_space<vmem>>, vector<4x16xf32>,
    %154 = vector.extract_strided_slice %91 {offsets = [0, 240], sizes = [4, 16], strides = [1, 1]} : vector<4x256xf32> to vector<4x16xf32>
    %c4_120 = arith.constant 4 : index
    %c891_121 = arith.constant 891 : index
    %155 = vector.load %arg17[%c4_120, %c891_121] : memref<8x1104xf32, #tpu.memory_space<vmem>>, vector<4x16xf32>
    tpu.vector_store %arg17[%c4_120, %c891_121], %154 {strides = array<i32>} : memref<8x1104xf32, #tpu.memory_space<vmem>>, vector<4x16xf32>,
    %c0_122 = arith.constant 0 : index
    %c0_123 = arith.constant 0 : index
    %156 = vector.load %arg17[%c0_122, %c0_123] : memref<8x1104xf32, #tpu.memory_space<vmem>>, vector<8x768xf32>
    %157 = arith.truncf %156 : vector<8x768xf32> to vector<8x768xbf16>
    %c0_124 = arith.constant 0 : index
    %c0_125 = arith.constant 0 : index
    %158 = vector.load %arg18[%c0_124, %c0_125] : memref<392x768xbf16, #tpu.memory_space<vmem>>, vector<8x768xbf16>
    tpu.vector_store %arg18[%c0_124, %c0_125], %157 {strides = array<i32>} : memref<392x768xbf16, #tpu.memory_space<vmem>>, vector<8x768xbf16>,
    %c0_126 = arith.constant 0 : index
    %c1_127 = arith.constant 1 : index
    %159 = vector.load %arg17[%c0_126, %c1_127] : memref<8x1104xf32, #tpu.memory_space<vmem>>, vector<8x768xf32>
    %160 = arith.truncf %159 : vector<8x768xf32> to vector<8x768xbf16>
    %c8 = arith.constant 8 : index
    %c0_128 = arith.constant 0 : index
    %161 = vector.load %arg18[%c8, %c0_128] : memref<392x768xbf16, #tpu.memory_space<vmem>>, vector<8x768xbf16>
    tpu.vector_store %arg18[%c8, %c0_128], %160 {strides = array<i32>} : memref<392x768xbf16, #tpu.memory_space<vmem>>, vector<8x768xbf16>,
    %c0_129 = arith.constant 0 : index
    %c2 = arith.constant 2 : index
    %162 = vector.load %arg17[%c0_129, %c2] : memref<8x1104xf32, #tpu.memory_space<vmem>>, vector<8x768xf32>
    %163 = arith.truncf %162 : vector<8x768xf32> to vector<8x768xbf16>
    %c16 = arith.constant 16 : index
    %c0_130 = arith.constant 0 : index
    %164 = vector.load %arg18[%c16, %c0_130] : memref<392x768xbf16, #tpu.memory_space<vmem>>, vector<8x768xbf16>
    tpu.vector_store %arg18[%c16, %c0_130], %163 {strides = array<i32>} : memref<392x768xbf16, #tpu.memory_space<vmem>>, vector<8x768xbf16>,
    %c0_131 = arith.constant 0 : index
    %c3 = arith.constant 3 : index
    %165 = vector.load %arg17[%c0_131, %c3] : memref<8x1104xf32, #tpu.memory_space<vmem>>, vector<8x768xf32>
    %166 = arith.truncf %165 : vector<8x768xf32> to vector<8x768xbf16>
    %c24 = arith.constant 24 : index
    %c0_132 = arith.constant 0 : index
    %167 = vector.load %arg18[%c24, %c0_132] : memref<392x768xbf16, #tpu.memory_space<vmem>>, vector<8x768xbf16>
    tpu.vector_store %arg18[%c24, %c0_132], %166 {strides = array<i32>} : memref<392x768xbf16, #tpu.memory_space<vmem>>, vector<8x768xbf16>,
    %c0_133 = arith.constant 0 : index
    %c4_134 = arith.constant 4 : index
    %168 = vector.load %arg17[%c0_133, %c4_134] : memref<8x1104xf32, #tpu.memory_space<vmem>>, vector<8x768xf32>
    %169 = arith.truncf %168 : vector<8x768xf32> to vector<8x768xbf16>
    %c32 = arith.constant 32 : index
    %c0_135 = arith.constant 0 : index
    %170 = vector.load %arg18[%c32, %c0_135] : memref<392x768xbf16, #tpu.memory_space<vmem>>, vector<8x768xbf16>
    tpu.vector_store %arg18[%c32, %c0_135], %169 {strides = array<i32>} : memref<392x768xbf16, #tpu.memory_space<vmem>>, vector<8x768xbf16>,
    %c0_136 = arith.constant 0 : index
    %c5 = arith.constant 5 : index
    %171 = vector.load %arg17[%c0_136, %c5] : memref<8x1104xf32, #tpu.memory_space<vmem>>, vector<8x768xf32>
    %172 = arith.truncf %171 : vector<8x768xf32> to vector<8x768xbf16>
    %c40 = arith.constant 40 : index
    %c0_137 = arith.constant 0 : index
    %173 = vector.load %arg18[%c40, %c0_137] : memref<392x768xbf16, #tpu.memory_space<vmem>>, vector<8x768xbf16>
    tpu.vector_store %arg18[%c40, %c0_137], %172 {strides = array<i32>} : memref<392x768xbf16, #tpu.memory_space<vmem>>, vector<8x768xbf16>,
    %c0_138 = arith.constant 0 : index
    %c6 = arith.constant 6 : index
    %174 = vector.load %arg17[%c0_138, %c6] : memref<8x1104xf32, #tpu.memory_space<vmem>>, vector<8x768xf32>
    %175 = arith.truncf %174 : vector<8x768xf32> to vector<8x768xbf16>
    %c48 = arith.constant 48 : index
    %c0_139 = arith.constant 0 : index
    %176 = vector.load %arg18[%c48, %c0_139] : memref<392x768xbf16, #tpu.memory_space<vmem>>, vector<8x768xbf16>
    tpu.vector_store %arg18[%c48, %c0_139], %175 {strides = array<i32>} : memref<392x768xbf16, #tpu.memory_space<vmem>>, vector<8x768xbf16>,
    %c0_140 = arith.constant 0 : index
    %c48_141 = arith.constant 48 : index
    %177 = vector.load %arg17[%c0_140, %c48_141] : memref<8x1104xf32, #tpu.memory_space<vmem>>, vector<8x768xf32>
    %178 = arith.truncf %177 : vector<8x768xf32> to vector<8x768xbf16>
    %c56 = arith.constant 56 : index
    %c0_142 = arith.constant 0 : index
    %179 = vector.load %arg18[%c56, %c0_142] : memref<392x768xbf16, #tpu.memory_space<vmem>>, vector<8x768xbf16>
    tpu.vector_store %arg18[%c56, %c0_142], %178 {strides = array<i32>} : memref<392x768xbf16, #tpu.memory_space<vmem>>, vector<8x768xbf16>,
    %c0_143 = arith.constant 0 : index
    %c49 = arith.constant 49 : index
    %180 = vector.load %arg17[%c0_143, %c49] : memref<8x1104xf32, #tpu.memory_space<vmem>>, vector<8x768xf32>
    %181 = arith.truncf %180 : vector<8x768xf32> to vector<8x768xbf16>
    %c64 = arith.constant 64 : index
    %c0_144 = arith.constant 0 : index
    %182 = vector.load %arg18[%c64, %c0_144] : memref<392x768xbf16, #tpu.memory_space<vmem>>, vector<8x768xbf16>
    tpu.vector_store %arg18[%c64, %c0_144], %181 {strides = array<i32>} : memref<392x768xbf16, #tpu.memory_space<vmem>>, vector<8x768xbf16>,
    %c0_145 = arith.constant 0 : index
    %c50 = arith.constant 50 : index
    %183 = vector.load %arg17[%c0_145, %c50] : memref<8x1104xf32, #tpu.memory_space<vmem>>, vector<8x768xf32>
    %184 = arith.truncf %183 : vector<8x768xf32> to vector<8x768xbf16>
    %c72 = arith.constant 72 : index
    %c0_146 = arith.constant 0 : index
    %185 = vector.load %arg18[%c72, %c0_146] : memref<392x768xbf16, #tpu.memory_space<vmem>>, vector<8x768xbf16>
    tpu.vector_store %arg18[%c72, %c0_146], %184 {strides = array<i32>} : memref<392x768xbf16, #tpu.memory_space<vmem>>, vector<8x768xbf16>,
    %c0_147 = arith.constant 0 : index
    %c51 = arith.constant 51 : index
    %186 = vector.load %arg17[%c0_147, %c51] : memref<8x1104xf32, #tpu.memory_space<vmem>>, vector<8x768xf32>
    %187 = arith.truncf %186 : vector<8x768xf32> to vector<8x768xbf16>
    %c80 = arith.constant 80 : index
    %c0_148 = arith.constant 0 : index
    %188 = vector.load %arg18[%c80, %c0_148] : memref<392x768xbf16, #tpu.memory_space<vmem>>, vector<8x768xbf16>
    tpu.vector_store %arg18[%c80, %c0_148], %187 {strides = array<i32>} : memref<392x768xbf16, #tpu.memory_space<vmem>>, vector<8x768xbf16>,
    %c0_149 = arith.constant 0 : index
    %c52 = arith.constant 52 : index
    %189 = vector.load %arg17[%c0_149, %c52] : memref<8x1104xf32, #tpu.memory_space<vmem>>, vector<8x768xf32>
    %190 = arith.truncf %189 : vector<8x768xf32> to vector<8x768xbf16>
    %c88 = arith.constant 88 : index
    %c0_150 = arith.constant 0 : index
    %191 = vector.load %arg18[%c88, %c0_150] : memref<392x768xbf16, #tpu.memory_space<vmem>>, vector<8x768xbf16>
    tpu.vector_store %arg18[%c88, %c0_150], %190 {strides = array<i32>} : memref<392x768xbf16, #tpu.memory_space<vmem>>, vector<8x768xbf16>,
    %c0_151 = arith.constant 0 : index
    %c53 = arith.constant 53 : index
    %192 = vector.load %arg17[%c0_151, %c53] : memref<8x1104xf32, #tpu.memory_space<vmem>>, vector<8x768xf32>
    %193 = arith.truncf %192 : vector<8x768xf32> to vector<8x768xbf16>
    %c96 = arith.constant 96 : index
    %c0_152 = arith.constant 0 : index
    %194 = vector.load %arg18[%c96, %c0_152] : memref<392x768xbf16, #tpu.memory_space<vmem>>, vector<8x768xbf16>
    tpu.vector_store %arg18[%c96, %c0_152], %193 {strides = array<i32>} : memref<392x768xbf16, #tpu.memory_space<vmem>>, vector<8x768xbf16>,
    %c0_153 = arith.constant 0 : index
    %c54 = arith.constant 54 : index
    %195 = vector.load %arg17[%c0_153, %c54] : memref<8x1104xf32, #tpu.memory_space<vmem>>, vector<8x768xf32>
    %196 = arith.truncf %195 : vector<8x768xf32> to vector<8x768xbf16>
    %c104 = arith.constant 104 : index
    %c0_154 = arith.constant 0 : index
    %197 = vector.load %arg18[%c104, %c0_154] : memref<392x768xbf16, #tpu.memory_space<vmem>>, vector<8x768xbf16>
    tpu.vector_store %arg18[%c104, %c0_154], %196 {strides = array<i32>} : memref<392x768xbf16, #tpu.memory_space<vmem>>, vector<8x768xbf16>,
    %c0_155 = arith.constant 0 : index
    %c96_156 = arith.constant 96 : index
    %198 = vector.load %arg17[%c0_155, %c96_156] : memref<8x1104xf32, #tpu.memory_space<vmem>>, vector<8x768xf32>
    %199 = arith.truncf %198 : vector<8x768xf32> to vector<8x768xbf16>
    %c112 = arith.constant 112 : index
    %c0_157 = arith.constant 0 : index
    %200 = vector.load %arg18[%c112, %c0_157] : memref<392x768xbf16, #tpu.memory_space<vmem>>, vector<8x768xbf16>
    tpu.vector_store %arg18[%c112, %c0_157], %199 {strides = array<i32>} : memref<392x768xbf16, #tpu.memory_space<vmem>>, vector<8x768xbf16>,
    %c0_158 = arith.constant 0 : index
    %c97 = arith.constant 97 : index
    %201 = vector.load %arg17[%c0_158, %c97] : memref<8x1104xf32, #tpu.memory_space<vmem>>, vector<8x768xf32>
    %202 = arith.truncf %201 : vector<8x768xf32> to vector<8x768xbf16>
    %c120 = arith.constant 120 : index
    %c0_159 = arith.constant 0 : index
    %203 = vector.load %arg18[%c120, %c0_159] : memref<392x768xbf16, #tpu.memory_space<vmem>>, vector<8x768xbf16>
    tpu.vector_store %arg18[%c120, %c0_159], %202 {strides = array<i32>} : memref<392x768xbf16, #tpu.memory_space<vmem>>, vector<8x768xbf16>,
    %c0_160 = arith.constant 0 : index
    %c98 = arith.constant 98 : index
    %204 = vector.load %arg17[%c0_160, %c98] : memref<8x1104xf32, #tpu.memory_space<vmem>>, vector<8x768xf32>
    %205 = arith.truncf %204 : vector<8x768xf32> to vector<8x768xbf16>
    %c128 = arith.constant 128 : index
    %c0_161 = arith.constant 0 : index
    %206 = vector.load %arg18[%c128, %c0_161] : memref<392x768xbf16, #tpu.memory_space<vmem>>, vector<8x768xbf16>
    tpu.vector_store %arg18[%c128, %c0_161], %205 {strides = array<i32>} : memref<392x768xbf16, #tpu.memory_space<vmem>>, vector<8x768xbf16>,
    %c0_162 = arith.constant 0 : index
    %c99 = arith.constant 99 : index
    %207 = vector.load %arg17[%c0_162, %c99] : memref<8x1104xf32, #tpu.memory_space<vmem>>, vector<8x768xf32>
    %208 = arith.truncf %207 : vector<8x768xf32> to vector<8x768xbf16>
    %c136 = arith.constant 136 : index
    %c0_163 = arith.constant 0 : index
    %209 = vector.load %arg18[%c136, %c0_163] : memref<392x768xbf16, #tpu.memory_space<vmem>>, vector<8x768xbf16>
    tpu.vector_store %arg18[%c136, %c0_163], %208 {strides = array<i32>} : memref<392x768xbf16, #tpu.memory_space<vmem>>, vector<8x768xbf16>,
    %c0_164 = arith.constant 0 : index
    %c100 = arith.constant 100 : index
    %210 = vector.load %arg17[%c0_164, %c100] : memref<8x1104xf32, #tpu.memory_space<vmem>>, vector<8x768xf32>
    %211 = arith.truncf %210 : vector<8x768xf32> to vector<8x768xbf16>
    %c144 = arith.constant 144 : index
    %c0_165 = arith.constant 0 : index
    %212 = vector.load %arg18[%c144, %c0_165] : memref<392x768xbf16, #tpu.memory_space<vmem>>, vector<8x768xbf16>
    tpu.vector_store %arg18[%c144, %c0_165], %211 {strides = array<i32>} : memref<392x768xbf16, #tpu.memory_space<vmem>>, vector<8x768xbf16>,
    %c0_166 = arith.constant 0 : index
    %c101 = arith.constant 101 : index
    %213 = vector.load %arg17[%c0_166, %c101] : memref<8x1104xf32, #tpu.memory_space<vmem>>, vector<8x768xf32>
    %214 = arith.truncf %213 : vector<8x768xf32> to vector<8x768xbf16>
    %c152 = arith.constant 152 : index
    %c0_167 = arith.constant 0 : index
    %215 = vector.load %arg18[%c152, %c0_167] : memref<392x768xbf16, #tpu.memory_space<vmem>>, vector<8x768xbf16>
    tpu.vector_store %arg18[%c152, %c0_167], %214 {strides = array<i32>} : memref<392x768xbf16, #tpu.memory_space<vmem>>, vector<8x768xbf16>,
    %c0_168 = arith.constant 0 : index
    %c102 = arith.constant 102 : index
    %216 = vector.load %arg17[%c0_168, %c102] : memref<8x1104xf32, #tpu.memory_space<vmem>>, vector<8x768xf32>
    %217 = arith.truncf %216 : vector<8x768xf32> to vector<8x768xbf16>
    %c160 = arith.constant 160 : index
    %c0_169 = arith.constant 0 : index
    %218 = vector.load %arg18[%c160, %c0_169] : memref<392x768xbf16, #tpu.memory_space<vmem>>, vector<8x768xbf16>
    tpu.vector_store %arg18[%c160, %c0_169], %217 {strides = array<i32>} : memref<392x768xbf16, #tpu.memory_space<vmem>>, vector<8x768xbf16>,
    %c0_170 = arith.constant 0 : index
    %c144_171 = arith.constant 144 : index
    %219 = vector.load %arg17[%c0_170, %c144_171] : memref<8x1104xf32, #tpu.memory_space<vmem>>, vector<8x768xf32>
    %220 = arith.truncf %219 : vector<8x768xf32> to vector<8x768xbf16>
    %c168 = arith.constant 168 : index
    %c0_172 = arith.constant 0 : index
    %221 = vector.load %arg18[%c168, %c0_172] : memref<392x768xbf16, #tpu.memory_space<vmem>>, vector<8x768xbf16>
    tpu.vector_store %arg18[%c168, %c0_172], %220 {strides = array<i32>} : memref<392x768xbf16, #tpu.memory_space<vmem>>, vector<8x768xbf16>,
    %c0_173 = arith.constant 0 : index
    %c145 = arith.constant 145 : index
    %222 = vector.load %arg17[%c0_173, %c145] : memref<8x1104xf32, #tpu.memory_space<vmem>>, vector<8x768xf32>
    %223 = arith.truncf %222 : vector<8x768xf32> to vector<8x768xbf16>
    %c176 = arith.constant 176 : index
    %c0_174 = arith.constant 0 : index
    %224 = vector.load %arg18[%c176, %c0_174] : memref<392x768xbf16, #tpu.memory_space<vmem>>, vector<8x768xbf16>
    tpu.vector_store %arg18[%c176, %c0_174], %223 {strides = array<i32>} : memref<392x768xbf16, #tpu.memory_space<vmem>>, vector<8x768xbf16>,
    %c0_175 = arith.constant 0 : index
    %c146 = arith.constant 146 : index
    %225 = vector.load %arg17[%c0_175, %c146] : memref<8x1104xf32, #tpu.memory_space<vmem>>, vector<8x768xf32>
    %226 = arith.truncf %225 : vector<8x768xf32> to vector<8x768xbf16>
    %c184 = arith.constant 184 : index
    %c0_176 = arith.constant 0 : index
    %227 = vector.load %arg18[%c184, %c0_176] : memref<392x768xbf16, #tpu.memory_space<vmem>>, vector<8x768xbf16>
    tpu.vector_store %arg18[%c184, %c0_176], %226 {strides = array<i32>} : memref<392x768xbf16, #tpu.memory_space<vmem>>, vector<8x768xbf16>,
    %c0_177 = arith.constant 0 : index
    %c147_178 = arith.constant 147 : index
    %228 = vector.load %arg17[%c0_177, %c147_178] : memref<8x1104xf32, #tpu.memory_space<vmem>>, vector<8x768xf32>
    %229 = arith.truncf %228 : vector<8x768xf32> to vector<8x768xbf16>
    %c192 = arith.constant 192 : index
    %c0_179 = arith.constant 0 : index
    %230 = vector.load %arg18[%c192, %c0_179] : memref<392x768xbf16, #tpu.memory_space<vmem>>, vector<8x768xbf16>
    tpu.vector_store %arg18[%c192, %c0_179], %229 {strides = array<i32>} : memref<392x768xbf16, #tpu.memory_space<vmem>>, vector<8x768xbf16>,
    %c0_180 = arith.constant 0 : index
    %c148 = arith.constant 148 : index
    %231 = vector.load %arg17[%c0_180, %c148] : memref<8x1104xf32, #tpu.memory_space<vmem>>, vector<8x768xf32>
    %232 = arith.truncf %231 : vector<8x768xf32> to vector<8x768xbf16>
    %c200 = arith.constant 200 : index
    %c0_181 = arith.constant 0 : index
    %233 = vector.load %arg18[%c200, %c0_181] : memref<392x768xbf16, #tpu.memory_space<vmem>>, vector<8x768xbf16>
    tpu.vector_store %arg18[%c200, %c0_181], %232 {strides = array<i32>} : memref<392x768xbf16, #tpu.memory_space<vmem>>, vector<8x768xbf16>,
    %c0_182 = arith.constant 0 : index
    %c149 = arith.constant 149 : index
    %234 = vector.load %arg17[%c0_182, %c149] : memref<8x1104xf32, #tpu.memory_space<vmem>>, vector<8x768xf32>
    %235 = arith.truncf %234 : vector<8x768xf32> to vector<8x768xbf16>
    %c208 = arith.constant 208 : index
    %c0_183 = arith.constant 0 : index
    %236 = vector.load %arg18[%c208, %c0_183] : memref<392x768xbf16, #tpu.memory_space<vmem>>, vector<8x768xbf16>
    tpu.vector_store %arg18[%c208, %c0_183], %235 {strides = array<i32>} : memref<392x768xbf16, #tpu.memory_space<vmem>>, vector<8x768xbf16>,
    %c0_184 = arith.constant 0 : index
    %c150 = arith.constant 150 : index
    %237 = vector.load %arg17[%c0_184, %c150] : memref<8x1104xf32, #tpu.memory_space<vmem>>, vector<8x768xf32>
    %238 = arith.truncf %237 : vector<8x768xf32> to vector<8x768xbf16>
    %c216 = arith.constant 216 : index
    %c0_185 = arith.constant 0 : index
    %239 = vector.load %arg18[%c216, %c0_185] : memref<392x768xbf16, #tpu.memory_space<vmem>>, vector<8x768xbf16>
    tpu.vector_store %arg18[%c216, %c0_185], %238 {strides = array<i32>} : memref<392x768xbf16, #tpu.memory_space<vmem>>, vector<8x768xbf16>,
    %c0_186 = arith.constant 0 : index
    %c192_187 = arith.constant 192 : index
    %240 = vector.load %arg17[%c0_186, %c192_187] : memref<8x1104xf32, #tpu.memory_space<vmem>>, vector<8x768xf32>
    %241 = arith.truncf %240 : vector<8x768xf32> to vector<8x768xbf16>
    %c224 = arith.constant 224 : index
    %c0_188 = arith.constant 0 : index
    %242 = vector.load %arg18[%c224, %c0_188] : memref<392x768xbf16, #tpu.memory_space<vmem>>, vector<8x768xbf16>
    tpu.vector_store %arg18[%c224, %c0_188], %241 {strides = array<i32>} : memref<392x768xbf16, #tpu.memory_space<vmem>>, vector<8x768xbf16>,
    %c0_189 = arith.constant 0 : index
    %c193 = arith.constant 193 : index
    %243 = vector.load %arg17[%c0_189, %c193] : memref<8x1104xf32, #tpu.memory_space<vmem>>, vector<8x768xf32>
    %244 = arith.truncf %243 : vector<8x768xf32> to vector<8x768xbf16>
    %c232 = arith.constant 232 : index
    %c0_190 = arith.constant 0 : index
    %245 = vector.load %arg18[%c232, %c0_190] : memref<392x768xbf16, #tpu.memory_space<vmem>>, vector<8x768xbf16>
    tpu.vector_store %arg18[%c232, %c0_190], %244 {strides = array<i32>} : memref<392x768xbf16, #tpu.memory_space<vmem>>, vector<8x768xbf16>,
    %c0_191 = arith.constant 0 : index
    %c194 = arith.constant 194 : index
    %246 = vector.load %arg17[%c0_191, %c194] : memref<8x1104xf32, #tpu.memory_space<vmem>>, vector<8x768xf32>
    %247 = arith.truncf %246 : vector<8x768xf32> to vector<8x768xbf16>
    %c240 = arith.constant 240 : index
    %c0_192 = arith.constant 0 : index
    %248 = vector.load %arg18[%c240, %c0_192] : memref<392x768xbf16, #tpu.memory_space<vmem>>, vector<8x768xbf16>
    tpu.vector_store %arg18[%c240, %c0_192], %247 {strides = array<i32>} : memref<392x768xbf16, #tpu.memory_space<vmem>>, vector<8x768xbf16>,
    %c0_193 = arith.constant 0 : index
    %c195_194 = arith.constant 195 : index
    %249 = vector.load %arg17[%c0_193, %c195_194] : memref<8x1104xf32, #tpu.memory_space<vmem>>, vector<8x768xf32>
    %250 = arith.truncf %249 : vector<8x768xf32> to vector<8x768xbf16>
    %c248 = arith.constant 248 : index
    %c0_195 = arith.constant 0 : index
    %251 = vector.load %arg18[%c248, %c0_195] : memref<392x768xbf16, #tpu.memory_space<vmem>>, vector<8x768xbf16>
    tpu.vector_store %arg18[%c248, %c0_195], %250 {strides = array<i32>} : memref<392x768xbf16, #tpu.memory_space<vmem>>, vector<8x768xbf16>,
    %c0_196 = arith.constant 0 : index
    %c196 = arith.constant 196 : index
    %252 = vector.load %arg17[%c0_196, %c196] : memref<8x1104xf32, #tpu.memory_space<vmem>>, vector<8x768xf32>
    %253 = arith.truncf %252 : vector<8x768xf32> to vector<8x768xbf16>
    %c256 = arith.constant 256 : index
    %c0_197 = arith.constant 0 : index
    %254 = vector.load %arg18[%c256, %c0_197] : memref<392x768xbf16, #tpu.memory_space<vmem>>, vector<8x768xbf16>
    tpu.vector_store %arg18[%c256, %c0_197], %253 {strides = array<i32>} : memref<392x768xbf16, #tpu.memory_space<vmem>>, vector<8x768xbf16>,
    %c0_198 = arith.constant 0 : index
    %c197 = arith.constant 197 : index
    %255 = vector.load %arg17[%c0_198, %c197] : memref<8x1104xf32, #tpu.memory_space<vmem>>, vector<8x768xf32>
    %256 = arith.truncf %255 : vector<8x768xf32> to vector<8x768xbf16>
    %c264 = arith.constant 264 : index
    %c0_199 = arith.constant 0 : index
    %257 = vector.load %arg18[%c264, %c0_199] : memref<392x768xbf16, #tpu.memory_space<vmem>>, vector<8x768xbf16>
    tpu.vector_store %arg18[%c264, %c0_199], %256 {strides = array<i32>} : memref<392x768xbf16, #tpu.memory_space<vmem>>, vector<8x768xbf16>,
    %c0_200 = arith.constant 0 : index
    %c198 = arith.constant 198 : index
    %258 = vector.load %arg17[%c0_200, %c198] : memref<8x1104xf32, #tpu.memory_space<vmem>>, vector<8x768xf32>
    %259 = arith.truncf %258 : vector<8x768xf32> to vector<8x768xbf16>
    %c272 = arith.constant 272 : index
    %c0_201 = arith.constant 0 : index
    %260 = vector.load %arg18[%c272, %c0_201] : memref<392x768xbf16, #tpu.memory_space<vmem>>, vector<8x768xbf16>
    tpu.vector_store %arg18[%c272, %c0_201], %259 {strides = array<i32>} : memref<392x768xbf16, #tpu.memory_space<vmem>>, vector<8x768xbf16>,
    %c0_202 = arith.constant 0 : index
    %c240_203 = arith.constant 240 : index
    %261 = vector.load %arg17[%c0_202, %c240_203] : memref<8x1104xf32, #tpu.memory_space<vmem>>, vector<8x768xf32>
    %262 = arith.truncf %261 : vector<8x768xf32> to vector<8x768xbf16>
    %c280 = arith.constant 280 : index
    %c0_204 = arith.constant 0 : index
    %263 = vector.load %arg18[%c280, %c0_204] : memref<392x768xbf16, #tpu.memory_space<vmem>>, vector<8x768xbf16>
    tpu.vector_store %arg18[%c280, %c0_204], %262 {strides = array<i32>} : memref<392x768xbf16, #tpu.memory_space<vmem>>, vector<8x768xbf16>,
    %c0_205 = arith.constant 0 : index
    %c241 = arith.constant 241 : index
    %264 = vector.load %arg17[%c0_205, %c241] : memref<8x1104xf32, #tpu.memory_space<vmem>>, vector<8x768xf32>
    %265 = arith.truncf %264 : vector<8x768xf32> to vector<8x768xbf16>
    %c288 = arith.constant 288 : index
    %c0_206 = arith.constant 0 : index
    %266 = vector.load %arg18[%c288, %c0_206] : memref<392x768xbf16, #tpu.memory_space<vmem>>, vector<8x768xbf16>
    tpu.vector_store %arg18[%c288, %c0_206], %265 {strides = array<i32>} : memref<392x768xbf16, #tpu.memory_space<vmem>>, vector<8x768xbf16>,
    %c0_207 = arith.constant 0 : index
    %c242 = arith.constant 242 : index
    %267 = vector.load %arg17[%c0_207, %c242] : memref<8x1104xf32, #tpu.memory_space<vmem>>, vector<8x768xf32>
    %268 = arith.truncf %267 : vector<8x768xf32> to vector<8x768xbf16>
    %c296 = arith.constant 296 : index
    %c0_208 = arith.constant 0 : index
    %269 = vector.load %arg18[%c296, %c0_208] : memref<392x768xbf16, #tpu.memory_space<vmem>>, vector<8x768xbf16>
    tpu.vector_store %arg18[%c296, %c0_208], %268 {strides = array<i32>} : memref<392x768xbf16, #tpu.memory_space<vmem>>, vector<8x768xbf16>,
    %c0_209 = arith.constant 0 : index
    %c243_210 = arith.constant 243 : index
    %270 = vector.load %arg17[%c0_209, %c243_210] : memref<8x1104xf32, #tpu.memory_space<vmem>>, vector<8x768xf32>
    %271 = arith.truncf %270 : vector<8x768xf32> to vector<8x768xbf16>
    %c304 = arith.constant 304 : index
    %c0_211 = arith.constant 0 : index
    %272 = vector.load %arg18[%c304, %c0_211] : memref<392x768xbf16, #tpu.memory_space<vmem>>, vector<8x768xbf16>
    tpu.vector_store %arg18[%c304, %c0_211], %271 {strides = array<i32>} : memref<392x768xbf16, #tpu.memory_space<vmem>>, vector<8x768xbf16>,
    %c0_212 = arith.constant 0 : index
    %c244 = arith.constant 244 : index
    %273 = vector.load %arg17[%c0_212, %c244] : memref<8x1104xf32, #tpu.memory_space<vmem>>, vector<8x768xf32>
    %274 = arith.truncf %273 : vector<8x768xf32> to vector<8x768xbf16>
    %c312 = arith.constant 312 : index
    %c0_213 = arith.constant 0 : index
    %275 = vector.load %arg18[%c312, %c0_213] : memref<392x768xbf16, #tpu.memory_space<vmem>>, vector<8x768xbf16>
    tpu.vector_store %arg18[%c312, %c0_213], %274 {strides = array<i32>} : memref<392x768xbf16, #tpu.memory_space<vmem>>, vector<8x768xbf16>,
    %c0_214 = arith.constant 0 : index
    %c245 = arith.constant 245 : index
    %276 = vector.load %arg17[%c0_214, %c245] : memref<8x1104xf32, #tpu.memory_space<vmem>>, vector<8x768xf32>
    %277 = arith.truncf %276 : vector<8x768xf32> to vector<8x768xbf16>
    %c320 = arith.constant 320 : index
    %c0_215 = arith.constant 0 : index
    %278 = vector.load %arg18[%c320, %c0_215] : memref<392x768xbf16, #tpu.memory_space<vmem>>, vector<8x768xbf16>
    tpu.vector_store %arg18[%c320, %c0_215], %277 {strides = array<i32>} : memref<392x768xbf16, #tpu.memory_space<vmem>>, vector<8x768xbf16>,
    %c0_216 = arith.constant 0 : index
    %c246 = arith.constant 246 : index
    %279 = vector.load %arg17[%c0_216, %c246] : memref<8x1104xf32, #tpu.memory_space<vmem>>, vector<8x768xf32>
    %280 = arith.truncf %279 : vector<8x768xf32> to vector<8x768xbf16>
    %c328 = arith.constant 328 : index
    %c0_217 = arith.constant 0 : index
    %281 = vector.load %arg18[%c328, %c0_217] : memref<392x768xbf16, #tpu.memory_space<vmem>>, vector<8x768xbf16>
    tpu.vector_store %arg18[%c328, %c0_217], %280 {strides = array<i32>} : memref<392x768xbf16, #tpu.memory_space<vmem>>, vector<8x768xbf16>,
    %c0_218 = arith.constant 0 : index
    %c288_219 = arith.constant 288 : index
    %282 = vector.load %arg17[%c0_218, %c288_219] : memref<8x1104xf32, #tpu.memory_space<vmem>>, vector<8x768xf32>
    %283 = arith.truncf %282 : vector<8x768xf32> to vector<8x768xbf16>
    %c336 = arith.constant 336 : index
    %c0_220 = arith.constant 0 : index
    %284 = vector.load %arg18[%c336, %c0_220] : memref<392x768xbf16, #tpu.memory_space<vmem>>, vector<8x768xbf16>
    tpu.vector_store %arg18[%c336, %c0_220], %283 {strides = array<i32>} : memref<392x768xbf16, #tpu.memory_space<vmem>>, vector<8x768xbf16>,
    %c0_221 = arith.constant 0 : index
    %c289 = arith.constant 289 : index
    %285 = vector.load %arg17[%c0_221, %c289] : memref<8x1104xf32, #tpu.memory_space<vmem>>, vector<8x768xf32>
    %286 = arith.truncf %285 : vector<8x768xf32> to vector<8x768xbf16>
    %c344 = arith.constant 344 : index
    %c0_222 = arith.constant 0 : index
    %287 = vector.load %arg18[%c344, %c0_222] : memref<392x768xbf16, #tpu.memory_space<vmem>>, vector<8x768xbf16>
    tpu.vector_store %arg18[%c344, %c0_222], %286 {strides = array<i32>} : memref<392x768xbf16, #tpu.memory_space<vmem>>, vector<8x768xbf16>,
    %c0_223 = arith.constant 0 : index
    %c290 = arith.constant 290 : index
    %288 = vector.load %arg17[%c0_223, %c290] : memref<8x1104xf32, #tpu.memory_space<vmem>>, vector<8x768xf32>
    %289 = arith.truncf %288 : vector<8x768xf32> to vector<8x768xbf16>
    %c352 = arith.constant 352 : index
    %c0_224 = arith.constant 0 : index
    %290 = vector.load %arg18[%c352, %c0_224] : memref<392x768xbf16, #tpu.memory_space<vmem>>, vector<8x768xbf16>
    tpu.vector_store %arg18[%c352, %c0_224], %289 {strides = array<i32>} : memref<392x768xbf16, #tpu.memory_space<vmem>>, vector<8x768xbf16>,
    %c0_225 = arith.constant 0 : index
    %c291_226 = arith.constant 291 : index
    %291 = vector.load %arg17[%c0_225, %c291_226] : memref<8x1104xf32, #tpu.memory_space<vmem>>, vector<8x768xf32>
    %292 = arith.truncf %291 : vector<8x768xf32> to vector<8x768xbf16>
    %c360 = arith.constant 360 : index
    %c0_227 = arith.constant 0 : index
    %293 = vector.load %arg18[%c360, %c0_227] : memref<392x768xbf16, #tpu.memory_space<vmem>>, vector<8x768xbf16>
    tpu.vector_store %arg18[%c360, %c0_227], %292 {strides = array<i32>} : memref<392x768xbf16, #tpu.memory_space<vmem>>, vector<8x768xbf16>,
    %c0_228 = arith.constant 0 : index
    %c292 = arith.constant 292 : index
    %294 = vector.load %arg17[%c0_228, %c292] : memref<8x1104xf32, #tpu.memory_space<vmem>>, vector<8x768xf32>
    %295 = arith.truncf %294 : vector<8x768xf32> to vector<8x768xbf16>
    %c368 = arith.constant 368 : index
    %c0_229 = arith.constant 0 : index
    %296 = vector.load %arg18[%c368, %c0_229] : memref<392x768xbf16, #tpu.memory_space<vmem>>, vector<8x768xbf16>
    tpu.vector_store %arg18[%c368, %c0_229], %295 {strides = array<i32>} : memref<392x768xbf16, #tpu.memory_space<vmem>>, vector<8x768xbf16>,
    %c0_230 = arith.constant 0 : index
    %c293 = arith.constant 293 : index
    %297 = vector.load %arg17[%c0_230, %c293] : memref<8x1104xf32, #tpu.memory_space<vmem>>, vector<8x768xf32>
    %298 = arith.truncf %297 : vector<8x768xf32> to vector<8x768xbf16>
    %c376 = arith.constant 376 : index
    %c0_231 = arith.constant 0 : index
    %299 = vector.load %arg18[%c376, %c0_231] : memref<392x768xbf16, #tpu.memory_space<vmem>>, vector<8x768xbf16>
    tpu.vector_store %arg18[%c376, %c0_231], %298 {strides = array<i32>} : memref<392x768xbf16, #tpu.memory_space<vmem>>, vector<8x768xbf16>,
    %c0_232 = arith.constant 0 : index
    %c294 = arith.constant 294 : index
    %300 = vector.load %arg17[%c0_232, %c294] : memref<8x1104xf32, #tpu.memory_space<vmem>>, vector<8x768xf32>
    %301 = arith.truncf %300 : vector<8x768xf32> to vector<8x768xbf16>
    %c384 = arith.constant 384 : index
    %c0_233 = arith.constant 0 : index
    %302 = vector.load %arg18[%c384, %c0_233] : memref<392x768xbf16, #tpu.memory_space<vmem>>, vector<8x768xbf16>
    tpu.vector_store %arg18[%c384, %c0_233], %301 {strides = array<i32>} : memref<392x768xbf16, #tpu.memory_space<vmem>>, vector<8x768xbf16>,
    %c0_234 = arith.constant 0 : index
    %c0_235 = arith.constant 0 : index
    %303 = vector.load %arg7[%c0_234, %c0_235] : memref<8x392xbf16, #tpu.memory_space<vmem>>, vector<8x392xbf16>
    %c0_236 = arith.constant 0 : index
    %c0_237 = arith.constant 0 : index
    %304 = vector.load %arg18[%c0_236, %c0_237] : memref<392x768xbf16, #tpu.memory_space<vmem>>, vector<392x768xbf16>
    %cst_238 = arith.constant dense<0.000000e+00> : vector<8x768xf32>
    %305 = tpu.matmul %303, %304, %cst_238 {dimension_numbers = #tpu.dot_dimension_numbers<[1], [0], [0], [1], [0, 0, 1, 1], [], []>} : vector<8x392xbf16>, vector<392x768xbf16>, vector<8x768xf32> -> vector<8x768xf32>
    %c0_239 = arith.constant 0 : index
    %c0_240 = arith.constant 0 : index
    %306 = vector.load %arg8[%c0_239, %c0_240] : memref<8x1xf32, #tpu.memory_space<vmem>>, vector<8x1xf32>
    %307 = vector.broadcast %306 : vector<8x1xf32> to vector<8x768xf32>
    %308 = arith.addf %305, %307 : vector<8x768xf32>
    %cst_241 = arith.constant dense<0.000000e+00> : vector<768xf32>
    %309 = vector.multi_reduction <add>, %308, %cst_241 [0] : vector<8x768xf32> to vector<768xf32>
    %310 = vector.shape_cast %309 : vector<768xf32> to vector<1x768xf32>
    %cst_242 = arith.constant 8.000000e+00 : f32
    %311 = vector.broadcast %cst_242 : f32 to vector<1x768xf32>
    %312 = arith.divf %310, %311 : vector<1x768xf32>
    %313 = vector.broadcast %312 : vector<1x768xf32> to vector<8x768xf32>
    %314 = arith.subf %308, %313 : vector<8x768xf32>
    %315 = arith.mulf %314, %314 : vector<8x768xf32>
    %cst_243 = arith.constant dense<0.000000e+00> : vector<768xf32>
    %316 = vector.multi_reduction <add>, %315, %cst_243 [0] : vector<8x768xf32> to vector<768xf32>
    %317 = vector.shape_cast %316 : vector<768xf32> to vector<1x768xf32>
    %cst_244 = arith.constant 8.000000e+00 : f32
    %318 = vector.broadcast %cst_244 : f32 to vector<1x768xf32>
    %319 = arith.divf %317, %318 : vector<1x768xf32>
    %320 = vector.broadcast %312 : vector<1x768xf32> to vector<8x768xf32>
    %321 = arith.subf %308, %320 : vector<8x768xf32>
    %cst_245 = arith.constant 9.99999974E-6 : f32
    %322 = vector.broadcast %cst_245 : f32 to vector<1x768xf32>
    %323 = arith.addf %319, %322 : vector<1x768xf32>
    %324 = math.rsqrt %323 : vector<1x768xf32>
    %325 = vector.broadcast %324 : vector<1x768xf32> to vector<8x768xf32>
    %326 = arith.mulf %321, %325 : vector<8x768xf32>
    %c0_246 = arith.constant 0 : index
    %c0_247 = arith.constant 0 : index
    %327 = vector.load %arg9[%c0_246, %c0_247] : memref<8x1xf32, #tpu.memory_space<vmem>>, vector<8x1xf32>
    %328 = vector.broadcast %327 : vector<8x1xf32> to vector<8x768xf32>
    %329 = arith.mulf %326, %328 : vector<8x768xf32>
    %c0_248 = arith.constant 0 : index
    %c0_249 = arith.constant 0 : index
    %330 = vector.load %arg10[%c0_248, %c0_249] : memref<8x1xf32, #tpu.memory_space<vmem>>, vector<8x1xf32>
    %331 = vector.broadcast %330 : vector<8x1xf32> to vector<8x768xf32>
    %332 = arith.addf %329, %331 : vector<8x768xf32>
    %c0_250 = arith.constant 0 : index
    %c0_251 = arith.constant 0 : index
    %333 = vector.load %arg11[%c0_250, %c0_251] : memref<16x8xbf16, #tpu.memory_space<vmem>>, vector<16x8xbf16>
    %334 = arith.truncf %332 : vector<8x768xf32> to vector<8x768xbf16>
    %cst_252 = arith.constant dense<0.000000e+00> : vector<16x768xf32>
    %335 = tpu.matmul %333, %334, %cst_252 {dimension_numbers = #tpu.dot_dimension_numbers<[1], [0], [0], [1], [0, 0, 1, 1], [], []>} : vector<16x8xbf16>, vector<8x768xbf16>, vector<16x768xf32> -> vector<16x768xf32>
    %c0_253 = arith.constant 0 : index
    %c0_254 = arith.constant 0 : index
    %336 = vector.load %arg12[%c0_253, %c0_254] : memref<16x1xf32, #tpu.memory_space<vmem>>, vector<16x1xf32>
    %337 = vector.broadcast %336 : vector<16x1xf32> to vector<16x768xf32>
    %338 = arith.addf %335, %337 : vector<16x768xf32>
    %cst_255 = arith.constant 5.000000e-01 : f32
    %339 = vector.broadcast %cst_255 : f32 to vector<16x768xf32>
    %340 = arith.mulf %339, %338 : vector<16x768xf32>
    %cst_256 = arith.constant 0.707106769 : f32
    %341 = vector.broadcast %cst_256 : f32 to vector<16x768xf32>
    %342 = arith.mulf %338, %341 : vector<16x768xf32>
    %343 = math.absf %342 : vector<16x768xf32>
    %cst_257 = arith.constant 0.327591091 : f32
    %344 = vector.broadcast %cst_257 : f32 to vector<16x768xf32>
    %345 = arith.mulf %344, %343 : vector<16x768xf32>
    %cst_258 = arith.constant 1.000000e+00 : f32
    %346 = vector.broadcast %cst_258 : f32 to vector<16x768xf32>
    %347 = arith.addf %346, %345 : vector<16x768xf32>
    %348 = tpu.reciprocal %347 : vector<16x768xf32> -> vector<16x768xf32>
    %cst_259 = arith.constant 1.06140542 : f32
    %349 = vector.broadcast %cst_259 : f32 to vector<16x768xf32>
    %350 = arith.mulf %349, %348 : vector<16x768xf32>
    %cst_260 = arith.constant -1.45315206 : f32
    %351 = vector.broadcast %cst_260 : f32 to vector<16x768xf32>
    %352 = arith.addf %350, %351 : vector<16x768xf32>
    %353 = arith.mulf %352, %348 : vector<16x768xf32>
    %cst_261 = arith.constant 1.42141378 : f32
    %354 = vector.broadcast %cst_261 : f32 to vector<16x768xf32>
    %355 = arith.addf %353, %354 : vector<16x768xf32>
    %356 = arith.mulf %355, %348 : vector<16x768xf32>
    %cst_262 = arith.constant -0.284496725 : f32
    %357 = vector.broadcast %cst_262 : f32 to vector<16x768xf32>
    %358 = arith.addf %356, %357 : vector<16x768xf32>
    %359 = arith.mulf %358, %348 : vector<16x768xf32>
    %cst_263 = arith.constant 0.254829586 : f32
    %360 = vector.broadcast %cst_263 : f32 to vector<16x768xf32>
    %361 = arith.addf %359, %360 : vector<16x768xf32>
    %362 = arith.mulf %361, %348 : vector<16x768xf32>
    %cst_264 = arith.constant 0.000000e+00 : f32
    %363 = vector.broadcast %cst_264 : f32 to vector<16x768xf32>
    %364 = arith.subf %363, %343 : vector<16x768xf32>
    %365 = arith.mulf %364, %343 : vector<16x768xf32>
    %366 = math.exp %365 : vector<16x768xf32>
    %367 = arith.mulf %362, %366 : vector<16x768xf32>
    %cst_265 = arith.constant 1.000000e+00 : f32
    %368 = vector.broadcast %cst_265 : f32 to vector<16x768xf32>
    %369 = arith.subf %368, %367 : vector<16x768xf32>
    %cst_266 = arith.constant 0.000000e+00 : f32
    %370 = vector.broadcast %cst_266 : f32 to vector<16x768xf32>
    %371 = arith.cmpf oge, %342, %370 : vector<16x768xf32>
    %cst_267 = arith.constant 0.000000e+00 : f32
    %372 = vector.broadcast %cst_267 : f32 to vector<16x768xf32>
    %373 = arith.subf %372, %369 : vector<16x768xf32>
    %374 = arith.select %371, %369, %373 : vector<16x768xi1>, vector<16x768xf32>
    %cst_268 = arith.constant 1.000000e+00 : f32
    %375 = vector.broadcast %cst_268 : f32 to vector<16x768xf32>
    %376 = arith.addf %375, %374 : vector<16x768xf32>
    %377 = arith.mulf %340, %376 : vector<16x768xf32>
    %378 = arith.truncf %377 : vector<16x768xf32> to vector<16x768xbf16>
    %c0_269 = arith.constant 0 : index
    %c0_270 = arith.constant 0 : index
    %379 = vector.load %arg19[%c0_269, %c0_270] : memref<24x768xbf16, #tpu.memory_space<vmem>>, vector<16x768xbf16>
    tpu.vector_store %arg19[%c0_269, %c0_270], %378 {strides = array<i32>} : memref<24x768xbf16, #tpu.memory_space<vmem>>, vector<16x768xbf16>,
    %c0_271 = arith.constant 0 : index
    %c147_272 = arith.constant 147 : index
    %380 = vector.load %arg17[%c0_271, %c147_272] : memref<8x1104xf32, #tpu.memory_space<vmem>>, vector<8x768xf32>
    %381 = arith.truncf %380 : vector<8x768xf32> to vector<8x768xbf16>
    %c16_273 = arith.constant 16 : index
    %c0_274 = arith.constant 0 : index
    %382 = vector.load %arg19[%c16_273, %c0_274] : memref<24x768xbf16, #tpu.memory_space<vmem>>, vector<8x768xbf16>
    tpu.vector_store %arg19[%c16_273, %c0_274], %381 {strides = array<i32>} : memref<24x768xbf16, #tpu.memory_space<vmem>>, vector<8x768xbf16>,
    %c0_275 = arith.constant 0 : index
    %c0_276 = arith.constant 0 : index
    %c0_277 = arith.constant 0 : index
    %383 = vector.load %arg4[%c0_275, %c0_276, %c0_277] : memref<1x8x2xf32, #tpu.memory_space<vmem>>, vector<1x8x2xf32>
    %384 = vector.shape_cast %383 : vector<1x8x2xf32> to vector<8x2xf32>
    %385 = vector.extract_strided_slice %384 {offsets = [0, 0], sizes = [8, 1], strides = [1, 1]} : vector<8x2xf32> to vector<8x1xf32>
    %c0_278 = arith.constant 0 : index
    %c0_279 = arith.constant 0 : index
    %386 = vector.load %arg6[%c0_278, %c0_279] : memref<2x768xf32, #tpu.memory_space<vmem>>, vector<1x768xf32>
    %387 = vector.broadcast %385 : vector<8x1xf32> to vector<8x768xf32>
    %388 = vector.broadcast %386 : vector<1x768xf32> to vector<8x768xf32>
    %389 = arith.mulf %387, %388 : vector<8x768xf32>
    %390 = vector.extract_strided_slice %384 {offsets = [0, 1], sizes = [8, 1], strides = [1, 1]} : vector<8x2xf32> to vector<8x1xf32>
    %c1_280 = arith.constant 1 : index
    %c0_281 = arith.constant 0 : index
    %391 = vector.load %arg6[%c1_280, %c0_281] : memref<2x768xf32, #tpu.memory_space<vmem>>, vector<1x768xf32>
    %392 = vector.broadcast %390 : vector<8x1xf32> to vector<8x768xf32>
    %393 = vector.broadcast %391 : vector<1x768xf32> to vector<8x768xf32>
    %394 = arith.mulf %392, %393 : vector<8x768xf32>
    %395 = arith.addf %389, %394 : vector<8x768xf32>
    %c0_282 = arith.constant 0 : index
    %c0_283 = arith.constant 0 : index
    %396 = vector.load %arg13[%c0_282, %c0_283] : memref<8x24xbf16, #tpu.memory_space<vmem>>, vector<8x24xbf16>
    %c0_284 = arith.constant 0 : index
    %c0_285 = arith.constant 0 : index
    %397 = vector.load %arg19[%c0_284, %c0_285] : memref<24x768xbf16, #tpu.memory_space<vmem>>, vector<24x768xbf16>
    %cst_286 = arith.constant dense<0.000000e+00> : vector<8x768xf32>
    %398 = tpu.matmul %396, %397, %cst_286 {dimension_numbers = #tpu.dot_dimension_numbers<[1], [0], [0], [1], [0, 0, 1, 1], [], []>} : vector<8x24xbf16>, vector<24x768xbf16>, vector<8x768xf32> -> vector<8x768xf32>
    %399 = arith.addf %398, %395 : vector<8x768xf32>
    %c0_287 = arith.constant 0 : index
    %c0_288 = arith.constant 0 : index
    %400 = vector.load %arg5[%c0_287, %c0_288] : memref<1x768xf32, #tpu.memory_space<vmem>>, vector<1x768xf32>
    %401 = vector.broadcast %400 : vector<1x768xf32> to vector<8x768xf32>
    %402 = arith.mulf %399, %401 : vector<8x768xf32>
    %c0_289 = arith.constant 0 : index
    %c49_290 = arith.constant 49 : index
    %403 = vector.load %arg20[%c0_289, %c49_290] : memref<8x912xf32, #tpu.memory_space<vmem>>, vector<8x768xf32>
    tpu.vector_store %arg20[%c0_289, %c49_290], %402 {strides = array<i32>} : memref<8x912xf32, #tpu.memory_space<vmem>>, vector<8x768xf32>,
    %c0_291 = arith.constant 0 : index
    %c0_292 = arith.constant 0 : index
    %404 = vector.load %arg20[%c0_291, %c0_292] : memref<8x912xf32, #tpu.memory_space<vmem>>, vector<8x768xf32>
    %405 = arith.truncf %404 : vector<8x768xf32> to vector<8x768xbf16>
    %c0_293 = arith.constant 0 : index
    %c0_294 = arith.constant 0 : index
    %406 = vector.load %arg21[%c0_293, %c0_294] : memref<72x768xbf16, #tpu.memory_space<vmem>>, vector<8x768xbf16>
    tpu.vector_store %arg21[%c0_293, %c0_294], %405 {strides = array<i32>} : memref<72x768xbf16, #tpu.memory_space<vmem>>, vector<8x768xbf16>,
    %c0_295 = arith.constant 0 : index
    %c1_296 = arith.constant 1 : index
    %407 = vector.load %arg20[%c0_295, %c1_296] : memref<8x912xf32, #tpu.memory_space<vmem>>, vector<8x768xf32>
    %408 = arith.truncf %407 : vector<8x768xf32> to vector<8x768xbf16>
    %c8_297 = arith.constant 8 : index
    %c0_298 = arith.constant 0 : index
    %409 = vector.load %arg21[%c8_297, %c0_298] : memref<72x768xbf16, #tpu.memory_space<vmem>>, vector<8x768xbf16>
    tpu.vector_store %arg21[%c8_297, %c0_298], %408 {strides = array<i32>} : memref<72x768xbf16, #tpu.memory_space<vmem>>, vector<8x768xbf16>,
    %c0_299 = arith.constant 0 : index
    %c2_300 = arith.constant 2 : index
    %410 = vector.load %arg20[%c0_299, %c2_300] : memref<8x912xf32, #tpu.memory_space<vmem>>, vector<8x768xf32>
    %411 = arith.truncf %410 : vector<8x768xf32> to vector<8x768xbf16>
    %c16_301 = arith.constant 16 : index
    %c0_302 = arith.constant 0 : index
    %412 = vector.load %arg21[%c16_301, %c0_302] : memref<72x768xbf16, #tpu.memory_space<vmem>>, vector<8x768xbf16>
    tpu.vector_store %arg21[%c16_301, %c0_302], %411 {strides = array<i32>} : memref<72x768xbf16, #tpu.memory_space<vmem>>, vector<8x768xbf16>,
    %c0_303 = arith.constant 0 : index
    %c48_304 = arith.constant 48 : index
    %413 = vector.load %arg20[%c0_303, %c48_304] : memref<8x912xf32, #tpu.memory_space<vmem>>, vector<8x768xf32>
    %414 = arith.truncf %413 : vector<8x768xf32> to vector<8x768xbf16>
    %c24_305 = arith.constant 24 : index
    %c0_306 = arith.constant 0 : index
    %415 = vector.load %arg21[%c24_305, %c0_306] : memref<72x768xbf16, #tpu.memory_space<vmem>>, vector<8x768xbf16>
    tpu.vector_store %arg21[%c24_305, %c0_306], %414 {strides = array<i32>} : memref<72x768xbf16, #tpu.memory_space<vmem>>, vector<8x768xbf16>,
    %c0_307 = arith.constant 0 : index
    %c49_308 = arith.constant 49 : index
    %416 = vector.load %arg20[%c0_307, %c49_308] : memref<8x912xf32, #tpu.memory_space<vmem>>, vector<8x768xf32>
    %417 = arith.truncf %416 : vector<8x768xf32> to vector<8x768xbf16>
    %c32_309 = arith.constant 32 : index
    %c0_310 = arith.constant 0 : index
    %418 = vector.load %arg21[%c32_309, %c0_310] : memref<72x768xbf16, #tpu.memory_space<vmem>>, vector<8x768xbf16>
    tpu.vector_store %arg21[%c32_309, %c0_310], %417 {strides = array<i32>} : memref<72x768xbf16, #tpu.memory_space<vmem>>, vector<8x768xbf16>,
    %c0_311 = arith.constant 0 : index
    %c50_312 = arith.constant 50 : index
    %419 = vector.load %arg20[%c0_311, %c50_312] : memref<8x912xf32, #tpu.memory_space<vmem>>, vector<8x768xf32>
    %420 = arith.truncf %419 : vector<8x768xf32> to vector<8x768xbf16>
    %c40_313 = arith.constant 40 : index
    %c0_314 = arith.constant 0 : index
    %421 = vector.load %arg21[%c40_313, %c0_314] : memref<72x768xbf16, #tpu.memory_space<vmem>>, vector<8x768xbf16>
    tpu.vector_store %arg21[%c40_313, %c0_314], %420 {strides = array<i32>} : memref<72x768xbf16, #tpu.memory_space<vmem>>, vector<8x768xbf16>,
    %c0_315 = arith.constant 0 : index
    %c96_316 = arith.constant 96 : index
    %422 = vector.load %arg20[%c0_315, %c96_316] : memref<8x912xf32, #tpu.memory_space<vmem>>, vector<8x768xf32>
    %423 = arith.truncf %422 : vector<8x768xf32> to vector<8x768xbf16>
    %c48_317 = arith.constant 48 : index
    %c0_318 = arith.constant 0 : index
    %424 = vector.load %arg21[%c48_317, %c0_318] : memref<72x768xbf16, #tpu.memory_space<vmem>>, vector<8x768xbf16>
    tpu.vector_store %arg21[%c48_317, %c0_318], %423 {strides = array<i32>} : memref<72x768xbf16, #tpu.memory_space<vmem>>, vector<8x768xbf16>,
    %c0_319 = arith.constant 0 : index
    %c97_320 = arith.constant 97 : index
    %425 = vector.load %arg20[%c0_319, %c97_320] : memref<8x912xf32, #tpu.memory_space<vmem>>, vector<8x768xf32>
    %426 = arith.truncf %425 : vector<8x768xf32> to vector<8x768xbf16>
    %c56_321 = arith.constant 56 : index
    %c0_322 = arith.constant 0 : index
    %427 = vector.load %arg21[%c56_321, %c0_322] : memref<72x768xbf16, #tpu.memory_space<vmem>>, vector<8x768xbf16>
    tpu.vector_store %arg21[%c56_321, %c0_322], %426 {strides = array<i32>} : memref<72x768xbf16, #tpu.memory_space<vmem>>, vector<8x768xbf16>,
    %c0_323 = arith.constant 0 : index
    %c98_324 = arith.constant 98 : index
    %428 = vector.load %arg20[%c0_323, %c98_324] : memref<8x912xf32, #tpu.memory_space<vmem>>, vector<8x768xf32>
    %429 = arith.truncf %428 : vector<8x768xf32> to vector<8x768xbf16>
    %c64_325 = arith.constant 64 : index
    %c0_326 = arith.constant 0 : index
    %430 = vector.load %arg21[%c64_325, %c0_326] : memref<72x768xbf16, #tpu.memory_space<vmem>>, vector<8x768xbf16>
    tpu.vector_store %arg21[%c64_325, %c0_326], %429 {strides = array<i32>} : memref<72x768xbf16, #tpu.memory_space<vmem>>, vector<8x768xbf16>,
    %c0_327 = arith.constant 0 : index
    %c0_328 = arith.constant 0 : index
    %431 = vector.load %arg14[%c0_327, %c0_328] : memref<32x72xbf16, #tpu.memory_space<vmem>>, vector<32x72xbf16>
    %c0_329 = arith.constant 0 : index
    %c0_330 = arith.constant 0 : index
    %432 = vector.load %arg21[%c0_329, %c0_330] : memref<72x768xbf16, #tpu.memory_space<vmem>>, vector<72x768xbf16>
    %cst_331 = arith.constant dense<0.000000e+00> : vector<32x768xf32>
    %433 = tpu.matmul %431, %432, %cst_331 {dimension_numbers = #tpu.dot_dimension_numbers<[1], [0], [0], [1], [0, 0, 1, 1], [], []>} : vector<32x72xbf16>, vector<72x768xbf16>, vector<32x768xf32> -> vector<32x768xf32>
    %c0_332 = arith.constant 0 : index
    %c0_333 = arith.constant 0 : index
    %434 = vector.load %arg15[%c0_332, %c0_333] : memref<32x1xf32, #tpu.memory_space<vmem>>, vector<32x1xf32>
    %435 = vector.broadcast %434 : vector<32x1xf32> to vector<32x768xf32>
    %436 = arith.addf %433, %435 : vector<32x768xf32>
    %437 = arith.truncf %436 : vector<32x768xf32> to vector<32x768xbf16>
    %c0_334 = arith.constant 0 : index
    %c0_335 = arith.constant 0 : index
    %c0_336 = arith.constant 0 : index
    %438 = vector.load %arg16[%c0_334, %c0_335, %c0_336] : memref<1x32x768xbf16, #tpu.memory_space<vmem>>, vector<1x32x768xbf16>
    %439 = vector.shape_cast %438 : vector<1x32x768xbf16> to vector<32x768xbf16>
    %440 = vector.shape_cast %437 : vector<32x768xbf16> to vector<1x32x768xbf16>
    tpu.vector_store %arg16[%c0_334, %c0_335, %c0_336], %440 {strides = array<i32>} : memref<1x32x768xbf16, #tpu.memory_space<vmem>>, vector<1x32x768xbf16>,
    return
  }
  func.func @transform_0(%arg0: i32) -> (i32, i32, i32) {
    %c0_i32 = arith.constant 0 : i32
    %c0_i32_0 = arith.constant 0 : i32
    %c0_i32_1 = arith.constant 0 : i32
    return %arg0, %c0_i32, %c0_i32_0 : i32, i32, i32
  }
  func.func @transform_1(%arg0: i32) -> (i32, i32, i32) {
    %c0_i32 = arith.constant 0 : i32
    %c0_i32_0 = arith.constant 0 : i32
    %c0_i32_1 = arith.constant 0 : i32
    return %arg0, %c0_i32, %c0_i32_0 : i32, i32, i32
  }
  func.func @transform_2(%arg0: i32) -> (i32, i32, i32) {
    %c0_i32 = arith.constant 0 : i32
    %c0_i32_0 = arith.constant 0 : i32
    %c0_i32_1 = arith.constant 0 : i32
    return %arg0, %c0_i32, %c0_i32_0 : i32, i32, i32
  }
  func.func @transform_3(%arg0: i32) -> (i32, i32, i32) {
    %c0_i32 = arith.constant 0 : i32
    %c0_i32_0 = arith.constant 0 : i32
    %c0_i32_1 = arith.constant 0 : i32
    return %arg0, %c0_i32, %c0_i32_0 : i32, i32, i32
  }
  func.func @transform_4(%arg0: i32) -> (i32, i32) {
    %c0_i32 = arith.constant 0 : i32
    %c0_i32_0 = arith.constant 0 : i32
    %c0_i32_1 = arith.constant 0 : i32
    return %c0_i32, %c0_i32_0 : i32, i32
  }
  func.func @transform_5(%arg0: i32) -> (i32, i32) {
    %c0_i32 = arith.constant 0 : i32
    %c0_i32_0 = arith.constant 0 : i32
    %c0_i32_1 = arith.constant 0 : i32
    return %c0_i32, %c0_i32_0 : i32, i32
  }
  func.func @transform_6(%arg0: i32) -> (i32, i32) {
    %c0_i32 = arith.constant 0 : i32
    %c0_i32_0 = arith.constant 0 : i32
    %c0_i32_1 = arith.constant 0 : i32
    return %c0_i32, %c0_i32_0 : i32, i32
  }
  func.func @transform_7(%arg0: i32) -> (i32, i32) {
    %c0_i32 = arith.constant 0 : i32
    %c0_i32_0 = arith.constant 0 : i32
    %c0_i32_1 = arith.constant 0 : i32
    return %c0_i32, %c0_i32_0 : i32, i32
  }
  func.func @transform_8(%arg0: i32) -> (i32, i32) {
    %c0_i32 = arith.constant 0 : i32
    %c0_i32_0 = arith.constant 0 : i32
    %c0_i32_1 = arith.constant 0 : i32
    return %c0_i32, %c0_i32_0 : i32, i32
  }
  func.func @transform_9(%arg0: i32) -> (i32, i32) {
    %c0_i32 = arith.constant 0 : i32
    %c0_i32_0 = arith.constant 0 : i32
    %c0_i32_1 = arith.constant 0 : i32
    return %c0_i32, %c0_i32_0 : i32, i32
  }
  func.func @transform_10(%arg0: i32) -> (i32, i32) {
    %c0_i32 = arith.constant 0 : i32
    %c0_i32_0 = arith.constant 0 : i32
    %c0_i32_1 = arith.constant 0 : i32
    return %c0_i32, %c0_i32_0 : i32, i32
  }
  func.func @transform_11(%arg0: i32) -> (i32, i32) {
    %c0_i32 = arith.constant 0 : i32
    %c0_i32_0 = arith.constant 0 : i32
    %c0_i32_1 = arith.constant 0 : i32
    return %c0_i32, %c0_i32_0 : i32, i32
  }
  func.func @transform_12(%arg0: i32) -> (i32, i32) {
    %c0_i32 = arith.constant 0 : i32
    %c0_i32_0 = arith.constant 0 : i32
    %c0_i32_1 = arith.constant 0 : i32
    return %c0_i32, %c0_i32_0 : i32, i32
  }
  func.func @transform_13(%arg0: i32) -> (i32, i32) {
    %c0_i32 = arith.constant 0 : i32
    %c0_i32_0 = arith.constant 0 : i32
    %c0_i32_1 = arith.constant 0 : i32
    return %c0_i32, %c0_i32_0 : i32, i32
  }
  func.func @transform_14(%arg0: i32) -> (i32, i32) {
    %c0_i32 = arith.constant 0 : i32
    %c0_i32_0 = arith.constant 0 : i32
    %c0_i32_1 = arith.constant 0 : i32
    return %c0_i32, %c0_i32_0 : i32, i32
  }
  func.func @transform_15(%arg0: i32) -> (i32, i32, i32) {
    %c0_i32 = arith.constant 0 : i32
    %c0_i32_0 = arith.constant 0 : i32
    %c0_i32_1 = arith.constant 0 : i32
    return %arg0, %c0_i32, %c0_i32_0 : i32, i32, i32
  }
}

</mosaic_0001>

<bundles_post_ra>
// kernel: up_forward.1
= control target key start
LH: loop header
LB: loop body
LE: loop exit
PB: predicated region body
PF: predicated region fallthrough
CT: control target
= control target key end

     0   :  { %s10886_s0 = inlined_call_operand.vmem [shape: f32[4,4,256], index: 0, kind: input, shape index: {}]   ;;  %s10887_s1 = inlined_call_operand.vmem [shape: f32[4,4,256], index: 1, kind: input, shape index: {}]   ;;  %s10888_s2 = inlined_call_operand.vmem [shape: f32[4,8,1], index: 2, kind: input, shape index: {}]   ;;  %s10889_s3 = inlined_call_operand.vmem [shape: f32[2,8,2], index: 3, kind: input, shape index: {}]   ;;  %s10890_s4 = inlined_call_operand.hbm [shape: f32[1,768], index: 4, kind: input, shape index: {}]   ;;  %s10891_s5 = inlined_call_operand.hbm [shape: f32[2,768], index: 5, kind: input, shape index: {}]   ;;  %s10892_s6 = inlined_call_operand.hbm [shape: bf16[8,392], index: 6, kind: input, shape index: {}]   ;;  %s10893_s7 = inlined_call_operand.hbm [shape: f32[8,1], index: 7, kind: input, shape index: {}]   ;;  %s10894_s8 = inlined_call_operand.vmem [shape: f32[8,1], index: 8, kind: input, shape index: {}]   ;;  %s10895_s9 = inlined_call_operand.vmem [shape: f32[8,1], index: 9, kind: input, shape index: {}]   ;;  %s10896_s10 = inlined_call_operand.hbm [shape: bf16[16,8], index: 10, kind: input, shape index: {}]   ;;  %s10897_s11 = inlined_call_operand.hbm [shape: f32[16,1], index: 11, kind: input, shape index: {}]   ;;  %s10898_s12 = inlined_call_operand.hbm [shape: bf16[8,24], index: 12, kind: input, shape index: {}]   ;;  %s10899_s13 = inlined_call_operand.hbm [shape: bf16[32,72], index: 13, kind: input, shape index: {}]   ;;  %s10900_s14 = inlined_call_operand.hbm [shape: f32[32,1], index: 14, kind: input, shape index: {}]   ;;  %s10901_s15 = inlined_call_operand.vmem [shape: bf16[2,32,768], index: 15, kind: output, shape index: {}]  }
   0x1   :  { %11156 = sst [smem:[#allocation47_spill]] %s10886_s0 }
   0x2   :  { %11157 = sst [smem:[#allocation48_spill]] %s10887_s1 }
   0x3   :  { %11158 = sst [smem:[#allocation49_spill]] %s10888_s2 }
   0x4   :  { %11159 = sst [smem:[#allocation50_spill]] %s10889_s3 }
   0x5   :  { %11160 = sst [smem:[#allocation51_spill]] %s10890_s4 }
   0x6   :  { %11161 = sst [smem:[#allocation52_spill]] %s10891_s5 }
   0x7   :  { %11162 = sst [smem:[#allocation53_spill]] %s10892_s6 }
   0x8   :  { %11163 = sst [smem:[#allocation54_spill]] %s10893_s7 }
   0x9   :  { %11164 = sst [smem:[#allocation55_spill]] %s10894_s8 }
   0xa   :  { %11165 = sst [smem:[#allocation56_spill]] %s10895_s9 }
   0xb   :  { %11166 = sst [smem:[#allocation57_spill]] %s10896_s10 }
   0xc   :  { %11167 = sst [smem:[#allocation58_spill]] %s10897_s11 }
   0xd   :  { %11168 = sst [smem:[#allocation59_spill]] %s10898_s12 }
   0xe   :  { %11169 = sst [smem:[#allocation60_spill]] %s10899_s13 }
   0xf   :  { %11170 = sst [smem:[#allocation61_spill]] %s10900_s14 }
  0x10   :  { %11171 = sst [smem:[#allocation62_spill]] %s10901_s15 }
  0x11   :  { %20 = vsyncpa [#allocation8], 0 }
  0x12   :  { %21 = vsyncpa [#allocation10], 0 }
  0x13   :  { %22 = vsyncpa [#allocation13], 0 }
  0x14   :  { %23 = vsyncpa [#allocation16], 0 }
  0x15   :  { %24 = vsyncpa [#allocation19], 0  ;;  %s8038_s18 = smov 0  }
  0x16 LB: > { %11172 = sst [smem:[#allocation26_spill]] %s7884_s18  ;;  %s8047_s22 = sadd.s32 4294967295, %s7884_s18   ;;  %s7884_s18 = sphi %s8038_s18, %s30_s18  }
  0x17   : > { %s11173_s5 = sld [smem:[#allocation52_spill]]  ;;  %p6396_p0 = scmp.ge.s32.totalorder %s7884_s18, 1 }
  0x18   : > { %11174 = sst [smem:[#allocation27_spill]] %s8047_s22  ;;  %p396_p1 = scmp.lt.s32.totalorder %s7884_s18, 3 }
  0x19   : > { %p7415_p2 = scmp.eq.s32.totalorder %s8047_s22, 0  ;;  %s7886_s24 = smov [#allocation9]  }
  0x1a   : > { %p8052_p3 = pnand %p6396_p0, %p396_p1  ;;  %s422_s25 = sshll.u32 %s7886_s24, 4  ;;  %s423_s25 = int_to_ptr.vmem [resolvable:$true] %s422_s25 }
  0x1b   : > { %s11176_s7 = sld [smem:[#allocation54_spill]]  ;;  %s7887_s19 = smov [#allocation12]  }
  0x1c   : > { %p7387_p4 = pneg %p8052_p3  ;;  %s11177_s11 = sld [smem:[#allocation58_spill]] }
  0x1d   : > { %s420_s21 = sshll.u32 %s11173_s5, 4  ;;  %s446_s20 = sshll.u32 %s7887_s19, 4  ;;  %s421_s21 = int_to_ptr.hbm [resolvable:$true] %s420_s21  ;;  %s447_s20 = int_to_ptr.vmem [resolvable:$true] %s446_s20 }
  0x1e   : > { %p8066_p5 = pnand %p7415_p2, %p7387_p4  ;;  %s7888_s24 = smov [#allocation15]  }
  0x1f   : > { %s477_s26 = sshll.u32 %s7888_s24, 4  ;;  %s10902_s27 = smov 128   ;;  %s478_s26 = int_to_ptr.vmem [resolvable:$true] %s477_s26 }
  0x20   : > { %7393 = dma.hbm_to_vmem [thread:$0]  (!%p8066_p5), %s421_s21, 192, %s423_s25, [#allocation10]  }
  0x21   : > { %s444_s28 = sshll.u32 %s11176_s7, 4  ;;  %s10903_s29 = smov 8   ;;  %s445_s28 = int_to_ptr.hbm [resolvable:$true] %s444_s28 }
  0x22   : > { %s475_s16 = sshll.u32 %s11177_s11, 4  ;;  %s11179_s13 = sld [smem:[#allocation60_spill]]  ;;  %s476_s16 = int_to_ptr.hbm [resolvable:$true] %s475_s16 }
  0x23   : > { %7399 = dma.hbm_to_vmem [thread:$0]  (!%p8066_p5), %s445_s28, 128, %s447_s20, [#allocation13]  }
  0x24   : > { %7405 = dma.hbm_to_vmem [thread:$0]  (!%p8066_p5), %s476_s16, 256, %s478_s26, [#allocation16], %s10902_s27, %s10902_s27, %s10903_s29  }
  0x25   : > { %s7891_s21 = smov [#allocation18]   ;;  %s11180_s4 = sld [smem:[#allocation51_spill]] }
  0x26   : > { %s503_s25 = sshll.u32 %s7891_s21, 4  ;;  %s7892_s7 = smov 64   ;;  %s504_s25 = int_to_ptr.vmem [resolvable:$true] %s503_s25 }
  0x27   : > { %s7893_s11 = smov 4   ;;  %s7894_s16 = smov [#allocation7]  }
  0x28   : > { %s501_s19 = sshll.u32 %s11179_s13, 4  ;;  %s410_s26 = sshll.u32 %s7894_s16, 4  ;;  %s502_s19 = int_to_ptr.hbm [resolvable:$true] %s501_s19  ;;  %s411_s26 = int_to_ptr.vmem [resolvable:$true] %s410_s26 }
  0x29   : > { %7411 = dma.hbm_to_vmem [thread:$0]  (!%p8066_p5), %s502_s19, 256, %s504_s25, [#allocation19], %s7892_s7, %s7892_s7, %s7893_s11  }
  0x2a   : > { %s11181_s6 = sld [smem:[#allocation53_spill]]  ;;  %s7895_s29 = smov [#allocation11]  }
  0x2b   : > { %s408_s24 = sshll.u32 %s11180_s4, 4  ;;  %s11182_s10 = sld [smem:[#allocation57_spill]]  ;;  %s409_s24 = int_to_ptr.hbm [resolvable:$true] %s408_s24 }
  0x2c   : > { %7390 = dma.hbm_to_vmem [thread:$0]  (!%p8066_p5), %s409_s24, 96, %s411_s26, [#allocation8]  }
  0x2d   : > { %s434_s4 = sshll.u32 %s7895_s29, 4  ;;  %s7896_s19 = smov [#allocation14]   ;;  %s435_s4 = int_to_ptr.vmem [resolvable:$true] %s434_s4 }
  0x2e   : > { %s463_s27 = sshll.u32 %s7896_s19, 4  ;;  %s11183_s12 = sld [smem:[#allocation59_spill]]  ;;  %s464_s27 = int_to_ptr.vmem [resolvable:$true] %s463_s27 }
  0x2f   : > { %s11184_s14 = sld [smem:[#allocation61_spill]]  ;;  %s7897_s29 = smov [#allocation17]  }
  0x30   : > { %s432_s30 = sshll.u32 %s11181_s6, 4  ;;  %s492_s28 = sshll.u32 %s7897_s29, 4  ;;  %s433_s30 = int_to_ptr.hbm [resolvable:$true] %s432_s30  ;;  %s493_s28 = int_to_ptr.vmem [resolvable:$true] %s492_s28 }
  0x31   : > { %s461_s20 = sshll.u32 %s11182_s10, 4  ;;  %s11185_s19 = smov 8   ;;  %s462_s20 = int_to_ptr.hbm [resolvable:$true] %s461_s20 }
  0x32   : > { %7396 = dma.hbm_to_vmem [thread:$0]  (!%p8066_p5), %s433_s30, 256, %s435_s4, [#allocation10]  }
  0x33   : > { %7402 = dma.hbm_to_vmem [thread:$0]  (!%p8066_p5), %s462_s20, 128, %s464_s27, [#allocation13], %s7892_s7, %s7892_s7, %s7893_s11  }
  0x34   : > { %s490_s5 = sshll.u32 %s11183_s12, 4  ;;  %s7898_s4 = smov [#allocation20]   ;;  %s491_s5 = int_to_ptr.hbm [resolvable:$true] %s490_s5 }
  0x35   : > { %s515_s21 = sshll.u32 %s11184_s14, 4  ;;  %s517_s30 = sshll.u32 %s7898_s4, 4  ;;  %s516_s21 = int_to_ptr.hbm [resolvable:$true] %s515_s21  ;;  %s518_s30 = int_to_ptr.vmem [resolvable:$true] %s517_s30 }
  0x36   : > { %7408 = dma.hbm_to_vmem [thread:$0]  (!%p8066_p5), %s491_s5, 64, %s493_s28, [#allocation16]  }
  0x37   : > { %s11186_s25 = smov 128   ;;  %569 = sbr.rel (%p8052_p3) target bundleno = 2288 (0x8f0), region = 80 }
  0x38   : > { %7414 = dma.hbm_to_vmem [thread:$0]  (!%p8066_p5), %s516_s21, 512, %s518_s30, [#allocation19], %s11186_s25, %s11186_s25, %s11185_s19  }
  0x3c   : > { %7863 = dma.done.wait (%p7415_p2), [#allocation8], 96  }
  0x3d   : > { %7865 = vsyncadd (%p7415_p2), [#allocation8], 4294967200 }
  0x3e   : > { %7867 = dma.done.wait (%p7415_p2), [#allocation10], 448  }
  0x3f   : > { %7869 = vsyncadd (%p7415_p2), [#allocation10], 4294966848 }
  0x40   : > { %7871 = dma.done.wait (%p7415_p2), [#allocation13], 256  }
  0x41   : > { %7873 = vsyncadd (%p7415_p2), [#allocation13], 4294967040 }
  0x42   : > { %7875 = dma.done.wait (%p7415_p2), [#allocation16], 320  }
  0x43   : > { %7877 = vsyncadd (%p7415_p2), [#allocation16], 4294966976 }
  0x44   : > { %7879 = dma.done.wait (%p7415_p2), [#allocation19], 768  }
  0x45   : > { %7881 = vsyncadd (%p7415_p2), [#allocation19], 4294966528  ;;  %s6417_s7 = sshll.u32 %s8047_s22, 1  ;;  %vm10904_vm0 = vcmask 654336   ;;  %v11008_v0 = vmov 0   ;;  %v7900_v1 = vmov 0.0  }
  0x46   : > { %7513 = vset.pattern.permute.xlu0 %v11008_v0  ;;  %p675_p6 = scmp.lt.s32.totalorder %s6417_s7, 3  ;;  %713 = vst.msk [vmem:[#allocation2 + $0x40] sm:$0xff] %vm10904_vm0, %v7900_v1  ;;  %7514 = vset.pattern.permute.xlu1 %v11008_v0  ;;  %s11187_s2 = sld [smem:[#allocation49_spill]]  ;;  %v7907_v8 = vmov 839922192   ;;  %vm753_vm1 = vcmask 281752  }
  0x47   : > { %704 = vst [vmem:[#allocation2] sm:$0xff] %v7900_v1  ;;  %7515 = vset.pattern.permute.xlu2 %v11008_v0  ;;  %s10985_s27 = smov 91   ;;  %s10991_s16 = smov 93   ;;  %v730_v9 = vunpack.c.l.s4 %v7907_v8  ;;  %vm762_vm2 = vcmask 285852   ;;  %vm786_vm3 = vcmask 19456   ;;  %vm769_vm4 = vcmask 675352  }
  0x48   : > { %s11485_s7 = smov (!%p675_p6, %s6417_s7), 3  ;;  %705 = vst [vmem:[#allocation2 + $0x8] sm:$0xff] %v7900_v1  ;;  %s10907_s5 = smov 90   ;;  %vm796_vm5 = vcmask 23556   ;;  %vm784_vm6 = vcmask 1044376   ;;  %vm777_vm7 = vcmask 679452  }
  0x49   : > { %706 = vst [vmem:[#allocation2 + $0x10] sm:$0xff] %v7900_v1  ;;  %s8143_s11 = sshll.u32 %s11485_s7, 3  ;;  %s10917_s24 = smov 95   ;;  %v8168_v10 = vunpack.c.0.s8 %v730_v9  ;;  %vm794_vm8 = vcmask 1048476   ;;  %vm803_vm9 = vcmask 412952   ;;  %vm818_vm10 = vcmask 806552  }
  0x4a   : > { %707 = vst [vmem:[#allocation2 + $0x18] sm:$0xff] %v7900_v1  ;;  %s10987_s26 = smov 92   ;;  %s10983_s21 = smov 94   ;;  %vm811_vm11 = vcmask 417052   ;;  %vm826_vm12 = vcmask 810652   ;;  %vm833_vm13 = vcmask 150552  }
  0x4b   : > { %708 = vst [vmem:[#allocation2 + $0x20] sm:$0xff] %v7900_v1  ;;  %s11188_s0 = sld [smem:[#allocation47_spill]]  ;;  %s10915_s30 = smov 96   ;;  %vm10905_vm14 = vcmask 544152   ;;  %vm10906_vm15 = vcmask 154652   ;;  %vm856_vm0 = vcmask 548252  }
  0x4c   : > { %s692_s20 = scalar_lea.vmem %s11187_s2, %s8143_s11  ;;  %709 = vst [vmem:[#allocation2 + $0x28] sm:$0xff] %v7900_v1  ;;  %s11189_s1 = sld [smem:[#allocation48_spill]] }
  0x4d   : > { %v724_v2 = vld [vmem:[%s692_s20] sm:$0xf]  ;;  %v3097_v3 = vld [vmem:[#allocation2 + $0x40] sm:$0xff]  ;;  %710 = vst [vmem:[#allocation2 + $0x30] sm:$0xff] %v7900_v1  ;;  %v736_v6 = vld [vmem:[%s692_s20 + $0x4] sm:$0xf] }
  0x4e   : > { %727 = vperm.xlu0 %7513, %v724_v2   ;;  %v6428_v4 = vld [vmem:[%s692_s20 + $0x8] sm:$0xf]  ;;  %v3101_v5 = vpack.c.bf16 %v3097_v3, %v3097_v3  ;;  %711 = vst [vmem:[#allocation2 + $0x38] sm:$0xff] %v7900_v1  ;;  %v6430_v7 = vld [vmem:[%s692_s20 + $0xc] sm:$0xf]  ;;  %s7909_s23 = smov 19  }
  0x4f   : > { %985 = vperm.xlu1 %7514, %v6428_v4   ;;  %714 = vst [vmem:[#allocation5] sm:$0xff] %v7900_v1  ;;  %s7911_s17 = smov 83   ;;  %s7912_s20 = smov 115  }
  0x50   : > { %3112 = vrot.lane.b32.xlu2 %v3101_v5, %s10985_s27  ;;  %720 = vst [vmem:[#allocation5 + $0x30] sm:$0xff] %v7900_v1  ;;  %s7913_s29 = smov 43   ;;  %s10979_s28 = smov 75  }
  0x51   : > { %s8166_s4 = scalar_lea.vmem %s11188_s0, %s8143_s11  ;;  %s11003_s19 = smov 11  }
  0x52   : > { %v723_v12 = vld [vmem:[%s8166_s4] sm:$0xff]  ;;  %s8180_s7 = scalar_lea.vmem %s11189_s1, %s8143_s11  ;;  %s7910_s11 = smov 51  }
  0x53   : > { %v735_v15 = vld [vmem:[%s8180_s7] sm:$0xff]  ;;  %s10975_s25 = smov 31   ;;  %s11216_s0 = smov 28  }
  0x54   : > { %s11217_s1 = smov 14   ;;  %s11218_s2 = smov 27  }
  0x55   : > { %s11219_s6 = smov 12   ;;  %s11220_s10 = smov 62  }
  0x56   : > { %739 = vperm.xlu0 %7513, %v736_v6   ;;  %s11221_s12 = smov 30   ;;  %s11222_s13 = smov 58  }
  0x57   : > { %998 = vperm.xlu1 %7514, %v6430_v7   ;;  %s11223_s14 = smov 59   ;;  %s11224_s18 = smov 11  }
  0x58   : > { %3032 = vrot.lane.b32.xlu2 %v3101_v5, %s10991_s16  ;;  %s11225_s15 = smov 61   ;;  %s11226_s3 = smov 64  }
  0x59   : > { %s11227_s22 = smov 15   ;;  %s11228_s8 = smov 63  }
  0x5a   : > { %s11229_s9 = smov 108  }
  0x5e   : > { %3152 = vrot.lane.b32.xlu0 %v3101_v5, %s10907_s5  ;;  %s10913_s5 = smov 79  }
  0x5f   : > { %3072 = vrot.lane.b32.xlu1 %v3101_v5, %s10987_s26 }
  0x60   : > { %2952 = vrot.lane.b32.xlu2 %v3101_v5, %s10917_s24  ;;  %s10927_s24 = smov 123  }
  0x67   : > { %2992 = vrot.lane.b32.xlu1 %v3101_v5, %s10983_s21 }
  0x6f   : > { %2912 = vrot.lane.b32.xlu1 %v3101_v5, %s10915_s30  ;;  %s10923_s30 = smov 126  }
  0xaa   : > { %v8202_v27 = vpop.permute.xlu2 %3112 }
  0xab   : > { %11190 = vst [vmem:[#allocation28_spill] sm:$0xff] %v8202_v27 }
  0xb2   : > { %v8206_v29 = vpop.permute.xlu2 %3032 }
  0xb3   : > { %11191 = vst [vmem:[#allocation29_spill] sm:$0xff] %v8206_v29 }
  0xba   : > { %v8212_v32 = vpop.permute.xlu2 %2952 }
  0xbb   : > { %11192 = vst [vmem:[#allocation30_spill] sm:$0xff] %v8212_v32 }
  0xc0   : > { %v728_v11 = vpop.permute.xlu0 %727 }
  0xc1   : > { %v732_v13 = vperm.slane %v728_v11, %v8168_v10  ;;  %v8216_v34 = vpop.permute.xlu1 %985 }
  0xc3   : > { %v8173_v14 = vadd.f32 %v732_v13, %v723_v12 }
  0xc5   : > { %748 = vst [vmem:[#allocation1] ss:$2 sm:$0xff] %v8173_v14 }
  0xc8   : > { %v740_v16 = vpop.permute.xlu0 %739 }
  0xc9   : > { %v744_v17 = vperm.slane %v740_v16, %v8168_v10  ;;  %v8221_v37 = vpop.permute.xlu1 %998  ;;  %v990_v16 = vperm.slane %v8216_v34, %v8168_v10 }
  0xcb   : > { %v8184_v18 = vadd.f32 %v744_v17, %v735_v15  ;;  %v6427_v17 = vld [vmem:[%s8166_s4 + $0x8] sm:$0xff]  ;;  %s10997_s4 = smov 107  }
  0xcc   : > { %v749_v19 = vld.sshfl [vmem:[#allocation1] sm:$0xff pattern:$0x75316420] }
  0xcd   : > { %757 = vst [vmem:[#allocation1 + $0x1] ss:$2 sm:$0xff] %v8184_v18  ;;  %750 = vrot.lane.b32.xlu2 %v749_v19, %s7909_s23  ;;  %v8288_v19 = vadd.f32 %v6427_v17, %v990_v16 }
  0xd0   : > { %v8229_v41 = vpop.permute.xlu0 %3152 }
  0xd1   : > { %v8225_v39 = vpop.permute.xlu1 %3072  ;;  %11194 = vst [vmem:[#allocation32_spill] sm:$0xff] %v8229_v41 }
  0xd2   : > { %11193 = vst [vmem:[#allocation31_spill] sm:$0xff] %v8225_v39 }
  0xd4   : > { %v758_v20 = vld.sshfl [vmem:[#allocation1] sm:$0xff pattern:$0x75316420] }
  0xd5   : > { %764 = vst [vmem:[#allocation1] ss:$2 sm:$0xff] %v8173_v14  ;;  %759 = vrot.lane.b32.xlu0 %v758_v20, %s7909_s23 }
  0xd9   : > { %v8231_v42 = vpop.permute.xlu1 %2992 }
  0xda   : > { %11195 = vst [vmem:[#allocation33_spill] sm:$0xff] %v8231_v42 }
  0xdc   : > { %v765_v21 = vld.sshfl [vmem:[#allocation1] sm:$0xff pattern:$0x75316420] }
  0xdd   : > { %772 = vst [vmem:[#allocation1 + $0x1] ss:$2 sm:$0xff] %v8184_v18  ;;  %766 = vrot.lane.b32.xlu0 %v765_v21, %s7910_s11  ;;  %v1003_v21 = vperm.slane %v8221_v37, %v8168_v10 }
  0xe1   : > { %v8239_v47 = vpop.permute.xlu1 %2912 }
  0xe2   : > { %11196 = vst [vmem:[#allocation34_spill] sm:$0xff] %v8239_v47 }
  0xe4   : > { %v773_v22 = vld.sshfl [vmem:[#allocation1] sm:$0xff pattern:$0x75316420] }
  0xe5   : > { %779 = vst [vmem:[#allocation1] ss:$2 sm:$0xff] %v8173_v14  ;;  %774 = vrot.lane.b32.xlu1 %v773_v22, %s7910_s11 }
  0xec   : > { %v780_v23 = vld.sshfl [vmem:[#allocation1] sm:$0xff pattern:$0x75316420] }
  0xed   : > { %789 = vst [vmem:[#allocation1 + $0x1] ss:$2 sm:$0xff] %v8184_v18  ;;  %781 = vrot.lane.b32.xlu2 %v780_v23, %s7911_s17  ;;  %v6429_v23 = vld [vmem:[%s8180_s7 + $0x8] sm:$0xff]  ;;  %s10925_s7 = smov 74  }
  0xf4   : > { %v790_v24 = vld.sshfl [vmem:[#allocation1] sm:$0xff pattern:$0x75316420] }
  0xf5   : > { %798 = vst [vmem:[#allocation1] ss:$2 sm:$0xff] %v8173_v14  ;;  %791 = vrot.lane.b32.xlu2 %v790_v24, %s7911_s17  ;;  %v8297_v24 = vadd.f32 %v6429_v23, %v1003_v21 }
  0xfc   : > { %v799_v25 = vld.sshfl [vmem:[#allocation1] sm:$0xff pattern:$0x75316420] }
  0xfd   : > { %806 = vst [vmem:[#allocation1 + $0x1] ss:$2 sm:$0xff] %v8184_v18  ;;  %800 = vrot.lane.b32.xlu0 %v799_v25, %s7912_s20 }
 0x104   : > { %v807_v26 = vld.sshfl [vmem:[#allocation1] sm:$0xff pattern:$0x75316420] }
 0x105   : > { %813 = vst [vmem:[#allocation1] ss:$2 sm:$0xff] %v8173_v14  ;;  %808 = vrot.lane.b32.xlu1 %v807_v26, %s7912_s20 }
 0x10c   : > { %v814_v28 = vld.sshfl [vmem:[#allocation1] sm:$0xff pattern:$0x75316420] }
 0x10d   : > { %821 = vst [vmem:[#allocation1 + $0x1] ss:$2 sm:$0xff] %v8184_v18  ;;  %815 = vrot.lane.b32.xlu2 %v814_v28, %s7909_s23 }
 0x114   : > { %v822_v30 = vld.sshfl [vmem:[#allocation1] sm:$0xff pattern:$0x75316420] }
 0x115   : > { %828 = vst [vmem:[#allocation1] ss:$2 sm:$0xff] %v8173_v14  ;;  %823 = vrot.lane.b32.xlu0 %v822_v30, %s7909_s23 }
 0x11c   : > { %v829_v31 = vld.sshfl [vmem:[#allocation1] sm:$0xff pattern:$0x75316420] }
 0x11d   : > { %836 = vst [vmem:[#allocation1 + $0x1] ss:$2 sm:$0xff] %v8184_v18  ;;  %830 = vrot.lane.b32.xlu0 %v829_v31, %s7910_s11 }
 0x124   : > { %v837_v33 = vld.sshfl [vmem:[#allocation1] sm:$0xff pattern:$0x75316420] }
 0x125   : > { %843 = vst [vmem:[#allocation1] ss:$2 sm:$0xff] %v8173_v14  ;;  %838 = vrot.lane.b32.xlu1 %v837_v33, %s7910_s11 }
 0x127   : > { %v751_v35 = vpop.permute.xlu2 %750 }
 0x128   : > { %754 = vst.msk [vmem:[#allocation2 + $0x8] sm:$0xf] %vm753_vm1, %v751_v35 }
 0x12c   : > { %v844_v36 = vld.sshfl [vmem:[#allocation1] sm:$0xff pattern:$0x75316420] }
 0x12d   : > { %851 = vst [vmem:[#allocation1 + $0x1] ss:$2 sm:$0xff] %v8184_v18  ;;  %845 = vrot.lane.b32.xlu2 %v844_v36, %s7911_s17 }
 0x134   : > { %v852_v38 = vld.sshfl [vmem:[#allocation1] sm:$0xff pattern:$0x75316420] }
 0x135   : > { %858 = vst [vmem:[#allocation1] ss:$2 sm:$0xff] %v8173_v14  ;;  %853 = vrot.lane.b32.xlu0 %v852_v38, %s7911_s17 }
 0x13c   : > { %v859_v40 = vld.sshfl [vmem:[#allocation1] sm:$0xff pattern:$0x75316420] }
 0x13d   : > { %866 = vst [vmem:[#allocation1 + $0x1] ss:$2 sm:$0xff] %v8184_v18  ;;  %860 = vrot.lane.b32.xlu1 %v859_v40, %s7912_s20 }
 0x144   : > { %v867_v43 = vld.sshfl [vmem:[#allocation1] sm:$0xff pattern:$0x75316420] }
 0x145   : > { %873 = vst [vmem:[#allocation1] ss:$2 sm:$0xff] %v8173_v14  ;;  %868 = vrot.lane.b32.xlu2 %v867_v43, %s7912_s20 }
 0x147   : > { %v760_v44 = vpop.permute.xlu0 %759  ;;  %v782_v45 = vpop.permute.xlu2 %781 }
 0x148   : > { %763 = vst.msk [vmem:[#allocation2 + $0x8] sm:$0xf0] %vm762_vm2, %v760_v44 }
 0x149   : > { %787 = vst.msk [vmem:[#allocation2 + $0x10] sm:$0xf] %vm786_vm3, %v782_v45 }
 0x14c   : > { %v874_v46 = vld.sshfl [vmem:[#allocation1 + $0x8] sm:$0xff pattern:$0x75316420] }
 0x14d   : > { %880 = vst [vmem:[#allocation1 + $0x1] ss:$2 sm:$0xff] %v8184_v18  ;;  %875 = vrot.lane.b32.xlu2 %v874_v46, %s7909_s23 }
 0x14f   : > { %v767_v48 = vpop.permute.xlu0 %766  ;;  %v792_v49 = vpop.permute.xlu2 %791 }
 0x150   : > { %770 = vst.msk [vmem:[#allocation2 + $0x8] sm:$0xf] %vm769_vm4, %v767_v48 }
 0x151   : > { %797 = vst.msk [vmem:[#allocation2 + $0x10] sm:$0xf0] %vm796_vm5, %v792_v49 }
 0x152   : > { %785 = vst.msk [vmem:[#allocation2 + $0x8] sm:$0xf] %vm784_vm6, %v782_v45 }
 0x154   : > { %v881_v50 = vld.sshfl [vmem:[#allocation1 + $0x8] sm:$0xff pattern:$0x75316420] }
 0x155   : > { %886 = vst [vmem:[#allocation1] ss:$2 sm:$0xff] %v8173_v14  ;;  %882 = vrot.lane.b32.xlu0 %v881_v50, %s7909_s23 }
 0x157   : > { %v775_v51 = vpop.permute.xlu1 %774 }
 0x158   : > { %778 = vst.msk [vmem:[#allocation2 + $0x8] sm:$0xf0] %vm777_vm7, %v775_v51 }
 0x159   : > { %795 = vst.msk [vmem:[#allocation2 + $0x8] sm:$0xf0] %vm794_vm8, %v792_v49 }
 0x15c   : > { %v887_v52 = vld.sshfl [vmem:[#allocation1 + $0x8] sm:$0xff pattern:$0x75316420] }
 0x15d   : > { %893 = vst [vmem:[#allocation1 + $0x1] ss:$2 sm:$0xff] %v8184_v18  ;;  %888 = vrot.lane.b32.xlu1 %v887_v52, %s7910_s11 }
 0x164   : > { %v894_v53 = vld.sshfl [vmem:[#allocation1 + $0x8] sm:$0xff pattern:$0x75316420] }
 0x165   : > { %899 = vst [vmem:[#allocation1] ss:$2 sm:$0xff] %v8173_v14  ;;  %895 = vrot.lane.b32.xlu2 %v894_v53, %s7910_s11 }
 0x167   : > { %v816_v56 = vpop.permute.xlu2 %815 }
 0x16c   : > { %v900_v54 = vld.sshfl [vmem:[#allocation1 + $0x8] sm:$0xff pattern:$0x75316420] }
 0x16d   : > { %907 = vst [vmem:[#allocation1 + $0x1] ss:$2 sm:$0xff] %v8184_v18  ;;  %901 = vrot.lane.b32.xlu1 %v900_v54, %s7911_s17 }
 0x16f   : > { %v801_v55 = vpop.permute.xlu0 %800 }
 0x170   : > { %804 = vst.msk [vmem:[#allocation2 + $0x10] sm:$0xf] %vm803_vm9, %v801_v55 }
 0x171   : > { %819 = vst.msk [vmem:[#allocation2 + $0x10] sm:$0xf] %vm818_vm10, %v816_v56 }
 0x174   : > { %v908_v57 = vld.sshfl [vmem:[#allocation1 + $0x8] sm:$0xff pattern:$0x75316420] }
 0x175   : > { %914 = vst [vmem:[#allocation1] ss:$2 sm:$0xff] %v8173_v14  ;;  %909 = vrot.lane.b32.xlu2 %v908_v57, %s7911_s17 }
 0x177   : > { %v809_v58 = vpop.permute.xlu1 %808 }
 0x178   : > { %812 = vst.msk [vmem:[#allocation2 + $0x10] sm:$0xf0] %vm811_vm11, %v809_v58 }
 0x17c   : > { %v915_v59 = vld.sshfl [vmem:[#allocation1 + $0x8] sm:$0xff pattern:$0x75316420] }
 0x17d   : > { %921 = vst [vmem:[#allocation1 + $0x1] ss:$2 sm:$0xff] %v8184_v18  ;;  %916 = vrot.lane.b32.xlu0 %v915_v59, %s7912_s20 }
 0x184   : > { %v922_v60 = vld.sshfl [vmem:[#allocation1 + $0x8] sm:$0xff pattern:$0x75316420] }
 0x185   : > { %927 = vst [vmem:[#allocation1] ss:$2 sm:$0xff] %v8173_v14  ;;  %923 = vrot.lane.b32.xlu1 %v922_v60, %s7912_s20 }
 0x187   : > { %v824_v61 = vpop.permute.xlu0 %823  ;;  %v846_v2 = vpop.permute.xlu2 %845 }
 0x188   : > { %827 = vst.msk [vmem:[#allocation2 + $0x10] sm:$0xf0] %vm826_vm12, %v824_v61 }
 0x18c   : > { %v928_v62 = vld.sshfl [vmem:[#allocation1 + $0x8] sm:$0xff pattern:$0x75316420] }
 0x18d   : > { %934 = vst [vmem:[#allocation1 + $0x1] ss:$2 sm:$0xff] %v8184_v18  ;;  %929 = vrot.lane.b32.xlu0 %v928_v62, %s7909_s23 }
 0x18f   : > { %v831_v63 = vpop.permute.xlu0 %830 }
 0x190   : > { %834 = vst.msk [vmem:[#allocation2 + $0x18] sm:$0xf] %vm833_vm13, %v831_v63 }
 0x191   : > { %849 = vst.msk [vmem:[#allocation2 + $0x18] sm:$0xf] %vm10905_vm14, %v846_v2  ;;  %vm871_vm14 = vcmask 941852  }
 0x194   : > { %v935_v3 = vld.sshfl [vmem:[#allocation1 + $0x8] sm:$0xff pattern:$0x75316420] }
 0x195   : > { %936 = vrot.lane.b32.xlu1 %v935_v3, %s7909_s23  ;;  %940 = vst [vmem:[#allocation1] ss:$2 sm:$0xff] %v8173_v14  ;;  %s10981_s23 = smov 32  }
 0x197   : > { %v839_v4 = vpop.permute.xlu1 %838 }
 0x198   : > { %842 = vst.msk [vmem:[#allocation2 + $0x18] sm:$0xf0] %vm10906_vm15, %v839_v4  ;;  %vm863_vm15 = vcmask 937752  }
 0x19c   : > { %v941_v5 = vld.sshfl [vmem:[#allocation1 + $0x8] sm:$0xff pattern:$0x75316420] }
 0x19d   : > { %942 = vrot.lane.b32.xlu2 %v941_v5, %s7910_s11  ;;  %947 = vst [vmem:[#allocation1 + $0x1] ss:$2 sm:$0xff] %v8184_v18 }
 0x19f   : > { %v869_v6 = vpop.permute.xlu2 %868 }
 0x1a4   : > { %v948_v7 = vld.sshfl [vmem:[#allocation1 + $0x8] sm:$0xff pattern:$0x75316420] }
 0x1a5   : > { %949 = vrot.lane.b32.xlu0 %v948_v7, %s7910_s11  ;;  %953 = vst [vmem:[#allocation1] ss:$2 sm:$0xff] %v8173_v14  ;;  %s10909_s11 = smov 77  }
 0x1a7   : > { %v854_v8 = vpop.permute.xlu0 %853  ;;  %v876_v9 = vpop.permute.xlu2 %875 }
 0x1a8   : > { %857 = vst.msk [vmem:[#allocation2 + $0x18] sm:$0xf0] %vm856_vm0, %v854_v8 }
 0x1a9   : > { %878 = vst.msk [vmem:[#allocation2 + $0x20] sm:$0xf] %vm753_vm1, %v876_v9  ;;  %vm11197_vm1 = vcmask 154652  }
 0x1aa   : > { %872 = vst.msk [vmem:[#allocation2 + $0x18] sm:$0xf0] %vm871_vm14, %v869_v6 }
 0x1ac   : > { %v954_v11 = vld.sshfl [vmem:[#allocation1 + $0x8] sm:$0xff pattern:$0x75316420] }
 0x1ad   : > { %955 = vrot.lane.b32.xlu1 %v954_v11, %s7911_s17  ;;  %960 = vst [vmem:[#allocation1 + $0x1] ss:$2 sm:$0xff] %v8184_v18 }
 0x1af   : > { %v861_v12 = vpop.permute.xlu1 %860 }
 0x1b0   : > { %864 = vst.msk [vmem:[#allocation2 + $0x18] sm:$0xf] %vm863_vm15, %v861_v12 }
 0x1b4   : > { %v961_v13 = vld.sshfl [vmem:[#allocation1 + $0x8] sm:$0xff pattern:$0x75316420] }
 0x1b5   : > { %962 = vrot.lane.b32.xlu2 %v961_v13, %s7911_s17  ;;  %966 = vst [vmem:[#allocation1] ss:$2 sm:$0xff] %v8173_v14  ;;  %s10973_s17 = smov 76  }
 0x1bc   : > { %v967_v15 = vld.sshfl [vmem:[#allocation1 + $0x8] sm:$0xff pattern:$0x75316420] }
 0x1bd   : > { %968 = vrot.lane.b32.xlu0 %v967_v15, %s7912_s20  ;;  %973 = vst [vmem:[#allocation1 + $0x1] ss:$2 sm:$0xff] %v8184_v18 }
 0x1bf   : > { %v896_v14 = vpop.permute.xlu2 %895 }
 0x1c4   : > { %v974_v20 = vld.sshfl [vmem:[#allocation1 + $0x8] sm:$0xff pattern:$0x75316420] }
 0x1c5   : > { %975 = vrot.lane.b32.xlu1 %v974_v20, %s7912_s20  ;;  %1007 = vst [vmem:[#allocation1] ss:$2 sm:$0xff] %v8288_v19  ;;  %s10911_s20 = smov 78  }
 0x1c7   : > { %v883_v22 = vpop.permute.xlu0 %882 }
 0x1c8   : > { %885 = vst.msk [vmem:[#allocation2 + $0x20] sm:$0xf0] %vm762_vm2, %v883_v22  ;;  %vm11198_vm2 = vcmask 544152  }
 0x1c9   : > { %898 = vst.msk [vmem:[#allocation2 + $0x20] sm:$0xf0] %vm777_vm7, %v896_v14  ;;  %vm1043_vm7 = vcmask 216152  }
 0x1cc   : > { %v1008_v18 = vld.sshfl [vmem:[#allocation1] sm:$0xff pattern:$0x75316420] }
 0x1cd   : > { %1009 = vrot.lane.b32.xlu1 %v1008_v18, %s7913_s29  ;;  %1016 = vst [vmem:[#allocation1 + $0x1] ss:$2 sm:$0xff] %v8297_v24 }
 0x1cf   : > { %v910_v25 = vpop.permute.xlu2 %909  ;;  %v889_v26 = vpop.permute.xlu1 %888 }
 0x1d0   : > { %912 = vst.msk [vmem:[#allocation2 + $0x20] sm:$0xf0] %vm794_vm8, %v910_v25  ;;  %vm1058_vm8 = vcmask 609752  }
 0x1d1   : > { %913 = vst.msk [vmem:[#allocation2 + $0x28] sm:$0xf0] %vm796_vm5, %v910_v25  ;;  %vm1051_vm5 = vcmask 220252  }
 0x1d2   : > { %891 = vst.msk [vmem:[#allocation2 + $0x20] sm:$0xf] %vm769_vm4, %v889_v26  ;;  %vm1028_vm4 = vcmask 872152  }
 0x1d4   : > { %v1017_v10 = vld.sshfl [vmem:[#allocation1] sm:$0xff pattern:$0x75316420] }
 0x1d5   : > { %1018 = vrot.lane.b32.xlu2 %v1017_v10, %s7913_s29  ;;  %1023 = vst [vmem:[#allocation1] ss:$2 sm:$0xff] %v8288_v19 }
 0x1dc   : > { %v1024_v28 = vld.sshfl [vmem:[#allocation1] sm:$0xff pattern:$0x75316420] }
 0x1dd   : > { %1025 = vrot.lane.b32.xlu0 %v1024_v28, %s10979_s28  ;;  %1031 = vst [vmem:[#allocation1 + $0x1] ss:$2 sm:$0xff] %v8297_v24 }
 0x1df   : > { %v902_v30 = vpop.permute.xlu1 %901 }
 0x1e0   : > { %904 = vst.msk [vmem:[#allocation2 + $0x20] sm:$0xf] %vm784_vm6, %v902_v30  ;;  %vm1036_vm6 = vcmask 876252  }
 0x1e1   : > { %905 = vst.msk [vmem:[#allocation2 + $0x28] sm:$0xf] %vm786_vm3, %v902_v30  ;;  %vm1021_vm3 = vcmask 482652  }
 0x1e4   : > { %v1032_v31 = vld.sshfl [vmem:[#allocation1] sm:$0xff pattern:$0x75316420] }
 0x1e5   : > { %1033 = vrot.lane.b32.xlu1 %v1032_v31, %s10979_s28  ;;  %1038 = vst [vmem:[#allocation1] ss:$2 sm:$0xff] %v8288_v19 }
 0x1ec   : > { %v1039_v33 = vld.sshfl [vmem:[#allocation1] sm:$0xff pattern:$0x75316420] }
 0x1ed   : > { %1040 = vrot.lane.b32.xlu1 %v1039_v33, %s10997_s4  ;;  %1046 = vst [vmem:[#allocation1 + $0x1] ss:$2 sm:$0xff] %v8297_v24 }
 0x1ef   : > { %v917_v34 = vpop.permute.xlu0 %916 }
 0x1f0   : > { %919 = vst.msk [vmem:[#allocation2 + $0x28] sm:$0xf] %vm803_vm9, %v917_v34  ;;  %vm1066_vm9 = vcmask 613852  }
 0x1f4   : > { %v1047_v35 = vld.sshfl [vmem:[#allocation1] sm:$0xff pattern:$0x75316420] }
 0x1f5   : > { %1048 = vrot.lane.b32.xlu2 %v1047_v35, %s10997_s4  ;;  %1053 = vst [vmem:[#allocation1] ss:$2 sm:$0xff] %v8288_v19 }
 0x1f7   : > { %v943_v36 = vpop.permute.xlu2 %942  ;;  %v924_v37 = vpop.permute.xlu1 %923 }
 0x1f8   : > { %945 = vst.msk [vmem:[#allocation2 + $0x30] sm:$0xf] %vm833_vm13, %v943_v36  ;;  %vm10945_vm13 = vcmask 84992  }
 0x1f9   : > { %926 = vst.msk [vmem:[#allocation2 + $0x28] sm:$0xf0] %vm811_vm11, %v924_v37  ;;  %vm1073_vm11 = vcmask 1003352  }
 0x1fc   : > { %v1054_v38 = vld.sshfl [vmem:[#allocation1] sm:$0xff pattern:$0x75316420] }
 0x1fd   : > { %1055 = vrot.lane.b32.xlu2 %v1054_v38, %s11003_s19  ;;  %1061 = vst [vmem:[#allocation1 + $0x1] ss:$2 sm:$0xff] %v8297_v24 }
 0x1ff   : > { %v930_v40 = vpop.permute.xlu0 %929 }
 0x200   : > { %932 = vst.msk [vmem:[#allocation2 + $0x28] sm:$0xf] %vm818_vm10, %v930_v40  ;;  %vm1081_vm10 = vcmask 1007452  }
 0x204   : > { %v1062_v43 = vld.sshfl [vmem:[#allocation1] sm:$0xff pattern:$0x75316420] }
 0x205   : > { %1063 = vrot.lane.b32.xlu0 %v1062_v43, %s11003_s19  ;;  %1068 = vst [vmem:[#allocation1] ss:$2 sm:$0xff] %v8288_v19 }
 0x207   : > { %v937_v44 = vpop.permute.xlu1 %936 }
 0x208   : > { %939 = vst.msk [vmem:[#allocation2 + $0x28] sm:$0xf0] %vm826_vm12, %v937_v44  ;;  %vm1088_vm12 = vcmask 347352  }
 0x20c   : > { %v1069_v45 = vld.sshfl [vmem:[#allocation1] sm:$0xff pattern:$0x75316420] }
 0x20d   : > { %1070 = vrot.lane.b32.xlu1 %v1069_v45, %s7913_s29  ;;  %1076 = vst [vmem:[#allocation1 + $0x1] ss:$2 sm:$0xff] %v8297_v24 }
 0x20f   : > { %v963_v49 = vpop.permute.xlu2 %962 }
 0x214   : > { %v1077_v46 = vld.sshfl [vmem:[#allocation1] sm:$0xff pattern:$0x75316420] }
 0x215   : > { %1078 = vrot.lane.b32.xlu2 %v1077_v46, %s7913_s29  ;;  %1083 = vst [vmem:[#allocation1] ss:$2 sm:$0xff] %v8288_v19 }
 0x217   : > { %v950_v48 = vpop.permute.xlu0 %949 }
 0x218   : > { %952 = vst.msk [vmem:[#allocation2 + $0x30] sm:$0xf0] %vm11197_vm1, %v950_v48  ;;  %vm1103_vm1 = vcmask 740952  }
 0x219   : > { %965 = vst.msk [vmem:[#allocation2 + $0x30] sm:$0xf0] %vm856_vm0, %v963_v49  ;;  %vm1012_vm0 = vcmask 478552  }
 0x21c   : > { %v1084_v50 = vld.sshfl [vmem:[#allocation1] sm:$0xff pattern:$0x75316420] }
 0x21d   : > { %1085 = vrot.lane.b32.xlu0 %v1084_v50, %s10979_s28  ;;  %1091 = vst [vmem:[#allocation1 + $0x1] ss:$2 sm:$0xff] %v8297_v24 }
 0x21f   : > { %v956_v51 = vpop.permute.xlu1 %955 }
 0x220   : > { %958 = vst.msk [vmem:[#allocation2 + $0x30] sm:$0xf] %vm11198_vm2, %v956_v51  ;;  %vm10946_vm2 = vcmask 1044440  }
 0x224   : > { %v1092_v52 = vld.sshfl [vmem:[#allocation1] sm:$0xff pattern:$0x75316420] }
 0x225   : > { %1093 = vrot.lane.b32.xlu1 %v1092_v52, %s10979_s28  ;;  %1098 = vst [vmem:[#allocation1] ss:$2 sm:$0xff] %v8288_v19 }
 0x22c   : > { %v1099_v53 = vld.sshfl [vmem:[#allocation1] sm:$0xff pattern:$0x75316420] }
 0x22d   : > { %1100 = vrot.lane.b32.xlu1 %v1099_v53, %s10997_s4  ;;  %1106 = vst [vmem:[#allocation1 + $0x1] ss:$2 sm:$0xff] %v8297_v24 }
 0x22f   : > { %v969_v54 = vpop.permute.xlu0 %968  ;;  %v1019_v55 = vpop.permute.xlu2 %1018 }
 0x230   : > { %971 = vst.msk [vmem:[#allocation2 + $0x30] sm:$0xf] %vm863_vm15, %v969_v54  ;;  %vm1111_vm15 = vcmask 745052  }
 0x231   : > { %1022 = vst.msk [vmem:[#allocation2 + $0x8] sm:$0xf0] %vm1021_vm3, %v1019_v55 }
 0x234   : > { %v1107_v56 = vld.sshfl [vmem:[#allocation1] sm:$0xff pattern:$0x75316420] }
 0x235   : > { %1108 = vrot.lane.b32.xlu2 %v1107_v56, %s10997_s4  ;;  %1113 = vst [vmem:[#allocation1] ss:$2 sm:$0xff] %v8288_v19 }
 0x237   : > { %v976_v57 = vpop.permute.xlu1 %975 }
 0x238   : > { %978 = vst.msk [vmem:[#allocation2 + $0x30] sm:$0xf0] %vm871_vm14, %v976_v57  ;;  %vm1096_vm14 = vcmask 351452  }
 0x23c   : > { %v1114_v58 = vld.sshfl [vmem:[#allocation1] sm:$0xff pattern:$0x75316420] }
 0x23d   : > { %1115 = vrot.lane.b32.xlu2 %v1114_v58, %s11003_s19  ;;  %1123 = vst [vmem:[#allocation1 + $0x1] ss:$2 sm:$0xff] %v8297_v24 }
 0x23f   : > { %v1010_v59 = vpop.permute.xlu1 %1009 }
 0x240   : > { %1013 = vst.msk [vmem:[#allocation2 + $0x8] sm:$0xf] %vm1012_vm0, %v1010_v59 }
 0x244   : > { %v1124_v60 = vld.sshfl [vmem:[#allocation1] sm:$0xff pattern:$0x75316420] }
 0x245   : > { %1125 = vrot.lane.b32.xlu0 %v1124_v60, %s11003_s19  ;;  %1132 = vst [vmem:[#allocation1] ss:$2 sm:$0xff] %v8288_v19 }
 0x24c   : > { %v1133_v61 = vld.sshfl [vmem:[#allocation1 + $0x8] sm:$0xff pattern:$0x75316420] }
 0x24d   : > { %1134 = vrot.lane.b32.xlu0 %v1133_v61, %s7913_s29  ;;  %1139 = vst [vmem:[#allocation1 + $0x1] ss:$2 sm:$0xff] %v8297_v24 }
 0x24f   : > { %v1026_v62 = vpop.permute.xlu0 %1025  ;;  %v1049_v63 = vpop.permute.xlu2 %1048 }
 0x250   : > { %1029 = vst.msk [vmem:[#allocation2 + $0x8] sm:$0xf] %vm1028_vm4, %v1026_v62 }
 0x251   : > { %1052 = vst.msk [vmem:[#allocation2 + $0x10] sm:$0xf0] %vm1051_vm5, %v1049_v63 }
 0x254   : > { %v1140_v2 = vld.sshfl [vmem:[#allocation1 + $0x8] sm:$0xff pattern:$0x75316420] }
 0x255   : > { %1141 = vrot.lane.b32.xlu1 %v1140_v2, %s7913_s29  ;;  %1145 = vst [vmem:[#allocation1] ss:$2 sm:$0xff] %v8288_v19 }
 0x257   : > { %v1034_v3 = vpop.permute.xlu1 %1033  ;;  %v1056_v8 = vpop.permute.xlu2 %1055 }
 0x258   : > { %1037 = vst.msk [vmem:[#allocation2 + $0x8] sm:$0xf0] %vm1036_vm6, %v1034_v3 }
 0x25c   : > { %v1146_v4 = vld.sshfl [vmem:[#allocation1 + $0x8] sm:$0xff pattern:$0x75316420] }
 0x25d   : > { %1152 = vst [vmem:[#allocation1 + $0x1] ss:$2 sm:$0xff] %v8297_v24  ;;  %1147 = vrot.lane.b32.xlu0 %v1146_v4, %s10979_s28 }
 0x25f   : > { %v1041_v5 = vpop.permute.xlu1 %1040  ;;  %v8357_v6 = vld [vmem:[#allocation2 + $0x8] sm:$0xff] }
 0x260   : > { %v1239_v7 = vld [vmem:[#allocation2 + $0x8] sm:$0xff]  ;;  %1044 = vst.msk [vmem:[#allocation2 + $0x10] sm:$0xf] %vm1043_vm7, %v1041_v5  ;;  %v8362_v9 = vpack.c.bf16 %v8357_v6, %v7900_v1 }
 0x261   : > { %v1244_v11 = vpack.c.bf16 %v1239_v7, %v7900_v1  ;;  %1059 = vst.msk [vmem:[#allocation2 + $0x10] sm:$0xf] %vm1058_vm8, %v1056_v8 }
 0x262   : > { %1826 = vrot.lane.b32.xlu2 %v8362_v9, %s10975_s25  ;;  %1746 = vrot.lane.b32.xlu1 %v8362_v9, %s10925_s7  ;;  %s10937_s7 = smov 127  }
 0x263   : > { %1247 = vst [vmem:[#allocation3] sm:$0xff] %v1244_v11 }
 0x264   : > { %v8370_v12 = vld.sshfl [vmem:[#allocation1 + $0x8] sm:$0xff pattern:$0x75316420] }
 0x265   : > { %1158 = vst [vmem:[#allocation1] ss:$2 sm:$0xff] %v8288_v19  ;;  %1786 = vrot.lane.b32.xlu0 %v8362_v9, %s10981_s23 }
 0x26a   : > { %1706 = vrot.lane.b32.xlu2 %v8362_v9, %s10979_s28  ;;  %1626 = vrot.lane.b32.xlu1 %v8362_v9, %s10909_s11  ;;  %s10977_s11 = smov 80  }
 0x26c   : > { %v8379_v1 = vld.sshfl [vmem:[#allocation1 + $0x8] sm:$0xff pattern:$0x75316420] }
 0x26d   : > { %1165 = vst [vmem:[#allocation1 + $0x1] ss:$2 sm:$0xff] %v8297_v24  ;;  %1666 = vrot.lane.b32.xlu0 %v8362_v9, %s10973_s17 }
 0x26f   : > { %v1079_v16 = vpop.permute.xlu2 %1078 }
 0x272   : > { %1586 = vrot.lane.b32.xlu1 %v8362_v9, %s10911_s20  ;;  %1546 = vrot.lane.b32.xlu2 %v8362_v9, %s10913_s5  ;;  %s10919_s20 = smov 122   ;;  %s10921_s5 = smov 124  }
 0x274   : > { %v1166_v13 = vld.sshfl [vmem:[#allocation1 + $0x8] sm:$0xff pattern:$0x75316420] }
 0x275   : > { %1171 = vst [vmem:[#allocation1] ss:$2 sm:$0xff] %v8288_v19  ;;  %1506 = vrot.lane.b32.xlu0 %v8362_v9, %s10977_s11 }
 0x277   : > { %v1064_v15 = vpop.permute.xlu0 %1063 }
 0x278   : > { %1067 = vst.msk [vmem:[#allocation2 + $0x10] sm:$0xf0] %vm1066_vm9, %v1064_v15 }
 0x279   : > { %1082 = vst.msk [vmem:[#allocation2 + $0x10] sm:$0xf0] %vm1081_vm10, %v1079_v16 }
 0x27a   : > { %1466 = vrot.lane.b32.xlu1 %v8362_v9, %s10919_s20  ;;  %1386 = vrot.lane.b32.xlu2 %v8362_v9, %s10921_s5  ;;  %s10929_s20 = smov 125   ;;  %s10961_s5 = smov 26  }
 0x27c   : > { %v1172_v17 = vld.sshfl [vmem:[#allocation1 + $0x8] sm:$0xff pattern:$0x75316420] }
 0x27d   : > { %1178 = vst [vmem:[#allocation1 + $0x1] ss:$2 sm:$0xff] %v8297_v24  ;;  %1306 = vrot.lane.b32.xlu0 %v8362_v9, %s10923_s30  ;;  %s10931_s30 = smov 27  }
 0x27f   : > { %v1071_v20 = vpop.permute.xlu1 %1070 }
 0x280   : > { %1074 = vst.msk [vmem:[#allocation2 + $0x10] sm:$0xf] %vm1073_vm11, %v1071_v20 }
 0x282   : > { %1426 = vrot.lane.b32.xlu1 %v8362_v9, %s10927_s24  ;;  %1346 = vrot.lane.b32.xlu2 %v8362_v9, %s10929_s20  ;;  %s10941_s24 = smov 29   ;;  %s10933_s20 = smov 30  }
 0x284   : > { %v1179_v21 = vld.sshfl [vmem:[#allocation1 + $0x8] sm:$0xff pattern:$0x75316420] }
 0x285   : > { %2026 = vrot.lane.b32.xlu0 %v8362_v9, %s10961_s5  ;;  %1184 = vst [vmem:[#allocation1] ss:$2 sm:$0xff] %v8288_v19  ;;  %s10999_s5 = smov 63  }
 0x287   : > { %v8425_v10 = vld [vmem:[#allocation2 + $0x10] sm:$0xff] }
 0x288   : > { %v8434_v28 = vpack.c.bf16 %v8425_v10, %v8357_v6  ;;  %v1240_v40 = vld [vmem:[#allocation2 + $0x10] sm:$0xff] }
 0x28a   : > { %1986 = vrot.lane.b32.xlu1 %v8362_v9, %s10931_s30  ;;  %1265 = vrot.lane.b32.xlu2 %v8362_v9, %s10937_s7  ;;  %s10935_s30 = smov 28   ;;  %s10959_s7 = smov 14  }
 0x28c   : > { %v1185_v14 = vld.sshfl [vmem:[#allocation1 + $0x8] sm:$0xff pattern:$0x75316420] }
 0x28d   : > { %1906 = vrot.lane.b32.xlu0 %v8362_v9, %s10941_s24  ;;  %1191 = vst [vmem:[#allocation1 + $0x1] ss:$2 sm:$0xff] %v8297_v24  ;;  %s10949_s24 = smov 12  }
 0x28f   : > { %v1086_v22 = vpop.permute.xlu0 %1085  ;;  %v1109_v23 = vpop.permute.xlu2 %1108 }
 0x290   : > { %1089 = vst.msk [vmem:[#allocation2 + $0x18] sm:$0xf] %vm1088_vm12, %v1086_v22 }
 0x292   : > { %1866 = vrot.lane.b32.xlu1 %v8362_v9, %s10933_s20  ;;  %1946 = vrot.lane.b32.xlu2 %v8362_v9, %s10935_s30  ;;  %s10939_s20 = smov 10   ;;  %s10943_s30 = smov 13  }
 0x294   : > { %v8420_v18 = vld.sshfl [vmem:[#allocation1 + $0x8] sm:$0xff pattern:$0x75316420] }
 0x295   : > { %1180 = vrot.lane.b32.xlu0 %v1179_v21, %s11003_s19  ;;  %1197 = vst [vmem:[#allocation1] ss:$2 sm:$0xff] %v8288_v19 }
 0x297   : > { %v1116_v25 = vpop.permute.xlu2 %1115  ;;  %v1094_v26 = vpop.permute.xlu1 %1093 }
 0x298   : > { %1121 = vst.msk [vmem:[#allocation2 + $0x20] sm:$0xf] %vm10945_vm13, %v1116_v25  ;;  %vm1128_vm13 = vcmask 1048540  }
 0x299   : > { %1097 = vst.msk [vmem:[#allocation2 + $0x18] sm:$0xf0] %vm1096_vm14, %v1094_v26 }
 0x29a   : > { %1112 = vst.msk [vmem:[#allocation2 + $0x18] sm:$0xf0] %vm1111_vm15, %v1109_v23  ;;  %1154 = vrot.lane.b32.xlu1 %v8370_v12, %s10979_s28  ;;  %1167 = vrot.lane.b32.xlu2 %v1166_v13, %s10997_s4 }
 0x29c   : > { %v8436_v30 = vld.sshfl [vmem:[#allocation1 + $0x8] sm:$0xff pattern:$0x75316420] }
 0x29d   : > { %2866 = vrot.lane.b32.xlu0 %v8434_v28, %s10939_s20  ;;  %1204 = vst [vmem:[#allocation1 + $0x1] ss:$2 sm:$0xff] %v8297_v24  ;;  %s10947_s20 = smov 15  }
 0x29f   : > { %v1101_v31 = vpop.permute.xlu1 %1100 }
 0x2a0   : > { %1104 = vst.msk [vmem:[#allocation2 + $0x18] sm:$0xf] %vm1103_vm1, %v1101_v31 }
 0x2a1   : > { %1119 = vst.msk [vmem:[#allocation2 + $0x18] sm:$0xf] %vm10946_vm2, %v1116_v25  ;;  %vm1130_vm2 = vcmask 89092  }
 0x2a2   : > { %1160 = vrot.lane.b32.xlu1 %v8379_v1, %s10997_s4  ;;  %1173 = vrot.lane.b32.xlu2 %v1172_v17, %s11003_s19 }
 0x2a4   : > { %v8446_v33 = vld.sshfl [vmem:[#allocation1 + $0x8] sm:$0xff pattern:$0x75316420] }
 0x2a5   : > { %2746 = vrot.lane.b32.xlu0 %v8434_v28, %s10943_s30  ;;  %1210 = vst [vmem:[#allocation1] ss:$2 sm:$0xff] %v8288_v19  ;;  %s10951_s30 = smov 62  }
 0x2aa   : > { %2826 = vrot.lane.b32.xlu1 %v8434_v28, %s11003_s19  ;;  %1186 = vrot.lane.b32.xlu2 %v1185_v14, %s7913_s29 }
 0x2ac   : > { %v1211_v34 = vld.sshfl [vmem:[#allocation1 + $0x8] sm:$0xff pattern:$0x75316420] }
 0x2ad   : > { %2706 = vrot.lane.b32.xlu0 %v8434_v28, %s10959_s7  ;;  %1217 = vst [vmem:[#allocation1 + $0x1] ss:$2 sm:$0xff] %v8297_v24  ;;  %s10967_s7 = smov 106  }
 0x2b2   : > { %2666 = vrot.lane.b32.xlu1 %v8434_v28, %s10947_s20  ;;  %2786 = vrot.lane.b32.xlu2 %v8434_v28, %s10949_s24  ;;  %s10953_s20 = smov 16   ;;  %s10955_s24 = smov 58  }
 0x2b4   : > { %v8461_v35 = vld.sshfl [vmem:[#allocation1 + $0x8] sm:$0xff pattern:$0x75316420] }
 0x2b5   : > { %2426 = vrot.lane.b32.xlu0 %v8434_v28, %s10951_s30  ;;  %1223 = vst [vmem:[#allocation1] ss:$2 sm:$0xff] %v8288_v19  ;;  %s10957_s30 = smov 59  }
 0x2b7   : > { %v1126_v36 = vpop.permute.xlu0 %1125 }
 0x2b8   : > { %1129 = vst.msk [vmem:[#allocation2 + $0x18] sm:$0xf0] %vm1128_vm13, %v1126_v36 }
 0x2b9   : > { %1131 = vst.msk [vmem:[#allocation2 + $0x20] sm:$0xf0] %vm1130_vm2, %v1126_v36 }
 0x2ba   : > { %2626 = vrot.lane.b32.xlu1 %v8434_v28, %s10953_s20  ;;  %2586 = vrot.lane.b32.xlu2 %v8434_v28, %s10955_s24  ;;  %s10963_s20 = smov 60   ;;  %s11001_s24 = smov 61  }
 0x2bc   : > { %v8472_v37 = vpop.permute.xlu2 %1826  ;;  %v1224_v38 = vld.sshfl [vmem:[#allocation1 + $0x8] sm:$0xff pattern:$0x75316420] }
 0x2bd   : > { %2546 = vrot.lane.b32.xlu0 %v8434_v28, %s10957_s30  ;;  %1231 = vst [vmem:[#allocation1 + $0x1] ss:$2 sm:$0xff] %v8297_v24  ;;  %s10965_s30 = smov 64  }
 0x2bf   : > { %v1135_v19 = vpop.permute.xlu0 %1134  ;;  %v1241_v43 = vld [vmem:[#allocation2 + $0x18] sm:$0xff] }
 0x2c0   : > { %1137 = vst.msk [vmem:[#allocation2 + $0x20] sm:$0xf] %vm1012_vm0, %v1135_v19  ;;  %v1245_v44 = vpack.c.bf16 %v1241_v43, %v1240_v40  ;;  %v8517_v54 = vld [vmem:[#allocation2 + $0x18] sm:$0xff]  ;;  %vm11098_vm0 = vcmask 261120  }
 0x2c1   : > { %v8523_v56 = vpack.c.bf16 %v8517_v54, %v8425_v10 }
 0x2c2   : > { %2506 = vrot.lane.b32.xlu1 %v8434_v28, %s10963_s20  ;;  %2466 = vrot.lane.b32.xlu2 %v8434_v28, %s11001_s24  ;;  %1248 = vst [vmem:[#allocation3 + $0x8] sm:$0xff] %v1245_v44  ;;  %s10969_s20 = smov 108   ;;  %s11214_s24 = smov 13  }
 0x2c4   : > { %v8482_v45 = vpop.permute.xlu2 %1706  ;;  %v1232_v14 = vld.sshfl [vmem:[#allocation1 + $0x8] sm:$0xff pattern:$0x75316420] }
 0x2c5   : > { %2346 = vrot.lane.b32.xlu0 %v8434_v28, %s10965_s30  ;;  %s10971_s30 = smov 109  }
 0x2c7   : > { %v1142_v24 = vpop.permute.xlu1 %1141 }
 0x2c8   : > { %1144 = vst.msk [vmem:[#allocation2 + $0x20] sm:$0xf0] %vm1021_vm3, %v1142_v24  ;;  %vm1277_vm3 = vcmask 1043456  }
 0x2ca   : > { %2306 = vrot.lane.b32.xlu1 %v8434_v28, %s10967_s7  ;;  %2386 = vrot.lane.b32.xlu2 %v8434_v28, %s10999_s5  ;;  %s10995_s7 = smov 111   ;;  %s11213_s5 = smov 127  }
 0x2cc   : > { %v8491_v46 = vpop.permute.xlu2 %1546 }
 0x2cd   : > { %2226 = vrot.lane.b32.xlu0 %v8434_v28, %s10969_s20  ;;  %s10993_s20 = smov 110   ;;  %v1554_v29 = vrot.slane %v8491_v46, 4 }
 0x2cf   : > { %v1148_v48 = vpop.permute.xlu0 %1147 }
 0x2d0   : > { %1150 = vst.msk [vmem:[#allocation2 + $0x20] sm:$0xf] %vm1028_vm4, %v1148_v48  ;;  %vm1759_vm4 = vcmask 605184  }
 0x2d2   : > { %2186 = vrot.lane.b32.xlu1 %v8434_v28, %s10971_s30  ;;  %2266 = vrot.lane.b32.xlu2 %v8434_v28, %s10997_s4  ;;  %s10989_s30 = smov 112  }
 0x2d4   : > { %v8500_v49 = vpop.permute.xlu1 %1746  ;;  %v8502_v50 = vpop.permute.xlu2 %1386 }
 0x2d5   : > { %2106 = vrot.lane.b32.xlu0 %v8434_v28, %s10995_s7  ;;  %s11211_s7 = smov 10  }
 0x2d7   : > { %v8506_v51 = vpop.permute.xlu0 %1786 }
 0x2da   : > { %1212 = vrot.lane.b32.xlu1 %v1211_v34, %s10997_s4  ;;  %2146 = vrot.lane.b32.xlu2 %v8434_v28, %s10993_s20  ;;  %s11210_s20 = smov 125  }
 0x2dc   : > { %v8511_v52 = vpop.permute.xlu1 %1626  ;;  %v8513_v53 = vpop.permute.xlu2 %1346 }
 0x2dd   : > { %1193 = vrot.lane.b32.xlu0 %v8420_v18, %s7913_s29  ;;  %s11199_s29 = smov 74   ;;  %v1634_v0 = vrot.slane %v8511_v52, 4 }
 0x2df   : > { %v8519_v55 = vpop.permute.xlu0 %1666 }
 0x2e2   : > { %3106 = vrot.lane.b32.xlu1 %v8523_v56, %s10985_s27  ;;  %2066 = vrot.lane.b32.xlu2 %v8434_v28, %s10989_s30  ;;  %s11206_s27 = smov 29   ;;  %s11208_s30 = smov 124  }
 0x2e4   : > { %v8529_v57 = vpop.permute.xlu1 %1586  ;;  %v8531_v58 = vpop.permute.xlu2 %1265 }
 0x2e5   : > { %1206 = vrot.lane.b32.xlu0 %v8446_v33, %s10979_s28 }
 0x2e7   : > { %v8535_v59 = vpop.permute.xlu0 %1506 }
 0x2ea   : > { %1788 = vrot.lane.b32.xlu1 %v8523_v56, %s10981_s23  ;;  %1199 = vrot.lane.b32.xlu2 %v8436_v30, %s10979_s28  ;;  %s11204_s23 = smov 77  }
 0x2ec   : > { %v8541_v60 = vpop.permute.xlu1 %1466  ;;  %v8543_v61 = vpop.permute.xlu2 %1946 }
 0x2ed   : > { %1225 = vrot.lane.b32.xlu0 %v1224_v38, %s11003_s19 }
 0x2ef   : > { %v8546_v62 = vpop.permute.xlu0 %1306 }
 0x2f2   : > { %2986 = vrot.lane.b32.xlu1 %v8523_v56, %s10983_s21  ;;  %1219 = vrot.lane.b32.xlu2 %v8461_v35, %s10997_s4  ;;  %s11205_s21 = smov 79   ;;  %s11212_s4 = smov 122  }
 0x2f4   : > { %v8552_v63 = vpop.permute.xlu1 %1426  ;;  %v1168_v2 = vpop.permute.xlu2 %1167 }
 0x2f5   : > { %1170 = vst.msk [vmem:[#allocation2 + $0x28] sm:$0xf0] %vm1051_vm5, %v1168_v2  ;;  %1828 = vrot.lane.b32.xlu0 %v8523_v56, %s10975_s25  ;;  %s11201_s25 = smov 95   ;;  %vm11232_vm5 = vcmask 1044440  }
 0x2f7   : > { %v8557_v3 = vpop.permute.xlu0 %2026 }
 0x2fa   : > { %1668 = vrot.lane.b32.xlu1 %v8523_v56, %s10973_s17  ;;  %3066 = vrot.lane.b32.xlu2 %v8523_v56, %s10987_s26  ;;  %s11200_s17 = smov 126   ;;  %s11207_s26 = smov 90  }
 0x2fc   : > { %v8563_v4 = vpop.permute.xlu1 %1986  ;;  %v1174_v5 = vpop.permute.xlu2 %1173 }
 0x2fd   : > { %3026 = vrot.lane.b32.xlu0 %v8523_v56, %s10991_s16  ;;  %s11209_s16 = smov 78  }
 0x2ff   : > { %v8567_v6 = vpop.permute.xlu0 %1906 }
 0x302   : > { %1508 = vrot.lane.b32.xlu1 %v8523_v56, %s10977_s11  ;;  %1748 = vrot.lane.b32.xlu2 %v8523_v56, %s11199_s29  ;;  %s11202_s11 = smov 96  }
 0x304   : > { %v8573_v7 = vpop.permute.xlu1 %1866  ;;  %v1187_v8 = vpop.permute.xlu2 %1186 }
 0x305   : > { %1708 = vrot.lane.b32.xlu0 %v8523_v56, %s10979_s28  ;;  %s11203_s28 = smov 26  }
 0x307   : > { %v1181_v9 = vpop.permute.xlu0 %1180 }
 0x308   : > { %1183 = vst.msk [vmem:[#allocation2 + $0x28] sm:$0xf0] %vm1066_vm9, %v1181_v9  ;;  %vm1639_vm9 = vcmask 629760  }
 0x30a   : > { %1308 = vrot.lane.b32.xlu1 %v8523_v56, %s11200_s17  ;;  %2946 = vrot.lane.b32.xlu2 %v8523_v56, %s11201_s25 }
 0x30c   : > { %v1155_v11 = vpop.permute.xlu1 %1154  ;;  %v8582_v12 = vpop.permute.xlu2 %2786 }
 0x30d   : > { %1157 = vst.msk [vmem:[#allocation2 + $0x20] sm:$0xf0] %vm1036_vm6, %v1155_v11  ;;  %2906 = vrot.lane.b32.xlu0 %v8523_v56, %s11202_s11  ;;  %v1754_v11 = vrot.slane %v8500_v49, 4  ;;  %vm11235_vm6 = vcmask 84992  }
 0x30f   : > { %v8587_v1 = vpop.permute.xlu0 %2866 }
 0x312   : > { %2028 = vrot.lane.b32.xlu1 %v8523_v56, %s11203_s28  ;;  %1628 = vrot.lane.b32.xlu2 %v8523_v56, %s11204_s23 }
 0x314   : > { %v1161_v13 = vpop.permute.xlu1 %1160  ;;  %v8593_v15 = vpop.permute.xlu2 %2586  ;;  %v8623_v18 = vld [vmem:[#allocation2 + $0x20] sm:$0xff] }
 0x315   : > { %1163 = vst.msk [vmem:[#allocation2 + $0x28] sm:$0xf] %vm1043_vm7, %v1161_v13  ;;  %1548 = vrot.lane.b32.xlu0 %v8523_v56, %s11205_s21  ;;  %v8629_v26 = vpack.c.bf16 %v8623_v18, %v8517_v54  ;;  %v1794_v13 = vrot.slane %v8506_v51, 4  ;;  %vm1839_vm7 = vcmask 252928  }
 0x316   : > { %1176 = vst.msk [vmem:[#allocation2 + $0x28] sm:$0xf] %vm1058_vm8, %v1174_v5  ;;  %v5221_v5 = vld [vmem:[#allocation2 + $0x20] sm:$0xff]  ;;  %vm11105_vm8 = vcmask 621568  }
 0x317   : > { %1189 = vst.msk [vmem:[#allocation2 + $0x28] sm:$0xf] %vm1073_vm11, %v1187_v8  ;;  %v8600_v16 = vpop.permute.xlu0 %2746  ;;  %vm1719_vm11 = vcmask 613376  }
 0x31a   : > { %1908 = vrot.lane.b32.xlu1 %v8523_v56, %s11206_s27  ;;  %3146 = vrot.lane.b32.xlu2 %v8523_v56, %s11207_s26 }
 0x31c   : > { %v8606_v17 = vpop.permute.xlu1 %2826  ;;  %v8608_v20 = vpop.permute.xlu2 %2466 }
 0x31d   : > { %1388 = vrot.lane.b32.xlu0 %v8523_v56, %s11208_s30 }
 0x31f   : > { %v8612_v21 = vpop.permute.xlu0 %2706 }
 0x322   : > { %1233 = vrot.lane.b32.xlu1 %v1232_v14, %s11003_s19  ;;  %1588 = vrot.lane.b32.xlu2 %v8523_v56, %s11209_s16  ;;  %s11215_s19 = smov 123  }
 0x324   : > { %v8617_v22 = vpop.permute.xlu1 %2666  ;;  %v8619_v23 = vpop.permute.xlu2 %2386 }
 0x325   : > { %1348 = vrot.lane.b32.xlu0 %v8523_v56, %s11210_s20 }
 0x327   : > { %v8625_v25 = vpop.permute.xlu0 %2426 }
 0x32a   : > { %2868 = vrot.lane.b32.xlu1 %v8629_v26, %s11211_s7  ;;  %1468 = vrot.lane.b32.xlu2 %v8523_v56, %s11212_s4  ;;  %s11241_s7 = smov 92  }
 0x32c   : > { %v8635_v10 = vpop.permute.xlu1 %2626  ;;  %v8637_v28 = vpop.permute.xlu2 %2266 }
 0x32d   : > { %1267 = vrot.lane.b32.xlu0 %v8523_v56, %s11213_s5 }
 0x32f   : > { %v8641_v30 = vpop.permute.xlu0 %2546 }
 0x332   : > { %2748 = vrot.lane.b32.xlu1 %v8629_v26, %s11214_s24  ;;  %1428 = vrot.lane.b32.xlu2 %v8523_v56, %s11215_s19  ;;  %s11238_s24 = smov 93  }
 0x334   : > { %v8647_v31 = vpop.permute.xlu1 %2506  ;;  %v8649_v33 = vpop.permute.xlu2 %2146 }
 0x335   : > { %1948 = vrot.lane.b32.xlu0 %v8523_v56, %s11216_s0 }
 0x337   : > { %v8653_v34 = vpop.permute.xlu0 %2346 }
 0x33a   : > { %2708 = vrot.lane.b32.xlu1 %v8629_v26, %s11217_s1  ;;  %1988 = vrot.lane.b32.xlu2 %v8523_v56, %s11218_s2  ;;  %s11236_s1 = smov 110  }
 0x33c   : > { %v8659_v35 = vpop.permute.xlu1 %2306  ;;  %v8661_v36 = vpop.permute.xlu2 %2066 }
 0x33d   : > { %2788 = vrot.lane.b32.xlu0 %v8629_v26, %s11219_s6  ;;  %s11239_s6 = smov 112  }
 0x33f   : > { %v8665_v38 = vpop.permute.xlu0 %2226 }
 0x342   : > { %2428 = vrot.lane.b32.xlu1 %v8629_v26, %s11220_s10  ;;  %1868 = vrot.lane.b32.xlu2 %v8523_v56, %s11221_s12 }
 0x344   : > { %v8671_v19 = vpop.permute.xlu1 %2186  ;;  %v1200_v40 = vpop.permute.xlu2 %1199 }
 0x345   : > { %1202 = vst.msk [vmem:[#allocation2 + $0x30] sm:$0xf] %vm1088_vm12, %v1200_v40  ;;  %2588 = vrot.lane.b32.xlu0 %v8629_v26, %s11222_s13  ;;  %s11231_s13 = smov 107   ;;  %vm11134_vm12 = vcmask 1031168  }
 0x347   : > { %v8676_v43 = vpop.permute.xlu0 %2106 }
 0x34a   : > { %2548 = vrot.lane.b32.xlu1 %v8629_v26, %s11223_s14  ;;  %2828 = vrot.lane.b32.xlu2 %v8629_v26, %s11224_s18  ;;  %s11230_s14 = smov 16   ;;  %s11240_s18 = smov 109  }
 0x34c   : > { %v1213_v44 = vpop.permute.xlu1 %1212  ;;  %v1220_v24 = vpop.permute.xlu2 %1219 }
 0x34d   : > { %1215 = vst.msk [vmem:[#allocation2 + $0x30] sm:$0xf] %vm1103_vm1, %v1213_v44  ;;  %2468 = vrot.lane.b32.xlu0 %v8629_v26, %s11225_s15  ;;  %vm11034_vm1 = vcmask 998400  }
 0x34f   : > { %v1194_v48 = vpop.permute.xlu0 %1193 }
 0x350   : > { %1196 = vst.msk [vmem:[#allocation2 + $0x28] sm:$0xf0] %vm1081_vm10, %v1194_v48  ;;  %vm11243_vm10 = vcmask 654336  }
 0x352   : > { %2348 = vrot.lane.b32.xlu1 %v8629_v26, %s11226_s3  ;;  %2668 = vrot.lane.b32.xlu2 %v8629_v26, %s11227_s22  ;;  %s11234_s22 = smov 60  }
 0x354   : > { %v8690_v54 = vpop.permute.xlu1 %3106  ;;  %v8692_v56 = vpop.permute.xlu2 %3066 }
 0x355   : > { %2388 = vrot.lane.b32.xlu0 %v8629_v26, %s11228_s8 }
 0x357   : > { %v1207_v2 = vpop.permute.xlu0 %1206  ;;  %v5222_v8 = vld [vmem:[#allocation2 + $0x28] sm:$0xff] }
 0x358   : > { %1209 = vst.msk [vmem:[#allocation2 + $0x30] sm:$0xf0] %vm1096_vm14, %v1207_v2  ;;  %v1246_v9 = vpack.c.bf16 %v5222_v8, %v5221_v5  ;;  %vm11120_vm14 = vcmask 637952  }
 0x359   : > { %1222 = vst.msk [vmem:[#allocation2 + $0x30] sm:$0xf0] %vm1111_vm15, %v1220_v24  ;;  %vm11025_vm15 = vcmask 211968  }
 0x35a   : > { %2228 = vrot.lane.b32.xlu1 %v8629_v26, %s11229_s9  ;;  %2628 = vrot.lane.b32.xlu2 %v8629_v26, %s11230_s14  ;;  %1249 = vst [vmem:[#allocation3 + $0x10] sm:$0xff] %v1246_v9  ;;  %s11233_s14 = smov 111  }
 0x35c   : > { %v8704_v14 = vpop.permute.xlu1 %1788  ;;  %v8706_v40 = vpop.permute.xlu2 %1748 }
 0x35d   : > { %v11010_v44 = vrot.slane %v8704_v14, 4  ;;  %v11009_v24 = vrot.slane %v8706_v40, 4  ;;  %2268 = vrot.lane.b32.xlu0 %v8629_v26, %s11231_s13 }
 0x35f   : > { %v1798_v48 = vsel %vm1277_vm3, %v1794_v13, %v11010_v44  ;;  %v1758_v2 = vsel %vm1277_vm3, %v1754_v11, %v11009_v24  ;;  %v1226_v5 = vpop.permute.xlu0 %1225  ;;  %v1674_v24 = vrot.slane %v8519_v55, 4 }
 0x360   : > { %v1800_v8 = vsel %vm11098_vm0, %v8506_v51, %v1798_v48  ;;  %v1760_v9 = vsel %vm1759_vm4, %v8500_v49, %v1758_v2  ;;  %1228 = vst.msk [vmem:[#allocation2 + $0x30] sm:$0xf] %vm11232_vm5, %v1226_v5  ;;  %v8734_v49 = vld [vmem:[#allocation2 + $0x28] sm:$0xff]  ;;  %v1834_v48 = vrot.slane %v8472_v37, 4  ;;  %vm1559_vm5 = vcmask 646144  }
 0x361   : > { %1808 = vst [vmem:[#allocation3 + $0x150] sm:$0xff] %v1800_v8  ;;  %v8742_v8 = vpack.c.bf16 %v8734_v49, %v8623_v18 }
 0x362   : > { %1768 = vst [vmem:[#allocation3 + $0x138] sm:$0xff] %v1760_v9  ;;  %2108 = vrot.lane.b32.xlu1 %v8629_v26, %s11233_s14  ;;  %2508 = vrot.lane.b32.xlu2 %v8629_v26, %s11234_s22  ;;  %s11237_s22 = smov 106  }
 0x363   : > { %1229 = vst.msk [vmem:[#allocation2 + $0x38] sm:$0xf] %vm11235_vm6, %v1226_v5  ;;  %vm11026_vm6 = vcmask 236544  }
 0x364   : > { %v8728_v11 = vpop.permute.xlu1 %2986  ;;  %v8730_v13 = vpop.permute.xlu2 %2946 }
 0x365   : > { %2148 = vrot.lane.b32.xlu0 %v8629_v26, %s11236_s1 }
 0x367   : > { %v8736_v51 = vpop.permute.xlu0 %1828 }
 0x368   : > { %v11011_v2 = vrot.slane %v8736_v51, 4 }
 0x36a   : > { %v1838_v5 = vsel %vm1277_vm3, %v1834_v48, %v11011_v2  ;;  %2308 = vrot.lane.b32.xlu2 %v8629_v26, %s11237_s22  ;;  %3028 = vrot.lane.b32.xlu1 %v8742_v8, %s11238_s24  ;;  %s11244_s24 = smov 91  }
 0x36b   : > { %v1840_v9 = vsel %vm1839_vm7, %v8472_v37, %v1838_v5 }
 0x36c   : > { %1848 = vst [vmem:[#allocation3 + $0x168] sm:$0xff] %v1840_v9  ;;  %v8755_v18 = vpop.permute.xlu1 %1668  ;;  %v8757_v44 = vpop.permute.xlu2 %1628 }
 0x36d   : > { %v11012_v48 = vrot.slane %v8755_v18, 4  ;;  %v11013_v2 = vrot.slane %v8757_v44, 4  ;;  %2068 = vrot.lane.b32.xlu0 %v8629_v26, %s11239_s6 }
 0x36f   : > { %v1678_v37 = vsel %vm1277_vm3, %v1674_v24, %v11012_v48  ;;  %v1638_v5 = vsel %vm1277_vm3, %v1634_v0, %v11013_v2  ;;  %v8769_v9 = vpop.permute.xlu0 %3026  ;;  %v6601_v24 = vld [vmem:[#allocation3 + $0x150] sm:$0xf] }
 0x370   : > { %v1680_v32 = vsel %vm11105_vm8, %v8519_v55, %v1678_v37  ;;  %v1640_v41 = vsel %vm1639_vm9, %v8511_v52, %v1638_v5  ;;  %v1514_v55 = vrot.slane %v8535_v59, 4  ;;  %v1714_v52 = vrot.slane %v8482_v45, 4 }
 0x371   : > { %1688 = vst [vmem:[#allocation3 + $0x108] sm:$0xff] %v1680_v32 }
 0x372   : > { %1648 = vst [vmem:[#allocation3 + $0xf0] sm:$0xff] %v1640_v41  ;;  %2188 = vrot.lane.b32.xlu2 %v8629_v26, %s11240_s18  ;;  %2908 = vrot.lane.b32.xlu1 %v8742_v8, %s11202_s11 }
 0x373   : > { %v7218_v48 = vld [vmem:[#allocation3 + $0x164] sm:$0xf0] }
 0x374   : > { %v8779_v47 = vpop.permute.xlu1 %1508  ;;  %v8781_v0 = vpop.permute.xlu2 %3146  ;;  %v6602_v2 = vor.u32 %v7218_v48, %v6601_v24  ;;  %v1594_v24 = vrot.slane %v8529_v57, 4 }
 0x375   : > { %v11015_v37 = vrot.slane %v8779_v47, 4  ;;  %3068 = vrot.lane.b32.xlu0 %v8742_v8, %s11241_s7 }
 0x376   : > { %4097 = vmatpush.bf16.msra.mxu0 %v6602_v2 }
 0x377   : > { %v1518_v32 = vsel %vm1277_vm3, %v1514_v55, %v11015_v37  ;;  %v8790_v41 = vpop.permute.xlu0 %1708 }
 0x378   : > { %11242 = vst [vmem:[#allocation35_spill] sm:$0xff] %v8790_v41  ;;  %v1520_v26 = vsel %vm11243_vm10, %v8535_v59, %v1518_v32  ;;  %v11014_v48 = vrot.slane %v8790_v41, 4  ;;  %v1314_v59 = vrot.slane %v8546_v62, 4  ;;  %vm11032_vm10 = vcmask 1006592  }
 0x379   : > { %1528 = vst [vmem:[#allocation3 + $0xa8] sm:$0xff] %v1520_v26 }
 0x37a   : > { %v1718_v5 = vsel %vm1277_vm3, %v1714_v52, %v11014_v48  ;;  %3108 = vrot.lane.b32.xlu2 %v8742_v8, %s11244_s24  ;;  %1750 = vrot.lane.b32.xlu1 %v8742_v8, %s11199_s29  ;;  %s11246_s29 = smov 94  }
 0x37b   : > { %v1720_v2 = vsel %vm1719_vm11, %v8482_v45, %v1718_v5 }
 0x37c   : > { %1728 = vst [vmem:[#allocation3 + $0x120] sm:$0xff] %v1720_v2  ;;  %v8807_v55 = vpop.permute.xlu1 %1308  ;;  %v8809_v32 = vpop.permute.xlu2 %1588 }
 0x37d   : > { %11245 = vst [vmem:[#allocation36_spill] sm:$0xff] %v8807_v55  ;;  %v11017_v52 = vrot.slane %v8807_v55, 4  ;;  %v11018_v26 = vrot.slane %v8809_v32, 4  ;;  %2948 = vrot.lane.b32.xlu0 %v8742_v8, %s11201_s25 }
 0x37f   : > { %v1318_v45 = vsel %vm1277_vm3, %v1314_v59, %v11017_v52  ;;  %v1598_v5 = vsel %vm1277_vm3, %v1594_v24, %v11018_v26  ;;  %v8821_v2 = vpop.permute.xlu0 %2906  ;;  %v7212_v52 = vld [vmem:[#allocation3 + $0x134] sm:$0xf0]  ;;  %v1474_v24 = vrot.slane %v8541_v60, 4  ;;  %v2034_v26 = vrot.slane %v8557_v3, 4 }
 0x380   : > { %v1320_v48 = vsel %vm11134_vm12, %v8546_v62, %v1318_v45  ;;  %v1600_v37 = vsel %vm11120_vm14, %v8529_v57, %v1598_v5  ;;  %v7206_v5 = vld [vmem:[#allocation3 + $0x104] sm:$0xf0] }
 0x381   : > { %1328 = vst [vmem:[#allocation3 + $0x30] sm:$0xff] %v1320_v48  ;;  %v6553_v48 = vld [vmem:[#allocation3 + $0xf0] sm:$0xf] }
 0x382   : > { %1608 = vst [vmem:[#allocation3 + $0xd8] sm:$0xff] %v1600_v37  ;;  %2988 = vrot.lane.b32.xlu2 %v8742_v8, %s11246_s29  ;;  %1630 = vrot.lane.b32.xlu1 %v8742_v8, %s11204_s23  ;;  %v6554_v41 = vor.u32 %v7206_v5, %v6553_v48  ;;  %s11247_s23 = smov 32  }
 0x383   : > { %v6577_v59 = vld [vmem:[#allocation3 + $0x120] sm:$0xf] }
 0x384   : > { %v8833_v42 = vpop.permute.xlu1 %2028  ;;  %v8835_v62 = vpop.permute.xlu2 %1468  ;;  %v6578_v45 = vor.u32 %v7212_v52, %v6577_v59 }
 0x385   : > { %v11029_v57 = vrot.slane %v8833_v42, 4  ;;  %v11033_v37 = vrot.slane %v8835_v62, 4  ;;  %3148 = vrot.lane.b32.xlu0 %v8742_v8, %s11207_s26 }
 0x386   : > { %4098 = vmatpush.bf16.msra.mxu0 %v6578_v45 }
 0x387   : > { %v2038_v39 = vsel %vm1277_vm3, %v2034_v26, %v11029_v57  ;;  %v1478_v52 = vsel %vm1277_vm3, %v1474_v24, %v11033_v37  ;;  %v8848_v59 = vpop.permute.xlu0 %1548 }
 0x388   : > { %v2040_v27 = vsel %vm11025_vm15, %v8557_v3, %v2038_v39  ;;  %v1480_v45 = vsel %vm11034_vm1, %v8541_v60, %v1478_v52  ;;  %v11060_v55 = vrot.slane %v8848_v59, 4  ;;  %v1434_v60 = vrot.slane %v8552_v63, 4 }
 0x389   : > { %2048 = vst [vmem:[#allocation3 + $0x1e0] sm:$0xff] %v2040_v27  ;;  %v1914_v27 = vrot.slane %v8567_v6, 4  ;;  %vm11125_vm15 = vcmask 1014784   ;;  %vm11040_vm1 = vcmask 1039360  }
 0x38a   : > { %1488 = vst [vmem:[#allocation3 + $0x90] sm:$0xff] %v1480_v45  ;;  %v1558_v26 = vsel %vm1277_vm3, %v1554_v29, %v11060_v55  ;;  %1790 = vrot.lane.b32.xlu2 %v8742_v8, %s11247_s23  ;;  %1550 = vrot.lane.b32.xlu1 %v8742_v8, %s11205_s21  ;;  %s11248_s21 = smov 31   ;;  %s11250_s23 = smov 80  }
 0x38b   : > { %v1560_v39 = vsel %vm1559_vm5, %v8491_v46, %v1558_v26  ;;  %4099 = vmatpush.bf16.msra.mxu0 %v6554_v41  ;;  %v1394_v46 = vrot.slane %v8502_v50, 4 }
 0x38c   : > { %1568 = vst [vmem:[#allocation3 + $0xc0] sm:$0xff] %v1560_v39  ;;  %v8866_v3 = vpop.permute.xlu1 %1908  ;;  %v8868_v24 = vpop.permute.xlu2 %1428 }
 0x38d   : > { %v11027_v29 = vrot.slane %v8866_v3, 4  ;;  %v11028_v48 = vrot.slane %v8868_v24, 4  ;;  %1830 = vrot.lane.b32.xlu0 %v8742_v8, %s11248_s21  ;;  %s11249_s21 = smov 76  }
 0x38f   : > { %v1918_v41 = vsel %vm1277_vm3, %v1914_v27, %v11027_v29  ;;  %v1438_v5 = vsel %vm1277_vm3, %v1434_v60, %v11028_v48  ;;  %v8881_v52 = vpop.permute.xlu0 %1388  ;;  %v7194_v48 = vld [vmem:[#allocation3 + $0xa4] sm:$0xf0] }
 0x390   : > { %v1920_v45 = vsel %vm11026_vm6, %v8567_v6, %v1918_v41  ;;  %v1440_v26 = vsel %vm11032_vm10, %v8552_v63, %v1438_v5  ;;  %v11048_v39 = vrot.slane %v8881_v52, 4  ;;  %v7200_v63 = vld [vmem:[#allocation3 + $0xd4] sm:$0xf0]  ;;  %vm11030_vm6 = vcmask 220160  }
 0x391   : > { %1928 = vst [vmem:[#allocation3 + $0x198] sm:$0xff] %v1920_v45  ;;  %vm11037_vm10 = vcmask 244736  }
 0x392   : > { %1448 = vst [vmem:[#allocation3 + $0x78] sm:$0xff] %v1440_v26  ;;  %v1398_v27 = vsel %vm1277_vm3, %v1394_v46, %v11048_v39  ;;  %1670 = vrot.lane.b32.xlu2 %v8742_v8, %s11249_s21  ;;  %1510 = vrot.lane.b32.xlu1 %v8742_v8, %s11250_s23  ;;  %v1994_v26 = vrot.slane %v8563_v4, 4  ;;  %s11251_s21 = smov 75  }
 0x393   : > { %v1400_v6 = vsel %vm11125_vm15, %v8502_v50, %v1398_v27  ;;  %v6529_v60 = vld [vmem:[#allocation3 + $0xc0] sm:$0xf]  ;;  %v6505_v50 = vld [vmem:[#allocation3 + $0x90] sm:$0xf] }
 0x394   : > { %1408 = vst [vmem:[#allocation3 + $0x60] sm:$0xff] %v1400_v6  ;;  %v1234_v41 = vpop.permute.xlu1 %1233  ;;  %v8897_v5 = vpop.permute.xlu2 %1988  ;;  %v6530_v45 = vor.u32 %v7200_v63, %v6529_v60  ;;  %v1354_v60 = vrot.slane %v8513_v53, 4  ;;  %v6506_v57 = vor.u32 %v7194_v48, %v6505_v50  ;;  %v2874_v48 = vrot.slane %v8587_v1, 4 }
 0x395   : > { %1236 = vst.msk [vmem:[#allocation2 + $0x30] sm:$0xf0] %vm1128_vm13, %v1234_v41  ;;  %v11031_v46 = vrot.slane %v8897_v5, 4  ;;  %1710 = vrot.lane.b32.xlu0 %v8742_v8, %s11251_s21  ;;  %vm1359_vm13 = vcmask 1022976  }
 0x396   : > { %1237 = vst.msk [vmem:[#allocation2 + $0x38] sm:$0xf0] %vm1130_vm2, %v1234_v41  ;;  %4100 = vmatpush.bf16.msra.mxu0 %v6530_v45  ;;  %vm11053_vm2 = vcmask 130048  }
 0x397   : > { %v1998_v27 = vsel %vm1277_vm3, %v1994_v26, %v11031_v46  ;;  %v8908_v6 = vpop.permute.xlu0 %1348 }
 0x398   : > { %v2000_v63 = vsel %vm11030_vm6, %v8563_v4, %v1998_v27  ;;  %v11035_v29 = vrot.slane %v8908_v6, 4  ;;  %v1874_v27 = vrot.slane %v8573_v7, 4  ;;  %vm11036_vm6 = vcmask 80896  }
 0x399   : > { %2008 = vst [vmem:[#allocation3 + $0x1c8] sm:$0xff] %v2000_v63  ;;  %v7188_v26 = vld [vmem:[#allocation3 + $0x74] sm:$0xf0] }
 0x39a   : > { %v1358_v41 = vsel %vm1277_vm3, %v1354_v60, %v11035_v29  ;;  %1590 = vrot.lane.b32.xlu2 %v8742_v8, %s11209_s16  ;;  %1310 = vrot.lane.b32.xlu1 %v8742_v8, %s11200_s17 }
 0x39b   : > { %v1360_v4 = vsel %vm1359_vm13, %v8513_v53, %v1358_v41  ;;  %4101 = vmatpush.bf16.msra.mxu0 %v6506_v57  ;;  %v6481_v45 = vld [vmem:[#allocation3 + $0x60] sm:$0xf]  ;;  %v1273_v53 = vrot.slane %v8531_v58, 4 }
 0x39c   : > { %1368 = vst [vmem:[#allocation3 + $0x48] sm:$0xff] %v1360_v4  ;;  %v8925_v50 = vpop.permute.xlu1 %2868  ;;  %v8927_v60 = vpop.permute.xlu2 %1868  ;;  %v6482_v63 = vor.u32 %v7188_v26, %v6481_v45 }
 0x39d   : > { %v11038_v46 = vrot.slane %v8925_v50, 4  ;;  %v11039_v37 = vrot.slane %v8927_v60, 4  ;;  %1470 = vrot.lane.b32.xlu0 %v8742_v8, %s11212_s4 }
 0x39f   : > { %v2878_v57 = vsel %vm1277_vm3, %v2874_v48, %v11038_v46  ;;  %v1878_v41 = vsel %vm1277_vm3, %v1874_v27, %v11039_v37  ;;  %4102 = vmatpush.bf16.msra.mxu0 %v6482_v63  ;;  %v8940_v4 = vpop.permute.xlu0 %1267  ;;  %v6457_v27 = vld [vmem:[#allocation3 + $0x30] sm:$0xf]  ;;  %v2754_v63 = vrot.slane %v8600_v16, 4 }
 0x3a0   : > { %v2880_v45 = vsel %vm11036_vm6, %v8587_v1, %v2878_v57  ;;  %v1880_v26 = vsel %vm11037_vm10, %v8573_v7, %v1878_v41  ;;  %v11047_v29 = vrot.slane %v8940_v4, 4  ;;  %v2834_v57 = vrot.slane %v8606_v17, 4 }
 0x3a1   : > { %2888 = vst [vmem:[#allocation3 + $0x3d8] sm:$0xff] %v2880_v45  ;;  %vm11041_vm6 = vcmask 105472   ;;  %vm11043_vm10 = vcmask 89088  }
 0x3a2   : > { %1888 = vst [vmem:[#allocation3 + $0x180] sm:$0xff] %v1880_v26  ;;  %v1278_v48 = vsel %vm1277_vm3, %v1273_v53, %v11047_v29  ;;  %1390 = vrot.lane.b32.xlu2 %v8742_v8, %s11208_s30  ;;  %1950 = vrot.lane.b32.xlu1 %v8742_v8, %s11216_s0  ;;  %s11279_s0 = smov 31  }
 0x3a3   : > { %v1280_v1 = vsel %vm11040_vm1, %v8531_v58, %v1278_v48  ;;  %v7182_v7 = vld [vmem:[#allocation3 + $0x44] sm:$0xf0]  ;;  %v1954_v58 = vrot.slane %v8543_v61, 4  ;;  %vm11045_vm1 = vcmask 228352  }
 0x3a4   : > { %1288 = vst [vmem:[#allocation3 + $0x18] sm:$0xff] %v1280_v1  ;;  %v8958_v41 = vpop.permute.xlu1 %2748  ;;  %v8960_v45 = vpop.permute.xlu2 %2828  ;;  %v6458_v53 = vor.u32 %v7182_v7, %v6457_v27 }
 0x3a5   : > { %v11042_v26 = vrot.slane %v8958_v41, 4  ;;  %v11044_v46 = vrot.slane %v8960_v45, 4  ;;  %1430 = vrot.lane.b32.xlu0 %v8742_v8, %s11215_s19 }
 0x3a6   : > { %4103 = vmatpush.bf16.msra.mxu0 %v6458_v53 }
 0x3a7   : > { %v2758_v48 = vsel %vm1277_vm3, %v2754_v63, %v11042_v26  ;;  %v2838_v1 = vsel %vm1277_vm3, %v2834_v57, %v11044_v46  ;;  %v8973_v27 = vpop.permute.xlu0 %1948  ;;  %v6433_v57 = vld [vmem:[#allocation3] sm:$0xf] }
 0x3a8   : > { %v2760_v7 = vsel %vm11041_vm6, %v8600_v16, %v2758_v48  ;;  %v2840_v37 = vsel %vm11043_vm10, %v8606_v17, %v2838_v1  ;;  %v11046_v53 = vrot.slane %v8973_v27, 4  ;;  %v2714_v48 = vrot.slane %v8612_v21, 4 }
 0x3a9   : > { %2768 = vst [vmem:[#allocation3 + $0x390] sm:$0xff] %v2760_v7  ;;  %v2674_v1 = vrot.slane %v8617_v22, 4  ;;  %vm11049_vm6 = vcmask 113664   ;;  %vm11054_vm10 = vcmask 121856  }
 0x3aa   : > { %2848 = vst [vmem:[#allocation3 + $0x3c0] sm:$0xff] %v2840_v37  ;;  %v1958_v63 = vsel %vm1277_vm3, %v1954_v58, %v11046_v53  ;;  %1350 = vrot.lane.b32.xlu2 %v8742_v8, %s11210_s20  ;;  %1910 = vrot.lane.b32.xlu1 %v8742_v8, %s11206_s27  ;;  %s11272_s27 = smov 16  }
 0x3ab   : > { %v1960_v16 = vsel %vm11045_vm1, %v8543_v61, %v1958_v63  ;;  %v7176_v17 = vld [vmem:[#allocation3 + $0x14] sm:$0xf0]  ;;  %v8999_v61 = vld [vmem:[#allocation2 + $0x30] sm:$0xff]  ;;  %v2794_v63 = vrot.slane %v8582_v12, 4  ;;  %vm11051_vm1 = vcmask 97280  }
 0x3ac   : > { %1968 = vst [vmem:[#allocation3 + $0x1b0] sm:$0xff] %v1960_v16  ;;  %v8991_v37 = vpop.permute.xlu1 %2708  ;;  %v8993_v7 = vpop.permute.xlu2 %2668  ;;  %v6434_v58 = vor.u32 %v7176_v17, %v6433_v57  ;;  %v9017_v39 = vpack.c.bf16 %v8999_v61, %v8734_v49 }
 0x3ad   : > { %v11050_v26 = vrot.slane %v8991_v37, 4  ;;  %v11057_v46 = vrot.slane %v8993_v7, 4  ;;  %1870 = vrot.lane.b32.xlu0 %v8742_v8, %s11221_s12 }
 0x3ae   : > { %4104 = vmatpush.bf16.msra.mxu0 %v6434_v58 }
 0x3af   : > { %v2718_v16 = vsel %vm1277_vm3, %v2714_v48, %v11050_v26  ;;  %v2678_v57 = vsel %vm1277_vm3, %v2674_v1, %v11057_v46  ;;  %v9008_v17 = vpop.permute.xlu0 %2788 }
 0x3b0   : > { %v2720_v53 = vsel %vm11049_vm6, %v8612_v21, %v2718_v16  ;;  %v2680_v29 = vsel %vm11054_vm10, %v8617_v22, %v2678_v57  ;;  %v11052_v58 = vrot.slane %v9008_v17, 4  ;;  %v2434_v22 = vrot.slane %v8625_v25, 4 }
 0x3b1   : > { %2728 = vst [vmem:[#allocation3 + $0x378] sm:$0xff] %v2720_v53  ;;  %vm2439_vm6 = vcmask 506880   ;;  %v2594_v16 = vrot.slane %v8593_v15, 4  ;;  %vm11061_vm10 = vcmask 490496  }
 0x3b2   : > { %2688 = vst [vmem:[#allocation3 + $0x360] sm:$0xff] %v2680_v29  ;;  %v2798_v48 = vsel %vm1277_vm3, %v2794_v63, %v11052_v58  ;;  %1269 = vrot.lane.b32.xlu2 %v8742_v8, %s11213_s5  ;;  %2430 = vrot.lane.b32.xlu1 %v9017_v39, %s11220_s10  ;;  %v2634_v29 = vrot.slane %v8635_v10, 4 }
 0x3b3   : > { %v2800_v21 = vsel %vm11051_vm1, %v8582_v12, %v2798_v48  ;;  %vm11059_vm1 = vcmask 474112  }
 0x3b4   : > { %2808 = vst [vmem:[#allocation3 + $0x3a8] sm:$0xff] %v2800_v21  ;;  %v9029_v49 = vpop.permute.xlu1 %2428  ;;  %v9031_v53 = vpop.permute.xlu2 %2628 }
 0x3b5   : > { %11252 = vst [vmem:[#allocation37_spill] sm:$0xff] %v9031_v53  ;;  %v11058_v1 = vrot.slane %v9029_v49, 4  ;;  %v11056_v63 = vrot.slane %v9031_v53, 4  ;;  %2350 = vrot.lane.b32.xlu0 %v9017_v39, %s11226_s3 }
 0x3b7   : > { %v2438_v12 = vsel %vm1277_vm3, %v2434_v22, %v11058_v1  ;;  %v2638_v57 = vsel %vm1277_vm3, %v2634_v29, %v11056_v63  ;;  %v9045_v48 = vpop.permute.xlu0 %2588  ;;  %v2514_v29 = vrot.slane %v8647_v31, 4 }
 0x3b8   : > { %11253 = vst [vmem:[#allocation38_spill] sm:$0xff] %v9045_v48  ;;  %v2440_v21 = vsel %vm2439_vm6, %v8625_v25, %v2438_v12  ;;  %v2640_v26 = vsel %vm11053_vm2, %v8635_v10, %v2638_v57  ;;  %v11055_v58 = vrot.slane %v9045_v48, 4  ;;  %v2554_v10 = vrot.slane %v8641_v30, 4  ;;  %v9067_v57 = vld [vmem:[#allocation2 + $0x38] sm:$0xff] }
 0x3b9   : > { %2448 = vst [vmem:[#allocation3 + $0x2d0] sm:$0xff] %v2440_v21  ;;  %vm11062_vm2 = vcmask 482304   ;;  %v9084_v63 = vpack.c.bf16 %v9067_v57, %v8999_v61 }
 0x3ba   : > { %2648 = vst [vmem:[#allocation3 + $0x348] sm:$0xff] %v2640_v26  ;;  %v2598_v22 = vsel %vm1277_vm3, %v2594_v16, %v11055_v58  ;;  %2030 = vrot.lane.b32.xlu2 %v8742_v8, %s11203_s28  ;;  %2390 = vrot.lane.b32.xlu1 %v9017_v39, %s11228_s8 }
 0x3bb   : > { %v2600_v25 = vsel %vm11059_vm1, %v8593_v15, %v2598_v22  ;;  %v2474_v15 = vrot.slane %v8608_v20, 4  ;;  %vm11064_vm1 = vcmask 498688  }
 0x3bc   : > { %2608 = vst [vmem:[#allocation3 + $0x330] sm:$0xff] %v2600_v25  ;;  %v9063_v12 = vpop.permute.xlu1 %2548  ;;  %v9065_v26 = vpop.permute.xlu2 %2508 }
 0x3bd   : > { %11254 = vst [vmem:[#allocation39_spill] sm:$0xff] %v9063_v12  ;;  %v11065_v16 = vrot.slane %v9063_v12, 4  ;;  %v11063_v21 = vrot.slane %v9065_v26, 4  ;;  %2310 = vrot.lane.b32.xlu0 %v9017_v39, %s11237_s22  ;;  %v2074_v12 = vrot.slane %v8661_v36, 4 }
 0x3be   : > { %11255 = vst [vmem:[#allocation40_spill] sm:$0xff] %v9065_v26 }
 0x3bf   : > { %v2558_v22 = vsel %vm1277_vm3, %v2554_v10, %v11065_v16  ;;  %v2518_v25 = vsel %vm1277_vm3, %v2514_v29, %v11063_v21  ;;  %v9080_v58 = vpop.permute.xlu0 %2468  ;;  %v2314_v29 = vrot.slane %v8659_v35, 4 }
 0x3c0   : > { %v2560_v46 = vsel %vm11062_vm2, %v8641_v30, %v2558_v22  ;;  %v2520_v1 = vsel %vm11061_vm10, %v8647_v31, %v2518_v25  ;;  %v11070_v55 = vrot.slane %v9080_v58, 4  ;;  %v2354_v31 = vrot.slane %v8653_v34, 4 }
 0x3c1   : > { %2568 = vst [vmem:[#allocation3 + $0x318] sm:$0xff] %v2560_v46  ;;  %vm11071_vm10 = vcmask 523264   ;;  %vm11069_vm2 = vcmask 867328  }
 0x3c2   : > { %2528 = vst [vmem:[#allocation3 + $0x300] sm:$0xff] %v2520_v1  ;;  %v2478_v10 = vsel %vm1277_vm3, %v2474_v15, %v11070_v55  ;;  %1990 = vrot.lane.b32.xlu2 %v8742_v8, %s11218_s2  ;;  %3070 = vrot.lane.b32.xlu1 %v9084_v63, %s11241_s7  ;;  %s11259_s7 = smov 11  }
 0x3c3   : > { %v2480_v30 = vsel %vm11064_vm1, %v8608_v20, %v2478_v10  ;;  %v2394_v20 = vrot.slane %v8619_v23, 4  ;;  %vm11072_vm1 = vcmask 515072  }
 0x3c4   : > { %2488 = vst [vmem:[#allocation3 + $0x2e8] sm:$0xff] %v2480_v30  ;;  %v9102_v46 = vpop.permute.xlu1 %2348  ;;  %v9104_v1 = vpop.permute.xlu2 %2308 }
 0x3c5   : > { %v11068_v15 = vrot.slane %v9102_v46, 4  ;;  %v11066_v8 = vrot.slane %v9104_v1, 4  ;;  %2190 = vrot.lane.b32.xlu0 %v9017_v39, %s11240_s18 }
 0x3c7   : > { %v2358_v22 = vsel %vm1277_vm3, %v2354_v31, %v11068_v15  ;;  %v2318_v25 = vsel %vm1277_vm3, %v2314_v29, %v11066_v8  ;;  %v9117_v10 = vpop.permute.xlu0 %2388  ;;  %v6793_v29 = vld [vmem:[#allocation3 + $0x2d0] sm:$0xf] }
 0x3c8   : > { %v2360_v30 = vsel %vm11071_vm10, %v8653_v34, %v2358_v22  ;;  %v2320_v21 = vsel %vm11069_vm2, %v8659_v35, %v2318_v25  ;;  %v11067_v16 = vrot.slane %v9117_v10, 4  ;;  %v7263_v22 = vld [vmem:[#allocation3 + $0x2d4] sm:$0xf]  ;;  %vm11075_vm2 = vcmask 883712  }
 0x3c9   : > { %2368 = vst [vmem:[#allocation3 + $0x2a0] sm:$0xff] %v2360_v30  ;;  %v2234_v30 = vrot.slane %v8665_v38, 4  ;;  %vm11077_vm10 = vcmask 891904  }
 0x3ca   : > { %2328 = vst [vmem:[#allocation3 + $0x288] sm:$0xff] %v2320_v21  ;;  %v2398_v31 = vsel %vm1277_vm3, %v2394_v20, %v11067_v16  ;;  %2470 = vrot.lane.b32.xlu2 %v9017_v39, %s11225_s15  ;;  %2230 = vrot.lane.b32.xlu1 %v9017_v39, %s11229_s9  ;;  %v2194_v21 = vrot.slane %v8671_v19, 4 }
 0x3cb   : > { %v2400_v34 = vsel %vm11072_vm1, %v8619_v23, %v2398_v31  ;;  %v7266_v35 = vld [vmem:[#allocation3 + $0x2e4] sm:$0xf0]  ;;  %v6795_v25 = vld [vmem:[#allocation3 + $0x2e8] sm:$0xf0]  ;;  %v2274_v31 = vrot.slane %v8637_v28, 4  ;;  %vm11078_vm1 = vcmask 875520  }
 0x3cc   : > { %2408 = vst [vmem:[#allocation3 + $0x2b8] sm:$0xff] %v2400_v34  ;;  %v9135_v8 = vpop.permute.xlu1 %2228  ;;  %v9137_v20 = vpop.permute.xlu2 %2188  ;;  %v6794_v16 = vor.u32 %v7266_v35, %v6793_v29  ;;  %v6798_v15 = vor.u32 %v7263_v22, %v6795_v25 }
 0x3cd   : > { %v11073_v55 = vrot.slane %v9135_v8, 4  ;;  %v11074_v23 = vrot.slane %v9137_v20, 4  ;;  %2110 = vrot.lane.b32.xlu0 %v9017_v39, %s11233_s14 }
 0x3ce   : > { %4110 = vmatpush.bf16.msra.mxu1 %v6794_v16  ;;  %4162 = vmatpush.bf16.msrb.mxu0 %v6798_v15 }
 0x3cf   : > { %v2238_v34 = vsel %vm1277_vm3, %v2234_v30, %v11073_v55  ;;  %v2198_v29 = vsel %vm1277_vm3, %v2194_v21, %v11074_v23  ;;  %v9150_v35 = vpop.permute.xlu0 %2268 }
 0x3d0   : > { %v2240_v22 = vsel %vm11075_vm2, %v8665_v38, %v2238_v34  ;;  %v2200_v25 = vsel %vm11077_vm10, %v8671_v19, %v2198_v29  ;;  %v11076_v16 = vrot.slane %v9150_v35, 4  ;;  %v6769_v30 = vld [vmem:[#allocation3 + $0x2a0] sm:$0xf]  ;;  %v7257_v21 = vld [vmem:[#allocation3 + $0x2a4] sm:$0xf]  ;;  %v2114_v29 = vrot.slane %v8676_v43, 4 }
 0x3d1   : > { %2248 = vst [vmem:[#allocation3 + $0x258] sm:$0xff] %v2240_v22  ;;  %v3114_v22 = vrot.slane %v8690_v54, 4  ;;  %vm11081_vm2 = vcmask 908288   ;;  %vm11083_vm10 = vcmask 744448  }
 0x3d2   : > { %2208 = vst [vmem:[#allocation3 + $0x240] sm:$0xff] %v2200_v25  ;;  %v2278_v15 = vsel %vm1277_vm3, %v2274_v31, %v11076_v16  ;;  %2270 = vrot.lane.b32.xlu2 %v9017_v39, %s11231_s13  ;;  %2990 = vrot.lane.b32.xlu1 %v9084_v63, %s11246_s29  ;;  %s11262_s29 = smov 13  }
 0x3d3   : > { %v2280_v38 = vsel %vm11078_vm1, %v8637_v28, %v2278_v15  ;;  %v7260_v19 = vld [vmem:[#allocation3 + $0x2b4] sm:$0xf0]  ;;  %v6771_v34 = vld [vmem:[#allocation3 + $0x2b8] sm:$0xf0]  ;;  %v2154_v15 = vrot.slane %v8649_v33, 4  ;;  %vm11090_vm1 = vcmask 900096  }
 0x3d4   : > { %2288 = vst [vmem:[#allocation3 + $0x270] sm:$0xff] %v2280_v38  ;;  %v9168_v25 = vpop.permute.xlu1 %2108  ;;  %v9170_v31 = vpop.permute.xlu2 %3108  ;;  %v6770_v55 = vor.u32 %v7260_v19, %v6769_v30  ;;  %v6774_v23 = vor.u32 %v7257_v21, %v6771_v34 }
 0x3d5   : > { %v11080_v16 = vrot.slane %v9168_v25, 4  ;;  %v11082_v28 = vrot.slane %v9170_v31, 4  ;;  %2910 = vrot.lane.b32.xlu0 %v9084_v63, %s11202_s11  ;;  %s11260_s11 = smov 12  }
 0x3d6   : > { %4111 = vmatpush.bf16.msra.mxu1 %v6770_v55  ;;  %4163 = vmatpush.bf16.msrb.mxu0 %v6774_v23 }
 0x3d7   : > { %v2118_v38 = vsel %vm1277_vm3, %v2114_v29, %v11080_v16  ;;  %v3118_v30 = vsel %vm1277_vm3, %v3114_v22, %v11082_v28  ;;  %v9183_v19 = vpop.permute.xlu0 %2148  ;;  %v7254_v29 = vld [vmem:[#allocation3 + $0x284] sm:$0xf0] }
 0x3d8   : > { %v2120_v21 = vsel %vm11081_vm2, %v8676_v43, %v2118_v38  ;;  %v3120_v34 = vsel %vm11083_vm10, %v8690_v54, %v3118_v30  ;;  %v11079_v55 = vrot.slane %v9183_v19, 4  ;;  %v6747_v38 = vld [vmem:[#allocation3 + $0x288] sm:$0xf0]  ;;  %v2994_v30 = vrot.slane %v8728_v11, 4  ;;  %v6723_v48 = vld [vmem:[#allocation3 + $0x258] sm:$0xf0] }
 0x3d9   : > { %2128 = vst [vmem:[#allocation3 + $0x210] sm:$0xff] %v2120_v21  ;;  %v3034_v21 = vrot.slane %v8769_v9, 4  ;;  %vm3039_vm2 = vcmask 760832   ;;  %vm11093_vm10 = vcmask 769024   ;;  %v6721_v26 = vld [vmem:[#allocation3 + $0x240] sm:$0xf] }
 0x3da   : > { %3128 = vst [vmem:[#allocation3 + $0x468] sm:$0xff] %v3120_v34  ;;  %v2158_v23 = vsel %vm1277_vm3, %v2154_v15, %v11079_v55  ;;  %3110 = vrot.lane.b32.xlu2 %v9084_v63, %s11244_s24  ;;  %2150 = vrot.lane.b32.xlu1 %v9017_v39, %s11236_s1  ;;  %s11256_s24 = smov 93  }
 0x3db   : > { %v2160_v43 = vsel %vm11090_vm1, %v8649_v33, %v2158_v23  ;;  %v6745_v54 = vld [vmem:[#allocation3 + $0x270] sm:$0xf]  ;;  %v7251_v22 = vld [vmem:[#allocation3 + $0x274] sm:$0xf]  ;;  %v7248_v23 = vld [vmem:[#allocation3 + $0x254] sm:$0xf0] }
 0x3dc   : > { %2168 = vst [vmem:[#allocation3 + $0x228] sm:$0xff] %v2160_v43  ;;  %v9201_v34 = vpop.permute.xlu1 %3028  ;;  %v9203_v15 = vpop.permute.xlu2 %2988  ;;  %v6746_v55 = vor.u32 %v7254_v29, %v6745_v54  ;;  %v6750_v16 = vor.u32 %v7251_v22, %v6747_v38  ;;  %v7245_v43 = vld [vmem:[#allocation3 + $0x244] sm:$0xf]  ;;  %vm11094_vm1 = vcmask 916480   ;;  %v6722_v38 = vor.u32 %v7248_v23, %v6721_v26 }
 0x3dd   : > { %v11101_v28 = vrot.slane %v9201_v34, 4  ;;  %v11100_v33 = vrot.slane %v9203_v15, 4  ;;  %2070 = vrot.lane.b32.xlu0 %v9017_v39, %s11239_s6  ;;  %v6726_v53 = vor.u32 %v7245_v43, %v6723_v48 }
 0x3de   : > { %4112 = vmatpush.bf16.msra.mxu1 %v6746_v55  ;;  %4164 = vmatpush.bf16.msrb.mxu0 %v6750_v16 }
 0x3df   : > { %v3038_v29 = vsel %vm1277_vm3, %v3034_v21, %v11101_v28  ;;  %v2998_v54 = vsel %vm1277_vm3, %v2994_v30, %v11100_v33  ;;  %v9216_v22 = vpop.permute.xlu0 %2068  ;;  %v6651_v33 = vld [vmem:[#allocation3 + $0x1c8] sm:$0xf0] }
 0x3e0   : > { %v3040_v39 = vsel %vm3039_vm2, %v8769_v9, %v3038_v29  ;;  %v3000_v16 = vsel %vm11093_vm10, %v8728_v11, %v2998_v54  ;;  %v11096_v55 = vrot.slane %v9216_v22, 4  ;;  %v2855_v9 = vld [vmem:[#allocation2 + $0x28] sm:$0xff]  ;;  %v6697_v30 = vld [vmem:[#allocation3 + $0x210] sm:$0xf]  ;;  %v7239_v23 = vld [vmem:[#allocation3 + $0x214] sm:$0xf] }
 0x3e1   : > { %3048 = vst [vmem:[#allocation3 + $0x438] sm:$0xff] %v3040_v39  ;;  %v9233_v48 = vpack.c.bf16 %v8999_v61, %v2855_v9  ;;  %vm2919_vm10 = vcmask 785408   ;;  %v11258_v9 = vrot.slane %v8704_v14, 4 }
 0x3e2   : > { %3008 = vst [vmem:[#allocation3 + $0x420] sm:$0xff] %v3000_v16  ;;  %v2078_v21 = vsel %vm1277_vm3, %v2074_v12, %v11096_v55  ;;  %3030 = vrot.lane.b32.xlu2 %v9084_v63, %s11256_s24  ;;  %2950 = vrot.lane.b32.xlu1 %v9084_v63, %s11201_s25  ;;  %v2914_v16 = vrot.slane %v8821_v2, 4  ;;  %s11257_s25 = smov 10   ;;  %v2954_v55 = vrot.slane %v8730_v13, 4  ;;  %s11265_s24 = smov 32  }
 0x3e3   : > { %v2080_v11 = vsel %vm11094_vm1, %v8661_v36, %v2078_v21  ;;  %4113 = vmatpush.bf16.msra.mxu1 %v6722_v38  ;;  %4165 = vmatpush.bf16.msrb.mxu0 %v6726_v53  ;;  %v7242_v26 = vld [vmem:[#allocation3 + $0x224] sm:$0xf0]  ;;  %v6699_v43 = vld [vmem:[#allocation3 + $0x228] sm:$0xf0]  ;;  %v3074_v38 = vrot.slane %v8692_v56, 4  ;;  %vm3079_vm1 = vcmask 752640  }
 0x3e4   : > { %2088 = vst [vmem:[#allocation3 + $0x1f8] sm:$0xff] %v2080_v11  ;;  %v9235_v12 = vpop.permute.xlu1 %2908  ;;  %v9237_v29 = vpop.permute.xlu2 %1790  ;;  %v6698_v54 = vor.u32 %v7242_v26, %v6697_v30  ;;  %v6702_v39 = vor.u32 %v7239_v23, %v6699_v43 }
 0x3e5   : > { %v11097_v36 = vrot.slane %v9235_v12, 4  ;;  %v11095_v53 = vrot.slane %v9237_v29, 4  ;;  %2870 = vrot.lane.b32.xlu0 %v9233_v48, %s11257_s25 }
 0x3e7   : > { %v2918_v21 = vsel %vm1277_vm3, %v2914_v16, %v11097_v36  ;;  %v1801_v30 = vsel %vm1277_vm3, %v11258_v9, %v11095_v53  ;;  %4114 = vmatpush.bf16.msra.mxu1 %v6698_v54  ;;  %4166 = vmatpush.bf16.msrb.mxu0 %v6702_v39  ;;  %v9253_v11 = vpop.permute.xlu0 %3068  ;;  %v6673_v54 = vld [vmem:[#allocation3 + $0x1e0] sm:$0xf]  ;;  %v7233_v39 = vld [vmem:[#allocation3 + $0x1e4] sm:$0xf] }
 0x3e8   : > { %v2920_v26 = vsel %vm2919_vm10, %v8821_v2, %v2918_v21  ;;  %v1802_v23 = vsel %vm11098_vm0, %v8704_v14, %v1801_v30  ;;  %v11104_v43 = vrot.slane %v9253_v11, 4  ;;  %vm2959_vm0 = vcmask 777216  }
 0x3e9   : > { %2928 = vst [vmem:[#allocation3 + $0x3f0] sm:$0xff] %v2920_v26 }
 0x3ea   : > { %1809 = vst [vmem:[#allocation3 + $0x158] sm:$0xff] %v1802_v23  ;;  %v3078_v16 = vsel %vm1277_vm3, %v3074_v38, %v11104_v43  ;;  %2830 = vrot.lane.b32.xlu2 %v9233_v48, %s11259_s7  ;;  %2790 = vrot.lane.b32.xlu1 %v9233_v48, %s11260_s11 }
 0x3eb   : > { %v3080_v2 = vsel %vm3079_vm1, %v8692_v56, %v3078_v16  ;;  %v7236_v14 = vld [vmem:[#allocation3 + $0x1f4] sm:$0xf0]  ;;  %v6675_v21 = vld [vmem:[#allocation3 + $0x1f8] sm:$0xf0]  ;;  %v6649_v56 = vld [vmem:[#allocation3 + $0x1b0] sm:$0xf] }
 0x3ec   : > { %3088 = vst [vmem:[#allocation3 + $0x450] sm:$0xff] %v3080_v2  ;;  %v9269_v9 = vpop.permute.xlu1 %1750  ;;  %v9271_v30 = vpop.permute.xlu2 %1670  ;;  %v6674_v26 = vor.u32 %v7236_v14, %v6673_v54  ;;  %v6678_v38 = vor.u32 %v7233_v39, %v6675_v21  ;;  %v7227_v16 = vld [vmem:[#allocation3 + $0x1b4] sm:$0xf]  ;;  %v11263_v2 = vrot.slane %v8706_v40, 4  ;;  %v11264_v14 = vrot.slane %v8755_v18, 4 }
 0x3ed   : > { %11261 = vst [vmem:[#allocation41_spill] sm:$0xff] %v9271_v30  ;;  %v11099_v23 = vrot.slane %v9269_v9, 4  ;;  %v11102_v53 = vrot.slane %v9271_v30, 4  ;;  %2750 = vrot.lane.b32.xlu0 %v9233_v48, %s11262_s29 }
 0x3ee   : > { %4115 = vmatpush.bf16.msra.mxu1 %v6674_v26  ;;  %4167 = vmatpush.bf16.msrb.mxu0 %v6678_v38  ;;  %v9292_v26 = vpack.c.bf16 %v8999_v61, %v8999_v61 }
 0x3ef   : > { %v1761_v54 = vsel %vm1277_vm3, %v11263_v2, %v11099_v23  ;;  %v1681_v39 = vsel %vm1277_vm3, %v11264_v14, %v11102_v53  ;;  %v9288_v21 = vpop.permute.xlu0 %2948  ;;  %v7230_v23 = vld [vmem:[#allocation3 + $0x1c4] sm:$0xf0]  ;;  %v6654_v14 = vor.u32 %v7227_v16, %v6651_v33  ;;  %v6625_v53 = vld [vmem:[#allocation3 + $0x180] sm:$0xf]  ;;  %v7224_v16 = vld [vmem:[#allocation3 + $0x194] sm:$0xf0] }
 0x3f0   : > { %v1762_v38 = vsel %vm1759_vm4, %v8706_v40, %v1761_v54  ;;  %v1682_v36 = vsel %vm11105_vm8, %v8755_v18, %v1681_v39  ;;  %v11103_v2 = vrot.slane %v9288_v21, 4  ;;  %v6650_v28 = vor.u32 %v7230_v23, %v6649_v56  ;;  %v7314_v40 = vld [vmem:[#allocation3 + $0x464] sm:$0xf0]  ;;  %v7221_v18 = vld [vmem:[#allocation3 + $0x184] sm:$0xf] }
 0x3f1   : > { %1769 = vst [vmem:[#allocation3 + $0x140] sm:$0xff] %v1762_v38  ;;  %v6627_v39 = vld [vmem:[#allocation3 + $0x198] sm:$0xf0]  ;;  %vm3159_vm8 = vcmask 736256  }
 0x3f2   : > { %1689 = vst [vmem:[#allocation3 + $0x110] sm:$0xff] %v1682_v36  ;;  %v2958_v61 = vsel %vm1277_vm3, %v2954_v55, %v11103_v2  ;;  %3150 = vrot.lane.b32.xlu2 %v9084_v63, %s11207_s26  ;;  %1792 = vrot.lane.b32.xlu1 %v9292_v26, %s11265_s24  ;;  %v6987_v36 = vld [vmem:[#allocation3 + $0x468] sm:$0xf0]  ;;  %s11268_s26 = smov 14   ;;  %s11271_s24 = smov 15  }
 0x3f3   : > { %v2960_v54 = vsel %vm2959_vm0, %v8730_v13, %v2958_v61  ;;  %4116 = vmatpush.bf16.msra.mxu1 %v6650_v28  ;;  %4168 = vmatpush.bf16.msrb.mxu0 %v6654_v14  ;;  %v6985_v33 = vld [vmem:[#allocation3 + $0x450] sm:$0xf]  ;;  %v7311_v23 = vld [vmem:[#allocation3 + $0x454] sm:$0xf]  ;;  %v6626_v13 = vor.u32 %v7224_v16, %v6625_v53  ;;  %v6630_v28 = vor.u32 %v7221_v18, %v6627_v39  ;;  %v6961_v14 = vld [vmem:[#allocation3 + $0x420] sm:$0xf] }
 0x3f4   : > { %2968 = vst [vmem:[#allocation3 + $0x408] sm:$0xff] %v2960_v54  ;;  %v9308_v56 = vpop.permute.xlu1 %1630  ;;  %v9310_v55 = vpop.permute.xlu2 %1590  ;;  %v6986_v63 = vor.u32 %v7314_v40, %v6985_v33  ;;  %v6990_v38 = vor.u32 %v7311_v23, %v6987_v36  ;;  %v7308_v61 = vld [vmem:[#allocation3 + $0x434] sm:$0xf0]  ;;  %v3154_v54 = vrot.slane %v8781_v0, 4  ;;  %v11269_v40 = vrot.slane %v8757_v44, 4 }
 0x3f5   : > { %11266 = vst [vmem:[#allocation42_spill] sm:$0xff] %v9308_v56  ;;  %v11106_v2 = vrot.slane %v9308_v56, 4  ;;  %v11108_v43 = vrot.slane %v9310_v55, 4  ;;  %2710 = vrot.lane.b32.xlu0 %v9233_v48, %s11268_s26  ;;  %v11270_v23 = vrot.slane %v8809_v32, 4  ;;  %v7305_v18 = vld [vmem:[#allocation3 + $0x424] sm:$0xf] }
 0x3f6   : > { %11267 = vst [vmem:[#allocation43_spill] sm:$0xff] %v9310_v55  ;;  %4123 = vmatpush.bf16.msra.mxu2 %v6986_v63  ;;  %v6963_v16 = vld [vmem:[#allocation3 + $0x438] sm:$0xf0] }
 0x3f7   : > { %v1641_v33 = vsel %vm1277_vm3, %v11269_v40, %v11106_v2  ;;  %v1601_v36 = vsel %vm1277_vm3, %v11270_v23, %v11108_v43  ;;  %4117 = vmatpush.bf16.msra.mxu1 %v6626_v13  ;;  %4169 = vmatpush.bf16.msrb.mxu0 %v6630_v28  ;;  %v9327_v53 = vpop.permute.xlu0 %3148  ;;  %v6962_v2 = vor.u32 %v7308_v61, %v6961_v14  ;;  %v6937_v28 = vld [vmem:[#allocation3 + $0x3f0] sm:$0xf]  ;;  %v7299_v14 = vld [vmem:[#allocation3 + $0x3f4] sm:$0xf] }
 0x3f8   : > { %v1642_v63 = vsel %vm1639_vm9, %v8757_v44, %v1641_v33  ;;  %v1602_v39 = vsel %vm11120_vm14, %v8809_v32, %v1601_v36  ;;  %v11109_v40 = vrot.slane %v9327_v53, 4  ;;  %v6966_v44 = vor.u32 %v7305_v18, %v6963_v16 }
 0x3f9   : > { %1649 = vst [vmem:[#allocation3 + $0xf8] sm:$0xff] %v1642_v63  ;;  %vm4074_vm14 = vcmask 64512  }
 0x3fa   : > { %1609 = vst [vmem:[#allocation3 + $0xe0] sm:$0xff] %v1602_v39  ;;  %v3158_v13 = vsel %vm1277_vm3, %v3154_v54, %v11109_v40  ;;  %2670 = vrot.lane.b32.xlu2 %v9233_v48, %s11271_s24  ;;  %2630 = vrot.lane.b32.xlu1 %v9233_v48, %s11272_s27  ;;  %s11275_s27 = smov 58   ;;  %v7293_v40 = vld [vmem:[#allocation3 + $0x3c4] sm:$0xf] }
 0x3fb   : > { %4175 = vmatpush.bf16.msrb.mxu1 %v6990_v38  ;;  %v9343_v32 = vsel %vm3159_vm8, %v8781_v0, %v3158_v13  ;;  %4124 = vmatpush.bf16.msra.mxu2 %v6962_v2  ;;  %v7302_v38 = vld [vmem:[#allocation3 + $0x404] sm:$0xf0]  ;;  %v6939_v61 = vld [vmem:[#allocation3 + $0x408] sm:$0xf0]  ;;  %v9354_v0 = vld [vmem:[#allocation11 + $0x8] sm:$0xff] }
 0x3fc   : > { %v9345_v33 = vpop.permute.xlu1 %1550  ;;  %v9347_v54 = vpop.permute.xlu2 %1390  ;;  %v6938_v23 = vor.u32 %v7302_v38, %v6937_v28  ;;  %v6942_v36 = vor.u32 %v7299_v14, %v6939_v61  ;;  %v3774_v63 = vunpack.c.l.b16 %v9343_v32  ;;  %v6913_v2 = vld [vmem:[#allocation3 + $0x3c0] sm:$0xf]  ;;  %v6603_v13 = vld [vmem:[#allocation3 + $0x168] sm:$0xf0]  ;;  %v11276_v28 = vrot.slane %v8848_v59, 4 }
 0x3fd   : > { %11273 = vst [vmem:[#allocation44_spill] sm:$0xff] %v9345_v33  ;;  %v11114_v18 = vrot.slane %v9345_v33, 4  ;;  %v11119_v16 = vrot.slane %v9347_v54, 4  ;;  %2590 = vrot.lane.b32.xlu0 %v9233_v48, %s11275_s27  ;;  %v11277_v14 = vrot.slane %v8881_v52, 4  ;;  %s11280_s27 = smov 60  }
 0x3fe   : > { %11274 = vst [vmem:[#allocation45_spill] sm:$0xff] %v9347_v54  ;;  %v3924_v39 = vpack.c.b16 %v3774_v63, %v3774_v63  ;;  %v7215_v54 = vld [vmem:[#allocation3 + $0x154] sm:$0xf] }
 0x3ff   : > { %4176 = vmatpush.bf16.msrb.mxu1 %v6966_v44  ;;  %v3331_v44 = vunpack.c.h.b16 %v9354_v0  ;;  %v1561_v38 = vsel %vm1277_vm3, %v11276_v28, %v11114_v18  ;;  %v1401_v61 = vsel %vm1277_vm3, %v11277_v14, %v11119_v16  ;;  %4125 = vmatpush.bf16.msra.mxu2 %v6938_v23  ;;  %v9367_v43 = vpop.permute.xlu0 %1830  ;;  %v7296_v28 = vld [vmem:[#allocation3 + $0x3d4] sm:$0xf0]  ;;  %v6915_v14 = vld [vmem:[#allocation3 + $0x3d8] sm:$0xf0]  ;;  %v6606_v23 = vor.u32 %v7215_v54, %v6603_v13 }
 0x400   : > { %v1562_v63 = vsel %vm1559_vm5, %v8848_v59, %v1561_v38  ;;  %v1402_v33 = vsel %vm11125_vm15, %v8881_v52, %v1401_v61  ;;  %v11122_v55 = vrot.slane %v9367_v43, 4  ;;  %v4080_v18 = vsel %vm1277_vm3, %v3924_v39, 0  ;;  %v6579_v38 = vld [vmem:[#allocation3 + $0x138] sm:$0xf0] }
 0x401   : > { %1569 = vst [vmem:[#allocation3 + $0xc8] sm:$0xff] %v1562_v63  ;;  %v6914_v56 = vor.u32 %v7296_v28, %v6913_v2  ;;  %4143 = vmatpush.bf16.msra.mxu3 %v4080_v18  ;;  %v9375_v16 = vpack.c.b16 %v3331_v44, %v3331_v44  ;;  %v11278_v59 = vrot.slane %v8736_v51, 4  ;;  %v7290_v2 = vld [vmem:[#allocation3 + $0x3a4] sm:$0xf0]  ;;  %v7209_v18 = vld [vmem:[#allocation3 + $0x124] sm:$0xf] }
 0x402   : > { %1409 = vst [vmem:[#allocation3 + $0x68] sm:$0xff] %v1402_v33  ;;  %1832 = vrot.lane.b32.xlu2 %v9292_v26, %s11279_s0  ;;  %2510 = vrot.lane.b32.xlu1 %v9233_v48, %s11280_s27  ;;  %v6891_v33 = vld [vmem:[#allocation3 + $0x3a8] sm:$0xf0]  ;;  %v6889_v44 = vld [vmem:[#allocation3 + $0x390] sm:$0xf]  ;;  %s11282_s0 = smov 74   ;;  %v6582_v63 = vor.u32 %v7209_v18, %v6579_v38 }
 0x403   : > { %4177 = vmatpush.bf16.msrb.mxu1 %v6942_v36  ;;  %v1841_v52 = vsel %vm1277_vm3, %v11278_v59, %v11122_v55  ;;  %v6918_v36 = vor.u32 %v7293_v40, %v6915_v14  ;;  %4126 = vmatpush.bf16.msra.mxu2 %v6914_v56  ;;  %v7287_v56 = vld [vmem:[#allocation3 + $0x394] sm:$0xf]  ;;  %v6555_v28 = vld [vmem:[#allocation3 + $0x108] sm:$0xf0]  ;;  %v7284_v59 = vld [vmem:[#allocation3 + $0x374] sm:$0xf0] }
 0x404   : > { %v1842_v54 = vsel %vm1839_vm7, %v8736_v51, %v1841_v52  ;;  %v9388_v39 = vpop.permute.xlu1 %1510  ;;  %v9390_v13 = vpop.permute.xlu2 %1350  ;;  %7007 = vmatmul.msk.bf16.vlgmr.msra.gmra.mxu3 %vm4074_vm14, %v9375_v16  ;;  %v6890_v51 = vor.u32 %v7290_v2, %v6889_v44  ;;  %v6894_v14 = vor.u32 %v7287_v56, %v6891_v33  ;;  %v7203_v52 = vld [vmem:[#allocation3 + $0xf4] sm:$0xf]  ;;  %v11284_v55 = vrot.slane %v8908_v6, 4  ;;  %v7281_v18 = vld [vmem:[#allocation3 + $0x364] sm:$0xf] }
 0x405   : > { %4149 = vmatpush.bf16.msrb.mxu3 %v6606_v23  ;;  %1849 = vst [vmem:[#allocation3 + $0x170] sm:$0xff] %v1842_v54  ;;  %v11126_v40 = vrot.slane %v9388_v39, 4  ;;  %v11127_v61 = vrot.slane %v9390_v13, 4  ;;  %1752 = vrot.lane.b32.xlu0 %v9292_v26, %s11282_s0  ;;  %v6865_v23 = vld [vmem:[#allocation3 + $0x360] sm:$0xf]  ;;  %vm11285_vm15 = vcmask 654336  }
 0x406   : > { %11281 = vst [vmem:[#allocation46_spill] sm:$0xff] %v9390_v13  ;;  %v6867_v33 = vld [vmem:[#allocation3 + $0x378] sm:$0xf0]  ;;  %s11288_s0 = smov 76  }
 0x407   : > { %4178 = vmatpush.bf16.msrb.mxu1 %v6918_v36  ;;  %v11283_v36 = vrot.slane %v8779_v47, 4  ;;  %v1361_v30 = vsel %vm1277_vm3, %v11284_v55, %v11127_v61  ;;  %4127 = vmatpush.bf16.msra.mxu2 %v6890_v51  ;;  %v9408_v2 = vpop.permute.xlu0 %1710  ;;  %v11286_v55 = vld [vmem:[#allocation35_spill] sm:$0xff] }
 0x408   : > { %v1362_v38 = vsel %vm1359_vm13, %v8908_v6, %v1361_v30  ;;  %v11128_v56 = vrot.slane %v9408_v2, 4  ;;  %v11287_v51 = vrot.slane %v11286_v55, 4  ;;  %v6841_v6 = vld [vmem:[#allocation3 + $0x330] sm:$0xf]  ;;  %v7197_v30 = vld [vmem:[#allocation3 + $0xc4] sm:$0xf] }
 0x409   : > { %v1521_v54 = vsel %vm1277_vm3, %v11283_v36, %v11126_v40  ;;  %4150 = vmatpush.bf16.msrb.mxu3 %v6582_v63  ;;  %v6866_v36 = vor.u32 %v7284_v59, %v6865_v23  ;;  %v6558_v40 = vor.u32 %v7203_v52, %v6555_v28  ;;  %1369 = vst [vmem:[#allocation3 + $0x50] sm:$0xff] %v1362_v38  ;;  %v7275_v28 = vld [vmem:[#allocation3 + $0x334] sm:$0xf]  ;;  %v7278_v52 = vld [vmem:[#allocation3 + $0x344] sm:$0xf0] }
 0x40a   : > { %v1522_v44 = vsel %vm11285_vm15, %v8779_v47, %v1521_v54  ;;  %v1721_v61 = vsel %vm1277_vm3, %v11287_v51, %v11128_v56  ;;  %1712 = vrot.lane.b32.xlu2 %v9292_v26, %s11251_s21  ;;  %1672 = vrot.lane.b32.xlu1 %v9292_v26, %s11288_s0  ;;  %v6870_v47 = vor.u32 %v7281_v18, %v6867_v33  ;;  %v6531_v54 = vld [vmem:[#allocation3 + $0xd8] sm:$0xf0]  ;;  %s11290_s21 = smov 77   ;;  %v11291_v51 = vld [vmem:[#allocation36_spill] sm:$0xff]  ;;  %v11293_v56 = vrot.slane %v8940_v4, 4  ;;  %s11296_s0 = smov 59  }
 0x40b   : > { %4179 = vmatpush.bf16.msrb.mxu1 %v6894_v14  ;;  %1529 = vst [vmem:[#allocation3 + $0xb0] sm:$0xff] %v1522_v44  ;;  %v1722_v63 = vsel %vm1719_vm11, %v11286_v55, %v1721_v61  ;;  %4128 = vmatpush.bf16.msra.mxu2 %v6866_v36  ;;  %v3775_v14 = vunpack.c.h.b16 %v9343_v32  ;;  %v6842_v61 = vor.u32 %v7278_v52, %v6841_v6  ;;  %v6843_v44 = vld [vmem:[#allocation3 + $0x348] sm:$0xf0]  ;;  %v6817_v32 = vld [vmem:[#allocation3 + $0x300] sm:$0xf]  ;;  %vm11294_vm15 = vcmask 1039360  }
 0x40c   : > { %1729 = vst [vmem:[#allocation3 + $0x128] sm:$0xff] %v1722_v63  ;;  %v9427_v23 = vpop.permute.xlu1 %1310  ;;  %v9429_v59 = vpop.permute.xlu2 %1269  ;;  %v6846_v38 = vor.u32 %v7275_v28, %v6843_v44  ;;  %v7272_v36 = vld [vmem:[#allocation3 + $0x314] sm:$0xf0]  ;;  %v7191_v55 = vld [vmem:[#allocation3 + $0x94] sm:$0xf] }
 0x40d   : > { %4151 = vmatpush.bf16.msrb.mxu3 %v6558_v40  ;;  %11289 = vst [vmem:[#allocation35_spill] sm:$0xff] %v9429_v59  ;;  %v11131_v18 = vrot.slane %v9427_v23, 4  ;;  %v11139_v33 = vrot.slane %v9429_v59, 4  ;;  %1632 = vrot.lane.b32.xlu0 %v9292_v26, %s11290_s21  ;;  %v6534_v40 = vor.u32 %v7197_v30, %v6531_v54  ;;  %v7269_v30 = vld [vmem:[#allocation3 + $0x304] sm:$0xf]  ;;  %v3925_v52 = vpack.c.b16 %v3775_v14, %v3775_v14 }
 0x40e   : > { %v6819_v28 = vld [vmem:[#allocation3 + $0x318] sm:$0xf0]  ;;  %v6818_v59 = vor.u32 %v7272_v36, %v6817_v32  ;;  %v11295_v14 = vrot.slane %v8835_v62, 4 }
 0x40f   : > { %4180 = vmatpush.bf16.msrb.mxu1 %v6870_v47  ;;  %v11292_v47 = vrot.slane %v11291_v51, 4  ;;  %v1281_v13 = vsel %vm1277_vm3, %v11293_v56, %v11139_v33  ;;  %4129 = vmatpush.bf16.msra.mxu2 %v6842_v61  ;;  %v9445_v6 = vpop.permute.xlu0 %1470  ;;  %v9452_v61 = vld [vmem:[#allocation11] sm:$0xff]  ;;  %v4083_v36 = vsel %vm1277_vm3, %v3925_v52, 0  ;;  %v11298_v52 = vrot.slane %v8973_v27, 4 }
 0x410   : > { %v1282_v44 = vsel %vm11294_vm15, %v8940_v4, %v1281_v13  ;;  %v6822_v4 = vor.u32 %v7269_v30, %v6819_v28  ;;  %v7185_v13 = vld [vmem:[#allocation3 + $0x64] sm:$0xf]  ;;  %vm11297_vm15 = vcmask 998400   ;;  %v6459_v28 = vld [vmem:[#allocation3 + $0x48] sm:$0xf0] }
 0x411   : > { %v1321_v63 = vsel %vm1277_vm3, %v11292_v47, %v11131_v18  ;;  %4152 = vmatpush.bf16.msrb.mxu3 %v6534_v40  ;;  %v11141_v47 = vrot.slane %v9445_v6, 4  ;;  %v6507_v18 = vld [vmem:[#allocation3 + $0xa8] sm:$0xf0]  ;;  %1289 = vst [vmem:[#allocation3 + $0x20] sm:$0xff] %v1282_v44  ;;  %v11299_v44 = vrot.slane %v8833_v42, 4 }
 0x412   : > { %v1322_v54 = vsel %vm11134_vm12, %v11291_v51, %v1321_v63  ;;  %v6510_v56 = vor.u32 %v7191_v55, %v6507_v18  ;;  %2550 = vrot.lane.b32.xlu2 %v9233_v48, %s11296_s0  ;;  %1592 = vrot.lane.b32.xlu1 %v9292_v26, %s11209_s16  ;;  %v3330_v18 = vunpack.c.l.b16 %v9354_v0  ;;  %v9470_v55 = vpack.c.bf16 %v9067_v57, %v9067_v57  ;;  %v6483_v51 = vld [vmem:[#allocation3 + $0x78] sm:$0xf0]  ;;  %v1497_v57 = vld [vmem:[#allocation2 + $0x30] sm:$0xff] }
 0x413   : > { %4181 = vmatpush.bf16.msrb.mxu1 %v6846_v38  ;;  %1329 = vst [vmem:[#allocation3 + $0x38] sm:$0xff] %v1322_v54  ;;  %v1481_v40 = vsel %vm1277_vm3, %v11295_v14, %v11141_v47  ;;  %v3329_v38 = vunpack.c.h.b16 %v9452_v61  ;;  %4130 = vmatpush.bf16.msra.mxu2 %v6818_v59  ;;  %v6486_v30 = vor.u32 %v7185_v13, %v6483_v51  ;;  %vm11301_vm12 = vcmask 211968  }
 0x414   : > { %v1482_v32 = vsel %vm11297_vm15, %v8835_v62, %v1481_v40  ;;  %v9472_v48 = vpop.permute.xlu1 %1950  ;;  %v9474_v26 = vpop.permute.xlu2 %2030  ;;  %v9478_v63 = vpack.c.b16 %v3330_v18, %v3330_v18  ;;  %vm11300_vm15 = vcmask 228352   ;;  %v7179_v18 = vld [vmem:[#allocation3 + $0x34] sm:$0xf] }
 0x415   : > { %4153 = vmatpush.bf16.msrb.mxu3 %v6510_v56  ;;  %1489 = vst [vmem:[#allocation3 + $0x98] sm:$0xff] %v1482_v32  ;;  %v9476_v0 = vpack.c.b16 %v3329_v38, %v3329_v38  ;;  %v11135_v62 = vrot.slane %v9472_v48, 4  ;;  %v11140_v59 = vrot.slane %v9474_v26, 4  ;;  %2472 = vrot.lane.b32.xlu0 %v9470_v55, %s11225_s15  ;;  %v9503_v38 = vpack.c.bf16 %v1497_v57, %v1497_v57  ;;  %v7219_v57 = vld [vmem:[#allocation3 + $0x16c] sm:$0xf0] }
 0x416   : > { %4131 = vmatmul.bf16.vlgmr.msra.gmra.mxu2 %v9478_v63  ;;  %v6462_v32 = vor.u32 %v7179_v18, %v6459_v28 }
 0x417   : > { %4182 = vmatpush.bf16.msrb.mxu1 %v6822_v4  ;;  %4195 = vmatpush.bf16.msrb.mxu2 %v4083_v36  ;;  %v1961_v54 = vsel %vm1277_vm3, %v11298_v52, %v11135_v62  ;;  %v2041_v56 = vsel %vm1277_vm3, %v11299_v44, %v11140_v59  ;;  %v9496_v14 = vpop.permute.xlu0 %1430  ;;  %v11302_v36 = vrot.slane %v8868_v24, 4  ;;  %v7173_v52 = vld [vmem:[#allocation3 + $0x4] sm:$0xf] }
 0x418   : > { %4118 = vmatmul.bf16.vlgmr.msra.gmra.mxu1 %v9476_v0  ;;  %v1962_v40 = vsel %vm11300_vm15, %v8973_v27, %v1961_v54  ;;  %v2042_v4 = vsel %vm11301_vm12, %v8833_v42, %v2041_v56  ;;  %v11143_v13 = vrot.slane %v9496_v14, 4  ;;  %v6435_v42 = vld [vmem:[#allocation3 + $0x18] sm:$0xf0]  ;;  %vm11303_vm12 = vcmask 1006592  }
 0x419   : > { %4154 = vmatpush.bf16.msrb.mxu3 %v6486_v30  ;;  %1969 = vst [vmem:[#allocation3 + $0x1b8] sm:$0xff] %v1962_v40  ;;  %v6438_v56 = vor.u32 %v7173_v52, %v6435_v42  ;;  %v6609_v40 = vld [vmem:[#allocation3 + $0x158] sm:$0xf]  ;;  %vm11307_vm15 = vcmask 236544  }
 0x41a   : > { %2049 = vst [vmem:[#allocation3 + $0x1e8] sm:$0xff] %v2042_v4  ;;  %v1441_v51 = vsel %vm1277_vm3, %v11302_v36, %v11143_v13  ;;  %2432 = vrot.lane.b32.xlu2 %v9470_v55, %s11220_s10  ;;  %1512 = vrot.lane.b32.xlu1 %v9503_v38, %s11250_s23  ;;  %s11304_s10 = smov 79   ;;  %v6610_v4 = vor.u32 %v7219_v57, %v6609_v40  ;;  %v3328_v40 = vunpack.c.l.b16 %v9452_v61 }
 0x41b   : > { %v1442_v27 = vsel %vm11303_vm12, %v8868_v24, %v1441_v51  ;;  %v11305_v24 = vrot.slane %v8866_v3, 4  ;;  %vm11308_vm12 = vcmask 220160  }
 0x41c   : > { %1449 = vst [vmem:[#allocation3 + $0x80] sm:$0xff] %v1442_v27  ;;  %v9516_v30 = vpop.permute.xlu1 %1910  ;;  %v9518_v28 = vpop.permute.xlu2 %1990  ;;  %v6585_v27 = vld [vmem:[#allocation3 + $0x128] sm:$0xf] }
 0x41d   : > { %4155 = vmatpush.bf16.msrb.mxu3 %v6462_v32  ;;  %v11137_v54 = vrot.slane %v9516_v30, 4  ;;  %v11138_v44 = vrot.slane %v9518_v28, 4  ;;  %1552 = vrot.lane.b32.xlu0 %v9503_v38, %s11304_s10  ;;  %v11306_v32 = vrot.slane %v8897_v5, 4 }
 0x41f   : > { %v1921_v18 = vsel %vm1277_vm3, %v11305_v24, %v11137_v54  ;;  %v2001_v36 = vsel %vm1277_vm3, %v11306_v32, %v11138_v44  ;;  %v9534_v51 = vpop.permute.xlu0 %1870  ;;  %v7213_v24 = vld [vmem:[#allocation3 + $0x13c] sm:$0xf0]  ;;  %v11309_v32 = vrot.slane %v8927_v60, 4 }
 0x420   : > { %v1922_v42 = vsel %vm11307_vm15, %v8866_v3, %v1921_v18  ;;  %v2002_v57 = vsel %vm11308_vm12, %v8897_v5, %v2001_v36  ;;  %v11136_v52 = vrot.slane %v9534_v51, 4  ;;  %v6586_v3 = vor.u32 %v7213_v24, %v6585_v27  ;;  %v2257_v27 = vld [vmem:[#allocation2 + $0x38] sm:$0xff] }
 0x421   : > { %4156 = vmatpush.bf16.msrb.mxu3 %v6438_v56  ;;  %1929 = vst [vmem:[#allocation3 + $0x1a0] sm:$0xff] %v1922_v42  ;;  %v9551_v5 = vpack.c.b16 %v3328_v40, %v3328_v40  ;;  %vm11310_vm15 = vcmask 244736   ;;  %v7207_v40 = vld [vmem:[#allocation3 + $0x10c] sm:$0xf0]  ;;  %v11311_v24 = vrot.slane %v9029_v49, 4  ;;  %vm11313_vm12 = vcmask 498688  }
 0x422   : > { %2009 = vst [vmem:[#allocation3 + $0x1d0] sm:$0xff] %v2002_v57  ;;  %v1881_v56 = vsel %vm1277_vm3, %v11309_v32, %v11136_v52  ;;  %2352 = vrot.lane.b32.xlu2 %v9470_v55, %s11226_s3  ;;  %1432 = vrot.lane.b32.xlu1 %v9503_v38, %s11215_s19  ;;  %v9585_v52 = vpack.c.bf16 %v2257_v27, %v2257_v27  ;;  %v6513_v27 = vld [vmem:[#allocation3 + $0x98] sm:$0xf] }
 0x423   : > { %v1882_v61 = vsel %vm11310_vm15, %v8927_v60, %v1881_v56  ;;  %4105 = vmatmul.bf16.vlgmr.msra.gmra.mxu0 %v9551_v5  ;;  %vm11315_vm15 = vcmask 523264  }
 0x424   : > { %1889 = vst [vmem:[#allocation3 + $0x188] sm:$0xff] %v1882_v61  ;;  %v9555_v18 = vpop.permute.xlu1 %2430  ;;  %v9557_v36 = vpop.permute.xlu2 %2470  ;;  %4157 = vmatmul.bf16.vlgmr.msrb.gmra.mxu3 %v9551_v5  ;;  %v6537_v61 = vld [vmem:[#allocation3 + $0xc8] sm:$0xf] }
 0x425   : > { %4201 = vmatpush.bf16.msra.mxu3 %v6610_v4  ;;  %v6561_v4 = vld [vmem:[#allocation3 + $0xf8] sm:$0xf]  ;;  %v11148_v42 = vrot.slane %v9555_v18, 4  ;;  %v11145_v57 = vrot.slane %v9557_v36, 4  ;;  %2392 = vrot.lane.b32.xlu0 %v9470_v55, %s11228_s8  ;;  %v11312_v55 = vrot.slane %v9080_v58, 4  ;;  %s11365_s8 = sld [smem:[#allocation56_spill]] }
 0x426   : > { %v6562_v60 = vor.u32 %v7207_v40, %v6561_v4  ;;  %7008 = vmatmul.msk.bf16.vlgmr.msrb.gmra.mxu2 %vm4074_vm14, %v9375_v16 }
 0x427   : > { %v2441_v32 = vsel %vm1277_vm3, %v11311_v24, %v11148_v42  ;;  %v2481_v56 = vsel %vm1277_vm3, %v11312_v55, %v11145_v57  ;;  %v7201_v24 = vld [vmem:[#allocation3 + $0xdc] sm:$0xf0]  ;;  %v11314_v55 = vrot.slane %v9102_v46, 4  ;;  %v11323_v57 = vld [vmem:[#allocation31_spill] sm:$0xff] }
 0x428   : > { %4183 = vmatmul.bf16.vlgmr.msrb.gmra.mxu1 %v9478_v63  ;;  %v2442_v4 = vsel %vm2439_vm6, %v9029_v49, %v2441_v32  ;;  %v2482_v40 = vsel %vm11313_vm12, %v9080_v58, %v2481_v56  ;;  %v6538_v58 = vor.u32 %v7201_v24, %v6537_v61  ;;  %v11317_v61 = vrot.slane %v9150_v35, 4 }
 0x429   : > { %4202 = vmatpush.bf16.msra.mxu3 %v6586_v3  ;;  %v9578_v3 = vpop.permute.xlu0 %2350  ;;  %2449 = vst [vmem:[#allocation3 + $0x2d8] sm:$0xff] %v2442_v4  ;;  %vm11318_vm12 = vcmask 515072  }
 0x42a   : > { %v11147_v62 = vrot.slane %v9578_v3, 4  ;;  %2489 = vst [vmem:[#allocation3 + $0x2f0] sm:$0xff] %v2482_v40  ;;  %2272 = vrot.lane.b32.xlu2 %v9585_v52, %s11231_s13  ;;  %2832 = vrot.lane.b32.xlu1 %v9585_v52, %s11259_s7  ;;  %v7195_v40 = vld [vmem:[#allocation3 + $0xac] sm:$0xf0]  ;;  %s11370_s13 = smov 16   ;;  %s11463_s7 = smov 31  }
 0x42c   : > { %v2361_v54 = vsel %vm1277_vm3, %v11314_v55, %v11147_v62  ;;  %v9600_v32 = vpop.permute.xlu2 %2270  ;;  %v6514_v55 = vor.u32 %v7195_v40, %v6513_v27 }
 0x42d   : > { %4203 = vmatpush.bf16.msra.mxu3 %v6562_v60  ;;  %v2362_v49 = vsel %vm11315_vm15, %v9102_v46, %v2361_v54  ;;  %v9598_v60 = vpop.permute.xlu1 %2390  ;;  %v11146_v4 = vrot.slane %v9600_v32, 4  ;;  %1472 = vrot.lane.b32.xlu0 %v9503_v38, %s11212_s4  ;;  %v11316_v46 = vrot.slane %v9117_v10, 4  ;;  %vm11319_vm15 = vcmask 875520   ;;  %s11440_s4 = sld [smem:[#allocation50_spill]] }
 0x42e   : > { %2369 = vst [vmem:[#allocation3 + $0x2a8] sm:$0xff] %v2362_v49  ;;  %v11142_v56 = vrot.slane %v9598_v60, 4  ;;  %v7189_v49 = vld [vmem:[#allocation3 + $0x7c] sm:$0xf0] }
 0x42f   : > { %v2281_v24 = vsel %vm1277_vm3, %v11317_v61, %v11146_v4  ;;  %v11320_v61 = vrot.slane %v9104_v1, 4  ;;  %v3077_v4 = vrot.slane %v11323_v57, 4 }
 0x430   : > { %v2401_v54 = vsel %vm1277_vm3, %v11316_v46, %v11142_v56  ;;  %v2282_v27 = vsel %vm11319_vm15, %v9150_v35, %v2281_v24  ;;  %v6801_v33 = vld [vmem:[#allocation3 + $0x2d8] sm:$0xf]  ;;  %v7264_v59 = vld [vmem:[#allocation3 + $0x2dc] sm:$0xf]  ;;  %vm11326_vm15 = vcmask 744448  }
 0x431   : > { %4204 = vmatpush.bf16.msra.mxu3 %v6538_v58  ;;  %v9616_v58 = vpop.permute.xlu0 %2310  ;;  %v2402_v44 = vsel %vm11318_vm12, %v9117_v10, %v2401_v54  ;;  %v7267_v46 = vld [vmem:[#allocation3 + $0x2ec] sm:$0xf0]  ;;  %v6803_v47 = vld [vmem:[#allocation3 + $0x2f0] sm:$0xf0]  ;;  %2289 = vst [vmem:[#allocation3 + $0x278] sm:$0xff] %v2282_v27  ;;  %vm11321_vm12 = vcmask 867328  }
 0x432   : > { %v11144_v40 = vrot.slane %v9616_v58, 4  ;;  %2409 = vst [vmem:[#allocation3 + $0x2c0] sm:$0xff] %v2402_v44  ;;  %2192 = vrot.lane.b32.xlu2 %v9585_v52, %s11240_s18  ;;  %1312 = vrot.lane.b32.xlu1 %v9503_v38, %s11200_s17  ;;  %v6802_v10 = vor.u32 %v7267_v46, %v6801_v33  ;;  %v6806_v35 = vor.u32 %v7264_v59, %v6803_v47  ;;  %v6489_v54 = vld [vmem:[#allocation3 + $0x68] sm:$0xf]  ;;  %v6465_v24 = vld [vmem:[#allocation3 + $0x38] sm:$0xf] }
 0x433   : > { %v7183_v33 = vld [vmem:[#allocation3 + $0x4c] sm:$0xf0]  ;;  %4170 = vmatmul.bf16.vlgmr.msrb.gmra.mxu0 %v9476_v0 }
 0x434   : > { %v2321_v56 = vsel %vm1277_vm3, %v11320_v61, %v11144_v40  ;;  %4214 = vmatpush.bf16.msra.mxu2 %v6802_v10  ;;  %4266 = vmatpush.bf16.msra.mxu1 %v6806_v35  ;;  %v3111_v13 = vpop.permute.xlu2 %3110  ;;  %v11322_v61 = vld [vmem:[#allocation28_spill] sm:$0xff]  ;;  %v6466_v47 = vor.u32 %v7183_v33, %v6465_v24 }
 0x435   : > { %4205 = vmatpush.bf16.msra.mxu3 %v6514_v55  ;;  %v2322_v44 = vsel %vm11321_vm12, %v9104_v1, %v2321_v56  ;;  %v6490_v55 = vor.u32 %v7189_v49, %v6489_v54  ;;  %v3071_v27 = vpop.permute.xlu1 %3070  ;;  %v3117_v40 = vrot.slane %v11322_v61, 4  ;;  %v3116_v42 = vrot.slane %v3111_v13, 4  ;;  %2312 = vrot.lane.b32.xlu0 %v9585_v52, %s11237_s22  ;;  %v6777_v35 = vld [vmem:[#allocation3 + $0x2a8] sm:$0xf]  ;;  %v7177_v54 = vld [vmem:[#allocation3 + $0x1c] sm:$0xf0]  ;;  %vm11327_vm12 = vmmov %vm11326_vm15 }
 0x436   : > { %2329 = vst [vmem:[#allocation3 + $0x290] sm:$0xff] %v2322_v44  ;;  %v3076_v62 = vrot.slane %v3071_v27, 4  ;;  %v11324_v1 = vrot.slane %v9253_v11, 4  ;;  %v11325_v49 = vrot.slane %v9170_v31, 4  ;;  %s11385_s22 = sld [smem:[#allocation55_spill]] }
 0x437   : > { %v3123_v46 = vsel %vm1277_vm3, %v3116_v42, %v3117_v40 }
 0x438   : > { %v3081_v59 = vsel %vm1277_vm3, %v11324_v1, %v3076_v62  ;;  %v3083_v56 = vsel %vm1277_vm3, %v3076_v62, %v3077_v4  ;;  %v3121_v57 = vsel %vm1277_vm3, %v11325_v49, %v3116_v42  ;;  %v7258_v62 = vld [vmem:[#allocation3 + $0x2ac] sm:$0xf]  ;;  %v3124_v33 = vsel %vm11327_vm12, %v3111_v13, %v3123_v46  ;;  %v6441_v49 = vld [vmem:[#allocation3 + $0x8] sm:$0xf] }
 0x439   : > { %4206 = vmatpush.bf16.msra.mxu3 %v6490_v55  ;;  %v9647_v10 = vpop.permute.xlu0 %2190  ;;  %v3082_v44 = vsel %vm3079_vm1, %v9253_v11, %v3081_v59  ;;  %v3084_v55 = vsel %vm3079_vm1, %v3071_v27, %v3083_v56  ;;  %v3122_v24 = vsel %vm11326_vm15, %v9170_v31, %v3121_v57  ;;  %v7261_v61 = vld [vmem:[#allocation3 + $0x2bc] sm:$0xf0]  ;;  %v6779_v4 = vld [vmem:[#allocation3 + $0x2c0] sm:$0xf0]  ;;  %v6753_v31 = vld [vmem:[#allocation3 + $0x278] sm:$0xf]  ;;  %v6442_v56 = vor.u32 %v7177_v54, %v6441_v49 }
 0x43a   : > { %3089 = vst [vmem:[#allocation3 + $0x458] sm:$0xff] %v3082_v44  ;;  %v2196_v42 = vrot.slane %v9647_v10, 4  ;;  %v6778_v40 = vor.u32 %v7261_v61, %v6777_v35  ;;  %v6782_v1 = vor.u32 %v7258_v62, %v6779_v4  ;;  %2872 = vrot.lane.b32.xlu2 %v9585_v52, %s11257_s25  ;;  %2152 = vrot.lane.b32.xlu1 %v9585_v52, %s11236_s1  ;;  %v7252_v11 = vld [vmem:[#allocation3 + $0x27c] sm:$0xf]  ;;  %v11328_v13 = vrot.slane %v9137_v20, 4  ;;  %s11360_s1 = smov 58  }
 0x43b   : > { %3090 = vst [vmem:[#allocation3 + $0x460] sm:$0xff] %v3084_v55  ;;  %vm11329_vm1 = vcmask 891904   ;;  %v11331_v54 = vrot.slane %v9135_v8, 4  ;;  %vm11333_vm15 = vcmask 883712   ;;  %vm11340_vm12 = vcmask 769024   ;;  %s11462_s25 = smov 32  }
 0x43c   : > { %3129 = vst [vmem:[#allocation3 + $0x470] sm:$0xff] %v3122_v24  ;;  %v2201_v27 = vsel %vm1277_vm3, %v11328_v13, %v2196_v42  ;;  %4215 = vmatpush.bf16.msra.mxu2 %v6778_v40  ;;  %4267 = vmatpush.bf16.msra.mxu1 %v6782_v1  ;;  %v3031_v35 = vpop.permute.xlu2 %3030  ;;  %v11330_v24 = vld [vmem:[#allocation29_spill] sm:$0xff] }
 0x43d   : > { %4207 = vmatpush.bf16.msra.mxu3 %v6466_v47  ;;  %v7255_v47 = vld [vmem:[#allocation3 + $0x28c] sm:$0xf0]  ;;  %v6755_v59 = vld [vmem:[#allocation3 + $0x290] sm:$0xf0]  ;;  %3130 = vst [vmem:[#allocation3 + $0x478] sm:$0xff] %v3124_v33  ;;  %v2202_v57 = vsel %vm11329_vm1, %v9137_v20, %v2201_v27  ;;  %v9667_v46 = vpop.permute.xlu1 %2230  ;;  %v3037_v61 = vrot.slane %v11330_v24, 4  ;;  %1392 = vrot.lane.b32.xlu0 %v9503_v38, %s11208_s30  ;;  %vm11341_vm1 = vmmov %vm11340_vm12 }
 0x43e   : > { %v6754_v44 = vor.u32 %v7255_v47, %v6753_v31  ;;  %v6758_v55 = vor.u32 %v7252_v11, %v6755_v59  ;;  %2209 = vst [vmem:[#allocation3 + $0x248] sm:$0xff] %v2202_v57  ;;  %v11153_v62 = vrot.slane %v9667_v46, 4  ;;  %v3036_v4 = vrot.slane %v3031_v35, 4 }
 0x43f   : > { %v11332_v33 = vrot.slane %v9201_v34, 4  ;;  %v11334_v59 = vrot.slane %v9168_v25, 4 }
 0x440   : > { %v2241_v20 = vsel %vm1277_vm3, %v11331_v54, %v11153_v62  ;;  %v3043_v1 = vsel %vm1277_vm3, %v3036_v4, %v3037_v61  ;;  %4216 = vmatpush.bf16.msra.mxu2 %v6754_v44  ;;  %4268 = vmatpush.bf16.msra.mxu1 %v6758_v55  ;;  %v11336_v55 = vld [vmem:[#allocation33_spill] sm:$0xff]  ;;  %v11337_v54 = vld [vmem:[#allocation34_spill] sm:$0xff] }
 0x441   : > { %4208 = vmatpush.bf16.msra.mxu3 %v6442_v56  ;;  %v3041_v40 = vsel %vm1277_vm3, %v11332_v33, %v3036_v4  ;;  %v9682_v49 = vpop.permute.xlu0 %2110  ;;  %v2242_v31 = vsel %vm11333_vm15, %v9135_v8, %v2241_v20  ;;  %v3044_v13 = vsel %vm3039_vm2, %v3031_v35, %v3043_v1  ;;  %v6993_v47 = vld [vmem:[#allocation3 + $0x458] sm:$0xf]  ;;  %v2997_v24 = vrot.slane %v11336_v55, 4 }
 0x442   : > { %v3042_v11 = vsel %vm3039_vm2, %v9201_v34, %v3041_v40  ;;  %v11150_v27 = vrot.slane %v9682_v49, 4  ;;  %2249 = vst [vmem:[#allocation3 + $0x260] sm:$0xff] %v2242_v31  ;;  %1352 = vrot.lane.b32.xlu2 %v9503_v38, %s11210_s20  ;;  %1271 = vrot.lane.b32.xlu1 %v9503_v38, %s11213_s5  ;;  %vm11335_vm2 = vcmask 908288   ;;  %v2917_v20 = vrot.slane %v11337_v54, 4  ;;  %s7957_s20 = smov 49  }
 0x443   : > { %3049 = vst [vmem:[#allocation3 + $0x440] sm:$0xff] %v3042_v11  ;;  %v7315_v8 = vld [vmem:[#allocation3 + $0x46c] sm:$0xf0]  ;;  %v11338_v33 = vrot.slane %v9203_v15, 4  ;;  %v11339_v1 = vrot.slane %v8960_v45, 4  ;;  %vm11342_vm15 = vcmask 89088  }
 0x444   : > { %4209 = vmatmul.bf16.vlgmr.msra.gmra.mxu3 %v9551_v5  ;;  %v2121_v56 = vsel %vm1277_vm3, %v11334_v59, %v11150_v27  ;;  %3050 = vst [vmem:[#allocation3 + $0x448] sm:$0xff] %v3044_v13  ;;  %v6994_v57 = vor.u32 %v7315_v8, %v6993_v47  ;;  %v9702_v44 = vpop.permute.xlu2 %2830  ;;  %v11343_v54 = vrot.slane %v9235_v12, 4  ;;  %v7204_v27 = vld [vmem:[#allocation3 + $0xfc] sm:$0xf] }
 0x445   : > { %v2122_v34 = vsel %vm11335_vm2, %v9168_v25, %v2121_v56  ;;  %v2991_v35 = vpop.permute.xlu1 %2990  ;;  %v2836_v4 = vrot.slane %v9702_v44, 4  ;;  %2232 = vrot.lane.b32.xlu0 %v9585_v52, %s11229_s9  ;;  %v6729_v13 = vld [vmem:[#allocation3 + $0x248] sm:$0xf]  ;;  %v7246_v47 = vld [vmem:[#allocation3 + $0x24c] sm:$0xf]  ;;  %vm11353_vm2 = vcmask 121856  }
 0x446   : > { %2129 = vst [vmem:[#allocation3 + $0x218] sm:$0xff] %v2122_v34  ;;  %4227 = vmatpush.bf16.msra.mxu0 %v6994_v57  ;;  %v2996_v61 = vrot.slane %v2991_v35, 4  ;;  %s11368_s9 = smov 29  }
 0x447   : > { %v2841_v31 = vsel %vm1277_vm3, %v11339_v1, %v2836_v4 }
 0x448   : > { %v3001_v25 = vsel %vm1277_vm3, %v11338_v33, %v2996_v61  ;;  %v3003_v40 = vsel %vm1277_vm3, %v2996_v61, %v2997_v24  ;;  %v2842_v8 = vsel %vm11342_vm15, %v8960_v45, %v2841_v31  ;;  %vm11366_vm15 = vcmask 261120  }
 0x449   : > { %v2911_v11 = vpop.permute.xlu0 %2910  ;;  %v3002_v59 = vsel %vm11340_vm12, %v9203_v15, %v3001_v25  ;;  %v3004_v56 = vsel %vm11341_vm1, %v2991_v35, %v3003_v40  ;;  %v7249_v57 = vld [vmem:[#allocation3 + $0x25c] sm:$0xf0]  ;;  %v6731_v55 = vld [vmem:[#allocation3 + $0x260] sm:$0xf0]  ;;  %2849 = vst [vmem:[#allocation3 + $0x3c8] sm:$0xff] %v2842_v8  ;;  %v11344_v40 = vld [vmem:[#allocation32_spill] sm:$0xff] }
 0x44a   : > { %v2916_v34 = vrot.slane %v2911_v11, 4  ;;  %3009 = vst [vmem:[#allocation3 + $0x428] sm:$0xff] %v3002_v59  ;;  %v6730_v24 = vor.u32 %v7249_v57, %v6729_v13  ;;  %v6734_v61 = vor.u32 %v7246_v47, %v6731_v55  ;;  %2752 = vrot.lane.b32.xlu2 %v9585_v52, %s11262_s29  ;;  %2672 = vrot.lane.b32.xlu1 %v9585_v52, %s11271_s24  ;;  %v11346_v47 = vrot.slane %v9327_v53, 4 }
 0x44b   : > { %3010 = vst [vmem:[#allocation3 + $0x430] sm:$0xff] %v3004_v56  ;;  %vm11358_vm12 = vcmask 97280   ;;  %vm11361_vm1 = vcmask 105472  }
 0x44c   : > { %v2921_v33 = vsel %vm1277_vm3, %v11343_v54, %v2916_v34  ;;  %v2923_v1 = vsel %vm1277_vm3, %v2916_v34, %v2917_v20  ;;  %4217 = vmatpush.bf16.msra.mxu2 %v6730_v24  ;;  %4269 = vmatpush.bf16.msra.mxu1 %v6734_v61  ;;  %v3151_v25 = vpop.permute.xlu2 %3150  ;;  %v3157_v20 = vrot.slane %v11344_v40, 4  ;;  %v7309_v54 = vld [vmem:[#allocation3 + $0x43c] sm:$0xf0] }
 0x44d   : > { %v2922_v45 = vsel %vm2919_vm10, %v9235_v12, %v2921_v33  ;;  %v2924_v15 = vsel %vm2919_vm10, %v2911_v11, %v2923_v1  ;;  %v9734_v35 = vpop.permute.xlu1 %2150  ;;  %v3156_v13 = vrot.slane %v3151_v25, 4  ;;  %2112 = vrot.lane.b32.xlu0 %v9585_v52, %s11233_s14  ;;  %v11345_v12 = vrot.slane %v9183_v19, 4  ;;  %v11350_v40 = vld [vmem:[#allocation30_spill] sm:$0xff] }
 0x44e   : > { %2929 = vst [vmem:[#allocation3 + $0x3f8] sm:$0xff] %v2922_v45  ;;  %v11154_v31 = vrot.slane %v9734_v35, 4  ;;  %vm11347_vm10 = vcmask 900096   ;;  %v11348_v45 = vrot.slane %v9216_v22, 4 }
 0x44f   : > { %2930 = vst [vmem:[#allocation3 + $0x400] sm:$0xff] %v2924_v15  ;;  %v3161_v59 = vsel %vm1277_vm3, %v11346_v47, %v3156_v13  ;;  %v3163_v56 = vsel %vm1277_vm3, %v3156_v13, %v3157_v20  ;;  %v2957_v20 = vrot.slane %v11350_v40, 4 }
 0x450   : > { %v2161_v11 = vsel %vm1277_vm3, %v11345_v12, %v11154_v31  ;;  %v9755_v57 = vsel %vm3159_vm8, %v9327_v53, %v3161_v59  ;;  %v9758_v55 = vsel %vm3159_vm8, %v3151_v25, %v3163_v56  ;;  %v6611_v53 = vld [vmem:[#allocation3 + $0x170] sm:$0xf0]  ;;  %vm11349_vm8 = vcmask 916480   ;;  %v7001_v31 = vld [vmem:[#allocation3 + $0x460] sm:$0xf] }
 0x451   : > { %v9749_v8 = vpop.permute.xlu0 %2070  ;;  %v2162_v34 = vsel %vm11347_vm10, %v9183_v19, %v2161_v11  ;;  %v6969_v61 = vld [vmem:[#allocation3 + $0x428] sm:$0xf]  ;;  %v3776_v1 = vunpack.c.l.b16 %v9755_v57  ;;  %3170 = vst [vmem:[#allocation3 + $0x490] sm:$0xff] %v9758_v55  ;;  %v7216_v11 = vld [vmem:[#allocation3 + $0x15c] sm:$0xf]  ;;  %vm11375_vm10 = vcmask 130048  }
 0x452   : > { %v11149_v24 = vrot.slane %v9749_v8, 4  ;;  %2169 = vst [vmem:[#allocation3 + $0x230] sm:$0xff] %v2162_v34  ;;  %v6970_v33 = vor.u32 %v7309_v54, %v6969_v61  ;;  %2032 = vrot.lane.b32.xlu2 %v9503_v38, %s11203_s28  ;;  %1992 = vrot.lane.b32.xlu1 %v9503_v38, %s11218_s2  ;;  %v6614_v34 = vor.u32 %v7216_v11, %v6611_v53  ;;  %s11362_s2 = smov 28  }
 0x453   : > { %v3926_v25 = vpack.c.b16 %v3776_v1, %v3776_v1 }
 0x454   : > { %v2081_v19 = vsel %vm1277_vm3, %v11348_v45, %v11149_v24  ;;  %4228 = vmatpush.bf16.msra.mxu0 %v6970_v33  ;;  %v9775_v12 = vpop.permute.xlu2 %2670  ;;  %v11352_v33 = vrot.slane %v8993_v7, 4  ;;  %v6587_v24 = vld [vmem:[#allocation3 + $0x140] sm:$0xf0] }
 0x455   : > { %v2082_v15 = vsel %vm11349_vm8, %v9216_v22, %v2081_v19  ;;  %v2951_v13 = vpop.permute.xlu1 %2950  ;;  %v11152_v59 = vrot.slane %v9775_v12, 4  ;;  %2792 = vrot.lane.b32.xlu0 %v9585_v52, %s11260_s11  ;;  %v4086_v56 = vsel %vm1277_vm3, %v3926_v25, 0  ;;  %v11351_v22 = vrot.slane %v9288_v21, 4  ;;  %v6705_v19 = vld [vmem:[#allocation3 + $0x218] sm:$0xf] }
 0x456   : > { %2089 = vst [vmem:[#allocation3 + $0x200] sm:$0xff] %v2082_v15  ;;  %v2956_v47 = vrot.slane %v2951_v13, 4  ;;  %4247 = vmatpush.bf16.msrb.mxu3 %v4086_v56  ;;  %v7240_v15 = vld [vmem:[#allocation3 + $0x21c] sm:$0xf]  ;;  %v7210_v25 = vld [vmem:[#allocation3 + $0x12c] sm:$0xf] }
 0x457   : > { %v2681_v1 = vsel %vm1277_vm3, %v11352_v33, %v11152_v59  ;;  %v11359_v59 = vrot.slane %v8958_v41, 4  ;;  %vm11376_vm8 = vcmask 482304  }
 0x458   : > { %v2961_v61 = vsel %vm1277_vm3, %v11351_v22, %v2956_v47  ;;  %v2963_v54 = vsel %vm1277_vm3, %v2956_v47, %v2957_v20  ;;  %v2682_v20 = vsel %vm11353_vm2, %v8993_v7, %v2681_v1  ;;  %v6681_v7 = vld [vmem:[#allocation3 + $0x1e8] sm:$0xf]  ;;  %vm11379_vm2 = vcmask 474112  }
 0x459   : > { %v9790_v45 = vpop.permute.xlu0 %2870  ;;  %v2962_v53 = vsel %vm2959_vm0, %v9288_v21, %v2961_v61  ;;  %v2964_v40 = vsel %vm2959_vm0, %v2951_v13, %v2963_v54  ;;  %v7243_v47 = vld [vmem:[#allocation3 + $0x22c] sm:$0xf0]  ;;  %v6707_v56 = vld [vmem:[#allocation3 + $0x230] sm:$0xf0]  ;;  %7009 = vmatmul.msk.bf16.vlgmr.msrb.gmra.mxu3 %vm4074_vm14, %v9375_v16  ;;  %v11354_v21 = vrot.slane %v8925_v50, 4  ;;  %v6590_v61 = vor.u32 %v7210_v25, %v6587_v24  ;;  %2689 = vst [vmem:[#allocation3 + $0x368] sm:$0xff] %v2682_v20 }
 0x45a   : > { %4253 = vmatpush.bf16.msra.mxu3 %v6614_v34  ;;  %v2876_v11 = vrot.slane %v9790_v45, 4  ;;  %2969 = vst [vmem:[#allocation3 + $0x410] sm:$0xff] %v2962_v53  ;;  %v6706_v22 = vor.u32 %v7243_v47, %v6705_v19  ;;  %v6710_v33 = vor.u32 %v7240_v15, %v6707_v56  ;;  %2712 = vrot.lane.b32.xlu2 %v9585_v52, %s11268_s26  ;;  %v7234_v34 = vld [vmem:[#allocation3 + $0x1ec] sm:$0xf]  ;;  %vm11355_vm0 = vcmask 80896  }
 0x45b   : > { %2970 = vst [vmem:[#allocation3 + $0x418] sm:$0xff] %v2964_v40  ;;  %1872 = vrot.lane.b32.xlu1 %v9503_v38, %s11221_s12  ;;  %v6563_v24 = vld [vmem:[#allocation3 + $0x110] sm:$0xf0]  ;;  %v7231_v25 = vld [vmem:[#allocation3 + $0x1cc] sm:$0xf0]  ;;  %v11356_v20 = vrot.slane %v9008_v17, 4 }
 0x45c   : > { %v2881_v13 = vsel %vm1277_vm3, %v11354_v21, %v2876_v11  ;;  %4218 = vmatpush.bf16.msra.mxu2 %v6706_v22  ;;  %4270 = vmatpush.bf16.msra.mxu1 %v6710_v33  ;;  %v1833_v53 = vpop.permute.xlu2 %1832  ;;  %v11357_v33 = vrot.slane %v9367_v43, 4 }
 0x45d   : > { %v2882_v54 = vsel %vm11355_vm0, %v8925_v50, %v2881_v13  ;;  %v7237_v1 = vld [vmem:[#allocation3 + $0x1fc] sm:$0xf0]  ;;  %v6683_v19 = vld [vmem:[#allocation3 + $0x200] sm:$0xf0]  ;;  %v9811_v15 = vpop.permute.xlu1 %2790  ;;  %v1837_v21 = vrot.slane %v1833_v53, 4  ;;  %2072 = vrot.lane.b32.xlu0 %v9585_v52, %s11239_s6  ;;  %v6566_v50 = vor.u32 %v7204_v27, %v6563_v24  ;;  %vm11383_vm0 = vcmask 490496  }
 0x45e   : > { %2889 = vst [vmem:[#allocation3 + $0x3e0] sm:$0xff] %v2882_v54  ;;  %v6682_v40 = vor.u32 %v7237_v1, %v6681_v7  ;;  %v6686_v47 = vor.u32 %v7234_v34, %v6683_v19  ;;  %4254 = vmatpush.bf16.msra.mxu3 %v6590_v61  ;;  %v11151_v56 = vrot.slane %v9811_v15, 4  ;;  %v6657_v34 = vld [vmem:[#allocation3 + $0x1b8] sm:$0xf]  ;;  %v6659_v61 = vld [vmem:[#allocation3 + $0x1d0] sm:$0xf0] }
 0x45f   : > { %v1843_v13 = vsel %vm1277_vm3, %v11357_v33, %v1837_v21  ;;  %v7198_v54 = vld [vmem:[#allocation3 + $0xcc] sm:$0xf]  ;;  %v6539_v1 = vld [vmem:[#allocation3 + $0xe0] sm:$0xf0]  ;;  %v6945_v24 = vld [vmem:[#allocation3 + $0x3f8] sm:$0xf]  ;;  %v6658_v21 = vor.u32 %v7231_v25, %v6657_v34 }
 0x460   : > { %v2801_v22 = vsel %vm1277_vm3, %v11356_v20, %v11151_v56  ;;  %4219 = vmatpush.bf16.msra.mxu2 %v6682_v40  ;;  %4271 = vmatpush.bf16.msra.mxu1 %v6686_v47  ;;  %v1844_v19 = vsel %vm1839_vm7, %v9367_v43, %v1843_v13  ;;  %v7228_v40 = vld [vmem:[#allocation3 + $0x1bc] sm:$0xf]  ;;  %v6633_v47 = vld [vmem:[#allocation3 + $0x188] sm:$0xf]  ;;  %v7222_v25 = vld [vmem:[#allocation3 + $0x18c] sm:$0xf]  ;;  %v6542_v13 = vor.u32 %v7198_v54, %v6539_v1 }
 0x461   : > { %v9824_v7 = vpop.permute.xlu0 %2750  ;;  %v2802_v27 = vsel %vm11358_vm12, %v9008_v17, %v2801_v22  ;;  %v7303_v20 = vld [vmem:[#allocation3 + $0x40c] sm:$0xf0]  ;;  %v7192_v56 = vld [vmem:[#allocation3 + $0x9c] sm:$0xf]  ;;  %1850 = vst [vmem:[#allocation3 + $0x178] sm:$0xff] %v1844_v19  ;;  %v6662_v43 = vor.u32 %v7228_v40, %v6659_v61  ;;  %vm11397_vm12 = vcmask 875520  }
 0x462   : > { %v11155_v53 = vrot.slane %v9824_v7, 4  ;;  %4255 = vmatpush.bf16.msra.mxu3 %v6566_v50  ;;  %2809 = vst [vmem:[#allocation3 + $0x3b0] sm:$0xff] %v2802_v27  ;;  %v6946_v33 = vor.u32 %v7303_v20, %v6945_v24  ;;  %2592 = vrot.lane.b32.xlu2 %v9585_v52, %s11360_s1  ;;  %v7225_v50 = vld [vmem:[#allocation3 + $0x19c] sm:$0xf0]  ;;  %v7312_v22 = vld [vmem:[#allocation3 + $0x45c] sm:$0xf] }
 0x463   : > { %2552 = vrot.lane.b32.xlu1 %v9585_v52, %s11296_s0  ;;  %v6921_v27 = vld [vmem:[#allocation3 + $0x3c8] sm:$0xf]  ;;  %v6995_v24 = vld [vmem:[#allocation3 + $0x470] sm:$0xf0]  ;;  %v6634_v54 = vor.u32 %v7225_v50, %v6633_v47  ;;  %v7306_v50 = vld [vmem:[#allocation3 + $0x42c] sm:$0xf] }
 0x464   : > { %v2761_v17 = vsel %vm1277_vm3, %v11359_v59, %v11155_v53  ;;  %4220 = vmatpush.bf16.msra.mxu2 %v6658_v21  ;;  %4229 = vmatpush.bf16.msra.mxu0 %v6946_v33  ;;  %v1713_v20 = vpop.permute.xlu2 %1712  ;;  %v7316_v53 = vld [vmem:[#allocation3 + $0x474] sm:$0xf0]  ;;  %v6515_v1 = vld [vmem:[#allocation3 + $0xb0] sm:$0xf0]  ;;  %v6998_v33 = vor.u32 %v7312_v22, %v6995_v24  ;;  %v6977_v24 = vld [vmem:[#allocation3 + $0x430] sm:$0xf] }
 0x465   : > { %v2762_v34 = vsel %vm11361_vm1, %v8958_v41, %v2761_v17  ;;  %v7297_v19 = vld [vmem:[#allocation3 + $0x3dc] sm:$0xf0]  ;;  %4272 = vmatpush.bf16.msra.mxu1 %v6662_v43  ;;  %v1793_v59 = vpop.permute.xlu1 %1792  ;;  %v1717_v40 = vrot.slane %v1713_v20, 4  ;;  %1952 = vrot.lane.b32.xlu0 %v9503_v38, %s11362_s2  ;;  %v6635_v41 = vld [vmem:[#allocation3 + $0x1a0] sm:$0xf0]  ;;  %v6518_v17 = vor.u32 %v7192_v56, %v6515_v1  ;;  %v4596_v47 = vld [vmem:[%s11365_s8] sm:$0xff] }
 0x466   : > { %2769 = vst [vmem:[#allocation3 + $0x398] sm:$0xff] %v2762_v34  ;;  %v6922_v62 = vor.u32 %v7297_v19, %v6921_v27  ;;  %4256 = vmatpush.bf16.msra.mxu3 %v6542_v13  ;;  %v1797_v61 = vrot.slane %v1793_v59, 4  ;;  %v6638_v21 = vor.u32 %v7222_v25, %v6635_v41  ;;  %v11363_v34 = vrot.slane %v9237_v29, 4  ;;  %v7310_v20 = vld [vmem:[#allocation3 + $0x444] sm:$0xf0] }
 0x467   : > { %v11364_v27 = vrot.slane %v9408_v2, 4  ;;  %v7002_v59 = vor.u32 %v7316_v53, %v7001_v31  ;;  %v6491_v31 = vld [vmem:[#allocation3 + $0x80] sm:$0xf0]  ;;  %v11367_v53 = vrot.slane %v8991_v37, 4  ;;  %vm11399_vm1 = vcmask 498688  }
 0x468   : > { %v1803_v43 = vsel %vm1277_vm3, %v11363_v34, %v1797_v61  ;;  %4221 = vmatpush.bf16.msra.mxu2 %v6634_v54  ;;  %4230 = vmatpush.bf16.msra.mxu0 %v6922_v62  ;;  %v6971_v62 = vld [vmem:[#allocation3 + $0x440] sm:$0xf0]  ;;  %v7186_v61 = vld [vmem:[#allocation3 + $0x6c] sm:$0xf]  ;;  %v6978_v54 = vor.u32 %v7310_v20, %v6977_v24  ;;  %v7304_v34 = vld [vmem:[#allocation3 + $0x414] sm:$0xf0] }
 0x469   : > { %v1723_v19 = vsel %vm1277_vm3, %v11364_v27, %v1717_v40  ;;  %v9850_v13 = vpop.permute.xlu0 %2710  ;;  %v1804_v56 = vsel %vm11366_vm15, %v9237_v29, %v1803_v43  ;;  %4273 = vmatpush.bf16.msra.mxu1 %v6638_v21  ;;  %v7291_v1 = vld [vmem:[#allocation3 + $0x3ac] sm:$0xf0]  ;;  %v6947_v21 = vld [vmem:[#allocation3 + $0x410] sm:$0xf0]  ;;  %v6494_v43 = vor.u32 %v7186_v61, %v6491_v31  ;;  %v3320_v20 = vld [vmem:[#allocation12] sm:$0xff]  ;;  %vm11401_vm15 = vcmask 654336  }
 0x46a   : > { %v1724_v25 = vsel %vm1719_vm11, %v9408_v2, %v1723_v19  ;;  %v2716_v22 = vrot.slane %v9850_v13, 4  ;;  %1810 = vst [vmem:[#allocation3 + $0x160] sm:$0xff] %v1804_v56  ;;  %4257 = vmatpush.bf16.msra.mxu3 %v6518_v17  ;;  %1912 = vrot.lane.b32.xlu2 %v9503_v38, %s11368_s9  ;;  %v6974_v2 = vor.u32 %v7306_v50, %v6971_v62  ;;  %vm11369_vm11 = vcmask 113664   ;;  %v7300_v19 = vld [vmem:[#allocation3 + $0x3fc] sm:$0xf]  ;;  %v11373_v62 = vld [vmem:[#allocation39_spill] sm:$0xff] }
 0x46b   : > { %1730 = vst [vmem:[#allocation3 + $0x130] sm:$0xff] %v1724_v25  ;;  %4599 = vperm.xlu1 %7514, %v4596_v47   ;;  %4222 = vmatmul.bf16.vlgmr.msra.gmra.mxu2 %v9476_v0  ;;  %v6953_v47 = vld [vmem:[#allocation3 + $0x400] sm:$0xf]  ;;  %v7180_v50 = vld [vmem:[#allocation3 + $0x3c] sm:$0xf]  ;;  %v11374_v31 = vrot.slane %v11373_v62, 4 }
 0x46c   : > { %4279 = vmatpush.bf16.msrb.mxu2 %v6998_v33  ;;  %v2721_v29 = vsel %vm1277_vm3, %v11367_v53, %v2716_v22  ;;  %4274 = vmatmul.bf16.vlgmr.msra.gmra.mxu1 %v9476_v0  ;;  %v9873_v38 = vpop.permute.xlu2 %2550  ;;  %v11371_v56 = vld [vmem:[#allocation37_spill] sm:$0xff]  ;;  %v5218_v61 = vld [vmem:[#allocation2 + $0x8] sm:$0xff] }
 0x46d   : > { %4331 = vmatpush.bf16.msrb.mxu1 %v7002_v59  ;;  %v2722_v40 = vsel %vm11369_vm11, %v8991_v37, %v2721_v29  ;;  %v6897_v41 = vld [vmem:[#allocation3 + $0x398] sm:$0xf]  ;;  %v9871_v33 = vpop.permute.xlu1 %2630  ;;  %v2556_v37 = vrot.slane %v9873_v38, 4  ;;  %2632 = vrot.lane.b32.xlu0 %v9585_v52, %s11370_s13  ;;  %v6950_v59 = vor.u32 %v7300_v19, %v6947_v21  ;;  %v11372_v25 = vrot.slane %v11371_v56, 4  ;;  %v7581_v21 = vld [vmem:[#allocation2 + $0x10] sm:$0xff] }
 0x46e   : > { %2729 = vst [vmem:[#allocation3 + $0x380] sm:$0xff] %v2722_v40  ;;  %v6898_v17 = vor.u32 %v7291_v1, %v6897_v41  ;;  %v2636_v27 = vrot.slane %v9871_v33, 4  ;;  %4258 = vmatpush.bf16.msra.mxu3 %v6494_v43  ;;  %v6923_v40 = vld [vmem:[#allocation3 + $0x3e0] sm:$0xf0]  ;;  %v6467_v43 = vld [vmem:[#allocation3 + $0x50] sm:$0xf0] }
 0x46f   : > { %v2561_v53 = vsel %vm1277_vm3, %v11374_v31, %v2556_v37  ;;  %v7294_v19 = vld [vmem:[#allocation3 + $0x3cc] sm:$0xf]  ;;  %vm11402_vm11 = vcmask 891904  }
 0x470   : > { %4280 = vmatpush.bf16.msrb.mxu2 %v6974_v2  ;;  %4231 = vmatpush.bf16.msra.mxu0 %v6898_v17  ;;  %v2641_v24 = vsel %vm1277_vm3, %v11372_v25, %v2636_v27  ;;  %v6954_v2 = vor.u32 %v7304_v34, %v6953_v47  ;;  %v2562_v41 = vsel %vm11376_vm8, %v11373_v62, %v2561_v53  ;;  %v11377_v47 = vld [vmem:[#allocation38_spill] sm:$0xff]  ;;  %vm11407_vm8 = vcmask 80896  }
 0x471   : > { %4332 = vmatpush.bf16.msrb.mxu1 %v6978_v54  ;;  %v9889_v29 = vpop.permute.xlu0 %2590  ;;  %v2642_v54 = vsel %vm11375_vm10, %v11371_v56, %v2641_v24  ;;  %v5225_v17 = vpack.c.bf16 %v7581_v21, %v5218_v61  ;;  %v6470_v25 = vor.u32 %v7180_v50, %v6467_v43  ;;  %v6617_v34 = vld [vmem:[#allocation3 + $0x160] sm:$0xf]  ;;  %2569 = vst [vmem:[#allocation3 + $0x320] sm:$0xff] %v2562_v41  ;;  %v11378_v31 = vrot.slane %v11377_v47, 4  ;;  %v6443_v62 = vld [vmem:[#allocation3 + $0x20] sm:$0xf0] }
 0x472   : > { %v2596_v1 = vrot.slane %v9889_v29, 4  ;;  %2649 = vst [vmem:[#allocation3 + $0x350] sm:$0xff] %v2642_v54  ;;  %3323 = vperm.xlu2 %7515, %v3320_v20   ;;  %v6926_v24 = vor.u32 %v7294_v19, %v6923_v40  ;;  %v7288_v50 = vld [vmem:[#allocation3 + $0x39c] sm:$0xf]  ;;  %v7220_v61 = vld [vmem:[#allocation3 + $0x174] sm:$0xf0] }
 0x473   : > { %5233 = vrot.lane.b32.xlu1 %v5225_v17, %s11240_s18  ;;  %4259 = vmatpush.bf16.msra.mxu3 %v6470_v25  ;;  %v7174_v43 = vld [vmem:[#allocation3 + $0xc] sm:$0xf]  ;;  %v6618_v20 = vor.u32 %v7220_v61, %v6617_v34  ;;  %v6899_v19 = vld [vmem:[#allocation3 + $0x3b0] sm:$0xf0]  ;;  %vm11406_vm10 = vcmask 1006592  }
 0x474   : > { %4281 = vmatpush.bf16.msrb.mxu2 %v6950_v59  ;;  %v2601_v56 = vsel %vm1277_vm3, %v11378_v31, %v2596_v1  ;;  %v6873_v59 = vld [vmem:[#allocation3 + $0x368] sm:$0xf]  ;;  %v2433_v41 = vpop.permute.xlu2 %2432  ;;  %v6902_v25 = vor.u32 %v7288_v50, %v6899_v19  ;;  %v11380_v31 = vld [vmem:[#allocation40_spill] sm:$0xff] }
 0x475   : > { %4333 = vmatpush.bf16.msrb.mxu1 %v6954_v2  ;;  %v2602_v53 = vsel %vm11379_vm2, %v11377_v47, %v2601_v56  ;;  %v7285_v2 = vld [vmem:[#allocation3 + $0x37c] sm:$0xf0]  ;;  %v9904_v54 = vpop.permute.xlu1 %2510  ;;  %v2437_v40 = vrot.slane %v2433_v41, 4  ;;  %2512 = vrot.lane.b32.xlu0 %v9585_v52, %s11280_s27  ;;  %v6446_v47 = vor.u32 %v7174_v43, %v6443_v62  ;;  %v11381_v56 = vrot.slane %v11380_v31, 4  ;;  %v6875_v61 = vld [vmem:[#allocation3 + $0x380] sm:$0xf0] }
 0x476   : > { %2609 = vst [vmem:[#allocation3 + $0x338] sm:$0xff] %v2602_v53  ;;  %v6874_v21 = vor.u32 %v7285_v2, %v6873_v59  ;;  %v2516_v17 = vrot.slane %v9904_v54, 4  ;;  %v11382_v59 = vrot.slane %v9555_v18, 4  ;;  %v4616_v2 = vld [vmem:[#allocation15] sm:$0xff]  ;;  %v11384_v43 = vrot.slane %v9269_v9, 4 }
 0x477   : > { %4260 = vmatpush.bf16.msra.mxu3 %v6446_v47  ;;  %v4584_v47 = vld [vmem:[%s11385_s22] sm:$0xff]  ;;  %vm11409_vm2 = vcmask 515072  }
 0x478   : > { %4282 = vmatpush.bf16.msrb.mxu2 %v6926_v24  ;;  %4232 = vmatpush.bf16.msra.mxu0 %v6874_v21  ;;  %v2521_v24 = vsel %vm1277_vm3, %v11381_v56, %v2516_v17  ;;  %v2443_v34 = vsel %vm1277_vm3, %v11382_v59, %v2437_v40  ;;  %v7282_v21 = vld [vmem:[#allocation3 + $0x36c] sm:$0xf] }
 0x479   : > { %v1753_v53 = vpop.permute.xlu0 %1752  ;;  %v2522_v41 = vsel %vm11383_vm0, %v11380_v31, %v2521_v24  ;;  %v2444_v62 = vsel %vm2439_vm6, %v9555_v18, %v2443_v34  ;;  %v6878_v19 = vor.u32 %v7282_v21, %v6875_v61  ;;  %v3777_v18 = vunpack.c.h.b16 %v9755_v57  ;;  %v7279_v31 = vld [vmem:[#allocation3 + $0x34c] sm:$0xf0]  ;;  %v6851_v61 = vld [vmem:[#allocation3 + $0x350] sm:$0xf0] }
 0x47a   : > { %v1757_v50 = vrot.slane %v1753_v53, 4  ;;  %2529 = vst [vmem:[#allocation3 + $0x308] sm:$0xff] %v2522_v41  ;;  %4620 = vperm.xlu2 %7515, %v4616_v2   ;;  %4261 = vmatmul.bf16.vlgmr.msra.gmra.mxu3 %v9551_v5  ;;  %v3778_v34 = vunpack.c.l.b16 %v9758_v55  ;;  %v11388_v21 = vrot.slane %v9578_v3, 4  ;;  %v7273_v55 = vld [vmem:[#allocation3 + $0x31c] sm:$0xf0]  ;;  %vm11390_vm6 = vcmask 523264  }
 0x47b   : > { %4305 = vmatpush.bf16.msrb.mxu3 %v6618_v20  ;;  %2450 = vst [vmem:[#allocation3 + $0x2e0] sm:$0xff] %v2444_v62  ;;  %5239 = vrot.lane.b32.xlu1 %v9585_v52, %s11240_s18  ;;  %v3927_v41 = vpack.c.b16 %v3777_v18, %v3777_v18  ;;  %vm11412_vm0 = vcmask 89088  }
 0x47c   : > { %4283 = vmatpush.bf16.msrb.mxu2 %v6902_v25  ;;  %v1763_v40 = vsel %vm1277_vm3, %v11384_v43, %v1757_v50  ;;  %v2353_v59 = vpop.permute.xlu2 %2352 }
 0x47d   : > { %v1764_v20 = vsel %vm1759_vm4, %v9269_v9, %v1763_v40  ;;  %v6849_v25 = vld [vmem:[#allocation3 + $0x338] sm:$0xf]  ;;  %v7276_v56 = vld [vmem:[#allocation3 + $0x33c] sm:$0xf]  ;;  %v1673_v24 = vpop.permute.xlu1 %1672  ;;  %v2357_v2 = vrot.slane %v2353_v59, 4  ;;  %4587 = vperm.xlu0 %7513, %v4584_v47   ;;  %vm11389_vm4 = vcmask 621568  }
 0x47e   : > { %1770 = vst [vmem:[#allocation3 + $0x148] sm:$0xff] %v1764_v20  ;;  %v6850_v52 = vor.u32 %v7279_v31, %v6849_v25  ;;  %v1677_v53 = vrot.slane %v1673_v24, 4  ;;  %v6854_v57 = vor.u32 %v7276_v56, %v6851_v61  ;;  %v11386_v9 = vld [vmem:[#allocation41_spill] sm:$0xff]  ;;  %v6827_v31 = vld [vmem:[#allocation3 + $0x320] sm:$0xf0] }
 0x47f   : > { %v11387_v62 = vrot.slane %v11386_v9, 4  ;;  %v2363_v43 = vsel %vm1277_vm3, %v11388_v21, %v2357_v2  ;;  %v7583_v20 = vld [vmem:[#allocation2 + $0x20] sm:$0xff] }
 0x480   : > { %4284 = vmatpush.bf16.msrb.mxu2 %v6878_v19  ;;  %4233 = vmatpush.bf16.msra.mxu0 %v6850_v52  ;;  %v7582_v19 = vld [vmem:[#allocation2 + $0x18] sm:$0xff]  ;;  %v2364_v18 = vsel %vm11390_vm6, %v9578_v3, %v2363_v43  ;;  %v3928_v52 = vpack.c.b16 %v3778_v34, %v3778_v34  ;;  %v11391_v61 = vld [vmem:[#allocation42_spill] sm:$0xff]  ;;  %vm11418_vm6 = vcmask 105472  }
 0x481   : > { %v1683_v50 = vsel %vm1277_vm3, %v11387_v62, %v1677_v53  ;;  %v1633_v40 = vpop.permute.xlu0 %1632  ;;  %v5226_v25 = vpack.c.bf16 %v7583_v20, %v7582_v19  ;;  %v6825_v24 = vld [vmem:[#allocation3 + $0x308] sm:$0xf]  ;;  %v7270_v59 = vld [vmem:[#allocation3 + $0x30c] sm:$0xf]  ;;  %2370 = vst [vmem:[#allocation3 + $0x2b0] sm:$0xff] %v2364_v18  ;;  %v11392_v62 = vrot.slane %v11391_v61, 4 }
 0x482   : > { %v1684_v47 = vsel %vm11389_vm4, %v11386_v9, %v1683_v50  ;;  %v1637_v56 = vrot.slane %v1633_v40, 4  ;;  %v6826_v53 = vor.u32 %v7273_v55, %v6825_v24  ;;  %v6830_v2 = vor.u32 %v7270_v59, %v6827_v31  ;;  %v4617_v50 = vld [vmem:[#allocation15 + $0x8] sm:$0xff]  ;;  %v7217_v34 = vld [vmem:[#allocation3 + $0x164] sm:$0xf] }
 0x483   : > { %1690 = vst [vmem:[#allocation3 + $0x118] sm:$0xff] %v1684_v47  ;;  %5235 = vrot.lane.b32.xlu2 %v5226_v25, %s11240_s18  ;;  %v4089_v9 = vsel %vm1277_vm3, %v3927_v41, 0  ;;  %v4092_v20 = vsel %vm1277_vm3, %v3928_v52, 0  ;;  %v6619_v41 = vld [vmem:[#allocation3 + $0x178] sm:$0xf0]  ;;  %v11393_v18 = vld [vmem:[#allocation43_spill] sm:$0xff] }
 0x484   : > { %4285 = vmatpush.bf16.msrb.mxu2 %v6854_v57  ;;  %v1643_v21 = vsel %vm1277_vm3, %v11392_v62, %v1637_v56  ;;  %4234 = vmatpush.bf16.msra.mxu0 %v6826_v53  ;;  %v6593_v57 = vld [vmem:[#allocation3 + $0x130] sm:$0xf]  ;;  %v2273_v19 = vpop.permute.xlu2 %2272  ;;  %v6622_v47 = vor.u32 %v7217_v34, %v6619_v41  ;;  %v11394_v56 = vrot.slane %v11393_v18, 4  ;;  %v11395_v59 = vrot.slane %v9600_v32, 4 }
 0x485   : > { %v1644_v3 = vsel %vm1639_vm9, %v11391_v61, %v1643_v21  ;;  %v7214_v43 = vld [vmem:[#allocation3 + $0x144] sm:$0xf0]  ;;  %v1593_v40 = vpop.permute.xlu1 %1592  ;;  %v2277_v25 = vrot.slane %v2273_v19, 4  ;;  %4625 = vperm.xlu0 %7513, %v4617_v50   ;;  %v6595_v52 = vld [vmem:[#allocation3 + $0x148] sm:$0xf0]  ;;  %vm11396_vm9 = vcmask 637952  }
 0x486   : > { %1650 = vst [vmem:[#allocation3 + $0x100] sm:$0xff] %v1644_v3  ;;  %v6594_v55 = vor.u32 %v7214_v43, %v6593_v57  ;;  %v1597_v31 = vrot.slane %v1593_v40, 4  ;;  %v7211_v50 = vld [vmem:[#allocation3 + $0x134] sm:$0xf]  ;;  %v11398_v3 = vrot.slane %v9557_v36, 4  ;;  %v7584_v40 = vld [vmem:[#allocation2 + $0x28] sm:$0xff] }
 0x487   : > { %4235 = vmatmul.bf16.vlgmr.msra.gmra.mxu0 %v9478_v63  ;;  %v2283_v53 = vsel %vm1277_vm3, %v11395_v59, %v2277_v25  ;;  %v6598_v43 = vor.u32 %v7211_v50, %v6595_v52  ;;  %v11400_v59 = vrot.slane %v9388_v39, 4  ;;  %vm11414_vm4 = vcmask 998400  }
 0x488   : > { %4286 = vmatpush.bf16.msrb.mxu2 %v6830_v2  ;;  %4299 = vmatpush.bf16.msrb.mxu0 %v4089_v9  ;;  %v1603_v24 = vsel %vm1277_vm3, %v11394_v56, %v1597_v31  ;;  %v2284_v62 = vsel %vm11397_vm12, %v9600_v32, %v2283_v53  ;;  %v5223_v9 = vld [vmem:[#allocation2 + $0x30] sm:$0xff]  ;;  %vm11423_vm12 = vcmask 900096  }
 0x489   : > { %4306 = vmatpush.bf16.msrb.mxu3 %v6594_v55  ;;  %v2473_v2 = vpop.permute.xlu0 %2472  ;;  %v1604_v61 = vsel %vm11396_vm9, %v11393_v18, %v1603_v24  ;;  %2290 = vst [vmem:[#allocation3 + $0x280] sm:$0xff] %v2284_v62  ;;  %v5227_v19 = vpack.c.bf16 %v5223_v9, %v7584_v40  ;;  %vm11420_vm9 = vcmask 867328  }
 0x48a   : > { %v2477_v21 = vrot.slane %v2473_v2, 4  ;;  %1610 = vst [vmem:[#allocation3 + $0xe8] sm:$0xff] %v1604_v61  ;;  %v7208_v55 = vld [vmem:[#allocation3 + $0x114] sm:$0xf0]  ;;  %v6571_v56 = vld [vmem:[#allocation3 + $0x118] sm:$0xf0] }
 0x48b   : > { %4287 = vmatmul.bf16.vlgmr.msrb.gmra.mxu2 %v9478_v63 }
 0x48c   : > { %4351 = vmatpush.bf16.msra.mxu2 %v4092_v20  ;;  %v2483_v57 = vsel %vm1277_vm3, %v11398_v3, %v2477_v21  ;;  %v2193_v25 = vpop.permute.xlu2 %2192  ;;  %v11403_v21 = vld [vmem:[#allocation44_spill] sm:$0xff] }
 0x48d   : > { %v2484_v34 = vsel %vm11399_vm1, %v9557_v36, %v2483_v57  ;;  %v6569_v20 = vld [vmem:[#allocation3 + $0x100] sm:$0xf]  ;;  %v7205_v31 = vld [vmem:[#allocation3 + $0x104] sm:$0xf]  ;;  %v1513_v32 = vpop.permute.xlu1 %1512  ;;  %v2197_v18 = vrot.slane %v2193_v25, 4  ;;  %5237 = vrot.lane.b32.xlu0 %v5227_v19, %s11240_s18  ;;  %v11404_v9 = vrot.slane %v11403_v21, 4 }
 0x48e   : > { %2490 = vst [vmem:[#allocation3 + $0x2f8] sm:$0xff] %v2484_v34  ;;  %v6570_v41 = vor.u32 %v7208_v55, %v6569_v20  ;;  %v6574_v24 = vor.u32 %v7205_v31, %v6571_v56  ;;  %v6809_v57 = vld [vmem:[#allocation3 + $0x2e0] sm:$0xf]  ;;  %vm11424_vm1 = vcmask 211968   ;;  %s11428_s18 = sld [smem:[#allocation27_spill]] }
 0x48f   : > { %v2203_v53 = vsel %vm1277_vm3, %v2196_v42, %v2197_v18 }
 0x490   : > { %4357 = vmatpush.bf16.msrb.mxu2 %v6622_v47  ;;  %v1517_v47 = vrot.slane %v1513_v32, 4  ;;  %4307 = vmatpush.bf16.msrb.mxu3 %v6570_v41  ;;  %v2204_v61 = vsel %vm11402_vm11, %v9647_v10, %v2203_v53  ;;  %v11405_v10 = vrot.slane %v9496_v14, 4  ;;  %vm11431_vm11 = vcmask 1039360  }
 0x491   : > { %v1553_v2 = vpop.permute.xlu0 %1552  ;;  %2210 = vst [vmem:[#allocation3 + $0x250] sm:$0xff] %v2204_v61  ;;  %v7202_v56 = vld [vmem:[#allocation3 + $0xe4] sm:$0xf0] }
 0x492   : > { %v1523_v36 = vsel %vm1277_vm3, %v11400_v59, %v1517_v47  ;;  %v1557_v62 = vrot.slane %v1553_v2, 4  ;;  %v11408_v47 = vrot.slane %v9598_v60, 4 }
 0x493   : > { %v1524_v52 = vsel %vm11401_vm15, %v9388_v39, %v1523_v36  ;;  %v6547_v36 = vld [vmem:[#allocation3 + $0xe8] sm:$0xf0]  ;;  %vm11427_vm15 = vcmask 1014784  }
 0x494   : > { %4358 = vmatpush.bf16.msrb.mxu2 %v6598_v43  ;;  %1530 = vst [vmem:[#allocation3 + $0xb8] sm:$0xff] %v1524_v52  ;;  %v1563_v50 = vsel %vm1277_vm3, %v11404_v9, %v1557_v62  ;;  %v2873_v34 = vpop.permute.xlu2 %2872  ;;  %p694_p7 = scmp.lt.s32.totalorder %s11428_s18, 1 }
 0x495   : > { %v1564_v3 = vsel %vm1559_vm5, %v11403_v21, %v1563_v50  ;;  %v7268_v42 = vld [vmem:[#allocation3 + $0x2f4] sm:$0xf0]  ;;  %v1433_v43 = vpop.permute.xlu1 %1432  ;;  %v2877_v19 = vrot.slane %v2873_v34, 4  ;;  %v11410_v21 = vld [vmem:[#allocation46_spill] sm:$0xff]  ;;  %v11413_v34 = vrot.slane %v9445_v6, 4 }
 0x496   : > { %1570 = vst [vmem:[#allocation3 + $0xd0] sm:$0xff] %v1564_v3  ;;  %v6810_v39 = vor.u32 %v7268_v42, %v6809_v57  ;;  %v1437_v40 = vrot.slane %v1433_v43, 4  ;;  %v11411_v9 = vrot.slane %v11410_v21, 4  ;;  %v10014_v43 = vpop.f32.mrf.mxu3  ;;  %s11487_s18 = smov (!%p694_p7, %s11428_s18), 1 }
 0x497   : > { %7010 = vmatmul.msk.bf16.vlgmr.msrb.gmra.mxu0 %vm4074_vm14, %v9375_v16  ;;  %v2883_v55 = vsel %vm1277_vm3, %v2876_v11, %v2877_v19  ;;  %v6785_v19 = vld [vmem:[#allocation3 + $0x2b0] sm:$0xf]  ;;  %s6425_s27 = sshll.u32 %s11487_s18, 3 }
 0x498   : > { %4359 = vmatpush.bf16.msrb.mxu2 %v6574_v24  ;;  %v1443_v20 = vsel %vm1277_vm3, %v11405_v10, %v1437_v40  ;;  %4318 = vmatpush.bf16.msra.mxu0 %v6810_v39  ;;  %v2884_v25 = vsel %vm11407_vm8, %v9790_v45, %v2883_v55  ;;  %vm11434_vm8 = vcmask 883712   ;;  %s697_s19 = scalar_lea.vmem %s11440_s4, %s6425_s27 }
 0x499   : > { %v2393_v31 = vpop.permute.xlu0 %2392  ;;  %v1444_v32 = vsel %vm11406_vm10, %v9496_v14, %v1443_v20  ;;  %2890 = vst [vmem:[#allocation3 + $0x3e8] sm:$0xff] %v2884_v25  ;;  %v10023_v25 = vpop.f32.mrf.mxu1  ;;  %vm11432_vm10 = vcmask 113664  }
 0x49a   : > { %v2397_v41 = vrot.slane %v2393_v31, 4  ;;  %1450 = vst [vmem:[#allocation3 + $0x88] sm:$0xff] %v1444_v32 }
 0x49b   : > { %7011 = vmatmul.msk.bf16.vlgmr.msra.gmra.mxu2 %vm4074_vm14, %v9375_v16 }
 0x49c   : > { %v2403_v18 = vsel %vm1277_vm3, %v11408_v47, %v2397_v41  ;;  %v1353_v14 = vpop.permute.xlu2 %1352  ;;  %v10025_v41 = vpop.f32.mrf.mxu2  ;;  %v11415_v47 = vrot.slane %v9427_v23, 4 }
 0x49d   : > { %v2404_v11 = vsel %vm11409_vm2, %v9598_v60, %v2403_v18  ;;  %v6545_v24 = vld [vmem:[#allocation3 + $0xd0] sm:$0xf]  ;;  %v7199_v59 = vld [vmem:[#allocation3 + $0xd4] sm:$0xf]  ;;  %v2833_v53 = vpop.permute.xlu1 %2832  ;;  %v1357_v61 = vrot.slane %v1353_v14, 4  ;;  %vm11436_vm2 = vcmask 121856  }
 0x49e   : > { %2410 = vst [vmem:[#allocation3 + $0x2c8] sm:$0xff] %v2404_v11  ;;  %v6546_v2 = vor.u32 %v7202_v56, %v6545_v24  ;;  %v6550_v52 = vor.u32 %v7199_v59, %v6547_v36  ;;  %v2837_v45 = vrot.slane %v2833_v53, 4  ;;  %v11416_v56 = vrot.slane %v9824_v7, 4 }
 0x49f   : > { %v1363_v60 = vsel %vm1277_vm3, %v11411_v9, %v1357_v61 }
 0x4a0   : > { %4308 = vmatpush.bf16.msrb.mxu3 %v6546_v2  ;;  %4360 = vmatpush.bf16.msrb.mxu2 %v6550_v52  ;;  %v2843_v62 = vsel %vm1277_vm3, %v2836_v4, %v2837_v45  ;;  %v1364_v57 = vsel %vm1359_vm13, %v11410_v21, %v1363_v60  ;;  %v10019_v39 = vpop.f32.mrf.mxu0  ;;  %vm11417_vm13 = vcmask 1031168   ;;  %v7298_v14 = vld [vmem:[#allocation3 + $0x3e4] sm:$0xf0]  ;;  %v4147_v2 = vpop.f32.mrf.mxu3  ;;  %v11419_v45 = vrot.slane %v9616_v58, 4 }
 0x4a1   : > { %v1473_v50 = vpop.permute.xlu0 %1472  ;;  %v2844_v3 = vsel %vm11412_vm0, %v9702_v44, %v2843_v62  ;;  %1370 = vst [vmem:[#allocation3 + $0x58] sm:$0xff] %v1364_v57  ;;  %v7196_v62 = vld [vmem:[#allocation3 + $0xb4] sm:$0xf0]  ;;  %vm11437_vm0 = vcmask 474112  }
 0x4a2   : > { %v1477_v42 = vrot.slane %v1473_v50, 4  ;;  %2850 = vst [vmem:[#allocation3 + $0x3d0] sm:$0xff] %v2844_v3 }
 0x4a4   : > { %v1483_v4 = vsel %vm1277_vm3, %v11413_v34, %v1477_v42  ;;  %v2753_v20 = vpop.permute.xlu2 %2752 }
 0x4a5   : > { %v1484_v40 = vsel %vm11414_vm4, %v9445_v6, %v1483_v4  ;;  %v7262_v10 = vld [vmem:[#allocation3 + $0x2c4] sm:$0xf0]  ;;  %v1313_v44 = vpop.permute.xlu1 %1312  ;;  %v2757_v32 = vrot.slane %v2753_v20, 4  ;;  %vm11439_vm4 = vcmask 908288  }
 0x4a6   : > { %1490 = vst [vmem:[#allocation3 + $0xa0] sm:$0xff] %v1484_v40  ;;  %v6786_v55 = vor.u32 %v7262_v10, %v6785_v19  ;;  %v1317_v31 = vrot.slane %v1313_v44, 4  ;;  %v4121_v40 = vpop.f32.mrf.mxu1  ;;  %v4134_v19 = vpop.f32.mrf.mxu2  ;;  %v11421_v10 = vrot.slane %v9734_v35, 4 }
 0x4a7   : > { %v2763_v6 = vsel %vm1277_vm3, %v11416_v56, %v2757_v32  ;;  %v11425_v56 = vld [vmem:[#allocation45_spill] sm:$0xff] }
 0x4a8   : > { %4319 = vmatpush.bf16.msra.mxu0 %v6786_v55  ;;  %v1323_v18 = vsel %vm1277_vm3, %v11415_v47, %v1317_v31  ;;  %v2764_v59 = vsel %vm11418_vm6, %v9824_v7, %v2763_v6  ;;  %v4108_v21 = vpop.f32.mrf.mxu0  ;;  %v6523_v7 = vld [vmem:[#allocation3 + $0xb8] sm:$0xf0]  ;;  %v11426_v6 = vrot.slane %v11425_v56, 4  ;;  %vm11444_vm6 = vcmask 236544  }
 0x4a9   : > { %v2313_v11 = vpop.permute.xlu0 %2312  ;;  %v1324_v24 = vsel %vm11417_vm13, %v9427_v23, %v1323_v18  ;;  %v6929_v53 = vld [vmem:[#allocation3 + $0x3d0] sm:$0xf]  ;;  %2770 = vst [vmem:[#allocation3 + $0x3a0] sm:$0xff] %v2764_v59  ;;  %v10052_v18 = vpop.f32.mrf.mxu3  ;;  %v6761_v59 = vld [vmem:[#allocation3 + $0x280] sm:$0xf]  ;;  %vm11443_vm13 = vcmask 220160  }
 0x4aa   : > { %v2317_v36 = vrot.slane %v2313_v11, 4  ;;  %1330 = vst [vmem:[#allocation3 + $0x40] sm:$0xff] %v1324_v24  ;;  %v6930_v52 = vor.u32 %v7298_v14, %v6929_v53 }
 0x4ac   : > { %v2323_v61 = vsel %vm1277_vm3, %v11419_v45, %v2317_v36  ;;  %4334 = vmatpush.bf16.msrb.mxu1 %v6930_v52  ;;  %v2033_v3 = vpop.permute.xlu2 %2032 }
 0x4ad   : > { %v2324_v9 = vsel %vm11420_vm9, %v9616_v58, %v2323_v61  ;;  %v6521_v23 = vld [vmem:[#allocation3 + $0xa0] sm:$0xf]  ;;  %v7193_v60 = vld [vmem:[#allocation3 + $0xa4] sm:$0xf]  ;;  %v2153_v50 = vpop.permute.xlu1 %2152  ;;  %v2037_v4 = vrot.slane %v2033_v3, 4  ;;  %v11422_v58 = vrot.slane %v9474_v26, 4 }
 0x4ae   : > { %2330 = vst [vmem:[#allocation3 + $0x298] sm:$0xff] %v2324_v9  ;;  %v6522_v57 = vor.u32 %v7196_v62, %v6521_v23  ;;  %v6526_v42 = vor.u32 %v7193_v60, %v6523_v7  ;;  %v2157_v34 = vrot.slane %v2153_v50, 4  ;;  %v10061_v45 = vpop.f32.mrf.mxu1  ;;  %v10063_v61 = vpop.f32.mrf.mxu2  ;;  %v11429_v62 = vld [vmem:[#allocation35_spill] sm:$0xff]  ;;  %vm11446_vm9 = vcmask 97280  }
 0x4af   : > { %v2043_v20 = vsel %vm1277_vm3, %v11422_v58, %v2037_v4  ;;  %v11430_v21 = vrot.slane %v11429_v62, 4  ;;  %v7190_v4 = vld [vmem:[#allocation3 + $0x84] sm:$0xf0] }
 0x4b0   : > { %4309 = vmatpush.bf16.msrb.mxu3 %v6522_v57  ;;  %4361 = vmatpush.bf16.msrb.mxu2 %v6526_v42  ;;  %v2163_v44 = vsel %vm1277_vm3, %v11421_v10, %v2157_v34  ;;  %v2044_v32 = vsel %vm11424_vm1, %v9474_v26, %v2043_v20  ;;  %v10059_v53 = vpop.f32.mrf.mxu0  ;;  %v11433_v42 = vrot.slane %v9667_v46, 4  ;;  %v6499_v10 = vld [vmem:[#allocation3 + $0x88] sm:$0xf0]  ;;  %vm11451_vm1 = vcmask 916480  }
 0x4b1   : > { %v1393_v55 = vpop.permute.xlu0 %1392  ;;  %v2164_v31 = vsel %vm11423_vm12, %v9734_v35, %v2163_v44  ;;  %2050 = vst [vmem:[#allocation3 + $0x1f0] sm:$0xff] %v2044_v32  ;;  %v4160_v57 = vpop.f32.mrf.mxu3  ;;  %vm11448_vm12 = vcmask 244736  }
 0x4b2   : > { %v1397_v47 = vrot.slane %v1393_v55, 4  ;;  %2170 = vst [vmem:[#allocation3 + $0x238] sm:$0xff] %v2164_v31  ;;  %v6473_v31 = vld [vmem:[#allocation3 + $0x40] sm:$0xf]  ;;  %v7265_v57 = vld [vmem:[#allocation3 + $0x2e4] sm:$0xf] }
 0x4b4   : > { %v1403_v11 = vsel %vm1277_vm3, %v11426_v6, %v1397_v47  ;;  %v2713_v26 = vpop.permute.xlu2 %2712 }
 0x4b5   : > { %v1404_v24 = vsel %vm11427_vm15, %v11425_v56, %v1403_v11  ;;  %v7256_v36 = vld [vmem:[#allocation3 + $0x294] sm:$0xf0]  ;;  %v1272_v35 = vpop.permute.xlu1 %1271  ;;  %v2717_v52 = vrot.slane %v2713_v26, 4  ;;  %v7181_v56 = vld [vmem:[#allocation3 + $0x44] sm:$0xf]  ;;  %vm11452_vm15 = vcmask 482304  }
 0x4b6   : > { %1410 = vst [vmem:[#allocation3 + $0x70] sm:$0xff] %v1404_v24  ;;  %v6762_v14 = vor.u32 %v7256_v36, %v6761_v59  ;;  %v1276_v2 = vrot.slane %v1272_v35, 4  ;;  %v4199_v6 = vpop.f32.mrf.mxu2  ;;  %v4186_v11 = vpop.f32.mrf.mxu1  ;;  %v11435_v24 = vrot.slane %v9775_v12, 4 }
 0x4b7   : > { %v2723_v23 = vsel %vm1277_vm3, %v2716_v22, %v2717_v52 }
 0x4b8   : > { %4320 = vmatpush.bf16.msra.mxu0 %v6762_v14  ;;  %v1283_v9 = vsel %vm1277_vm3, %v11430_v21, %v1276_v2  ;;  %v2724_v50 = vsel %vm11432_vm10, %v9850_v13, %v2723_v23  ;;  %v4173_v44 = vpop.f32.mrf.mxu0  ;;  %v6475_v14 = vld [vmem:[#allocation3 + $0x58] sm:$0xf0]  ;;  %vm11454_vm10 = vcmask 228352  }
 0x4b9   : > { %v2233_v60 = vpop.permute.xlu0 %2232  ;;  %v1284_v7 = vsel %vm11431_vm11, %v11429_v62, %v1283_v9  ;;  %2730 = vst [vmem:[#allocation3 + $0x388] sm:$0xff] %v2724_v50  ;;  %v6478_v21 = vor.u32 %v7181_v56, %v6475_v14  ;;  %v6811_v23 = vld [vmem:[#allocation3 + $0x2f8] sm:$0xf0] }
 0x4ba   : > { %v2237_v3 = vrot.slane %v2233_v60, 4  ;;  %1290 = vst [vmem:[#allocation3 + $0x28] sm:$0xff] %v1284_v7  ;;  %v11438_v60 = vrot.slane %v9682_v49, 4  ;;  %v6449_v7 = vld [vmem:[#allocation3 + $0x10] sm:$0xf] }
 0x4bb   : > { %v6763_v14 = vld [vmem:[#allocation3 + $0x298] sm:$0xf0] }
 0x4bc   : > { %v2243_v34 = vsel %vm1277_vm3, %v11433_v42, %v2237_v3  ;;  %v2593_v58 = vpop.permute.xlu2 %2592  ;;  %v6737_v3 = vld [vmem:[#allocation3 + $0x250] sm:$0xf] }
 0x4bd   : > { %v2244_v22 = vsel %vm11434_vm8, %v9667_v46, %v2243_v34  ;;  %v6497_v40 = vld [vmem:[#allocation3 + $0x70] sm:$0xf]  ;;  %v7187_v19 = vld [vmem:[#allocation3 + $0x74] sm:$0xf]  ;;  %v2673_v13 = vpop.permute.xlu1 %2672  ;;  %v2597_v47 = vrot.slane %v2593_v58, 4  ;;  %vm11455_vm8 = vcmask 130048  }
 0x4be   : > { %2250 = vst [vmem:[#allocation3 + $0x268] sm:$0xff] %v2244_v22  ;;  %v6498_v20 = vor.u32 %v7190_v4, %v6497_v40  ;;  %v6502_v55 = vor.u32 %v7187_v19, %v6499_v10  ;;  %v2677_v32 = vrot.slane %v2673_v13, 4  ;;  %v7184_v46 = vld [vmem:[#allocation3 + $0x54] sm:$0xf0]  ;;  %v7175_v40 = vld [vmem:[#allocation3 + $0x14] sm:$0xf]  ;;  %v6814_v19 = vor.u32 %v7265_v57, %v6811_v23 }
 0x4bf   : > { %v2603_v36 = vsel %vm1277_vm3, %v2596_v1, %v2597_v47  ;;  %v6474_v26 = vor.u32 %v7184_v46, %v6473_v31  ;;  %v7955_v10 = vmov 8.0   ;;  %v7253_v23 = vld [vmem:[#allocation3 + $0x284] sm:$0xf] }
 0x4c0   : > { %4310 = vmatpush.bf16.msrb.mxu3 %v6498_v20  ;;  %4362 = vmatpush.bf16.msrb.mxu2 %v6502_v55  ;;  %v2683_v59 = vsel %vm1277_vm3, %v11435_v24, %v2677_v32  ;;  %v2604_v52 = vsel %vm11437_vm0, %v9889_v29, %v2603_v36  ;;  %7518 = vrcp.f32 %v7955_v10  ;;  %v5257_v20 = vld [vmem:[%s697_s19] sm:$0xff]  ;;  %v11441_v55 = vrot.slane %v9518_v28, 4 }
 0x4c1   : > { %v2113_v35 = vpop.permute.xlu0 %2112  ;;  %v2684_v2 = vsel %vm11436_vm2, %v9775_v12, %v2683_v59  ;;  %v7178_v9 = vld [vmem:[#allocation3 + $0x24] sm:$0xf0]  ;;  %2610 = vst [vmem:[#allocation3 + $0x340] sm:$0xff] %v2604_v52  ;;  %v6451_v50 = vld [vmem:[#allocation3 + $0x28] sm:$0xf0]  ;;  %v11442_v32 = vrot.slane %v9516_v30, 4  ;;  %5261 = vperm.xlu2 %7515, %v5257_v20  }
 0x4c2   : > { %v2117_v62 = vrot.slane %v2113_v35, 4  ;;  %2690 = vst [vmem:[#allocation3 + $0x370] sm:$0xff] %v2684_v2  ;;  %v6450_v4 = vor.u32 %v7178_v9, %v6449_v7  ;;  %v6454_v58 = vor.u32 %v7175_v40, %v6451_v50  ;;  %v7259_v24 = vld [vmem:[#allocation3 + $0x2b4] sm:$0xf]  ;;  %v7956_v59 = vmov 1  }
 0x4c3   : > { %7516 = vset.pattern.permute.xlu0 %v7956_v59  ;;  %v7244_v52 = vld [vmem:[#allocation3 + $0x234] sm:$0xf0]  ;;  %v11449_v10 = vmov 0   ;;  %vm11456_vm2 = vcmask 891904   ;;  %vm11457_vm0 = vcmask 490496  }
 0x4c4   : > { %v2123_v1 = vsel %vm1277_vm3, %v11438_v60, %v2117_v62  ;;  %4311 = vmatpush.bf16.msrb.mxu3 %v6474_v26  ;;  %4363 = vmatpush.bf16.msrb.mxu2 %v6478_v21  ;;  %v1913_v34 = vpop.permute.xlu2 %1912  ;;  %v11445_v26 = vrot.slane %v9811_v15, 4 }
 0x4c5   : > { %v2124_v12 = vsel %vm11439_vm4, %v9682_v49, %v2123_v1  ;;  %v7250_v29 = vld [vmem:[#allocation3 + $0x264] sm:$0xf0]  ;;  %v1993_v42 = vpop.permute.xlu1 %1992  ;;  %v1917_v13 = vrot.slane %v1913_v34, 4  ;;  %v6787_v49 = vld [vmem:[#allocation3 + $0x2c8] sm:$0xf0]  ;;  %5286 = vperm.xlu0 %7516, %v5257_v20  }
 0x4c6   : > { %2130 = vst [vmem:[#allocation3 + $0x220] sm:$0xff] %v2124_v12  ;;  %v6738_v22 = vor.u32 %v7250_v29, %v6737_v3  ;;  %v1997_v44 = vrot.slane %v1993_v42, 4  ;;  %v6790_v36 = vor.u32 %v7259_v24, %v6787_v49  ;;  %v10116_v35 = vpop.eup %7518  ;;  %v6739_v50 = vld [vmem:[#allocation3 + $0x268] sm:$0xf0]  ;;  %v11447_v12 = vrot.slane %v9534_v51, 4 }
 0x4c7   : > { %v1923_v47 = vsel %vm1277_vm3, %v11442_v32, %v1917_v13  ;;  %vm4450_vm11 = vweird.f32 %v10116_v35 }
 0x4c8   : > { %4312 = vmatpush.bf16.msrb.mxu3 %v6450_v4  ;;  %4321 = vmatpush.bf16.msra.mxu0 %v6738_v22  ;;  %v2003_v31 = vsel %vm1277_vm3, %v11441_v55, %v1997_v44  ;;  %v1924_v11 = vsel %vm11444_vm6, %v9516_v30, %v1923_v47 }
 0x4c9   : > { %4364 = vmatpush.bf16.msrb.mxu2 %v6454_v58  ;;  %v2793_v56 = vpop.permute.xlu0 %2792  ;;  %v2004_v6 = vsel %vm11443_vm13, %v9518_v28, %v2003_v31  ;;  %1930 = vst [vmem:[#allocation3 + $0x1a8] sm:$0xff] %v1924_v11  ;;  %v6715_v31 = vld [vmem:[#allocation3 + $0x238] sm:$0xf0] }
 0x4ca   : > { %v2797_v46 = vrot.slane %v2793_v56, 4  ;;  %2010 = vst [vmem:[#allocation3 + $0x1d8] sm:$0xff] %v2004_v6  ;;  %v6881_v6 = vld [vmem:[#allocation3 + $0x370] sm:$0xf] }
 0x4cb   : > { %4313 = vmatmul.bf16.vlgmr.msrb.gmra.mxu3 %v9551_v5 }
 0x4cc   : > { %4370 = vmatpush.bf16.msra.mxu3 %v6814_v19  ;;  %v2803_v28 = vsel %vm1277_vm3, %v11445_v26, %v2797_v46  ;;  %4365 = vmatmul.bf16.vlgmr.msrb.gmra.mxu2 %v9551_v5  ;;  %v10124_v21 = vpop.permute.xlu2 %3323  ;;  %v6766_v5 = vor.u32 %v7253_v23, %v6763_v14  ;;  %v10140_v19 = vpop.f32.mrf.mxu3  ;;  %v6689_v23 = vld [vmem:[#allocation3 + $0x1f0] sm:$0xf] }
 0x4cd   : > { %v2804_v30 = vsel %vm11446_vm9, %v9811_v15, %v2803_v28  ;;  %v6713_v2 = vld [vmem:[#allocation3 + $0x220] sm:$0xf]  ;;  %v1873_v62 = vpop.permute.xlu1 %1872  ;;  %v4107_v1 = vadd.f32 %v10019_v39, %v10124_v21  ;;  %v4159_v7 = vadd.f32 %v10052_v18, %v10124_v21  ;;  %v4446_v15 = vmul.f32 8.0, %v10116_v35  ;;  %v7247_v18 = vld [vmem:[#allocation3 + $0x254] sm:$0xf]  ;;  %7517 = vset.pattern.permute.xlu0 %v11449_v10  ;;  %vm11458_vm9 = vmmov %vm11456_vm2 }
 0x4ce   : > { %2810 = vst [vmem:[#allocation3 + $0x3b8] sm:$0xff] %v2804_v30  ;;  %v6714_v9 = vor.u32 %v7244_v52, %v6713_v2  ;;  %v1877_v60 = vrot.slane %v1873_v62, 4  ;;  %v6742_v40 = vor.u32 %v7247_v18, %v6739_v50  ;;  %v7241_v13 = vld [vmem:[#allocation3 + $0x224] sm:$0xf] }
 0x4cf   : > { %v4120_v29 = vadd.f32 %v10023_v25, %v4107_v1  ;;  %v4172_v57 = vadd.f32 %v10059_v53, %v4159_v7  ;;  %v11450_v25 = vrot.slane %v9749_v8, 4  ;;  %v4447_v44 = vsub.f32 1.0, %v4446_v15  ;;  %v7235_v7 = vld [vmem:[#allocation3 + $0x1f4] sm:$0xf] }
 0x4d0   : > { %4371 = vmatpush.bf16.msra.mxu3 %v6790_v36  ;;  %4322 = vmatpush.bf16.msra.mxu0 %v6714_v9  ;;  %v1883_v3 = vsel %vm1277_vm3, %v11447_v12, %v1877_v60  ;;  %v6718_v56 = vor.u32 %v7241_v13, %v6715_v31  ;;  %v11453_v9 = vrot.slane %v9472_v48, 4 }
 0x4d1   : > { %v2073_v42 = vpop.permute.xlu0 %2072  ;;  %v1884_v39 = vsel %vm11448_vm12, %v9534_v51, %v1883_v3  ;;  %v4133_v4 = vadd.f32 %v10025_v41, %v4120_v29  ;;  %v4185_v22 = vadd.f32 %v10061_v45, %v4172_v57  ;;  %v6905_v41 = vld [vmem:[#allocation3 + $0x3a0] sm:$0xf]  ;;  %v4448_v46 = vmul.f32 %v10116_v35, %v4447_v44  ;;  %vm11459_vm12 = vmmov %vm11456_vm2 }
 0x4d2   : > { %v2077_v34 = vrot.slane %v2073_v42, 4  ;;  %1890 = vst [vmem:[#allocation3 + $0x190] sm:$0xff] %v1884_v39 }
 0x4d3   : > { %v4198_v58 = vadd.f32 %v10063_v61, %v4185_v22  ;;  %v4146_v45 = vadd.f32 %v10014_v43, %v4133_v4  ;;  %v7286_v43 = vld [vmem:[#allocation3 + $0x384] sm:$0xf0]  ;;  %v4449_v62 = vadd.f32 %v10116_v35, %v4448_v46 }
 0x4d4   : > { %4372 = vmatpush.bf16.msra.mxu3 %v6766_v5  ;;  %v2083_v53 = vsel %vm1277_vm3, %v11450_v25, %v2077_v34  ;;  %v10156_v26 = vpop.permute.xlu2 %4620  ;;  %v6882_v14 = vor.u32 %v7286_v43, %v6881_v6  ;;  %v4212_v2 = vpop.f32.mrf.mxu3  ;;  %v7313_v6 = vld [vmem:[#allocation3 + $0x464] sm:$0xf] }
 0x4d5   : > { %v2084_v51 = vsel %vm11451_vm1, %v9749_v8, %v2083_v53  ;;  %v7292_v49 = vld [vmem:[#allocation3 + $0x3b4] sm:$0xf0]  ;;  %v2553_v20 = vpop.permute.xlu1 %2552  ;;  %v4415_v32 = vrot.slane %v4198_v58, 4  ;;  %v4409_v11 = vrot.slane %v4146_v45, 4  ;;  %v10168_v42 = vsel %vm4450_vm11, %v10116_v35, %v4449_v62 }
 0x4d6   : > { %2090 = vst [vmem:[#allocation3 + $0x208] sm:$0xff] %v2084_v51  ;;  %v6906_v55 = vor.u32 %v7292_v49, %v6905_v41  ;;  %v2557_v47 = vrot.slane %v2553_v20, 4  ;;  %v7232_v35 = vld [vmem:[#allocation3 + $0x1d4] sm:$0xf0]  ;;  %v6667_v41 = vld [vmem:[#allocation3 + $0x1d8] sm:$0xf0] }
 0x4d7   : > { %v4416_v8 = vadd.f32 %v4415_v32, %v4198_v58  ;;  %v4410_v59 = vadd.f32 %v4409_v11, %v4146_v45 }
 0x4d8   : > { %4373 = vmatpush.bf16.msra.mxu3 %v6742_v40  ;;  %4335 = vmatpush.bf16.msrb.mxu1 %v6906_v55  ;;  %v2563_v61 = vsel %vm1277_vm3, %v2556_v37, %v2557_v47 }
 0x4d9   : > { %v1953_v24 = vpop.permute.xlu0 %1952  ;;  %v2564_v36 = vsel %vm11452_vm15, %v9873_v38, %v2563_v61  ;;  %v4417_v30 = vrot.slane %v4416_v8, 2  ;;  %v4411_v52 = vrot.slane %v4410_v59, 2  ;;  %v7226_v61 = vld [vmem:[#allocation3 + $0x1a4] sm:$0xf0] }
 0x4da   : > { %v1957_v28 = vrot.slane %v1953_v24, 4  ;;  %2570 = vst [vmem:[#allocation3 + $0x328] sm:$0xff] %v2564_v36  ;;  %v6643_v24 = vld [vmem:[#allocation3 + $0x1a8] sm:$0xf0] }
 0x4db   : > { %v4418_v60 = vadd.f32 %v4417_v30, %v4416_v8  ;;  %v4412_v15 = vadd.f32 %v4411_v52, %v4410_v59 }
 0x4dc   : > { %4374 = vmatpush.bf16.msra.mxu3 %v6718_v56  ;;  %v1963_v37 = vsel %vm1277_vm3, %v11453_v9, %v1957_v28  ;;  %4336 = vmatpush.bf16.msrb.mxu1 %v6882_v14  ;;  %v10171_v22 = vpop.f32.mrf.mxu3  ;;  %v7223_v56 = vld [vmem:[#allocation3 + $0x194] sm:$0xf] }
 0x4dd   : > { %v1964_v38 = vsel %vm11454_vm10, %v9472_v48, %v1963_v37  ;;  %v7238_v1 = vld [vmem:[#allocation3 + $0x204] sm:$0xf0]  ;;  %v6691_v5 = vld [vmem:[#allocation3 + $0x208] sm:$0xf0]  ;;  %v10165_v50 = vpop.permute.xlu1 %4599  ;;  %v4419_v29 = vrot.slane %v4418_v60, 1  ;;  %v4413_v57 = vrot.slane %v4412_v15, 1  ;;  %v10174_v10 = vpop.permute.xlu2 %5235  ;;  %v6646_v14 = vor.u32 %v7223_v56, %v6643_v24 }
 0x4de   : > { %1970 = vst [vmem:[#allocation3 + $0x1c0] sm:$0xff] %v1964_v38  ;;  %v6690_v12 = vor.u32 %v7238_v1, %v6689_v23  ;;  %v6694_v3 = vor.u32 %v7235_v7, %v6691_v5  ;;  %v7307_v37 = vld [vmem:[#allocation3 + $0x434] sm:$0xf]  ;;  %v6857_v38 = vld [vmem:[#allocation3 + $0x340] sm:$0xf] }
 0x4df   : > { %v4420_v39 = vadd.f32 %v4419_v29, %v4418_v60  ;;  %v4414_v18 = vadd.f32 %v4413_v57, %v4412_v15  ;;  %v6979_v15 = vld [vmem:[#allocation3 + $0x448] sm:$0xf0]  ;;  %v6955_v29 = vld [vmem:[#allocation3 + $0x418] sm:$0xf0]  ;;  %v7585_v57 = vld [vmem:[#allocation3 + $0x490] sm:$0xff] }
 0x4e0   : > { %4323 = vmatpush.bf16.msra.mxu0 %v6690_v12  ;;  %4375 = vmatpush.bf16.msra.mxu3 %v6694_v3 }
 0x4e1   : > { %v2633_v34 = vpop.permute.xlu0 %2632  ;;  %v4453_v4 = vmul.f32 %v10168_v42, %v4420_v39  ;;  %v4452_v40 = vmul.f32 %v10168_v42, %v4414_v18  ;;  %v3779_v39 = vunpack.c.h.b16 %v7585_v57 }
 0x4e2   : > { %v2637_v48 = vrot.slane %v2633_v34, 4 }
 0x4e3   : > { %v10179_v53 = vsub.f32 %v4198_v58, %v4453_v4  ;;  %v10183_v49 = vsub.f32 %v4146_v45, %v4452_v40  ;;  %v6641_v58 = vld [vmem:[#allocation3 + $0x190] sm:$0xf]  ;;  %v7003_v45 = vld [vmem:[#allocation3 + $0x478] sm:$0xf0]  ;;  %v7301_v4 = vld [vmem:[#allocation3 + $0x404] sm:$0xf] }
 0x4e4   : > { %v2643_v25 = vsel %vm1277_vm3, %v2636_v27, %v2637_v48  ;;  %v5242_v27 = vrot.slane %v10174_v10, 4  ;;  %v6642_v28 = vor.u32 %v7226_v61, %v6641_v58  ;;  %v7006_v2 = vor.u32 %v7313_v6, %v7003_v45  ;;  %v4251_v52 = vpop.f32.mrf.mxu3  ;;  %v6907_v6 = vld [vmem:[#allocation3 + $0x3b8] sm:$0xf0]  ;;  %v7283_v61 = vld [vmem:[#allocation3 + $0x374] sm:$0xf] }
 0x4e5   : > { %v2644_v44 = vsel %vm11455_vm8, %v9871_v33, %v2643_v25  ;;  %v6665_v13 = vld [vmem:[#allocation3 + $0x1c0] sm:$0xf]  ;;  %v7229_v51 = vld [vmem:[#allocation3 + $0x1c4] sm:$0xf]  ;;  %v5234_v20 = vpop.permute.xlu1 %5233  ;;  %v4465_v32 = vmul.f32 %v10179_v53, %v10179_v53  ;;  %v4464_v33 = vmul.f32 %v10183_v49, %v10183_v49  ;;  %v6958_v25 = vor.u32 %v7301_v4, %v6955_v29 }
 0x4e6   : > { %2650 = vst [vmem:[#allocation3 + $0x358] sm:$0xff] %v2644_v44  ;;  %v6666_v55 = vor.u32 %v7232_v35, %v6665_v13  ;;  %v6670_v31 = vor.u32 %v7229_v51, %v6667_v41  ;;  %v5241_v47 = vrot.slane %v5234_v20, 4  ;;  %v7295_v44 = vld [vmem:[#allocation3 + $0x3d4] sm:$0xf]  ;;  %v3929_v13 = vpack.c.b16 %v3779_v39, %v3779_v39  ;;  %v7274_v41 = vld [vmem:[#allocation3 + $0x324] sm:$0xf0] }
 0x4e7   : > { %v4476_v11 = vrot.slane %v4465_v32, 4  ;;  %v4470_v43 = vrot.slane %v4464_v33, 4 }
 0x4e8   : > { %4324 = vmatpush.bf16.msra.mxu0 %v6666_v55  ;;  %4376 = vmatpush.bf16.msra.mxu3 %v6670_v31  ;;  %v5245_v46 = vsel %vm1277_vm3, %v5241_v47, %v5242_v27 }
 0x4e9   : > { %v2513_v8 = vpop.permute.xlu0 %2512  ;;  %v10194_v59 = vsel %vm11456_vm2, %v5234_v20, %v5245_v46  ;;  %v4477_v30 = vadd.f32 %v4476_v11, %v4465_v32  ;;  %v4471_v62 = vadd.f32 %v4470_v43, %v4464_v33  ;;  %v10206_v20 = vpop.f32.mrf.mxu1  ;;  %v6931_v32 = vld [vmem:[#allocation3 + $0x3e8] sm:$0xf0]  ;;  %v4095_v33 = vsel %vm1277_vm3, %v3929_v13, 0  ;;  %v7289_v46 = vld [vmem:[#allocation3 + $0x3a4] sm:$0xf] }
 0x4ea   : > { %v2517_v36 = vrot.slane %v2513_v8, 4  ;;  %v6934_v58 = vor.u32 %v7295_v44, %v6931_v32  ;;  %v6910_v8 = vor.u32 %v7289_v46, %v6907_v6  ;;  %v4211_v43 = vadd.f32 %v10140_v19, %v10124_v21 }
 0x4eb   : > { %v4478_v23 = vrot.slane %v4477_v30, 2  ;;  %v4472_v7 = vrot.slane %v4471_v62, 2 }
 0x4ec   : > { %v2523_v9 = vsel %vm1277_vm3, %v2516_v17, %v2517_v36  ;;  %4325 = vmatpush.bf16.msra.mxu0 %v6642_v28  ;;  %4377 = vmatpush.bf16.msra.mxu3 %v6646_v14  ;;  %v6982_v17 = vor.u32 %v7307_v37, %v6979_v15  ;;  %v6883_v36 = vld [vmem:[#allocation3 + $0x388] sm:$0xf0] }
 0x4ed   : > { %v2524_v60 = vsel %vm11457_vm0, %v9904_v54, %v2523_v9  ;;  %v7280_v1 = vld [vmem:[#allocation3 + $0x354] sm:$0xf0]  ;;  %v4479_v12 = vadd.f32 %v4478_v23, %v4477_v30  ;;  %v4473_v3 = vadd.f32 %v4472_v7, %v4471_v62  ;;  %v5240_v14 = vpop.permute.xlu1 %5239  ;;  %v6886_v30 = vor.u32 %v7283_v61, %v6883_v36  ;;  %v6859_v62 = vld [vmem:[#allocation3 + $0x358] sm:$0xf0] }
 0x4ee   : > { %2530 = vst [vmem:[#allocation3 + $0x310] sm:$0xff] %v2524_v60  ;;  %v6858_v5 = vor.u32 %v7280_v1, %v6857_v38  ;;  %v4223_v34 = vpop.f32.mrf.mxu2  ;;  %v5244_v38 = vrot.slane %v5240_v14, 4 }
 0x4ef   : > { %4326 = vmatmul.bf16.vlgmr.msra.gmra.mxu0 %v9476_v0  ;;  %4378 = vmatmul.bf16.vlgmr.msra.gmra.mxu3 %v9476_v0  ;;  %v4480_v54 = vrot.slane %v4479_v12, 1  ;;  %v4474_v48 = vrot.slane %v4473_v3, 1  ;;  %v4224_v7 = vadd.f32 %v4223_v34, %v4211_v43 }
 0x4f0   : > { %4383 = vmatpush.bf16.msrb.mxu0 %v7006_v2  ;;  %4337 = vmatpush.bf16.msrb.mxu1 %v6858_v5  ;;  %v7277_v5 = vld [vmem:[#allocation3 + $0x344] sm:$0xf] }
 0x4f1   : > { %v10203_v18 = vpop.permute.xlu0 %4587  ;;  %v4481_v40 = vadd.f32 %v4480_v54, %v4479_v12  ;;  %v4475_v35 = vadd.f32 %v4474_v48, %v4473_v3  ;;  %v4277_v24 = vpop.f32.mrf.mxu1  ;;  %v6862_v15 = vor.u32 %v7277_v5, %v6859_v62 }
 0x4f3   : > { %v4507_v0 = vmul.f32 %v4481_v40, %v10168_v42  ;;  %v4506_v55 = vmul.f32 %v4475_v35, %v10168_v42  ;;  %v6835_v40 = vld [vmem:[#allocation3 + $0x328] sm:$0xf0] }
 0x4f4   : > { %4384 = vmatpush.bf16.msrb.mxu0 %v6982_v17 }
 0x4f5   : > { %v6833_v51 = vld [vmem:[#allocation3 + $0x310] sm:$0xf]  ;;  %v4513_v47 = vadd.f32 1e-05, %v4507_v0  ;;  %v4512_v56 = vadd.f32 1e-05, %v4506_v55 }
 0x4f6   : > { %v6834_v31 = vor.u32 %v7274_v41, %v6833_v51  ;;  %v4225_v45 = vpop.f32.mrf.mxu2  ;;  %v7271_v29 = vld [vmem:[#allocation3 + $0x314] sm:$0xf] }
 0x4f7   : > { %7520 = vrsqrt.f32 %v4513_v47  ;;  %vm4534_vm4 = vweird.f32 %v4513_v47  ;;  %vm4524_vm13 = vweird.f32 %v4512_v56 }
 0x4f8   : > { %4385 = vmatpush.bf16.msrb.mxu0 %v6958_v25  ;;  %4338 = vmatpush.bf16.msrb.mxu1 %v6834_v31  ;;  %7522 = vrsqrt.f32 %v4512_v56 }
 0x4f9   : > { %v10210_v11 = vpop.permute.xlu0 %4625 }
 0x4fb   : > { %4339 = vmatmul.bf16.vlgmr.msrb.gmra.mxu1 %v9478_v63 }
 0x4fc   : > { %4386 = vmatpush.bf16.msrb.mxu0 %v6934_v58  ;;  %4403 = vmatpush.bf16.msra.mxu1 %v4095_v33 }
 0x4fd   : > { %v7521_v28 = vpop.eup %7520  ;;  %v4262_v9 = vpop.f32.mrf.mxu3 }
 0x4fe   : > { %v7523_v2 = vpop.eup %7522  ;;  %v4529_v52 = vmul.f32 %v7521_v28, %v4513_v47  ;;  %vm4535_vm6 = vweird.f32 %v7521_v28  ;;  %v4263_v41 = vadd.f32 %v4262_v9, %v10124_v21 }
 0x4ff   : > { %v4519_v23 = vmul.f32 %v7523_v2, %v4512_v56  ;;  %vm4525_vm1 = vweird.f32 %v7523_v2  ;;  %vm4536_vm15 = vmor %vm4534_vm4, %vm4535_vm6 }
 0x500   : > { %4387 = vmatpush.bf16.msrb.mxu0 %v6910_v8  ;;  %v4530_v60 = vmul.f32 %v7521_v28, %v4529_v52  ;;  %vm4526_vm11 = vmor %vm4524_vm13, %vm4525_vm1  ;;  %v4276_v6 = vadd.f32 %v10206_v20, %v4263_v41 }
 0x501   : > { %v5238_v37 = vpop.permute.xlu0 %5237  ;;  %v4520_v12 = vmul.f32 %v7523_v2, %v4519_v23 }
 0x502   : > { %v5243_v1 = vrot.slane %v5238_v37, 4  ;;  %v4531_v19 = vmul.f32 0.5, %v4530_v60 }
 0x503   : > { %v4521_v54 = vmul.f32 0.5, %v4520_v12 }
 0x504   : > { %4388 = vmatpush.bf16.msrb.mxu0 %v6886_v30  ;;  %v5247_v17 = vsel %vm1277_vm3, %v5242_v27, %v5243_v1  ;;  %v5249_v3 = vsel %vm1277_vm3, %v5243_v1, %v5244_v38  ;;  %v4236_v34 = vpop.f32.mrf.mxu0  ;;  %v4532_v48 = vsub.f32 1.5, %v4531_v19  ;;  %v6838_v27 = vor.u32 %v7271_v29, %v6835_v40 }
 0x505   : > { %v10221_v57 = vsel %vm11458_vm9, %v10174_v10, %v5247_v17  ;;  %v5250_v39 = vsel %vm11459_vm12, %v5238_v37, %v5249_v3  ;;  %v4237_v4 = vadd.f32 %v4236_v34, %v4224_v7  ;;  %v4522_v25 = vsub.f32 1.5, %v4521_v54  ;;  %v4264_v10 = vpop.f32.mrf.mxu3 }
 0x506   : > { %5256 = vst [vmem:[#allocation4 + $0x40] sm:$0xff] %v5250_v39  ;;  %v4533_v35 = vmul.f32 %v7521_v28, %v4532_v48 }
 0x507   : > { %v4250_v44 = vadd.f32 %v10171_v22, %v4237_v4  ;;  %v4523_v13 = vmul.f32 %v7523_v2, %v4522_v25 }
 0x508   : > { %4389 = vmatpush.bf16.msrb.mxu0 %v6862_v15  ;;  %v4537_v0 = vsel %vm4536_vm15, %v7521_v28, %v4533_v35 }
 0x509   : > { %v4421_v51 = vrot.slane %v4250_v44, 4  ;;  %v4579_v55 = vmul.f32 %v4537_v0, %v10179_v53  ;;  %v4527_v31 = vsel %vm4526_vm11, %v7523_v2, %v4523_v13 }
 0x50a   : > { %v4578_v22 = vmul.f32 %v4527_v31, %v10183_v49  ;;  %v10239_v49 = vld [vmem:[#allocation14] sm:$0xff] }
 0x50b   : > { %7012 = vmatmul.msk.bf16.vlgmr.msra.gmra.mxu1 %vm4074_vm14, %v9375_v16  ;;  %v4422_v32 = vadd.f32 %v4421_v51, %v4250_v44  ;;  %v4591_v56 = vmul.f32 %v10203_v18, %v4579_v55 }
 0x50c   : > { %4390 = vmatpush.bf16.msrb.mxu0 %v6838_v27  ;;  %v4238_v58 = vpop.f32.mrf.mxu0  ;;  %v4590_v45 = vmul.f32 %v10203_v18, %v4578_v22 }
 0x50d   : > { %v4423_v33 = vrot.slane %v4422_v32, 2  ;;  %v4603_v53 = vadd.f32 %v10165_v50, %v4591_v56 }
 0x50e   : > { %v4288_v47 = vpop.f32.mrf.mxu2  ;;  %v4602_v16 = vadd.f32 %v10165_v50, %v4590_v45 }
 0x50f   : > { %4391 = vmatmul.bf16.vlgmr.msrb.gmra.mxu0 %v9478_v63  ;;  %v4424_v46 = vadd.f32 %v4423_v33, %v4422_v32  ;;  %v4611_v8 = vpack.c.bf16 %v4603_v53, %v4603_v53  ;;  %v4289_v24 = vadd.f32 %v4288_v47, %v4276_v6  ;;  %v5345_v33 = vunpack.c.l.b16 %v10194_v59 }
 0x510   : > { %v4610_v63 = vpack.c.bf16 %v4602_v16, %v4602_v16 }
 0x511   : > { %v4425_v61 = vrot.slane %v4424_v46, 1  ;;  %v4640_v43 = vsel %vm1277_vm3, %v4611_v8, 0  ;;  %v5357_v8 = vpack.c.b16 %v5345_v33, %v5345_v33 }
 0x512   : > { %v4637_v28 = vsel %vm1277_vm3, %v4610_v63, 0  ;;  %4675 = vmatpush.bf16.msra.mxu2 %v4640_v43  ;;  %v5284_v43 = vld [vmem:[#allocation9 + $0x1] ss:$2 sm:$0x3f] }
 0x513   : > { %v4426_v36 = vadd.f32 %v4425_v61, %v4424_v46  ;;  %4661 = vmatpush.bf16.msrb.mxu1 %v4637_v28 }
 0x514   : > { %v4301_v14 = vpop.f32.mrf.mxu0 }
 0x515   : > { %v4454_v30 = vmul.f32 %v10168_v42, %v4426_v36  ;;  %v4302_v2 = vadd.f32 %v4301_v14, %v4289_v24  ;;  %7018 = vmatmul.msk.bf16.vlgmr.msra.gmra.mxu2 %vm4074_vm14, %v10239_v49  ;;  %v5258_v24 = vld [vmem:[#allocation9] ss:$2 sm:$0x3f] }
 0x516   : > { %v4290_v20 = vpop.f32.mrf.mxu2 }
 0x517   : > { %v4460_v52 = vsub.f32 %v4250_v44, %v4454_v30  ;;  %v4427_v62 = vrot.slane %v4302_v2, 4  ;;  %v5374_v20 = vsel %vm1277_vm3, %v5357_v8, 0 }
 0x519   : > { %v4466_v9 = vmul.f32 %v4460_v52, %v4460_v52  ;;  %v4428_v37 = vadd.f32 %v4427_v62, %v4302_v2 }
 0x51b   : > { %7017 = vmatmul.msk.bf16.vlgmr.msrb.gmra.mxu1 %vm4074_vm14, %v10239_v49  ;;  %v4482_v23 = vrot.slane %v4466_v9, 4  ;;  %v4429_v60 = vrot.slane %v4428_v37, 2  ;;  %v10259_v30 = vpop.permute.xlu2 %5261 }
 0x51c   : > { %v4303_v38 = vpop.f32.mrf.mxu0 }
 0x51d   : > { %v4483_v1 = vadd.f32 %v4482_v23, %v4466_v9  ;;  %v4430_v7 = vadd.f32 %v4429_v60, %v4428_v37  ;;  %v5269_v9 = vperm.slane %v5258_v24, 4  ;;  %v5294_v60 = vperm.slane %v5284_v43, 4 }
 0x51e   : > { %v10249_v40 = vpop.f32.mrf.mxu2 }
 0x51f   : > { %v4484_v5 = vrot.slane %v4483_v1, 2  ;;  %v4431_v15 = vrot.slane %v4430_v7, 1 }
 0x521   : > { %v4485_v12 = vadd.f32 %v4484_v5, %v4483_v1  ;;  %v4432_v19 = vadd.f32 %v4431_v15, %v4430_v7  ;;  %v5281_v1 = vmul.f32 %v5269_v9, %v10259_v30 }
 0x523   : > { %v4486_v17 = vrot.slane %v4485_v12, 1  ;;  %v4455_v3 = vmul.f32 %v10168_v42, %v4432_v19 }
 0x525   : > { %v4487_v29 = vadd.f32 %v4486_v17, %v4485_v12  ;;  %v4461_v39 = vsub.f32 %v4302_v2, %v4455_v3  ;;  %v5270_v2 = vperm.slane %v5258_v24, 5  ;;  %v5346_v12 = vunpack.c.h.b16 %v10194_v59 }
 0x526   : > { %v4355_v0 = vpop.f32.mrf.mxu2 }
 0x527   : > { %v4508_v34 = vmul.f32 %v4487_v29, %v10168_v42  ;;  %v4467_v54 = vmul.f32 %v4461_v39, %v4461_v39  ;;  %v5282_v37 = vmul.f32 %v5270_v2, %v10259_v30 }
 0x529   : > { %v4514_v48 = vadd.f32 1e-05, %v4508_v34  ;;  %v4488_v4 = vrot.slane %v4467_v54, 4 }
 0x52b   : > { %7524 = vrsqrt.f32 %v4514_v48  ;;  %v4489_v27 = vadd.f32 %v4488_v4, %v4467_v54  ;;  %vm4544_vm10 = vweird.f32 %v4514_v48  ;;  %v5358_v54 = vpack.c.b16 %v5346_v12, %v5346_v12 }
 0x52d   : > { %v4490_v25 = vrot.slane %v4489_v27, 2 }
 0x52f   : > { %v4491_v35 = vadd.f32 %v4490_v25, %v4489_v27 }
 0x531   : > { %v7525_v44 = vpop.eup %7524  ;;  %v4492_v10 = vrot.slane %v4491_v35, 1 }
 0x532   : > { %v4539_v13 = vmul.f32 %v7525_v44, %v4514_v48  ;;  %vm4545_vm8 = vweird.f32 %v7525_v44 }
 0x533   : > { %v4493_v51 = vadd.f32 %v4492_v10, %v4491_v35  ;;  %vm4546_vm2 = vmor %vm4544_vm10, %vm4545_vm8 }
 0x534   : > { %v4540_v41 = vmul.f32 %v7525_v44, %v4539_v13 }
 0x535   : > { %v4509_v55 = vmul.f32 %v4493_v51, %v10168_v42 }
 0x536   : > { %v4541_v31 = vmul.f32 0.5, %v4540_v41 }
 0x537   : > { %v4515_v32 = vadd.f32 1e-05, %v4509_v55  ;;  %v10257_v14 = vpop.permute.xlu0 %5286 }
 0x538   : > { %v4542_v47 = vsub.f32 1.5, %v4541_v31  ;;  %v5306_v15 = vmul.f32 %v5294_v60, %v10257_v14 }
 0x539   : > { %7526 = vrsqrt.f32 %v4515_v32  ;;  %vm4554_vm0 = vweird.f32 %v4515_v32 }
 0x53a   : > { %v4543_v22 = vmul.f32 %v7525_v44, %v4542_v47  ;;  %v10271_v3 = vadd.f32 %v5306_v15, %v5281_v1 }
 0x53c   : > { %v4547_v58 = vsel %vm4546_vm2, %v7525_v44, %v4543_v22 }
 0x53d   : > { %v4580_v56 = vmul.f32 %v4547_v58, %v4460_v52  ;;  %v5295_v52 = vperm.slane %v5284_v43, 5 }
 0x53f   : > { %v7527_v6 = vpop.eup %7526  ;;  %v4592_v45 = vmul.f32 %v10203_v18, %v4580_v56  ;;  %v5307_v23 = vmul.f32 %v5295_v52, %v10257_v14 }
 0x540   : > { %v4549_v53 = vmul.f32 %v7527_v6, %v4515_v32  ;;  %vm4555_vm4 = vweird.f32 %v7527_v6 }
 0x541   : > { %v4604_v46 = vadd.f32 %v10165_v50, %v4592_v45  ;;  %vm4556_vm13 = vmor %vm4554_vm0, %vm4555_vm4  ;;  %v10266_v5 = vadd.f32 %v5307_v23, %v5282_v37 }
 0x542   : > { %v4550_v16 = vmul.f32 %v7527_v6, %v4549_v53 }
 0x543   : > { %v4612_v61 = vpack.c.bf16 %v4604_v46, %v4604_v46 }
 0x544   : > { %v4551_v63 = vmul.f32 0.5, %v4550_v16 }
 0x545   : > { %v4643_v36 = vsel %vm1277_vm3, %v4612_v61, 0 }
 0x546   : > { %v4552_v28 = vsub.f32 1.5, %v4551_v63  ;;  %4689 = vmatpush.bf16.msrb.mxu3 %v4643_v36 }
 0x548   : > { %v4553_v62 = vmul.f32 %v7527_v6, %v4552_v28 }
 0x549   : > { %7019 = vmatmul.msk.bf16.vlgmr.msrb.gmra.mxu3 %vm4074_vm14, %v10239_v49 }
 0x54a   : > { %5397 = vmatpush.bf16.msra.mxu3 %v5374_v20  ;;  %v4557_v38 = vsel %vm4556_vm13, %v7527_v6, %v4553_v62 }
 0x54b   : > { %v4581_v7 = vmul.f32 %v4557_v38, %v4461_v39  ;;  %v5377_v39 = vsel %vm1277_vm3, %v5358_v54, 0 }
 0x54d   : > { %v4593_v19 = vmul.f32 %v10203_v18, %v4581_v7 }
 0x54e   : > { %v4314_v17 = vpop.f32.mrf.mxu3 }
 0x54f   : > { %v4366_v29 = vpop.f32.mrf.mxu2  ;;  %v4605_v34 = vadd.f32 %v10165_v50, %v4593_v19  ;;  %v4315_v10 = vadd.f32 %v4314_v17, %v10124_v21 }
 0x550   : > { %v4367_v33 = vadd.f32 %v4366_v29, %v10124_v21 }
 0x551   : > { %v4613_v48 = vpack.c.bf16 %v4605_v34, %v4605_v34 }
 0x553   : > { %v4646_v4 = vsel %vm1277_vm3, %v4613_v48, 0 }
 0x554   : > { %4703 = vmatpush.bf16.msra.mxu0 %v4646_v4 }
 0x556   : > { %v4316_v27 = vpop.f32.mrf.mxu3 }
 0x557   : > { %v4368_v25 = vpop.f32.mrf.mxu2  ;;  %7020 = vmatmul.msk.bf16.vlgmr.msra.gmra.mxu0 %vm4074_vm14, %v10239_v49 }
 0x558   : > { %5410 = vmatpush.bf16.msrb.mxu0 %v5377_v39 }
 0x56c   : > { %v4327_v59 = vpop.f32.mrf.mxu0 }
 0x56d   : > { %v4328_v13 = vadd.f32 %v4327_v59, %v4315_v10 }
 0x572   : > { %v4379_v35 = vpop.f32.mrf.mxu3 }
 0x573   : > { %v4380_v45 = vadd.f32 %v4379_v35, %v4367_v33 }
 0x574   : > { %v4329_v44 = vpop.f32.mrf.mxu0 }
 0x578   : > { %v4340_v0 = vpop.f32.mrf.mxu1 }
 0x579   : > { %v4341_v51 = vadd.f32 %v4340_v0, %v4328_v13 }
 0x57a   : > { %v4381_v41 = vpop.f32.mrf.mxu3 }
 0x57b   : > { %v4354_v55 = vadd.f32 %v10249_v40, %v4341_v51 }
 0x57d   : > { %v4433_v31 = vrot.slane %v4354_v55, 4 }
 0x57f   : > { %v4434_v32 = vadd.f32 %v4433_v31, %v4354_v55 }
 0x580   : > { %v4342_v47 = vpop.f32.mrf.mxu1 }
 0x581   : > { %v4435_v22 = vrot.slane %v4434_v32, 2 }
 0x583   : > { %v4436_v58 = vadd.f32 %v4435_v22, %v4434_v32 }
 0x585   : > { %v4437_v56 = vrot.slane %v4436_v58, 1 }
 0x587   : > { %v4438_v6 = vadd.f32 %v4437_v56, %v4436_v58 }
 0x588   : > { %v4405_v53 = vpop.f32.mrf.mxu1 }
 0x589   : > { %v4456_v46 = vmul.f32 %v10168_v42, %v4438_v6 }
 0x58b   : > { %v10282_v61 = vsub.f32 %v4354_v55, %v4456_v46 }
 0x58c   : > { %v4392_v16 = vpop.f32.mrf.mxu0 }
 0x58d   : > { %v4393_v8 = vadd.f32 %v4392_v16, %v4380_v45  ;;  %v4468_v40 = vmul.f32 %v10282_v61, %v10282_v61 }
 0x58f   : > { %v4406_v24 = vadd.f32 %v4405_v53, %v4393_v8  ;;  %v4494_v43 = vrot.slane %v4468_v40, 4  ;;  %v5347_v8 = vunpack.c.l.b16 %v10221_v57 }
 0x590   : > { %v4407_v28 = vpop.f32.mrf.mxu1 }
 0x591   : > { %v4439_v63 = vrot.slane %v4406_v24, 4  ;;  %v4495_v20 = vadd.f32 %v4494_v43, %v4468_v40 }
 0x593   : > { %v4440_v36 = vadd.f32 %v4439_v63, %v4406_v24  ;;  %v4496_v52 = vrot.slane %v4495_v20, 2 }
 0x594   : > { %v4394_v2 = vpop.f32.mrf.mxu0 }
 0x595   : > { %v4441_v21 = vrot.slane %v4440_v36, 2  ;;  %v4497_v9 = vadd.f32 %v4496_v52, %v4495_v20 }
 0x597   : > { %v4442_v62 = vadd.f32 %v4441_v21, %v4440_v36  ;;  %v4498_v23 = vrot.slane %v4497_v9, 1 }
 0x598   : > { %v4663_v38 = vpop.f32.mrf.mxu1  ;;  %v4677_v12 = vpop.f32.mrf.mxu2 }
 0x599   : > { %v4443_v37 = vrot.slane %v4442_v62, 1  ;;  %v4499_v1 = vadd.f32 %v4498_v23, %v4497_v9  ;;  %v10287_v7 = vadd.f32 %v4663_v38, %v10156_v26  ;;  %v10295_v29 = vadd.f32 %v4677_v12, %v10156_v26 }
 0x59a   : > { %v5348_v38 = vunpack.c.h.b16 %v10221_v57 }
 0x59b   : > { %v4444_v60 = vadd.f32 %v4443_v37, %v4442_v62  ;;  %v4510_v19 = vmul.f32 %v4499_v1, %v10168_v42  ;;  %v10292_v17 = vmul.f32 0.70710677, %v10287_v7  ;;  %v10303_v39 = vmul.f32 0.70710677, %v10295_v29 }
 0x59d   : > { %v4457_v15 = vmul.f32 %v10168_v42, %v4444_v60  ;;  %v4516_v54 = vadd.f32 1e-05, %v4510_v19  ;;  %v4762_v48 = vand.u32 2147483647, %v10292_v17  ;;  %v10306_v59 = vand.u32 2147483647, %v10303_v39 }
 0x59f   : > { %v10297_v34 = vsub.f32 %v4406_v24, %v4457_v15  ;;  %7528 = vrsqrt.f32 %v4516_v54  ;;  %v4774_v27 = vmul.f32 0.3275911, %v4762_v48  ;;  %v4775_v0 = vmul.f32 0.3275911, %v10306_v59 }
 0x5a0   : > { %v4665_v35 = vpop.f32.mrf.mxu1  ;;  %v4679_v22 = vpop.f32.mrf.mxu2  ;;  %vm4564_vm6 = vweird.f32 %v4516_v54  ;;  %v5074_v40 = vsub.f32 0.0, %v4762_v48 }
 0x5a1   : > { %v4469_v4 = vmul.f32 %v10297_v34, %v10297_v34  ;;  %v4786_v44 = vadd.f32 1.0, %v4774_v27  ;;  %v10309_v10 = vadd.f32 %v4665_v35, %v10210_v11  ;;  %v10312_v41 = vadd.f32 1.0, %v4775_v0 }
 0x5a2   : > { %v10322_v45 = vadd.f32 %v4679_v22, %v10210_v11  ;;  %v5086_v60 = vmul.f32 %v5074_v40, %v4762_v48  ;;  %v5075_v0 = vsub.f32 0.0, %v10306_v59 }
 0x5a3   : > { %v4500_v25 = vrot.slane %v4469_v4, 4  ;;  %7530 = vrcp.f32 %v4786_v44  ;;  %v10315_v31 = vmul.f32 0.70710677, %v10309_v10  ;;  %v4807_v24 = vand.u32 2147483647, %v4786_v44 }
 0x5a4   : > { %7532 = vrcp.f32 %v10312_v41  ;;  %v4809_v2 = vand.u32 2147483648, %v4786_v44  ;;  %v10330_v52 = vmul.f32 0.70710677, %v10322_v45  ;;  %vm4803_vm15 = vweird.f32 %v4786_v44 }
 0x5a5   : > { %v4501_v13 = vadd.f32 %v4500_v25, %v4469_v4  ;;  %v7529_v55 = vpop.eup %7528  ;;  %v10319_v33 = vand.u32 2147483647, %v10315_v31  ;;  %vm4808_vm10 = vcmp.eq.f32.partialorder %v4807_v24, 8.507059e+37  ;;  %v4823_v48 = vand.u32 2147483648, %v10312_v41 }
 0x5a6   : > { %v4559_v32 = vmul.f32 %v7529_v55, %v4516_v54  ;;  %vm4565_vm9 = vweird.f32 %v7529_v55  ;;  %v4810_v19 = vor.u32 1.1754944e-38, %v4809_v2  ;;  %v4821_v54 = vand.u32 2147483647, %v10312_v41 }
 0x5a7   : > { %v4502_v51 = vrot.slane %v4501_v13, 2  ;;  %v4780_v63 = vmul.f32 0.3275911, %v10319_v33  ;;  %vm4566_vm1 = vmor %vm4564_vm6, %vm4565_vm9  ;;  %v10344_v25 = vand.u32 2147483647, %v10330_v52  ;;  %vm4817_vm2 = vweird.f32 %v10312_v41 }
 0x5a8   : > { %v4560_v58 = vmul.f32 %v7529_v55, %v4559_v32  ;;  %vm4822_vm0 = vcmp.eq.f32.partialorder %v4821_v54, 8.507059e+37  ;;  %v5087_v2 = vmul.f32 %v5075_v0, %v10306_v59 }
 0x5a9   : > { %v4503_v47 = vadd.f32 %v4502_v51, %v4501_v13  ;;  %v7531_v6 = vpop.eup %7530  ;;  %v10327_v21 = vadd.f32 1.0, %v4780_v63  ;;  %v4781_v51 = vmul.f32 0.3275911, %v10344_v25 }
 0x5aa   : > { %v4561_v53 = vmul.f32 0.5, %v4560_v58  ;;  %v4799_v16 = vmul.f32 %v7531_v6, %v4786_v44  ;;  %v7533_v20 = vpop.eup %7532  ;;  %vm4804_vm12 = vweird.f32 %v7531_v6 }
 0x5ab   : > { %v4504_v56 = vrot.slane %v4503_v47, 1  ;;  %v4813_v23 = vmul.f32 %v7533_v20, %v10312_v41  ;;  %7534 = vrcp.f32 %v10327_v21  ;;  %vm4805_vm11 = vmor %vm4803_vm15, %vm4804_vm12  ;;  %vm4818_vm8 = vweird.f32 %v7533_v20 }
 0x5ac   : > { %v4562_v43 = vsub.f32 1.5, %v4561_v53  ;;  %v4800_v28 = vsub.f32 1.0, %v4799_v16  ;;  %vm4819_vm4 = vmor %vm4817_vm2, %vm4818_vm8  ;;  %v4893_v24 = vand.u32 2147483648, %v10327_v21  ;;  %vm4887_vm6 = vweird.f32 %v10327_v21 }
 0x5ad   : > { %v4505_v46 = vadd.f32 %v4504_v56, %v4503_v47  ;;  %v4814_v4 = vsub.f32 1.0, %v4813_v23  ;;  %v5098_v47 = vmul.f32 1.442695, %v5086_v60 }
 0x5ae   : > { %v4563_v62 = vmul.f32 %v7529_v55, %v4562_v43  ;;  %v4801_v37 = vmul.f32 %v7531_v6, %v4800_v28 }
 0x5af   : > { %v4511_v36 = vmul.f32 %v4505_v46, %v10168_v42  ;;  %v5359_v42 = vpack.c.b16 %v5347_v8, %v5347_v8  ;;  %v4815_v13 = vmul.f32 %v7533_v20, %v4814_v4  ;;  %v10355_v46 = vadd.f32 1.0, %v4781_v51 }
 0x5b0   : > { %v4567_v1 = vsel %vm4566_vm1, %v7529_v55, %v4563_v62  ;;  %v4802_v15 = vadd.f32 %v7531_v6, %v4801_v37 }
 0x5b1   : > { %v10332_v9 = vadd.f32 1e-05, %v4511_v36  ;;  %v4582_v12 = vmul.f32 %v4567_v1, %v10282_v61  ;;  %v5380_v55 = vsel %vm1277_vm3, %v5359_v42, 0  ;;  %v7535_v32 = vpop.eup %7534  ;;  %v4816_v22 = vadd.f32 %v7533_v20, %v4815_v13 }
 0x5b2   : > { %v4806_v27 = vsel %vm4805_vm11, %v7531_v6, %v4802_v15  ;;  %v4824_v6 = vor.u32 1.1754944e-38, %v4823_v48  ;;  %v4883_v53 = vmul.f32 %v7535_v32, %v10327_v21  ;;  %vm4888_vm13 = vweird.f32 %v7535_v32 }
 0x5b3   : > { %7536 = vrsqrt.f32 %v10332_v9  ;;  %v10346_v35 = vsel %vm4808_vm10, %v4810_v19, %v4806_v27  ;;  %v4594_v44 = vmul.f32 %v10203_v18, %v4582_v12  ;;  %v4820_v8 = vsel %vm4819_vm4, %v7533_v20, %v4816_v22  ;;  %vm4889_vm12 = vmor %vm4887_vm6, %vm4888_vm13 }
 0x5b4   : > { %v4966_v61 = vmul.f32 1.0614054, %v10346_v35  ;;  %v10361_v43 = vsel %vm4822_vm0, %v4824_v6, %v4820_v8  ;;  %v4884_v41 = vsub.f32 1.0, %v4883_v53  ;;  %7538 = vrcp.f32 %v10355_v46 }
 0x5b5   : > { %v4606_v40 = vadd.f32 %v10165_v50, %v4594_v44  ;;  %7540 = vpow2.f32 %v5098_v47  ;;  %v4967_v28 = vmul.f32 1.0614054, %v10361_v43  ;;  %v4891_v20 = vand.u32 2147483647, %v10327_v21 }
 0x5b6   : > { %v4978_v56 = vadd.f32 -1.4531521, %v4966_v61  ;;  %v4885_v37 = vmul.f32 %v7535_v32, %v4884_v41  ;;  %v5080_v42 = vsub.f32 0.0, %v10319_v33  ;;  %v4894_v19 = vor.u32 1.1754944e-38, %v4893_v24 }
 0x5b7   : > { %v4979_v60 = vadd.f32 -1.4531521, %v4967_v28  ;;  %v4614_v1 = vpack.c.bf16 %v4606_v40, %v4606_v40  ;;  %vm4574_vm1 = vweird.f32 %v10332_v9  ;;  %vm4892_vm15 = vcmp.eq.f32.partialorder %v4891_v20, 8.507059e+37 }
 0x5b8   : > { %v4990_v63 = vmul.f32 %v4978_v56, %v10346_v35  ;;  %v4886_v12 = vadd.f32 %v7535_v32, %v4885_v37  ;;  %v5100_v22 = vmul.f32 1.442695, %v5087_v2  ;;  %v5092_v53 = vmul.f32 %v5080_v42, %v10319_v33 }
 0x5b9   : > { %v7537_v58 = vpop.eup %7536  ;;  %v4991_v59 = vmul.f32 %v4979_v60, %v10361_v43  ;;  %v4649_v54 = vsel %vm1277_vm3, %v4614_v1, 0  ;;  %v4907_v40 = vand.u32 2147483648, %v10355_v46  ;;  %v4905_v57 = vand.u32 2147483647, %v10355_v46 }
 0x5ba   : > { %v4569_v16 = vmul.f32 %v7537_v58, %v10332_v9  ;;  %v5002_v62 = vadd.f32 1.4214138, %v4990_v63  ;;  %vm4575_vm9 = vweird.f32 %v7537_v58  ;;  %v7539_v27 = vpop.eup %7538  ;;  %v4890_v13 = vsel %vm4889_vm12, %v7535_v32, %v4886_v12  ;;  %4717 = vmatpush.bf16.msra.mxu1 %v4649_v54 }
 0x5bb   : > { %v7541_v44 = vpop.eup %7540  ;;  %v5003_v0 = vadd.f32 1.4214138, %v4991_v59  ;;  %v10373_v51 = vsel %vm4892_vm15, %v4894_v19, %v4890_v13  ;;  %v4897_v21 = vmul.f32 %v7539_v27, %v10355_v46  ;;  %vm4576_vm11 = vmor %vm4574_vm1, %vm4575_vm9  ;;  %v5360_v9 = vpack.c.b16 %v5348_v38, %v5348_v38 }
 0x5bc   : > { %v4570_v36 = vmul.f32 %v7537_v58, %v4569_v16  ;;  %v5014_v15 = vmul.f32 %v5002_v62, %v10346_v35  ;;  %v4972_v56 = vmul.f32 1.0614054, %v10373_v51  ;;  %vm4902_vm10 = vweird.f32 %v7539_v27 }
 0x5bd   : > { %v5015_v6 = vmul.f32 %v5003_v0, %v10361_v43  ;;  %v4898_v16 = vsub.f32 1.0, %v4897_v21  ;;  %7021 = vmatmul.msk.bf16.vlgmr.msra.gmra.mxu1 %vm4074_vm14, %v10239_v49  ;;  %7542 = vpow2.f32 %v5100_v22  ;;  %v5110_v28 = vmul.f32 1.442695, %v5092_v53 }
 0x5be   : > { %v4571_v23 = vmul.f32 0.5, %v4570_v36  ;;  %v5026_v48 = vadd.f32 -0.28449672, %v5014_v15  ;;  %5423 = vmatpush.bf16.msrb.mxu1 %v5380_v55  ;;  %v4984_v24 = vadd.f32 -1.4531521, %v4972_v56  ;;  %vm4901_vm8 = vweird.f32 %v10355_v46 }
 0x5bf   : > { %v5027_v63 = vadd.f32 -0.28449672, %v5015_v6  ;;  %v4899_v41 = vmul.f32 %v7539_v27, %v4898_v16  ;;  %vm4903_vm2 = vmor %vm4901_vm8, %vm4902_vm10  ;;  %v4908_v37 = vor.u32 1.1754944e-38, %v4907_v40  ;;  %vm4906_vm0 = vcmp.eq.f32.partialorder %v4905_v57, 8.507059e+37 }
 0x5c0   : > { %v4572_v4 = vsub.f32 1.5, %v4571_v23  ;;  %v5038_v47 = vmul.f32 %v5026_v48, %v10346_v35  ;;  %v4996_v33 = vmul.f32 %v4984_v24, %v10373_v51  ;;  %7544 = vpow2.f32 %v5110_v28 }
 0x5c1   : > { %v5039_v36 = vmul.f32 %v5027_v63, %v10361_v43  ;;  %vm5146_vm4 = vcmp.ge.f32.partialorder %v10292_v17, 0.0  ;;  %vm5147_vm13 = vcmp.ge.f32.partialorder %v10303_v39, 0.0  ;;  %v4738_v16 = vmul.f32 0.5, %v10287_v7 }
 0x5c2   : > { %v4573_v61 = vmul.f32 %v7537_v58, %v4572_v4  ;;  %v5050_v8 = vadd.f32 0.2548296, %v5038_v47  ;;  %v5008_v62 = vadd.f32 1.4214138, %v4996_v33  ;;  %v4739_v24 = vmul.f32 0.5, %v10295_v29 }
 0x5c3   : > { %v5051_v23 = vadd.f32 0.2548296, %v5039_v36  ;;  %v7543_v46 = vpop.eup %7542  ;;  %vm5153_vm6 = vcmp.ge.f32.partialorder %v10330_v52, 0.0 }
 0x5c4   : > { %v4577_v32 = vsel %vm4576_vm11, %v7537_v58, %v4573_v61  ;;  %v5062_v38 = vmul.f32 %v5050_v8, %v10346_v35  ;;  %v5081_v35 = vsub.f32 0.0, %v10344_v25 }
 0x5c5   : > { %v4583_v55 = vmul.f32 %v4577_v32, %v10297_v34  ;;  %v4900_v34 = vadd.f32 %v7539_v27, %v4899_v41  ;;  %v5063_v12 = vmul.f32 %v5051_v23, %v10361_v43 }
 0x5c6   : > { %v5122_v2 = vmul.f32 %v7541_v44, %v5062_v38  ;;  %v5093_v44 = vmul.f32 %v5081_v35, %v10344_v25  ;;  %v7545_v53 = vpop.eup %7544 }
 0x5c7   : > { %v4595_v58 = vmul.f32 %v10203_v18, %v4583_v55  ;;  %v4904_v60 = vsel %vm4903_vm2, %v7539_v27, %v4900_v34  ;;  %v5020_v18 = vmul.f32 %v5008_v62, %v10373_v51  ;;  %v5123_v48 = vmul.f32 %v7543_v46, %v5063_v12 }
 0x5c8   : > { %v5134_v42 = vsub.f32 1.0, %v5122_v2  ;;  %v4909_v1 = vsel %vm4906_vm0, %v4908_v37, %v4904_v60  ;;  %v5383_v27 = vsel %vm1277_vm3, %v5360_v9, 0  ;;  %v5112_v25 = vmul.f32 1.442695, %v5093_v44 }
 0x5c9   : > { %v4607_v20 = vadd.f32 %v10165_v50, %v4595_v58  ;;  %v4973_v19 = vmul.f32 1.0614054, %v4909_v1  ;;  %v5032_v59 = vadd.f32 -0.28449672, %v5020_v18  ;;  %v5135_v61 = vsub.f32 1.0, %v5123_v48  ;;  %v5323_v18 = vld [vmem:[#allocation4 + $0x40] sm:$0xff] }
 0x5ca   : > { %v5158_v4 = vsub.f32 0.0, %v5134_v42  ;;  %7546 = vpow2.f32 %v5112_v25  ;;  %v5349_v48 = vunpack.c.l.b16 %v5323_v18  ;;  %v4744_v44 = vmul.f32 0.5, %v10309_v10 }
 0x5cb   : > { %v4615_v15 = vpack.c.bf16 %v4607_v20, %v4607_v20  ;;  %v4985_v50 = vadd.f32 -1.4531521, %v4973_v19  ;;  %v5044_v13 = vmul.f32 %v5032_v59, %v10373_v51  ;;  %v5159_v56 = vsub.f32 0.0, %v5135_v61 }
 0x5cc   : > { %v5170_v43 = vsel %vm5146_vm4, %v5134_v42, %v5158_v4  ;;  %v4691_v21 = vpop.f32.mrf.mxu3  ;;  %v5350_v10 = vunpack.c.h.b16 %v5323_v18 }
 0x5cd   : > { %v4652_v54 = vsel %vm1277_vm3, %v4615_v15, 0  ;;  %v4997_v0 = vmul.f32 %v4985_v50, %v4909_v1  ;;  %v5056_v47 = vadd.f32 0.2548296, %v5044_v13  ;;  %v10404_v22 = vadd.f32 %v4691_v21, %v10156_v26 }
 0x5ce   : > { %4731 = vmatpush.bf16.msrb.mxu2 %v4652_v54  ;;  %v5182_v9 = vadd.f32 1.0, %v5170_v43  ;;  %v5171_v55 = vsel %vm5147_vm13, %v5135_v61, %v5159_v56  ;;  %v4745_v21 = vmul.f32 0.5, %v10322_v45  ;;  %vm5369_vm13 = vcmask 195584  }
 0x5cf   : > { %v5009_v17 = vadd.f32 1.4214138, %v4997_v0  ;;  %v5068_v32 = vmul.f32 %v5056_v47, %v10373_v51  ;;  %v10411_v6 = vmul.f32 0.70710677, %v10404_v22  ;;  %v5183_v40 = vadd.f32 1.0, %v5171_v55 }
 0x5d0   : > { %v5194_v41 = vmul.f32 %v5182_v9, %v4738_v16  ;;  %v7547_v20 = vpop.eup %7546 }
 0x5d1   : > { %7022 = vmatmul.msk.bf16.vlgmr.msrb.gmra.mxu2 %vm4074_vm14, %v10239_v49  ;;  %v5021_v8 = vmul.f32 %v5009_v17, %v4909_v1  ;;  %v5128_v49 = vmul.f32 %v7545_v53, %v5068_v32  ;;  %v10416_v39 = vand.u32 2147483647, %v10411_v6  ;;  %v5195_v57 = vmul.f32 %v5183_v40, %v4739_v24 }
 0x5d2   : > { %5436 = vmatpush.bf16.msra.mxu2 %v5383_v27  ;;  %vm5152_vm14 = vcmp.ge.f32.partialorder %v10315_v31, 0.0 }
 0x5d3   : > { %v5033_v63 = vadd.f32 -0.28449672, %v5021_v8  ;;  %v4776_v51 = vmul.f32 0.3275911, %v10416_v39  ;;  %v5140_v38 = vsub.f32 1.0, %v5128_v49  ;;  %v5206_v7 = vpack.c.bf16 %v5195_v57, %v5194_v41 }
 0x5d4   : > { %v4693_v58 = vpop.f32.mrf.mxu3  ;;  %v4705_v36 = vpop.f32.mrf.mxu0  ;;  %v5362_v41 = vpack.c.b16 %v5350_v10, %v5350_v10 }
 0x5d5   : > { %v5045_v33 = vmul.f32 %v5033_v63, %v4909_v1  ;;  %v4788_v28 = vadd.f32 1.0, %v4776_v51  ;;  %v10420_v29 = vadd.f32 %v4693_v58, %v10210_v11  ;;  %5212 = vst [vmem:[#allocation4] sm:$0xff] %v5206_v7  ;;  %v10423_v2 = vadd.f32 %v4705_v36, %v10156_v26 }
 0x5d6   : > { %v5164_v62 = vsub.f32 0.0, %v5140_v38  ;;  %v5361_v63 = vpack.c.b16 %v5349_v48, %v5349_v48 }
 0x5d7   : > { %v5057_v34 = vadd.f32 0.2548296, %v5045_v33  ;;  %7548 = vrcp.f32 %v4788_v28  ;;  %v10426_v23 = vmul.f32 0.70710677, %v10420_v29  ;;  %v10433_v42 = vmul.f32 0.70710677, %v10423_v2 }
 0x5d8   : > { %v5176_v15 = vsel %vm5152_vm14, %v5140_v38, %v5164_v62  ;;  %v4837_v56 = vand.u32 2147483648, %v4788_v28  ;;  %v4835_v9 = vand.u32 2147483647, %v4788_v28  ;;  %vm4831_vm12 = vweird.f32 %v4788_v28 }
 0x5d9   : > { %v5069_v37 = vmul.f32 %v5057_v34, %v4909_v1  ;;  %v10430_v35 = vand.u32 2147483647, %v10426_v23  ;;  %v10437_v4 = vand.u32 2147483647, %v10433_v42  ;;  %v5188_v50 = vadd.f32 1.0, %v5176_v15 }
 0x5da   : > { %v4838_v8 = vor.u32 1.1754944e-38, %v4837_v56  ;;  %vm4836_vm15 = vcmp.eq.f32.partialorder %v4835_v9, 8.507059e+37  ;;  %v5076_v38 = vsub.f32 0.0, %v10416_v39  ;;  %v5386_v62 = vsel %vm1277_vm3, %v5361_v63, 0 }
 0x5db   : > { %v5129_v60 = vmul.f32 %v7547_v20, %v5069_v37  ;;  %v4782_v1 = vmul.f32 0.3275911, %v10430_v35  ;;  %v4777_v13 = vmul.f32 0.3275911, %v10437_v4  ;;  %v5200_v52 = vmul.f32 %v5188_v50, %v4744_v44 }
 0x5dc   : > { %v4707_v19 = vpop.f32.mrf.mxu0  ;;  %v5389_v37 = vsel %vm1277_vm3, %v5362_v41, 0  ;;  %v5088_v15 = vmul.f32 %v5076_v38, %v10416_v39 }
 0x5dd   : > { %v5141_v12 = vsub.f32 1.0, %v5129_v60  ;;  %v7549_v46 = vpop.eup %7548  ;;  %v10440_v31 = vadd.f32 %v4707_v19, %v10210_v11  ;;  %v4794_v27 = vadd.f32 1.0, %v4782_v1  ;;  %v10449_v32 = vadd.f32 1.0, %v4777_v13  ;;  %v7318_v1 = vld [vmem:[#allocation4 + $0x4] sm:$0xf] }
 0x5de   : > { %v4827_v54 = vmul.f32 %v7549_v46, %v4788_v28  ;;  %vm4832_vm9 = vweird.f32 %v7549_v46  ;;  %v5082_v19 = vsub.f32 0.0, %v10430_v35  ;;  %v5102_v9 = vmul.f32 1.442695, %v5088_v15 }
 0x5df   : > { %v5165_v59 = vsub.f32 0.0, %v5141_v12  ;;  %v10446_v0 = vmul.f32 0.70710677, %v10440_v31  ;;  %7550 = vrcp.f32 %v4794_v27  ;;  %vm4833_vm1 = vmor %vm4831_vm12, %vm4832_vm9  ;;  %v4919_v33 = vand.u32 2147483647, %v4794_v27 }
 0x5e0   : > { %v4828_v61 = vsub.f32 1.0, %v4827_v54  ;;  %7552 = vrcp.f32 %v10449_v32  ;;  %v4921_v28 = vand.u32 2147483648, %v4794_v27  ;;  %vm4915_vm10 = vweird.f32 %v4794_v27 }
 0x5e1   : > { %v5177_v43 = vsel %vm5153_vm6, %v5141_v12, %v5165_v59  ;;  %v10452_v53 = vand.u32 2147483647, %v10446_v0  ;;  %vm10468_vm8 = vcmp.eq.f32.partialorder %v4919_v33, 8.507059e+37  ;;  %v4849_v44 = vand.u32 2147483647, %v10449_v32 }
 0x5e2   : > { %v5189_v47 = vadd.f32 1.0, %v5177_v43  ;;  %v4829_v17 = vmul.f32 %v7549_v46, %v4828_v61  ;;  %v4922_v48 = vor.u32 1.1754944e-38, %v4921_v28  ;;  %v4851_v39 = vand.u32 2147483648, %v10449_v32 }
 0x5e3   : > { %v4783_v24 = vmul.f32 0.3275911, %v10452_v53  ;;  %vm4845_vm4 = vweird.f32 %v10449_v32  ;;  %vm4850_vm6 = vcmp.eq.f32.partialorder %v4849_v44, 8.507059e+37 }
 0x5e4   : > { %v5201_v25 = vmul.f32 %v5189_v47, %v4745_v21  ;;  %v4830_v16 = vadd.f32 %v7549_v46, %v4829_v17 }
 0x5e5   : > { %v7551_v40 = vpop.eup %7550  ;;  %v10460_v58 = vadd.f32 1.0, %v4783_v24  ;;  %v4852_v24 = vor.u32 1.1754944e-38, %v4851_v39 }
 0x5e6   : > { %v5209_v55 = vpack.c.bf16 %v5201_v25, %v5200_v52  ;;  %v4834_v45 = vsel %vm4833_vm1, %v7549_v46, %v4830_v16  ;;  %v4911_v51 = vmul.f32 %v7551_v40, %v4794_v27  ;;  %v7553_v34 = vpop.eup %7552  ;;  %vm4916_vm11 = vweird.f32 %v7551_v40  ;;  %v7025_v46 = vld [vmem:[#allocation4] sm:$0xf] }
 0x5e7   : > { %v10456_v49 = vsel %vm4836_vm15, %v4838_v8, %v4834_v45  ;;  %7554 = vrcp.f32 %v10460_v58  ;;  %v4841_v18 = vmul.f32 %v7553_v34, %v10449_v32  ;;  %vm4917_vm2 = vmor %vm4915_vm10, %vm4916_vm11  ;;  %vm4846_vm0 = vweird.f32 %v7553_v34  ;;  %v10481_v25 = vld [vmem:[#allocation17] sm:$0xf] }
 0x5e8   : > { %5215 = vst [vmem:[#allocation4 + $0x18] sm:$0xff] %v5209_v55  ;;  %v4968_v57 = vmul.f32 1.0614054, %v10456_v49  ;;  %v4912_v7 = vsub.f32 1.0, %v4911_v51  ;;  %v5094_v45 = vmul.f32 %v5082_v19, %v10430_v35  ;;  %vm4847_vm14 = vmor %vm4845_vm4, %vm4846_vm0  ;;  %v5077_v32 = vsub.f32 0.0, %v10437_v4 }
 0x5e9   : > { %v4842_v50 = vsub.f32 1.0, %v4841_v18  ;;  %v4933_v38 = vand.u32 2147483647, %v10460_v58  ;;  %v4935_v35 = vand.u32 2147483648, %v10460_v58  ;;  %7556 = vpow2.f32 %v5102_v9 }
 0x5ea   : > { %v4980_v36 = vadd.f32 -1.4531521, %v4968_v57  ;;  %v4913_v60 = vmul.f32 %v7551_v40, %v4912_v7  ;;  %vm4929_vm12 = vweird.f32 %v10460_v58  ;;  %vm5148_vm11 = vcmp.ge.f32.partialorder %v10411_v6, 0.0 }
 0x5eb   : > { %v4843_v47 = vmul.f32 %v7553_v34, %v4842_v50  ;;  %vm4934_vm15 = vcmp.eq.f32.partialorder %v4933_v38, 8.507059e+37  ;;  %v4936_v18 = vor.u32 1.1754944e-38, %v4935_v35  ;;  %vm5149_vm10 = vcmp.ge.f32.partialorder %v10433_v42, 0.0 }
 0x5ec   : > { %v4992_v20 = vmul.f32 %v4980_v36, %v10456_v49  ;;  %v4914_v54 = vadd.f32 %v7551_v40, %v4913_v60  ;;  %v5089_v60 = vmul.f32 %v5077_v32, %v10437_v4 }
 0x5ed   : > { %v7555_v17 = vpop.eup %7554  ;;  %v4844_v55 = vadd.f32 %v7553_v34, %v4843_v47 }
 0x5ee   : > { %v5004_v59 = vadd.f32 1.4214138, %v4992_v20  ;;  %v4918_v21 = vsel %vm4917_vm2, %v7551_v40, %v4914_v54  ;;  %v4925_v8 = vmul.f32 %v7555_v17, %v10460_v58  ;;  %vm4930_vm9 = vweird.f32 %v7555_v17 }
 0x5ef   : > { %v7321_v13 = vld [vmem:[#allocation4 + $0x14] sm:$0xf0]  ;;  %v7027_v43 = vld [vmem:[#allocation4 + $0x18] sm:$0xf0]  ;;  %v10478_v52 = vsel %vm10468_vm8, %v4922_v48, %v4918_v21  ;;  %v4848_v41 = vsel %vm4847_vm14, %v7553_v34, %v4844_v55  ;;  %v5114_v20 = vmul.f32 1.442695, %v5094_v45  ;;  %vm4931_vm1 = vmor %vm4929_vm12, %vm4930_vm9  ;;  %v7557_v50 = vpop.eup %7556 }
 0x5f0   : > { %v7026_v27 = vor.u32 %v7321_v13, %v7025_v46  ;;  %v5016_v61 = vmul.f32 %v5004_v59, %v10456_v49  ;;  %v7030_v56 = vor.u32 %v7318_v1, %v7027_v43  ;;  %v4974_v16 = vmul.f32 1.0614054, %v10478_v52 }
 0x5f1   : > { %v4926_v57 = vsub.f32 1.0, %v4925_v8  ;;  %v4853_v51 = vsel %vm4850_vm6, %v4852_v24, %v4848_v41  ;;  %v5083_v48 = vsub.f32 0.0, %v10452_v53  ;;  %v5104_v58 = vmul.f32 1.442695, %v5089_v60 }
 0x5f2   : > { %5398 = vmatpush.bf16.msra.mxu3 %v7026_v27  ;;  %v5028_v10 = vadd.f32 -0.28449672, %v5016_v61  ;;  %5411 = vmatpush.bf16.msrb.mxu0 %v7030_v56  ;;  %v4986_v63 = vadd.f32 -1.4531521, %v4974_v16  ;;  %v4969_v7 = vmul.f32 1.0614054, %v4853_v51  ;;  %7558 = vpow2.f32 %v5114_v20 }
 0x5f3   : > { %v4927_v28 = vmul.f32 %v7555_v17, %v4926_v57  ;;  %v5095_v61 = vmul.f32 %v5083_v48, %v10452_v53  ;;  %7560 = vpow2.f32 %v5104_v58  ;;  %vm5154_vm8 = vcmp.ge.f32.partialorder %v10426_v23, 0.0 }
 0x5f4   : > { %v5040_v40 = vmul.f32 %v5028_v10, %v10456_v49  ;;  %v4998_v36 = vmul.f32 %v4986_v63, %v10478_v52  ;;  %vm5155_vm2 = vcmp.ge.f32.partialorder %v10446_v0, 0.0 }
 0x5f5   : > { %7047 = vmatmul.msk.bf16.vlgmr.msra.gmra.mxu3 %vm5369_vm13, %v10481_v25  ;;  %7048 = vmatmul.msk.bf16.vlgmr.msrb.gmra.mxu0 %vm5369_vm13, %v10481_v25  ;;  %v5116_v55 = vmul.f32 1.442695, %v5095_v61 }
 0x5f6   : > { %5449 = vmatpush.bf16.msrb.mxu3 %v5386_v62  ;;  %5462 = vmatpush.bf16.msra.mxu0 %v5389_v37  ;;  %v5052_v33 = vadd.f32 0.2548296, %v5040_v40  ;;  %v5010_v34 = vadd.f32 1.4214138, %v4998_v36  ;;  %v4981_v62 = vadd.f32 -1.4531521, %v4969_v7  ;;  %v4928_v37 = vadd.f32 %v7555_v17, %v4927_v28 }
 0x5f7   : > { %7562 = vpow2.f32 %v5116_v55 }
 0x5f8   : > { %v5064_v15 = vmul.f32 %v5052_v33, %v10456_v49  ;;  %v5022_v12 = vmul.f32 %v5010_v34, %v10478_v52  ;;  %v4993_v19 = vmul.f32 %v4981_v62, %v4853_v51  ;;  %v4932_v46 = vsel %vm4931_vm1, %v7555_v17, %v4928_v37  ;;  %v7559_v10 = vpop.eup %7558 }
 0x5f9   : > { %v4937_v1 = vsel %vm4934_vm15, %v4936_v18, %v4932_v46  ;;  %v7561_v40 = vpop.eup %7560  ;;  %v4741_v37 = vmul.f32 0.5, %v10423_v2 }
 0x5fa   : > { %v5034_v59 = vadd.f32 -0.28449672, %v5022_v12  ;;  %v5005_v54 = vadd.f32 1.4214138, %v4993_v19  ;;  %v4975_v13 = vmul.f32 1.0614054, %v4937_v1  ;;  %v5124_v44 = vmul.f32 %v7557_v50, %v5064_v15 }
 0x5fc   : > { %v5046_v4 = vmul.f32 %v5034_v59, %v10478_v52  ;;  %v5017_v39 = vmul.f32 %v5005_v54, %v4853_v51  ;;  %v4987_v27 = vadd.f32 -1.4531521, %v4975_v13  ;;  %v5136_v47 = vsub.f32 1.0, %v5124_v44 }
 0x5fd   : > { %v7563_v34 = vpop.eup %7562 }
 0x5fe   : > { %v5058_v43 = vadd.f32 0.2548296, %v5046_v4  ;;  %v5029_v49 = vadd.f32 -0.28449672, %v5017_v39  ;;  %v4999_v21 = vmul.f32 %v4987_v27, %v4937_v1  ;;  %v5160_v24 = vsub.f32 0.0, %v5136_v47 }
 0x600   : > { %v5070_v56 = vmul.f32 %v5058_v43, %v10478_v52  ;;  %v5041_v17 = vmul.f32 %v5029_v49, %v4853_v51  ;;  %v5011_v9 = vadd.f32 1.4214138, %v4999_v21  ;;  %v5172_v38 = vsel %vm5148_vm11, %v5136_v47, %v5160_v24 }
 0x601   : > { %v5184_v36 = vadd.f32 1.0, %v5172_v38 }
 0x602   : > { %v5053_v16 = vadd.f32 0.2548296, %v5041_v17  ;;  %v5130_v8 = vmul.f32 %v7559_v10, %v5070_v56  ;;  %v5023_v45 = vmul.f32 %v5011_v9, %v4937_v1 }
 0x604   : > { %v5065_v32 = vmul.f32 %v5053_v16, %v4853_v51  ;;  %v5035_v63 = vadd.f32 -0.28449672, %v5023_v45  ;;  %v5142_v53 = vsub.f32 1.0, %v5130_v8  ;;  %v4740_v51 = vmul.f32 0.5, %v10404_v22 }
 0x605   : > { %v4747_v22 = vmul.f32 0.5, %v10440_v31 }
 0x606   : > { %v5125_v41 = vmul.f32 %v7561_v40, %v5065_v32  ;;  %v5047_v57 = vmul.f32 %v5035_v63, %v4937_v1  ;;  %v5166_v7 = vsub.f32 0.0, %v5142_v53  ;;  %v5196_v6 = vmul.f32 %v5184_v36, %v4740_v51 }
 0x608   : > { %v5137_v35 = vsub.f32 1.0, %v5125_v41  ;;  %v5059_v52 = vadd.f32 0.2548296, %v5047_v57  ;;  %v5178_v18 = vsel %vm5154_vm8, %v5142_v53, %v5166_v7 }
 0x609   : > { %v5190_v59 = vadd.f32 1.0, %v5178_v18 }
 0x60a   : > { %v5161_v33 = vsub.f32 0.0, %v5137_v35  ;;  %v5071_v28 = vmul.f32 %v5059_v52, %v4937_v1  ;;  %v4746_v1 = vmul.f32 0.5, %v10420_v29 }
 0x60c   : > { %v5173_v62 = vsel %vm5149_vm10, %v5137_v35, %v5161_v33  ;;  %v5131_v60 = vmul.f32 %v7563_v34, %v5071_v28  ;;  %v5202_v54 = vmul.f32 %v5190_v59, %v4746_v1 }
 0x60d   : > { %v5185_v20 = vadd.f32 1.0, %v5173_v62 }
 0x60e   : > { %v5143_v12 = vsub.f32 1.0, %v5131_v60 }
 0x60f   : > { %v5197_v15 = vmul.f32 %v5185_v20, %v4741_v37 }
 0x610   : > { %v5167_v46 = vsub.f32 0.0, %v5143_v12 }
 0x611   : > { %v5207_v19 = vpack.c.bf16 %v5197_v15, %v5196_v6 }
 0x612   : > { %v5179_v42 = vsel %vm5155_vm2, %v5143_v12, %v5167_v46 }
 0x613   : > { %5213 = vst [vmem:[#allocation4 + $0x8] sm:$0xff] %v5207_v19  ;;  %v5191_v2 = vadd.f32 1.0, %v5179_v42 }
 0x615   : > { %v5203_v48 = vmul.f32 %v5191_v2, %v4747_v22 }
 0x617   : > { %v5210_v50 = vpack.c.bf16 %v5203_v48, %v5202_v54 }
 0x619   : > { %5216 = vst [vmem:[#allocation4 + $0x20] sm:$0xff] %v5210_v50 }
 0x61a   : > { %v7033_v23 = vld [vmem:[#allocation4 + $0x8] sm:$0xf]  ;;  %v7319_v13 = vld [vmem:[#allocation4 + $0xc] sm:$0xf] }
 0x620   : > { %v7322_v58 = vld [vmem:[#allocation4 + $0x1c] sm:$0xf0]  ;;  %v7035_v44 = vld [vmem:[#allocation4 + $0x20] sm:$0xf0] }
 0x621   : > { %v7034_v4 = vor.u32 %v7322_v58, %v7033_v23  ;;  %v7038_v39 = vor.u32 %v7319_v13, %v7035_v44  ;;  %v10569_v44 = vld [vmem:[#allocation9] ss:$2 sm:$0x3f] }
 0x623   : > { %5424 = vmatpush.bf16.msrb.mxu1 %v7034_v4  ;;  %5437 = vmatpush.bf16.msra.mxu2 %v7038_v39  ;;  %v5266_v4 = vperm.slane %v10569_v44, 1 }
 0x626   : > { %7049 = vmatmul.msk.bf16.vlgmr.msrb.gmra.mxu1 %vm5369_vm13, %v10481_v25  ;;  %7050 = vmatmul.msk.bf16.vlgmr.msra.gmra.mxu2 %vm5369_vm13, %v10481_v25 }
 0x63a   : > { %v4719_v29 = vpop.f32.mrf.mxu1 }
 0x63b   : > { %v10518_v31 = vadd.f32 %v4719_v29, %v10156_v26 }
 0x63d   : > { %v10521_v0 = vmul.f32 0.70710677, %v10518_v31 }
 0x63f   : > { %v10524_v27 = vand.u32 2147483647, %v10521_v0 }
 0x641   : > { %v4778_v43 = vmul.f32 0.3275911, %v10524_v27  ;;  %v5078_v54 = vsub.f32 0.0, %v10524_v27 }
 0x642   : > { %v4721_v49 = vpop.f32.mrf.mxu1 }
 0x643   : > { %v4790_v61 = vadd.f32 1.0, %v4778_v43  ;;  %v10528_v21 = vadd.f32 %v4721_v49, %v10210_v11  ;;  %v5090_v39 = vmul.f32 %v5078_v54, %v10524_v27  ;;  %v10574_v49 = vld [vmem:[#allocation9 + $0x1] ss:$2 sm:$0x3f]  ;;  %v5278_v27 = vmul.f32 %v5266_v4, %v10259_v30 }
 0x645   : > { %7564 = vrcp.f32 %v4790_v61  ;;  %v10531_v47 = vmul.f32 0.70710677, %v10528_v21  ;;  %v4865_v45 = vand.u32 2147483648, %v4790_v61  ;;  %v4863_v40 = vand.u32 2147483647, %v4790_v61 }
 0x646   : > { %vm4859_vm4 = vweird.f32 %v4790_v61 }
 0x647   : > { %v10534_v56 = vand.u32 2147483647, %v10531_v47  ;;  %v4866_v53 = vor.u32 1.1754944e-38, %v4865_v45  ;;  %vm4864_vm6 = vcmp.eq.f32.partialorder %v4863_v40, 8.507059e+37  ;;  %v5106_v40 = vmul.f32 1.442695, %v5090_v39 }
 0x649   : > { %v4784_v17 = vmul.f32 0.3275911, %v10534_v56 }
 0x64b   : > { %v7565_v9 = vpop.eup %7564  ;;  %v4796_v16 = vadd.f32 1.0, %v4784_v17  ;;  %v5084_v17 = vsub.f32 0.0, %v10534_v56 }
 0x64c   : > { %v4855_v10 = vmul.f32 %v7565_v9, %v4790_v61  ;;  %vm4860_vm0 = vweird.f32 %v7565_v9  ;;  %v5291_v61 = vperm.slane %v10574_v49, 1 }
 0x64d   : > { %7566 = vrcp.f32 %v4796_v16  ;;  %vm4861_vm14 = vmor %vm4859_vm4, %vm4860_vm0  ;;  %v4949_v37 = vand.u32 2147483648, %v4796_v16  ;;  %v4947_v6 = vand.u32 2147483647, %v4796_v16  ;;  %vm4943_vm12 = vweird.f32 %v4796_v16 }
 0x64e   : > { %v4856_v8 = vsub.f32 1.0, %v4855_v10 }
 0x64f   : > { %v4950_v19 = vor.u32 1.1754944e-38, %v4949_v37  ;;  %vm4948_vm15 = vcmp.eq.f32.partialorder %v4947_v6, 8.507059e+37  ;;  %v5290_v6 = vperm.slane %v10574_v49, 0 }
 0x650   : > { %v4857_v32 = vmul.f32 %v7565_v9, %v4856_v8 }
 0x651   : > { %v5302_v39 = vmul.f32 %v5290_v6, %v10257_v14 }
 0x652   : > { %v4858_v41 = vadd.f32 %v7565_v9, %v4857_v32 }
 0x653   : > { %v7567_v38 = vpop.eup %7566 }
 0x654   : > { %v4733_v55 = vpop.f32.mrf.mxu2  ;;  %v4862_v35 = vsel %vm4861_vm14, %v7565_v9, %v4858_v41  ;;  %vm4944_vm9 = vweird.f32 %v7567_v38 }
 0x655   : > { %v10538_v24 = vadd.f32 %v4733_v55, %v10156_v26  ;;  %v10546_v52 = vsel %vm4864_vm6, %v4866_v53, %v4862_v35  ;;  %v4939_v26 = vmul.f32 %v7567_v38, %v4796_v16  ;;  %vm4945_vm1 = vmor %vm4943_vm12, %vm4944_vm9  ;;  %v5265_v55 = vperm.slane %v10569_v44, 0 }
 0x656   : > { %v4970_v7 = vmul.f32 1.0614054, %v10546_v52  ;;  %v5096_v35 = vmul.f32 %v5084_v17, %v10534_v56  ;;  %vm5150_vm9 = vcmp.ge.f32.partialorder %v10521_v0, 0.0 }
 0x657   : > { %v10541_v63 = vmul.f32 0.70710677, %v10538_v24  ;;  %v4940_v34 = vsub.f32 1.0, %v4939_v26  ;;  %v5277_v4 = vmul.f32 %v5265_v55, %v10259_v30 }
 0x658   : > { %v4982_v51 = vadd.f32 -1.4531521, %v4970_v7 }
 0x659   : > { %v10544_v57 = vand.u32 2147483647, %v10541_v63  ;;  %v4941_v60 = vmul.f32 %v7567_v38, %v4940_v34  ;;  %vm5151_vm12 = vcmp.ge.f32.partialorder %v10541_v63, 0.0 }
 0x65a   : > { %v4994_v18 = vmul.f32 %v4982_v51, %v10546_v52 }
 0x65b   : > { %v4779_v33 = vmul.f32 0.3275911, %v10544_v57  ;;  %v4942_v12 = vadd.f32 %v7567_v38, %v4941_v60  ;;  %v5079_v34 = vsub.f32 0.0, %v10544_v57 }
 0x65c   : > { %v4735_v36 = vpop.f32.mrf.mxu2 }
 0x65d   : > { %v10551_v28 = vadd.f32 %v4735_v36, %v10210_v11  ;;  %v4791_v62 = vadd.f32 1.0, %v4779_v33  ;;  %v5006_v11 = vadd.f32 1.4214138, %v4994_v18  ;;  %v4946_v59 = vsel %vm4945_vm1, %v7567_v38, %v4942_v12  ;;  %v10592_v12 = vld [vmem:[#allocation7] sm:$0x3f] }
 0x65e   : > { %v10562_v1 = vsel %vm4948_vm15, %v4950_v19, %v4946_v59  ;;  %v5303_v33 = vmul.f32 %v5291_v61, %v10257_v14  ;;  %v5471_v55 = vperm.slane %v10592_v12, 0  ;;  %vm5156_vm1 = vcmp.ge.f32.partialorder %v10531_v47, 0.0 }
 0x65f   : > { %v10554_v20 = vmul.f32 0.70710677, %v10551_v28  ;;  %7568 = vrcp.f32 %v4791_v62  ;;  %v5018_v42 = vmul.f32 %v5006_v11, %v10546_v52  ;;  %v4976_v48 = vmul.f32 1.0614054, %v10562_v1 }
 0x660   : > { %v4879_v43 = vand.u32 2147483648, %v4791_v62  ;;  %v4877_v10 = vand.u32 2147483647, %v4791_v62  ;;  %vm4873_vm10 = vweird.f32 %v4791_v62  ;;  %v5118_v11 = vmul.f32 1.442695, %v5096_v35 }
 0x661   : > { %v10558_v15 = vand.u32 2147483647, %v10554_v20  ;;  %v4988_v23 = vadd.f32 -1.4531521, %v4976_v48  ;;  %v5030_v58 = vadd.f32 -0.28449672, %v5018_v42  ;;  %v5091_v42 = vmul.f32 %v5079_v34, %v10544_v57 }
 0x662   : > { %v4880_v53 = vor.u32 1.1754944e-38, %v4879_v43  ;;  %vm4878_vm2 = vcmp.eq.f32.partialorder %v4877_v10, 8.507059e+37  ;;  %vm5157_vm15 = vcmp.ge.f32.partialorder %v10554_v20, 0.0  ;;  %v5267_v20 = vperm.slane %v10569_v44, 2 }
 0x663   : > { %v4785_v46 = vmul.f32 0.3275911, %v10558_v15  ;;  %v5000_v29 = vmul.f32 %v4988_v23, %v10562_v1  ;;  %v5042_v45 = vmul.f32 %v5030_v58, %v10546_v52  ;;  %v5472_v23 = vperm.slane %v10592_v12, 1 }
 0x664   : > { %v5085_v43 = vsub.f32 0.0, %v10558_v15  ;;  %v5108_v17 = vmul.f32 1.442695, %v5091_v42 }
 0x665   : > { %v10564_v22 = vadd.f32 1.0, %v4785_v46  ;;  %v7569_v2 = vpop.eup %7568  ;;  %v5012_v16 = vadd.f32 1.4214138, %v5000_v29  ;;  %v5054_v51 = vadd.f32 0.2548296, %v5042_v45  ;;  %v5309_v46 = vadd.f32 %v5303_v33, %v5278_v27 }
 0x666   : > { %v4869_v50 = vmul.f32 %v7569_v2, %v4791_v62  ;;  %vm4874_vm11 = vweird.f32 %v7569_v2 }
 0x667   : > { %7570 = vrcp.f32 %v10564_v22  ;;  %v5024_v41 = vmul.f32 %v5012_v16, %v10562_v1  ;;  %vm4875_vm8 = vmor %vm4873_vm10, %vm4874_vm11  ;;  %v4963_v60 = vand.u32 2147483648, %v10564_v22  ;;  %v4961_v56 = vand.u32 2147483647, %v10564_v22 }
 0x668   : > { %v4870_v13 = vsub.f32 1.0, %v4869_v50  ;;  %7572 = vpow2.f32 %v5106_v40  ;;  %vm4957_vm4 = vweird.f32 %v10564_v22  ;;  %v5066_v54 = vmul.f32 %v5054_v51, %v10546_v52 }
 0x669   : > { %v5036_v36 = vadd.f32 -0.28449672, %v5024_v41  ;;  %v4964_v50 = vor.u32 1.1754944e-38, %v4963_v60  ;;  %vm4962_vm6 = vcmp.eq.f32.partialorder %v4961_v56, 8.507059e+37  ;;  %7574 = vpow2.f32 %v5118_v11 }
 0x66a   : > { %v4871_v9 = vmul.f32 %v7569_v2, %v4870_v13  ;;  %v5097_v40 = vmul.f32 %v5085_v43, %v10558_v15  ;;  %7576 = vpow2.f32 %v5108_v17  ;;  %vm5520_vm11 = vcmask 1047944  }
 0x66b   : > { %v5048_v59 = vmul.f32 %v5036_v36, %v10562_v1  ;;  %vm11464_vm10 = vcmask 261120  }
 0x66c   : > { %v4872_v32 = vadd.f32 %v7569_v2, %v4871_v9  ;;  %v5120_v60 = vmul.f32 1.442695, %v5097_v40 }
 0x66d   : > { %v7571_v8 = vpop.eup %7570  ;;  %v5060_v52 = vadd.f32 0.2548296, %v5048_v59 }
 0x66e   : > { %v4953_v38 = vmul.f32 %v7571_v8, %v10564_v22  ;;  %v4876_v26 = vsel %vm4875_vm8, %v7569_v2, %v4872_v32  ;;  %vm4958_vm0 = vweird.f32 %v7571_v8  ;;  %v7573_v61 = vpop.eup %7572  ;;  %v5308_v32 = vadd.f32 %v5302_v39, %v5277_v4 }
 0x66f   : > { %v10585_v7 = vsel %vm4878_vm2, %v4880_v53, %v4876_v26  ;;  %vm4959_vm14 = vmor %vm4957_vm4, %vm4958_vm0  ;;  %v5126_v10 = vmul.f32 %v7573_v61, %v5066_v54  ;;  %v5072_v53 = vmul.f32 %v5060_v52, %v10562_v1  ;;  %v7575_v51 = vpop.eup %7574  ;;  %7578 = vpow2.f32 %v5120_v60 }
 0x670   : > { %v4954_v62 = vsub.f32 1.0, %v4953_v38  ;;  %v4971_v37 = vmul.f32 1.0614054, %v10585_v7  ;;  %v7577_v1 = vpop.eup %7576  ;;  %v4742_v39 = vmul.f32 0.5, %v10518_v31  ;;  %v4749_v31 = vmul.f32 0.5, %v10551_v28 }
 0x671   : > { %v5138_v26 = vsub.f32 1.0, %v5126_v10  ;;  %v5132_v6 = vmul.f32 %v7575_v51, %v5072_v53  ;;  %vm11465_vm8 = vcmask 637952   ;;  %vm11466_vm2 = vcmask 1039360  }
 0x672   : > { %v4955_v18 = vmul.f32 %v7571_v8, %v4954_v62  ;;  %v4983_v19 = vadd.f32 -1.4531521, %v4971_v37  ;;  %v5413_v13 = vpop.f32.mrf.mxu0  ;;  %vm11467_vm0 = vcmask 244736   ;;  %vm11468_vm4 = vcmask 1031168  }
 0x673   : > { %v5414_v22 = vadd.f32 %v5413_v13, %v5309_v46  ;;  %v5144_v59 = vsub.f32 1.0, %v5132_v6  ;;  %v5474_v6 = vperm.slane %v10592_v12, 3 }
 0x674   : > { %v4956_v2 = vadd.f32 %v7571_v8, %v4955_v18  ;;  %v4995_v48 = vmul.f32 %v4983_v19, %v10585_v7  ;;  %v5162_v18 = vsub.f32 0.0, %v5138_v26 }
 0x675   : > { %v7579_v4 = vpop.eup %7578 }
 0x676   : > { %v4960_v58 = vsel %vm4959_vm14, %v7571_v8, %v4956_v2  ;;  %v5007_v29 = vadd.f32 1.4214138, %v4995_v48  ;;  %v5484_v8 = vmul.f32 %v5472_v23, %v5414_v22  ;;  %v5174_v2 = vsel %vm5150_vm9, %v5138_v26, %v5162_v18  ;;  %vm11470_vm9 = vmmov %vm11464_vm10 }
 0x677   : > { %v4965_v57 = vsel %vm4962_vm6, %v4964_v50, %v4960_v58  ;;  %v5186_v23 = vadd.f32 1.0, %v5174_v2  ;;  %v5168_v58 = vsub.f32 0.0, %v5144_v59  ;;  %v5293_v26 = vperm.slane %v10574_v49, 3 }
 0x678   : > { %v4977_v9 = vmul.f32 1.0614054, %v4965_v57  ;;  %v5019_v16 = vmul.f32 %v5007_v29, %v10585_v7  ;;  %5497 = vrot.lane.b32.xlu2 %v5484_v8, %s7957_s20  ;;  %v5400_v41 = vpop.f32.mrf.mxu3  ;;  %v4743_v29 = vmul.f32 0.5, %v10538_v24  ;;  %vm11469_vm14 = vcmask 654336  }
 0x679   : > { %v5401_v35 = vadd.f32 %v5400_v41, %v5308_v32  ;;  %v5198_v0 = vmul.f32 %v5186_v23, %v4742_v39  ;;  %v5180_v61 = vsel %vm5156_vm1, %v5144_v59, %v5168_v58  ;;  %v5476_v59 = vperm.slane %v10592_v12, 5  ;;  %vm11472_vm1 = vmmov %vm11465_vm8 }
 0x67a   : > { %v4989_v45 = vadd.f32 -1.4531521, %v4977_v9  ;;  %v5031_v27 = vadd.f32 -0.28449672, %v5019_v16  ;;  %v5415_v62 = vpop.f32.mrf.mxu0  ;;  %v5192_v16 = vadd.f32 1.0, %v5180_v61  ;;  %vm6052_vm6 = vcmask 588800  }
 0x67b   : > { %v5483_v34 = vmul.f32 %v5471_v55, %v5401_v35  ;;  %v5268_v35 = vperm.slane %v10569_v44, 3 }
 0x67c   : > { %v5001_v38 = vmul.f32 %v4989_v45, %v4965_v57  ;;  %v5043_v33 = vmul.f32 %v5031_v27, %v10585_v7 }
 0x67d   : > { %5495 = vrot.lane.b32.xlu1 %v5483_v34, %s7957_s20  ;;  %v5280_v51 = vmul.f32 %v5268_v35, %v10259_v30 }
 0x67e   : > { %v5013_v36 = vadd.f32 1.4214138, %v5001_v38  ;;  %v5055_v37 = vadd.f32 0.2548296, %v5043_v33  ;;  %v5292_v38 = vperm.slane %v10574_v49, 2 }
 0x680   : > { %v5025_v15 = vmul.f32 %v5013_v36, %v4965_v57  ;;  %v5067_v56 = vmul.f32 %v5055_v37, %v10585_v7  ;;  %v5402_v46 = vpop.f32.mrf.mxu3  ;;  %v5304_v28 = vmul.f32 %v5292_v38, %v10257_v14  ;;  %v5473_v36 = vperm.slane %v10592_v12, 2 }
 0x681   : > { %v5305_v37 = vmul.f32 %v5293_v26, %v10257_v14 }
 0x682   : > { %v5037_v11 = vadd.f32 -0.28449672, %v5025_v15  ;;  %v5127_v19 = vmul.f32 %v7577_v1, %v5067_v56 }
 0x684   : > { %v5049_v42 = vmul.f32 %v5037_v11, %v4965_v57  ;;  %v5139_v54 = vsub.f32 1.0, %v5127_v19 }
 0x686   : > { %v5061_v48 = vadd.f32 0.2548296, %v5049_v42  ;;  %v5163_v50 = vsub.f32 0.0, %v5139_v54 }
 0x688   : > { %v5073_v13 = vmul.f32 %v5061_v48, %v4965_v57  ;;  %v5175_v7 = vsel %vm5151_vm12, %v5139_v54, %v5163_v50  ;;  %v4748_v57 = vmul.f32 0.5, %v10528_v21  ;;  %v5279_v21 = vmul.f32 %v5267_v20, %v10259_v30  ;;  %vm11471_vm12 = vmmov %vm11470_vm9 }
 0x689   : > { %v5187_v43 = vadd.f32 1.0, %v5175_v7 }
 0x68a   : > { %v5133_v22 = vmul.f32 %v7579_v4, %v5073_v13  ;;  %v5204_v8 = vmul.f32 %v5192_v16, %v4748_v57  ;;  %v5310_v33 = vadd.f32 %v5304_v28, %v5279_v21  ;;  %v5475_v13 = vperm.slane %v10592_v12, 4 }
 0x68b   : > { %v5199_v52 = vmul.f32 %v5187_v43, %v4743_v29 }
 0x68c   : > { %v5145_v17 = vsub.f32 1.0, %v5133_v22 }
 0x68d   : > { %v5208_v9 = vpack.c.bf16 %v5199_v52, %v5198_v0 }
 0x68e   : > { %v5169_v10 = vsub.f32 0.0, %v5145_v17 }
 0x68f   : > { %5214 = vst [vmem:[#allocation4 + $0x10] sm:$0xff] %v5208_v9 }
 0x690   : > { %v5181_v63 = vsel %vm5157_vm15, %v5145_v17, %v5169_v10  ;;  %vm11473_vm15 = vmmov %vm11472_vm1 }
 0x691   : > { %v5193_v24 = vadd.f32 1.0, %v5181_v63 }
 0x693   : > { %v5205_v45 = vmul.f32 %v5193_v24, %v4749_v31 }
 0x695   : > { %v5211_v32 = vpack.c.bf16 %v5205_v45, %v5204_v8 }
 0x696   : > { %v7041_v47 = vld [vmem:[#allocation4 + $0x10] sm:$0xf]  ;;  %v7320_v27 = vld [vmem:[#allocation4 + $0x14] sm:$0xf] }
 0x697   : > { %5217 = vst [vmem:[#allocation4 + $0x28] sm:$0xff] %v5211_v32 }
 0x69e   : > { %v7323_v55 = vld [vmem:[#allocation4 + $0x24] sm:$0xf0]  ;;  %v7043_v40 = vld [vmem:[#allocation4 + $0x28] sm:$0xf0] }
 0x69f   : > { %v7042_v41 = vor.u32 %v7323_v55, %v7041_v47  ;;  %v7046_v53 = vor.u32 %v7320_v27, %v7043_v40 }
 0x6a1   : > { %5450 = vmatpush.bf16.msrb.mxu3 %v7042_v41  ;;  %5463 = vmatpush.bf16.msra.mxu0 %v7046_v53 }
 0x6a3   : > { %v5426_v34 = vpop.f32.mrf.mxu1 }
 0x6a4   : > { %7051 = vmatmul.msk.bf16.vlgmr.msrb.gmra.mxu3 %vm5369_vm13, %v10481_v25  ;;  %7052 = vmatmul.msk.bf16.vlgmr.msra.gmra.mxu0 %vm5369_vm13, %v10481_v25  ;;  %v5427_v62 = vadd.f32 %v5426_v34, %v5310_v33  ;;  %v5311_v25 = vadd.f32 %v5305_v37, %v5280_v51  ;;  %vm5507_vm13 = vcmask 400384  }
 0x6a6   : > { %v5485_v60 = vmul.f32 %v5473_v36, %v5427_v62 }
 0x6a8   : > { %5499 = vrot.lane.b32.xlu1 %v5485_v60, %s7957_s20 }
 0x6a9   : > { %v5439_v15 = vpop.f32.mrf.mxu2 }
 0x6aa   : > { %v5440_v18 = vadd.f32 %v5439_v15, %v5311_v25 }
 0x6ab   : > { %v5428_v44 = vpop.f32.mrf.mxu1 }
 0x6ac   : > { %v5486_v56 = vmul.f32 %v5474_v6, %v5440_v18 }
 0x6ae   : > { %5501 = vrot.lane.b32.xlu2 %v5486_v56, %s7957_s20 }
 0x6b1   : > { %v5441_v49 = vpop.f32.mrf.mxu2 }
 0x6d2   : > { %v5498_v1 = vpop.permute.xlu2 %5497 }
 0x6ef   : > { %v5496_v11 = vpop.permute.xlu1 %5495 }
 0x6f0   : > { %v5508_v30 = vsel %vm5507_vm13, %v5496_v11, %v5498_v1  ;;  %5521 = vst.msk [vmem:[#allocation5] sm:$0xff] %vm5520_vm11, %v5496_v11  ;;  %vm11475_vm11 = vmmov %vm11467_vm0 }
 0x6f7   : > { %v5528_v14 = vld [vmem:[#allocation5] sm:$0xff] }
 0x6f8   : > { %v5534_v19 = vpack.c.bf16 %v5508_v30, %v5528_v14 }
 0x6fa   : > { %5537 = vst [vmem:[#allocation6] sm:$0xff] %v5534_v19  ;;  %5828 = vrot.lane.b32.xlu2 %v5534_v19, %s11221_s12 }
 0x702   : > { %5672 = vrot.lane.b32.xlu2 %v5534_v19, %s11304_s10 }
 0x708   : > { %v5502_v46 = vpop.permute.xlu2 %5501 }
 0x70a   : > { %5633 = vrot.lane.b32.xlu2 %v5534_v19, %s11250_s23 }
 0x71a   : > { %v5500_v42 = vpop.permute.xlu1 %5499 }
 0x71b   : > { %v5509_v54 = vsel %vm5507_vm13, %v5498_v1, %v5500_v42  ;;  %v5510_v48 = vsel %vm5507_vm13, %v5500_v42, %v5502_v46 }
 0x71c   : > { %v5535_v23 = vpack.c.bf16 %v5510_v48, %v5509_v54 }
 0x71e   : > { %5538 = vst [vmem:[#allocation6 + $0x8] sm:$0xff] %v5535_v23  ;;  %5752 = vrot.lane.b32.xlu2 %v5535_v23, %s11462_s25 }
 0x721   : > { %v5465_v2 = vpop.f32.mrf.mxu0 }
 0x722   : > { %v5466_v50 = vadd.f32 %v5465_v2, %v10266_v5 }
 0x724   : > { %v5488_v58 = vmul.f32 %v5476_v59, %v5466_v50 }
 0x726   : > { %5505 = vrot.lane.b32.xlu1 %v5488_v58, %s7957_s20  ;;  %5713 = vrot.lane.b32.xlu2 %v5535_v23, %s11209_s16 }
 0x727   : > { %v5452_v4 = vpop.f32.mrf.mxu3 }
 0x728   : > { %v5453_v7 = vadd.f32 %v5452_v4, %v10271_v3 }
 0x729   : > { %v5467_v39 = vpop.f32.mrf.mxu0 }
 0x72a   : > { %v5487_v29 = vmul.f32 %v5475_v13, %v5453_v7 }
 0x72c   : > { %5503 = vrot.lane.b32.xlu0 %v5487_v29, %s7957_s20 }
 0x72e   : > { %5750 = vrot.lane.b32.xlu1 %v5534_v19, %s11462_s25  ;;  %5557 = vrot.lane.b32.xlu2 %v5535_v23, %s11213_s5 }
 0x72f   : > { %v5454_v5 = vpop.f32.mrf.mxu3 }
 0x734   : > { %5789 = vrot.lane.b32.xlu0 %v5534_v19, %s11463_s7 }
 0x736   : > { %5711 = vrot.lane.b32.xlu1 %v5534_v19, %s11209_s16 }
 0x73c   : > { %5594 = vrot.lane.b32.xlu0 %v5534_v19, %s11200_s17 }
 0x73e   : > { %5555 = vrot.lane.b32.xlu1 %v5534_v19, %s11213_s5 }
 0x744   : > { %5830 = vrot.lane.b32.xlu0 %v5535_v23, %s11221_s12 }
 0x746   : > { %5791 = vrot.lane.b32.xlu1 %v5535_v23, %s11463_s7 }
 0x74c   : > { %5674 = vrot.lane.b32.xlu0 %v5535_v23, %s11304_s10 }
 0x74e   : > { %5596 = vrot.lane.b32.xlu1 %v5535_v23, %s11200_s17 }
 0x754   : > { %5635 = vrot.lane.b32.xlu0 %v5535_v23, %s11250_s23  ;;  %v5829_v3 = vpop.permute.xlu2 %5828 }
 0x755   : > { %v5836_v36 = vrot.slane %v5829_v3, 4 }
 0x75c   : > { %v10660_v12 = vpop.permute.xlu2 %5672 }
 0x75d   : > { %v5680_v11 = vrot.slane %v10660_v12, 4 }
 0x764   : > { %v10662_v43 = vpop.permute.xlu2 %5633 }
 0x765   : > { %v5641_v5 = vrot.slane %v10662_v43, 4 }
 0x778   : > { %v10665_v0 = vpop.permute.xlu2 %5752 }
 0x779   : > { %v5759_v63 = vrot.slane %v10665_v0, 4 }
 0x780   : > { %v10682_v8 = vpop.permute.xlu2 %5713 }
 0x781   : > { %v5720_v55 = vrot.slane %v10682_v8, 4 }
 0x788   : > { %v10698_v53 = vpop.permute.xlu2 %5557 }
 0x789   : > { %v5564_v21 = vrot.slane %v10698_v53, 4 }
 0x798   : > { %v5506_v22 = vpop.permute.xlu1 %5505 }
 0x799   : > { %5527 = vst.msk [vmem:[#allocation5 + $0x30] sm:$0xff] %vm5507_vm13, %v5506_v22 }
 0x79e   : > { %v5504_v61 = vpop.permute.xlu0 %5503 }
 0x79f   : > { %v5511_v52 = vsel %vm5507_vm13, %v5502_v46, %v5504_v61  ;;  %v5512_v17 = vsel %vm5507_vm13, %v5504_v61, %v5506_v22  ;;  %v5884_v61 = vld [vmem:[#allocation20 + $0x8] sm:$0xff]  ;;  %vm11474_vm13 = vmmov %vm11466_vm2 }
 0x7a0   : > { %v10669_v9 = vpack.c.bf16 %v5512_v17, %v5511_v52  ;;  %v5751_v10 = vpop.permute.xlu1 %5750  ;;  %v5741_v16 = vld [vmem:[#allocation5 + $0x30] sm:$0xff] }
 0x7a1   : > { %v5758_v57 = vrot.slane %v5751_v10, 4  ;;  %v10672_v31 = vpack.c.bf16 %v5741_v16, %v5741_v16 }
 0x7a2   : > { %5539 = vst [vmem:[#allocation6 + $0x10] sm:$0xff] %v10669_v9 }
 0x7a3   : > { %v5762_v24 = vsel %vm1277_vm3, %v5758_v57, %v5759_v63  ;;  %5756 = vrot.lane.b32.xlu0 %v10672_v31, %s11462_s25  ;;  %5834 = vrot.lane.b32.xlu1 %v10672_v31, %s11221_s12 }
 0x7a4   : > { %v5763_v45 = vsel %vm11464_vm10, %v5751_v10, %v5762_v24  ;;  %5795 = vrot.lane.b32.xlu2 %v10672_v31, %s11463_s7  ;;  %vm11476_vm10 = vmmov %vm11467_vm0 }
 0x7a5   : > { %5771 = vst [vmem:[#allocation6 + $0x90] sm:$0xff] %v5763_v45  ;;  %v5886_v45 = vld [vmem:[#allocation20 + $0x18] sm:$0xff] }
 0x7a6   : > { %v5790_v32 = vpop.permute.xlu0 %5789 }
 0x7a7   : > { %v5797_v51 = vrot.slane %v5790_v32, 4 }
 0x7a8   : > { %v5712_v47 = vpop.permute.xlu1 %5711 }
 0x7a9   : > { %v5719_v27 = vrot.slane %v5712_v47, 4 }
 0x7ab   : > { %v5723_v40 = vsel %vm1277_vm3, %v5719_v27, %v5720_v55  ;;  %5717 = vrot.lane.b32.xlu0 %v10672_v31, %s11209_s16  ;;  %5678 = vrot.lane.b32.xlu1 %v10672_v31, %s11304_s10 }
 0x7ac   : > { %v5724_v41 = vsel %vm11465_vm8, %v5712_v47, %v5723_v40  ;;  %5600 = vrot.lane.b32.xlu2 %v10672_v31, %s11200_s17  ;;  %v7135_v50 = vld [vmem:[#allocation6 + $0x90] sm:$0xf]  ;;  %v7344_v13 = vld [vmem:[#allocation6 + $0x94] sm:$0xf]  ;;  %vm11478_vm8 = vmmov %vm11468_vm4 }
 0x7ad   : > { %5732 = vst [vmem:[#allocation6 + $0x78] sm:$0xff] %v5724_v41 }
 0x7ae   : > { %v5595_v20 = vpop.permute.xlu0 %5594 }
 0x7af   : > { %v5602_v59 = vrot.slane %v5595_v20, 4 }
 0x7b0   : > { %v5556_v38 = vpop.permute.xlu1 %5555 }
 0x7b1   : > { %v5563_v28 = vrot.slane %v5556_v38, 4 }
 0x7b3   : > { %v5567_v35 = vsel %vm1277_vm3, %v5563_v28, %v5564_v21  ;;  %5832 = vrot.lane.b32.xlu0 %v10669_v9, %s11221_s12  ;;  %5793 = vrot.lane.b32.xlu1 %v10669_v9, %s11463_s7  ;;  %v7063_v28 = vld [vmem:[#allocation6] sm:$0xf]  ;;  %s7350_s12 = smul.u32 96, %s11487_s18 }
 0x7b4   : > { %v5568_v26 = vsel %vm11466_vm2, %v5556_v38, %v5567_v35  ;;  %5754 = vrot.lane.b32.xlu2 %v10669_v9, %s11462_s25  ;;  %v7341_v52 = vld [vmem:[#allocation6 + $0x74] sm:$0xf0]  ;;  %v7113_v16 = vld [vmem:[#allocation6 + $0x78] sm:$0xf0] }
 0x7b5   : > { %5576 = vst [vmem:[#allocation6 + $0x18] sm:$0xff] %v5568_v26 }
 0x7b6   : > { %v10711_v33 = vpop.permute.xlu0 %5830 }
 0x7b7   : > { %v5837_v34 = vrot.slane %v10711_v33, 4 }
 0x7b8   : > { %v10714_v62 = vpop.permute.xlu1 %5791 }
 0x7b9   : > { %v5840_v37 = vsel %vm1277_vm3, %v5836_v36, %v5837_v34  ;;  %v5798_v60 = vrot.slane %v10714_v62, 4  ;;  %v10766_v36 = vld [vmem:[#allocation18] sm:$0xff] }
 0x7ba   : > { %v5841_v25 = vsel %vm11467_vm0, %v5829_v3, %v5840_v37  ;;  %vm11481_vm0 = vmmov %vm11474_vm13 }
 0x7bb   : > { %v5801_v6 = vsel %vm1277_vm3, %v5797_v51, %v5798_v60  ;;  %5676 = vrot.lane.b32.xlu0 %v10669_v9, %s11304_s10  ;;  %5598 = vrot.lane.b32.xlu1 %v10669_v9, %s11200_s17  ;;  %v5992_v15 = vunpack.c.l.b16 %v5841_v25  ;;  %v5993_v18 = vunpack.c.h.b16 %v5841_v25  ;;  %v10772_v51 = vld [vmem:[#allocation18 + $0x8] sm:$0xff] }
 0x7bc   : > { %v5802_v44 = vsel %vm1839_vm7, %v5790_v32, %v5801_v6  ;;  %5715 = vrot.lane.b32.xlu2 %v10669_v9, %s11209_s16  ;;  %v7065_v38 = vld [vmem:[#allocation6 + $0x18] sm:$0xf0] }
 0x7bd   : > { %5810 = vst [vmem:[#allocation6 + $0xa8] sm:$0xff] %v5802_v44  ;;  %v6022_v56 = vpack.c.b16 %v5992_v15, %v5992_v15  ;;  %v6023_v49 = vpack.c.b16 %v5993_v18, %v5993_v18 }
 0x7be   : > { %v10731_v1 = vpop.permute.xlu0 %5674 }
 0x7bf   : > { %v5681_v30 = vrot.slane %v10731_v1, 4  ;;  %v6060_v14 = vsel %vm1277_vm3, %v6022_v56, 0  ;;  %v6063_v19 = vsel %vm1277_vm3, %v6023_v49, 0 }
 0x7c0   : > { %v10737_v46 = vpop.permute.xlu1 %5596  ;;  %6080 = vmatpush.bf16.msra.mxu1 %v6060_v14  ;;  %6099 = vmatpush.bf16.msrb.mxu2 %v6063_v19 }
 0x7c1   : > { %v5684_v42 = vsel %vm1277_vm3, %v5680_v11, %v5681_v30  ;;  %v5603_v2 = vrot.slane %v10737_v46, 4 }
 0x7c2   : > { %v5685_v54 = vsel %vm1559_vm5, %v10660_v12, %v5684_v42  ;;  %v5883_v12 = vld [vmem:[#allocation20] sm:$0xff] }
 0x7c3   : > { %5693 = vst [vmem:[#allocation6 + $0x60] sm:$0xff] %v5685_v54  ;;  %v5606_v48 = vsel %vm1277_vm3, %v5602_v59, %v5603_v2  ;;  %5637 = vrot.lane.b32.xlu0 %v10669_v9, %s11250_s23  ;;  %5639 = vrot.lane.b32.xlu1 %v10672_v31, %s11250_s23  ;;  %s11482_s23 = sld [smem:[#allocation62_spill]] }
 0x7c4   : > { %v5607_v23 = vsel %vm11468_vm4, %v5595_v20, %v5606_v48  ;;  %5559 = vrot.lane.b32.xlu2 %v10669_v9, %s11213_s5  ;;  %v7347_v58 = vld [vmem:[#allocation6 + $0xa4] sm:$0xf0]  ;;  %v7137_v4 = vld [vmem:[#allocation6 + $0xa8] sm:$0xf0]  ;;  %v7329_v20 = vld [vmem:[#allocation6 + $0x14] sm:$0xf0] }
 0x7c5   : > { %5615 = vst [vmem:[#allocation6 + $0x30] sm:$0xff] %v5607_v23  ;;  %v7136_v7 = vor.u32 %v7347_v58, %v7135_v50  ;;  %v7140_v39 = vor.u32 %v7344_v13, %v7137_v4  ;;  %v7064_v35 = vor.u32 %v7329_v20, %v7063_v28 }
 0x7c6   : > { %v10755_v29 = vpop.permute.xlu0 %5635 }
 0x7c7   : > { %v5642_v3 = vrot.slane %v10755_v29, 4  ;;  %6081 = vmatpush.bf16.msra.mxu1 %v7136_v7  ;;  %6100 = vmatpush.bf16.msrb.mxu2 %v7140_v39 }
 0x7c9   : > { %v5645_v22 = vsel %vm1277_vm3, %v5641_v5, %v5642_v3  ;;  %s10869_s17 = scalar_lea.vmem %s11482_s23, %s7350_s12 }
 0x7ca   : > { %v5646_v17 = vsel %vm11469_vm14, %v10662_v43, %v5645_v22  ;;  %v7111_v9 = vld [vmem:[#allocation6 + $0x60] sm:$0xf]  ;;  %v7338_v10 = vld [vmem:[#allocation6 + $0x64] sm:$0xf] }
 0x7cb   : > { %5654 = vst [vmem:[#allocation6 + $0x48] sm:$0xff] %v5646_v17  ;;  %5561 = vrot.lane.b32.xlu0 %v10672_v31, %s11213_s5  ;;  %5889 = vperm.xlu1 %7514, %v5883_v12   ;;  %v7112_v57 = vor.u32 %v7341_v52, %v7111_v9  ;;  %v7116_v24 = vor.u32 %v7338_v10, %v7113_v16  ;;  %v7326_v31 = vld [vmem:[#allocation6 + $0x4] sm:$0xf] }
 0x7cc   : > { %5894 = vperm.xlu2 %7515, %v5884_v61   ;;  %v7087_v32 = vld [vmem:[#allocation6 + $0x30] sm:$0xf]  ;;  %v7332_v27 = vld [vmem:[#allocation6 + $0x34] sm:$0xf]  ;;  %v7068_v26 = vor.u32 %v7326_v31, %v7065_v38 }
 0x7cd   : > { %6082 = vmatpush.bf16.msra.mxu1 %v7112_v57  ;;  %6101 = vmatpush.bf16.msrb.mxu2 %v7116_v24 }
 0x7d2   : > { %v7335_v47 = vld [vmem:[#allocation6 + $0x44] sm:$0xf0]  ;;  %v7089_v40 = vld [vmem:[#allocation6 + $0x48] sm:$0xf0] }
 0x7d3   : > { %5904 = vperm.xlu1 %7514, %v5886_v45   ;;  %v7088_v43 = vor.u32 %v7335_v47, %v7087_v32  ;;  %v7092_v41 = vor.u32 %v7332_v27, %v7089_v40 }
 0x7d5   : > { %6083 = vmatpush.bf16.msra.mxu1 %v7088_v43  ;;  %6102 = vmatpush.bf16.msrb.mxu2 %v7092_v41 }
 0x7d9   : > { %6084 = vmatpush.bf16.msra.mxu1 %v7064_v35  ;;  %6103 = vmatpush.bf16.msrb.mxu2 %v7068_v26 }
 0x7dc   : > { %7157 = vmatmul.msk.bf16.vlgmr.msra.gmra.mxu1 %vm6052_vm6, %v10766_v36  ;;  %7159 = vmatmul.msk.bf16.vlgmr.msrb.gmra.mxu2 %vm6052_vm6, %v10766_v36 }
 0x7ec   : > { %7158 = vmatmul.msk.bf16.gmra.mxu1 %vm6052_vm6, %v10772_v51  ;;  %7160 = vmatmul.msk.bf16.gmra.mxu2 %vm6052_vm6, %v10772_v51 }
 0x7fe   : > { %v5796_v37 = vpop.permute.xlu2 %5795 }
 0x7ff   : > { %v5800_v5 = vrot.slane %v5796_v37, 4 }
 0x806   : > { %v10778_v25 = vpop.permute.xlu2 %5600 }
 0x807   : > { %v5605_v43 = vrot.slane %v10778_v25, 4 }
 0x80e   : > { %v5755_v6 = vpop.permute.xlu2 %5754 }
 0x80f   : > { %v5760_v15 = vrot.slane %v5755_v6, 4 }
 0x811   : > { %v5764_v18 = vsel %vm1277_vm3, %v5759_v63, %v5760_v15 }
 0x812   : > { %v5765_v44 = vsel %vm11470_vm9, %v10665_v0, %v5764_v18 }
 0x813   : > { %5772 = vst [vmem:[#allocation6 + $0x98] sm:$0xff] %v5765_v44 }
 0x815   : > { %v5757_v56 = vpop.permute.xlu0 %5756  ;;  %v5835_v49 = vpop.permute.xlu1 %5834 }
 0x816   : > { %v5761_v11 = vrot.slane %v5757_v56, 4  ;;  %v5716_v14 = vpop.permute.xlu2 %5715  ;;  %v5839_v12 = vrot.slane %v5835_v49, 4 }
 0x817   : > { %v5721_v19 = vrot.slane %v5716_v14, 4 }
 0x818   : > { %v5766_v59 = vsel %vm1277_vm3, %v5760_v15, %v5761_v11 }
 0x819   : > { %v5767_v42 = vsel %vm11471_vm12, %v5755_v6, %v5766_v59  ;;  %v5725_v54 = vsel %vm1277_vm3, %v5720_v55, %v5721_v19 }
 0x81a   : > { %5773 = vst [vmem:[#allocation6 + $0xa0] sm:$0xff] %v5767_v42  ;;  %v5726_v63 = vsel %vm11472_vm1, %v10682_v8, %v5725_v54  ;;  %v7143_v49 = vld [vmem:[#allocation6 + $0x98] sm:$0xf] }
 0x81b   : > { %5733 = vst [vmem:[#allocation6 + $0x80] sm:$0xff] %v5726_v63 }
 0x81d   : > { %v5718_v0 = vpop.permute.xlu0 %5717  ;;  %v5679_v48 = vpop.permute.xlu1 %5678 }
 0x81e   : > { %v5722_v50 = vrot.slane %v5718_v0, 4  ;;  %v10792_v23 = vpop.permute.xlu2 %5559  ;;  %v5683_v41 = vrot.slane %v5679_v48, 4 }
 0x81f   : > { %v5565_v58 = vrot.slane %v10792_v23, 4 }
 0x820   : > { %v5727_v13 = vsel %vm1277_vm3, %v5721_v19, %v5722_v50 }
 0x821   : > { %v5728_v4 = vsel %vm11473_vm15, %v5716_v14, %v5727_v13  ;;  %v5569_v55 = vsel %vm1277_vm3, %v5564_v21, %v5565_v58  ;;  %v7151_v14 = vld [vmem:[#allocation6 + $0xa0] sm:$0xf]  ;;  %v7346_v19 = vld [vmem:[#allocation6 + $0xa4] sm:$0xf] }
 0x822   : > { %5734 = vst [vmem:[#allocation6 + $0x88] sm:$0xff] %v5728_v4  ;;  %v5570_v8 = vsel %vm11474_vm13, %v10698_v53, %v5569_v55 }
 0x823   : > { %5577 = vst [vmem:[#allocation6 + $0x20] sm:$0xff] %v5570_v8 }
 0x825   : > { %v5833_v7 = vpop.permute.xlu0 %5832  ;;  %v5794_v39 = vpop.permute.xlu1 %5793 }
 0x826   : > { %v5838_v22 = vrot.slane %v5833_v7, 4  ;;  %v5799_v61 = vrot.slane %v5794_v39, 4 }
 0x828   : > { %v5842_v52 = vsel %vm1277_vm3, %v5837_v34, %v5838_v22  ;;  %v5844_v17 = vsel %vm1277_vm3, %v5838_v22, %v5839_v12  ;;  %v5803_v21 = vsel %vm1277_vm3, %v5798_v60, %v5799_v61  ;;  %v5805_v9 = vsel %vm1277_vm3, %v5799_v61, %v5800_v5 }
 0x829   : > { %v5843_v53 = vsel %vm11475_vm11, %v10711_v33, %v5842_v52  ;;  %v5845_v10 = vsel %vm11476_vm10, %v5833_v7, %v5844_v17  ;;  %v5804_v16 = vsel %vm1839_vm7, %v10714_v62, %v5803_v21  ;;  %v5806_v57 = vsel %vm1839_vm7, %v5794_v39, %v5805_v9  ;;  %vm11477_vm7 = vmmov %vm11468_vm4  ;;  %v7342_v7 = vld [vmem:[#allocation6 + $0x7c] sm:$0xf0]  ;;  %v7121_v39 = vld [vmem:[#allocation6 + $0x80] sm:$0xf0] }
 0x82a   : > { %v5994_v24 = vunpack.c.l.b16 %v5843_v53  ;;  %v5995_v34 = vunpack.c.h.b16 %v5843_v53  ;;  %v5996_v45 = vunpack.c.l.b16 %v5845_v10  ;;  %v5997_v32 = vunpack.c.h.b16 %v5845_v10  ;;  %5811 = vst [vmem:[#allocation6 + $0xb0] sm:$0xff] %v5804_v16  ;;  %v7343_v5 = vld [vmem:[#allocation6 + $0x84] sm:$0xf0]  ;;  %v7129_v17 = vld [vmem:[#allocation6 + $0x88] sm:$0xf0] }
 0x82b   : > { %5812 = vst [vmem:[#allocation6 + $0xb8] sm:$0xff] %v5806_v57  ;;  %v5885_v57 = vld [vmem:[#allocation20 + $0x10] sm:$0xff] }
 0x82c   : > { %v6024_v47 = vpack.c.b16 %v5994_v24, %v5994_v24  ;;  %v6025_v27 = vpack.c.b16 %v5995_v34, %v5995_v34  ;;  %v6026_v60 = vpack.c.b16 %v5996_v45, %v5996_v45  ;;  %v6027_v40 = vpack.c.b16 %v5997_v32, %v5997_v32  ;;  %5899 = vperm.xlu0 %7517, %v5885_v57  }
 0x82d   : > { %v5677_v33 = vpop.permute.xlu0 %5676  ;;  %v5599_v20 = vpop.permute.xlu1 %5598 }
 0x82e   : > { %v5682_v38 = vrot.slane %v5677_v33, 4  ;;  %v5604_v28 = vrot.slane %v5599_v20, 4  ;;  %v6066_v62 = vsel %vm1277_vm3, %v6024_v47, 0  ;;  %v6069_v31 = vsel %vm1277_vm3, %v6025_v27, 0 }
 0x82f   : > { %6118 = vmatpush.bf16.msra.mxu3 %v6066_v62  ;;  %6137 = vmatpush.bf16.msrb.mxu0 %v6069_v31  ;;  %v6072_v35 = vsel %vm1277_vm3, %v6026_v60, 0  ;;  %v6075_v26 = vsel %vm1277_vm3, %v6027_v40, 0  ;;  %v7330_v31 = vld [vmem:[#allocation6 + $0x1c] sm:$0xf0] }
 0x830   : > { %v5686_v37 = vsel %vm1277_vm3, %v5681_v30, %v5682_v38  ;;  %v5688_v25 = vsel %vm1277_vm3, %v5682_v38, %v5683_v41  ;;  %v5608_v6 = vsel %vm1277_vm3, %v5603_v2, %v5604_v28  ;;  %v5610_v15 = vsel %vm1277_vm3, %v5604_v28, %v5605_v43  ;;  %6156 = vmatpush.bf16.msrb.mxu1 %v6072_v35  ;;  %v7345_v30 = vld [vmem:[#allocation6 + $0x9c] sm:$0xf]  ;;  %v7073_v35 = vld [vmem:[#allocation6 + $0x20] sm:$0xf0] }
 0x831   : > { %v5687_v18 = vsel %vm1559_vm5, %v10731_v1, %v5686_v37  ;;  %v5689_v44 = vsel %vm1559_vm5, %v5677_v33, %v5688_v25  ;;  %v5609_v56 = vsel %vm11477_vm7, %v10737_v46, %v5608_v6  ;;  %6175 = vmatpush.bf16.msra.mxu2 %v6075_v26  ;;  %v5611_v11 = vsel %vm11478_vm8, %v5599_v20, %v5610_v15  ;;  %v7348_v2 = vld [vmem:[#allocation6 + $0xac] sm:$0xf0]  ;;  %v7145_v59 = vld [vmem:[#allocation6 + $0xb0] sm:$0xf0]  ;;  %vm11479_vm5 = vmmov %vm11469_vm14 }
 0x832   : > { %5694 = vst [vmem:[#allocation6 + $0x68] sm:$0xff] %v5687_v18  ;;  %v7144_v42 = vor.u32 %v7348_v2, %v7143_v49  ;;  %v7148_v54 = vor.u32 %v7345_v30, %v7145_v59  ;;  %v7349_v1 = vld [vmem:[#allocation6 + $0xb4] sm:$0xf0]  ;;  %v7153_v63 = vld [vmem:[#allocation6 + $0xb8] sm:$0xf0]  ;;  %vm11480_vm2 = vmmov %vm11479_vm5  ;;  %v5895_v59 = vpop.permute.xlu2 %5894 }
 0x833   : > { %5695 = vst [vmem:[#allocation6 + $0x70] sm:$0xff] %v5689_v44  ;;  %v7152_v46 = vor.u32 %v7349_v1, %v7151_v14  ;;  %v7156_v50 = vor.u32 %v7346_v19, %v7153_v63  ;;  %v7327_v26 = vld [vmem:[#allocation6 + $0xc] sm:$0xf]  ;;  %v7079_v25 = vld [vmem:[#allocation6 + $0x10] sm:$0xf] }
 0x834   : > { %5616 = vst [vmem:[#allocation6 + $0x38] sm:$0xff] %v5609_v56  ;;  %6119 = vmatpush.bf16.msra.mxu3 %v7144_v42  ;;  %6138 = vmatpush.bf16.msrb.mxu0 %v7148_v54  ;;  %v7328_v15 = vld [vmem:[#allocation6 + $0x14] sm:$0xf] }
 0x835   : > { %5617 = vst [vmem:[#allocation6 + $0x40] sm:$0xff] %v5611_v11  ;;  %v5638_v0 = vpop.permute.xlu0 %5637  ;;  %v5640_v48 = vpop.permute.xlu1 %5639  ;;  %6157 = vmatpush.bf16.msrb.mxu1 %v7152_v46  ;;  %6176 = vmatpush.bf16.msra.mxu2 %v7156_v50 }
 0x836   : > { %v5643_v13 = vrot.slane %v5638_v0, 4  ;;  %v5644_v4 = vrot.slane %v5640_v48, 4 }
 0x838   : > { %v5647_v55 = vsel %vm1277_vm3, %v5642_v3, %v5643_v13  ;;  %v5649_v8 = vsel %vm1277_vm3, %v5643_v13, %v5644_v4 }
 0x839   : > { %v5648_v12 = vsel %vm11479_vm5, %v10755_v29, %v5647_v55  ;;  %v5650_v22 = vsel %vm11480_vm2, %v5638_v0, %v5649_v8  ;;  %v7119_v61 = vld [vmem:[#allocation6 + $0x68] sm:$0xf]  ;;  %v7339_v52 = vld [vmem:[#allocation6 + $0x6c] sm:$0xf] }
 0x83a   : > { %5655 = vst [vmem:[#allocation6 + $0x50] sm:$0xff] %v5648_v12  ;;  %v7120_v21 = vor.u32 %v7342_v7, %v7119_v61  ;;  %v7124_v9 = vor.u32 %v7339_v52, %v7121_v39  ;;  %v7127_v53 = vld [vmem:[#allocation6 + $0x70] sm:$0xf]  ;;  %v7340_v10 = vld [vmem:[#allocation6 + $0x74] sm:$0xf] }
 0x83b   : > { %5656 = vst [vmem:[#allocation6 + $0x58] sm:$0xff] %v5650_v22  ;;  %v7128_v3 = vor.u32 %v7343_v5, %v7127_v53  ;;  %v7132_v16 = vor.u32 %v7340_v10, %v7129_v17  ;;  %v7095_v45 = vld [vmem:[#allocation6 + $0x38] sm:$0xf]  ;;  %v7333_v32 = vld [vmem:[#allocation6 + $0x3c] sm:$0xf] }
 0x83c   : > { %6120 = vmatpush.bf16.msra.mxu3 %v7120_v21  ;;  %6139 = vmatpush.bf16.msrb.mxu0 %v7124_v9  ;;  %v7103_v47 = vld [vmem:[#allocation6 + $0x40] sm:$0xf]  ;;  %v7334_v43 = vld [vmem:[#allocation6 + $0x44] sm:$0xf] }
 0x83d   : > { %v5562_v24 = vpop.permute.xlu0 %5561  ;;  %6158 = vmatpush.bf16.msrb.mxu1 %v7128_v3  ;;  %6177 = vmatpush.bf16.msra.mxu2 %v7132_v16  ;;  %v5890_v30 = vpop.permute.xlu1 %5889 }
 0x83e   : > { %v5566_v29 = vrot.slane %v5562_v24, 4 }
 0x840   : > { %v5571_v34 = vsel %vm1277_vm3, %v5565_v58, %v5566_v29  ;;  %v7071_v58 = vld [vmem:[#allocation6 + $0x8] sm:$0xf] }
 0x841   : > { %v5572_v27 = vsel %vm11481_vm0, %v10792_v23, %v5571_v34  ;;  %v7336_v60 = vld [vmem:[#allocation6 + $0x4c] sm:$0xf0]  ;;  %v7097_v40 = vld [vmem:[#allocation6 + $0x50] sm:$0xf0]  ;;  %v7072_v37 = vor.u32 %v7330_v31, %v7071_v58  ;;  %v7076_v23 = vor.u32 %v7327_v26, %v7073_v35 }
 0x842   : > { %5578 = vst [vmem:[#allocation6 + $0x28] sm:$0xff] %v5572_v27  ;;  %v7096_v41 = vor.u32 %v7336_v60, %v7095_v45  ;;  %v7100_v33 = vor.u32 %v7333_v32, %v7097_v40  ;;  %v7337_v20 = vld [vmem:[#allocation6 + $0x54] sm:$0xf0]  ;;  %v7105_v38 = vld [vmem:[#allocation6 + $0x58] sm:$0xf0] }
 0x843   : > { %v7104_v28 = vor.u32 %v7337_v20, %v7103_v47  ;;  %v7108_v62 = vor.u32 %v7334_v43, %v7105_v38 }
 0x844   : > { %6121 = vmatpush.bf16.msra.mxu3 %v7096_v41  ;;  %6140 = vmatpush.bf16.msrb.mxu0 %v7100_v33 }
 0x845   : > { %6159 = vmatpush.bf16.msrb.mxu1 %v7104_v28  ;;  %6178 = vmatpush.bf16.msra.mxu2 %v7108_v62  ;;  %v5905_v46 = vpop.permute.xlu1 %5904 }
 0x848   : > { %6122 = vmatpush.bf16.msra.mxu3 %v7072_v37  ;;  %6141 = vmatpush.bf16.msrb.mxu0 %v7076_v23 }
 0x849   : > { %v7331_v6 = vld [vmem:[#allocation6 + $0x24] sm:$0xf0]  ;;  %v7081_v18 = vld [vmem:[#allocation6 + $0x28] sm:$0xf0] }
 0x84a   : > { %v7080_v44 = vor.u32 %v7331_v6, %v7079_v25  ;;  %v7084_v56 = vor.u32 %v7328_v15, %v7081_v18 }
 0x84b   : > { %7161 = vmatmul.msk.bf16.vlgmr.msra.gmra.mxu3 %vm6052_vm6, %v10766_v36  ;;  %7163 = vmatmul.msk.bf16.vlgmr.msrb.gmra.mxu0 %vm6052_vm6, %v10766_v36 }
 0x84c   : > { %6160 = vmatpush.bf16.msrb.mxu1 %v7080_v44  ;;  %6179 = vmatpush.bf16.msra.mxu2 %v7084_v56 }
 0x84f   : > { %7165 = vmatmul.msk.bf16.vlgmr.msrb.gmra.mxu1 %vm6052_vm6, %v10766_v36  ;;  %7167 = vmatmul.msk.bf16.vlgmr.msra.gmra.mxu2 %vm6052_vm6, %v10766_v36 }
 0x859   : > { %v6086_v49 = vpop.f32.mrf.mxu1 }
 0x85a   : > { %v6087_v14 = vadd.f32 %v6086_v49, %v5890_v30 }
 0x85b   : > { %7162 = vmatmul.msk.bf16.gmra.mxu3 %vm6052_vm6, %v10772_v51  ;;  %7164 = vmatmul.msk.bf16.gmra.mxu0 %vm6052_vm6, %v10772_v51 }
 0x85f   : > { %v6105_v11 = vpop.f32.mrf.mxu2  ;;  %7166 = vmatmul.msk.bf16.gmra.mxu1 %vm6052_vm6, %v10772_v51  ;;  %7168 = vmatmul.msk.bf16.gmra.mxu2 %vm6052_vm6, %v10772_v51 }
 0x860   : > { %v6106_v19 = vadd.f32 %v6105_v11, %v5890_v30 }
 0x861   : > { %v6088_v36 = vpop.f32.mrf.mxu1 }
 0x862   : > { %v6191_v2 = vpack.c.bf16 %v6106_v19, %v6087_v14  ;;  %v6089_v54 = vadd.f32 %v6088_v36, %v5895_v59 }
 0x864   : > { %6203 = vst [vmem:[%s10869_s17] sm:$0xff] %v6191_v2 }
 0x867   : > { %v6107_v42 = vpop.f32.mrf.mxu2 }
 0x868   : > { %v6108_v1 = vadd.f32 %v6107_v42, %v5895_v59 }
 0x869   : > { %v6091_v51 = vpop.f32.mrf.mxu1 }
 0x86a   : > { %v6194_v63 = vpack.c.bf16 %v6108_v1, %v6089_v54 }
 0x86c   : > { %6206 = vst [vmem:[%s10869_s17 + $0x18] sm:$0xff] %v6194_v63 }
 0x86f   : > { %v6110_v0 = vpop.f32.mrf.mxu2 }
 0x871   : > { %v6093_v48 = vpop.f32.mrf.mxu1 }
 0x872   : > { %v6094_v13 = vadd.f32 %v6093_v48, %v5905_v46 }
 0x877   : > { %v6112_v50 = vpop.f32.mrf.mxu2 }
 0x878   : > { %v6113_v4 = vadd.f32 %v6112_v50, %v5905_v46 }
 0x87a   : > { %v6200_v55 = vpack.c.bf16 %v6113_v4, %v6094_v13 }
 0x87c   : > { %6212 = vst [vmem:[%s10869_s17 + $0x48] sm:$0xff] %v6200_v55 }
 0x89e   : > { %v5900_v8 = vpop.permute.xlu0 %5899 }
 0x89f   : > { %v6092_v7 = vadd.f32 %v6091_v51, %v5900_v8  ;;  %v6111_v39 = vadd.f32 %v6110_v0, %v5900_v8 }
 0x8a1   : > { %v6197_v5 = vpack.c.bf16 %v6111_v39, %v6092_v7 }
 0x8a3   : > { %6209 = vst [vmem:[%s10869_s17 + $0x30] sm:$0xff] %v6197_v5 }
 0x8c8   : > { %v6143_v12 = vpop.f32.mrf.mxu0 }
 0x8c9   : > { %v6144_v52 = vadd.f32 %v6143_v12, %v5890_v30 }
 0x8cc   : > { %v6162_v22 = vpop.f32.mrf.mxu1 }
 0x8cd   : > { %v6163_v10 = vadd.f32 %v6162_v22, %v5890_v30 }
 0x8ce   : > { %v6124_v61 = vpop.f32.mrf.mxu3 }
 0x8cf   : > { %v6125_v17 = vadd.f32 %v6124_v61, %v5890_v30 }
 0x8d0   : > { %v6145_v21 = vpop.f32.mrf.mxu0 }
 0x8d1   : > { %v6192_v9 = vpack.c.bf16 %v6144_v52, %v6125_v17  ;;  %v6146_v29 = vadd.f32 %v6145_v21, %v5895_v59 }
 0x8d2   : > { %v6181_v53 = vpop.f32.mrf.mxu2 }
 0x8d3   : > { %6204 = vst [vmem:[%s10869_s17 + $0x8] sm:$0xff] %v6192_v9  ;;  %v6182_v3 = vadd.f32 %v6181_v53, %v5890_v30 }
 0x8d4   : > { %v6164_v16 = vpop.f32.mrf.mxu1 }
 0x8d5   : > { %v6193_v57 = vpack.c.bf16 %v6182_v3, %v6163_v10  ;;  %v6165_v27 = vadd.f32 %v6164_v16, %v5895_v59 }
 0x8d6   : > { %v6126_v24 = vpop.f32.mrf.mxu3 }
 0x8d7   : > { %6205 = vst [vmem:[%s10869_s17 + $0x10] sm:$0xff] %v6193_v57  ;;  %v6127_v34 = vadd.f32 %v6126_v24, %v5895_v59 }
 0x8d8   : > { %v6148_v32 = vpop.f32.mrf.mxu0 }
 0x8d9   : > { %v6195_v45 = vpack.c.bf16 %v6146_v29, %v6127_v34  ;;  %v6149_v40 = vadd.f32 %v6148_v32, %v5900_v8 }
 0x8da   : > { %v6183_v47 = vpop.f32.mrf.mxu2 }
 0x8db   : > { %6207 = vst [vmem:[%s10869_s17 + $0x20] sm:$0xff] %v6195_v45  ;;  %v6184_v60 = vadd.f32 %v6183_v47, %v5895_v59 }
 0x8dc   : > { %v6167_v41 = vpop.f32.mrf.mxu1 }
 0x8dd   : > { %v6196_v43 = vpack.c.bf16 %v6184_v60, %v6165_v27  ;;  %v6168_v38 = vadd.f32 %v6167_v41, %v5900_v8 }
 0x8de   : > { %v6129_v33 = vpop.f32.mrf.mxu3 }
 0x8df   : > { %6208 = vst [vmem:[%s10869_s17 + $0x28] sm:$0xff] %v6196_v43  ;;  %v6130_v20 = vadd.f32 %v6129_v33, %v5900_v8 }
 0x8e0   : > { %v6150_v35 = vpop.f32.mrf.mxu0 }
 0x8e1   : > { %v6198_v28 = vpack.c.bf16 %v6149_v40, %v6130_v20  ;;  %v6151_v37 = vadd.f32 %v6150_v35, %v5905_v46 }
 0x8e2   : > { %v6186_v62 = vpop.f32.mrf.mxu2 }
 0x8e3   : > { %6210 = vst [vmem:[%s10869_s17 + $0x38] sm:$0xff] %v6198_v28  ;;  %v6187_v31 = vadd.f32 %v6186_v62, %v5900_v8 }
 0x8e4   : > { %v6169_v25 = vpop.f32.mrf.mxu1 }
 0x8e5   : > { %v6199_v58 = vpack.c.bf16 %v6187_v31, %v6168_v38  ;;  %v6170_v18 = vadd.f32 %v6169_v25, %v5905_v46 }
 0x8e6   : > { %v6131_v26 = vpop.f32.mrf.mxu3 }
 0x8e7   : > { %6211 = vst [vmem:[%s10869_s17 + $0x40] sm:$0xff] %v6199_v58  ;;  %v6132_v23 = vadd.f32 %v6131_v26, %v5905_v46 }
 0x8e9   : > { %v6201_v6 = vpack.c.bf16 %v6151_v37, %v6132_v23 }
 0x8ea   : > { %v6188_v15 = vpop.f32.mrf.mxu2 }
 0x8eb   : > { %6213 = vst [vmem:[%s10869_s17 + $0x50] sm:$0xff] %v6201_v6  ;;  %v6189_v44 = vadd.f32 %v6188_v15, %v5905_v46 }
 0x8ed   : > { %v6202_v56 = vpack.c.bf16 %v6189_v44, %v6170_v18 }
 0x8ef   : > { %6214 = vst [vmem:[%s10869_s17 + $0x58] sm:$0xff] %v6202_v56 }
 0x8f0 PF: > { %s11483_s11 = sld [smem:[#allocation26_spill]] }
 0x8f6   : > { %s30_s18 = sadd.s32 1, %s11483_s11  }
 0x8f7   : > { %p27_p8 = scmp.ge.s32.totalorder %s30_s18, 4  }
 0x8f9   :  { %29 = sbr.rel (!%p27_p8) target bundleno = 22 (0x16), region = 192 }
 0x8fe   :  { %6236 = vsyncpa [#allocation8], 1 }
 0x8ff   :  { %6238 = vsyncpa [#allocation8 + $0x1], 1 }
 0x900   :  { %6239 = vsyncpa [#allocation10], 1 }
 0x901   :  { %6240 = vsyncpa [#allocation13], 1 }
 0x902   :  { %6241 = vsyncpa [#allocation16], 1 }
 0x903   :  { %6242 = vsyncpa [#allocation19], 1 }

</bundles_post_ra>
